<compile_context>
chip_gen: v7x
topology: tpu7x:2x2x1
jax: 0.10.0
libtpu: 0.0.40
codegen_flags: <defaults>
</compile_context>

<pallas_src>
import functools

import jax
import jax.numpy as jnp
from jax.experimental import pallas as pl


# --------------------------- in-kernel GRU helpers ---------------------------

def _gate_pre(x, wih_ref, bih_ref):
    """x: (M, Fin); wih_ref: (3, Fin, H); bih_ref: (3, 1, H) -> [r, z, n] (M, H)."""
    return [jnp.dot(x, wih_ref[g], preferred_element_type=jnp.float32) + bih_ref[g]
            for g in range(3)]


def _gru_cell(h_prev, xr, xz, xn, whh_ref, bhh_ref):
    """PyTorch GRU cell (gate order r, z, n), per-gate weights."""
    hr = jnp.dot(h_prev, whh_ref[0], preferred_element_type=jnp.float32) + bhh_ref[0]
    hz = jnp.dot(h_prev, whh_ref[1], preferred_element_type=jnp.float32) + bhh_ref[1]
    hn = jnp.dot(h_prev, whh_ref[2], preferred_element_type=jnp.float32) + bhh_ref[2]
    r = jax.nn.sigmoid(xr + hr)
    z = jax.nn.sigmoid(xz + hz)
    n = jnp.tanh(xn + r * hn)
    return (1.0 - z) * n + z * h_prev


def _run_gru_layer(xg, whh_ref, bhh_ref, mask, h0, T, B):
    """Fully unrolled time recurrence for one GRU layer.

    xg: 3 x (T*B, H) time-major input-gate pre-activations; mask: (T*B, 1);
    h0: (B, H).  Packed-sequence semantics: h carries through padded steps,
    padded outputs are zeroed (pad_packed_sequence).  Static Python loop ==
    lax.fori_loop(..., unroll=True) here (T static & small) -> every slice is
    static and the LLO scheduler sees the whole straight-line body.
    """
    h = h0
    outs = []
    for t in range(T):
        sl = slice(t * B, (t + 1) * B)
        m = mask[sl]                                            # (B, 1)
        h_new = _gru_cell(h, xg[0][sl], xg[1][sl], xg[2][sl], whh_ref, bhh_ref)
        h = m * h_new + (1.0 - m) * h                           # carry last valid h
        outs.append(m * h)                                      # padded steps -> 0
    return jnp.concatenate(outs, axis=0), h                     # (T*B, H), (B, H)


# ------------------------------- fused kernel -------------------------------

def _frag2mol_kernel(
        ids_ref, mask_ref, emb_ref,
        e0_wih, e0_bih, e0_whh, e0_bhh,
        e1_wih, e1_bih, e1_whh, e1_bhh,
        d0_wih, d0_bih, d0_whh, d0_bhh,
        d1_wih, d1_bih, d1_whh, d1_bhh,
        wmean, bmean, wlogv, blogv,
        wlh, blh, wout, bout, eps_ref,
        out_ref, mean_ref, std_ref, z_ref):
    B = eps_ref.shape[0]
    TB = ids_ref.shape[0]
    T = TB // B
    H = e0_whh.shape[-1]
    L = wlh.shape[0]                 # hidden_layers (== 2 for this kernel)
    Vp = emb_ref.shape[0]            # sublane-padded vocab for the table

    mask = mask_ref[...]                                         # (T*B, 1)

    # ---- embedding lookup as one-hot @ table (table resident in VMEM) ----
    ids = ids_ref[...]                                           # (T*B, 1) int32
    onehot = (jax.lax.broadcasted_iota(jnp.int32, (TB, Vp), 1) == ids
              ).astype(jnp.float32)
    x_emb = jnp.dot(onehot, emb_ref[...],
                    preferred_element_type=jnp.float32)          # (T*B, E)

    # ------------------------- Encoder (2-layer GRU) -------------------------
    h_init = jnp.zeros((B, H), jnp.float32)
    xg = _gate_pre(x_emb, e0_wih, e0_bih)                        # one big MXU pass
    seq, h_e0 = _run_gru_layer(xg, e0_whh, e0_bhh, mask, h_init, T, B)
    xg = _gate_pre(seq, e1_wih, e1_bih)
    _, h_e1 = _run_gru_layer(xg, e1_whh, e1_bhh, mask, h_init, T, B)

    # PyTorch `state.view(B, H*L)` (raw reshape of the (L,B,H) state) applied
    # to a linear, without any in-kernel reshape:
    #   s2 row (l*B + b) = h_layer_l[b];  view row b = s2 rows [b*L, b*L+L)
    #   => mean[b] = sum_c s2[b*L+c] @ W_chunk_c + bias
    s2 = jnp.concatenate([h_e0, h_e1], axis=0)                   # (L*B, H)

    def mixed_linear(w_ref, b_ref):
        ps = [jnp.dot(s2, w_ref[c], preferred_element_type=jnp.float32)
              for c in range(L)]                                 # each (L*B, Z)
        rows = []
        for b in range(B):
            acc = ps[0][b * L:b * L + 1, :]
            for c in range(1, L):
                acc = acc + ps[c][b * L + c:b * L + c + 1, :]
            rows.append(acc)
        return jnp.concatenate(rows, axis=0) + b_ref[...]        # (B, Z)

    mean = mixed_linear(wmean, bmean)
    logv = mixed_linear(wlogv, blogv)
    std = jnp.exp(0.5 * logv)
    z = eps_ref[...] * std + mean
    mean_ref[...] = mean
    std_ref[...] = std
    z_ref[...] = z

    # -------------------- LatentToHidden + Decoder (2 layers) --------------------
    h_d0 = jnp.dot(z, wlh[0], preferred_element_type=jnp.float32) + blh[0]
    h_d1 = jnp.dot(z, wlh[1], preferred_element_type=jnp.float32) + blh[1]

    xg = _gate_pre(x_emb, d0_wih, d0_bih)
    seq, _ = _run_gru_layer(xg, d0_whh, d0_bhh, mask, h_d0, T, B)
    xg = _gate_pre(seq, d1_wih, d1_bih)
    seq, _ = _run_gru_layer(xg, d1_whh, d1_bhh, mask, h_d1, T, B)

    # rnn2out fused: single (T*B, 128) lane-dense matmul + store.
    out_ref[...] = (jnp.dot(seq, wout[...], preferred_element_type=jnp.float32)
                    + bout[...])


# ------------------------------- Parameter init -------------------------------

def init_params(key, vocab_size, embed_size, hidden_size, hidden_layers,
                latent_size):
    """Weights stored directly in the kernel-friendly (pre-transposed, per-gate /
    per-chunk) layout so no transposes happen per forward call."""
    assert hidden_layers == 2, "fused kernel is written for hidden_layers == 2"
    V, E, H, L, Z = vocab_size, embed_size, hidden_size, hidden_layers, latent_size
    keys = iter(jax.random.split(key, 64))

    def unif(shape, fan_in):
        bound = 1.0 / jnp.sqrt(jnp.float32(fan_in))
        return jax.random.uniform(next(keys), shape, jnp.float32, -bound, bound)

    params = {}
    # TODO(synk): PyTorch loads emb_{E}.dat from disk; deterministic random here.
    params['embedding'] = 0.1 * jax.random.normal(next(keys), (V, E), jnp.float32)

    def gru_params(input_size):
        layers = []
        for l in range(L):
            fin = input_size if l == 0 else H
            layers.append((
                unif((3, fin, H), H),     # W_ih^T per gate (r, z, n)
                unif((3, 1, H), H),       # b_ih per gate
                unif((3, H, H), H),       # W_hh^T per gate
                unif((3, 1, H), H),       # b_hh per gate
            ))
        return layers

    params['enc_gru'] = gru_params(E)
    params['dec_gru'] = gru_params(E)

    enc_in = H * L                                    # pooling=None path
    params['rnn2mean'] = (unif((L, H, Z), enc_in), unif((1, Z), enc_in))
    params['rnn2logv'] = (unif((L, H, Z), enc_in), unif((1, Z), enc_in))
    params['latent2hidden'] = (unif((L, Z, H), Z), unif((L, 1, H), Z))
    params['rnn2out'] = (unif((H, V), H), unif((1, V), H))
    return params


# -------------------------------- Forward pass --------------------------------

@jax.jit
def frag2mol_forward(params, inputs, lengths, eps):
    """inputs: (B, T) int32 token ids; lengths: (B,) int32 sorted descending
    (enforce_sorted=True); eps: (B, Z) f32 reparameterisation noise.
    Returns (output (B,T,V), mu (B,Z), sigma (B,Z), z (B,Z))."""
    B, T = inputs.shape
    emb = params['embedding']
    V, E = emb.shape
    e0, e1 = params['enc_gru']
    d0, d1 = params['dec_gru']
    wmean, bmean = params['rnn2mean']
    wlogv, blogv = params['rnn2logv']
    wlh, blh = params['latent2hidden']
    wout, bout = params['rnn2out']
    H = e0[2].shape[-1]
    Z = wmean.shape[-1]

    # ---- tiny layout glue (all << 1 KB): time-major ids/mask, padding ----
    vp_in = (V + 7) // 8 * 8                        # sublane-pad the emb table
    vp_out = (V + 127) // 128 * 128                 # lane-dense logits store
    emb_p = jnp.zeros((vp_in, E), jnp.float32).at[:V].set(emb)
    wout_p = jnp.zeros((H, vp_out), jnp.float32).at[:, :V].set(wout)
    bout_p = jnp.zeros((1, vp_out), jnp.float32).at[:, :V].set(bout)

    ids_tm = jnp.transpose(inputs).reshape(T * B, 1).astype(jnp.int32)
    mask_tm = (jnp.arange(T)[:, None] < lengths[None, :]
               ).astype(jnp.float32).reshape(T * B, 1)

    logits, mean, std, z = pl.pallas_call(
        _frag2mol_kernel,
        out_shape=[
            jax.ShapeDtypeStruct((T * B, vp_out), jnp.float32),
            jax.ShapeDtypeStruct((B, Z), jnp.float32),
            jax.ShapeDtypeStruct((B, Z), jnp.float32),
            jax.ShapeDtypeStruct((B, Z), jnp.float32),
        ],
    )(ids_tm, mask_tm, emb_p,
      e0[0], e0[1], e0[2], e0[3],
      e1[0], e1[1], e1[2], e1[3],
      d0[0], d0[1], d0[2], d0[3],
      d1[0], d1[1], d1[2], d1[3],
      wmean, bmean, wlogv, blogv,
      wlh, blh, wout_p, bout_p, eps.astype(jnp.float32))

    output = logits.reshape(T, B, vp_out).transpose(1, 0, 2)[:, :, :V]
    return output, mean, std, z


# --------------------------- pure-JAX reference ---------------------------

def reference_forward(params, inputs, lengths, eps):
    B, T = inputs.shape
    emb_table = params['embedding']
    wmean, bmean = params['rnn2mean']
    wlogv, blogv = params['rnn2logv']
    wlh, blh = params['latent2hidden']
    wout, bout = params['rnn2out']
    L, _, _ = wmean.shape
    H = wout.shape[0]
    V = wout.shape[1]

    x = emb_table[inputs]                                        # (B, T, E)
    mask = (jnp.arange(T)[None, :] < lengths[:, None]).astype(jnp.float32)

    def gru(x_bte, layers, h0_l):
        seq = x_bte
        finals = []
        for l, (wih, bih, whh, bhh) in enumerate(layers):
            h = h0_l[l]
            ys = []
            for t in range(T):
                xt = seq[:, t, :]
                m = mask[:, t][:, None]
                r = jax.nn.sigmoid(xt @ wih[0] + bih[0] + h @ whh[0] + bhh[0])
                zg = jax.nn.sigmoid(xt @ wih[1] + bih[1] + h @ whh[1] + bhh[1])
                n = jnp.tanh(xt @ wih[2] + bih[2] + r * (h @ whh[2] + bhh[2]))
                h_new = (1.0 - zg) * n + zg * h
                h = m * h_new + (1.0 - m) * h
                ys.append(m * h)
            seq = jnp.stack(ys, axis=1)
            finals.append(h)
        return seq, jnp.stack(finals, axis=0)

    zeros = jnp.zeros((L, B, H), jnp.float32)
    _, state = gru(x, params['enc_gru'], zeros)
    state_flat = state.reshape(B, H * L)                         # raw PyTorch view
    wm_full = jnp.concatenate([wmean[c] for c in range(L)], axis=0)
    wv_full = jnp.concatenate([wlogv[c] for c in range(L)], axis=0)
    mean = state_flat @ wm_full + bmean
    logv = state_flat @ wv_full + blogv
    std = jnp.exp(0.5 * logv)
    z = eps * std + mean
    dec_h0 = jnp.stack([z @ wlh[l] + blh[l] for l in range(L)], axis=0)
    dec_seq, _ = gru(x, params['dec_gru'], dec_h0)
    out = dec_seq.reshape(B * T, H) @ wout + bout
    return out.reshape(B, T, V), mean, std, z


# ------------------------------------ Main ------------------------------------

if __name__ == "__main__":
    key = jax.random.PRNGKey(0)
    k_param, k_inp, k_noise = jax.random.split(key, 3)

    # config: embed_size=32, hidden_size=32, hidden_layers=2, latent_size=16,
    # dropout (eval -> identity), pooling=None, pred_logp=False, pred_sas=False
    V, E, H, L, Z = 20, 32, 32, 2, 16
    B, T = 2, 8

    params = init_params(k_param, V, E, H, L, Z)
    inputs = jax.random.randint(k_inp, (B, T), 0, V, dtype=jnp.int32)
    lengths = jnp.array([T, T - 2], jnp.int32)     # sorted desc (enforce_sorted)
    eps = jax.random.normal(k_noise, (B, Z), jnp.float32)   # torch.randn_like(mean)

    out, mu, sigma, z = frag2mol_forward(params, inputs, lengths, eps)
    jax.block_until_ready((out, mu, sigma, z))

    assert out.shape == (B, T, V)
    assert mu.shape == (B, Z) and sigma.shape == (B, Z) and z.shape == (B, Z)
    assert bool(jnp.all(jnp.isfinite(out)))

    # Correctness check against a pure-JAX reference (loose tol: MXU f32 matmul).
    r_out, r_mu, r_sigma, r_z = reference_forward(params, inputs, lengths, eps)
    for got, ref in ((out, r_out), (mu, r_mu), (sigma, r_sigma), (z, r_z)):
        assert bool(jnp.allclose(got, ref, atol=1e-2, rtol=1e-2)), \
            float(jnp.max(jnp.abs(got - ref)))

    print("KERNEL_OK")
</pallas_src>

<mosaic_0001>
module attributes {stable_mosaic.version = 11 : i64} {
  func.func @_frag2mol_kernel(%arg0: memref<16x1xi32, #tpu.memory_space<vmem>>, %arg1: memref<16x1xf32, #tpu.memory_space<vmem>>, %arg2: memref<24x32xf32, #tpu.memory_space<vmem>>, %arg3: memref<3x32x32xf32, #tpu.memory_space<vmem>>, %arg4: memref<3x1x32xf32, #tpu.memory_space<vmem>>, %arg5: memref<3x32x32xf32, #tpu.memory_space<vmem>>, %arg6: memref<3x1x32xf32, #tpu.memory_space<vmem>>, %arg7: memref<3x32x32xf32, #tpu.memory_space<vmem>>, %arg8: memref<3x1x32xf32, #tpu.memory_space<vmem>>, %arg9: memref<3x32x32xf32, #tpu.memory_space<vmem>>, %arg10: memref<3x1x32xf32, #tpu.memory_space<vmem>>, %arg11: memref<3x32x32xf32, #tpu.memory_space<vmem>>, %arg12: memref<3x1x32xf32, #tpu.memory_space<vmem>>, %arg13: memref<3x32x32xf32, #tpu.memory_space<vmem>>, %arg14: memref<3x1x32xf32, #tpu.memory_space<vmem>>, %arg15: memref<3x32x32xf32, #tpu.memory_space<vmem>>, %arg16: memref<3x1x32xf32, #tpu.memory_space<vmem>>, %arg17: memref<3x32x32xf32, #tpu.memory_space<vmem>>, %arg18: memref<3x1x32xf32, #tpu.memory_space<vmem>>, %arg19: memref<2x32x16xf32, #tpu.memory_space<vmem>>, %arg20: memref<1x16xf32, #tpu.memory_space<vmem>>, %arg21: memref<2x32x16xf32, #tpu.memory_space<vmem>>, %arg22: memref<1x16xf32, #tpu.memory_space<vmem>>, %arg23: memref<2x16x32xf32, #tpu.memory_space<vmem>>, %arg24: memref<2x1x32xf32, #tpu.memory_space<vmem>>, %arg25: memref<32x128xf32, #tpu.memory_space<vmem>>, %arg26: memref<1x128xf32, #tpu.memory_space<vmem>>, %arg27: memref<2x16xf32, #tpu.memory_space<vmem>>, %arg28: memref<16x128xf32, #tpu.memory_space<vmem>>, %arg29: memref<2x16xf32, #tpu.memory_space<vmem>>, %arg30: memref<2x16xf32, #tpu.memory_space<vmem>>, %arg31: memref<2x16xf32, #tpu.memory_space<vmem>>) attributes {dimension_semantics = [], scalar_prefetch = 0 : i64, scratch_operands = 0 : i64, tpu.core_type = #tpu.core_type<tc>} {
    %c0 = arith.constant 0 : index
    %c0_0 = arith.constant 0 : index
    %0 = vector.load %arg1[%c0, %c0_0] : memref<16x1xf32, #tpu.memory_space<vmem>>, vector<16x1xf32>
    %c0_1 = arith.constant 0 : index
    %c0_2 = arith.constant 0 : index
    %1 = vector.load %arg0[%c0_1, %c0_2] : memref<16x1xi32, #tpu.memory_space<vmem>>, vector<16x1xi32>
    %2 = tpu.iota {dimensions = array<i32: 1>} : vector<16x24xi32>
    %3 = vector.broadcast %1 : vector<16x1xi32> to vector<16x24xi32>
    %4 = arith.cmpi eq, %2, %3 : vector<16x24xi32>
    %5 = arith.extui %4 : vector<16x24xi1> to vector<16x24xi32>
    %6 = arith.sitofp %5 : vector<16x24xi32> to vector<16x24xf32>
    %c0_3 = arith.constant 0 : index
    %c0_4 = arith.constant 0 : index
    %7 = vector.load %arg2[%c0_3, %c0_4] : memref<24x32xf32, #tpu.memory_space<vmem>>, vector<24x32xf32>
    %cst = arith.constant dense<0.000000e+00> : vector<16x32xf32>
    %8 = tpu.matmul %6, %7, %cst {dimension_numbers = #tpu.dot_dimension_numbers<[1], [0], [0], [1], [0, 0, 1, 1], [], []>} : vector<16x24xf32>, vector<24x32xf32>, vector<16x32xf32> -> vector<16x32xf32>
    %cst_5 = arith.constant 0.000000e+00 : f32
    %9 = vector.broadcast %cst_5 : f32 to vector<2x32xf32>
    %c0_6 = arith.constant 0 : index
    %c0_7 = arith.constant 0 : index
    %c0_8 = arith.constant 0 : index
    %10 = vector.load %arg3[%c0_6, %c0_7, %c0_8] : memref<3x32x32xf32, #tpu.memory_space<vmem>>, vector<1x32x32xf32>
    %11 = vector.shape_cast %10 : vector<1x32x32xf32> to vector<32x32xf32>
    %cst_9 = arith.constant dense<0.000000e+00> : vector<16x32xf32>
    %12 = tpu.matmul %8, %11, %cst_9 {dimension_numbers = #tpu.dot_dimension_numbers<[1], [0], [0], [1], [0, 0, 1, 1], [], []>} : vector<16x32xf32>, vector<32x32xf32>, vector<16x32xf32> -> vector<16x32xf32>
    %c0_10 = arith.constant 0 : index
    %c0_11 = arith.constant 0 : index
    %c0_12 = arith.constant 0 : index
    %13 = vector.load %arg4[%c0_10, %c0_11, %c0_12] : memref<3x1x32xf32, #tpu.memory_space<vmem>>, vector<1x1x32xf32>
    %14 = vector.shape_cast %13 : vector<1x1x32xf32> to vector<1x32xf32>
    %15 = vector.broadcast %14 : vector<1x32xf32> to vector<16x32xf32>
    %16 = arith.addf %12, %15 : vector<16x32xf32>
    %c1 = arith.constant 1 : index
    %c0_13 = arith.constant 0 : index
    %c0_14 = arith.constant 0 : index
    %17 = vector.load %arg3[%c1, %c0_13, %c0_14] : memref<3x32x32xf32, #tpu.memory_space<vmem>>, vector<1x32x32xf32>
    %18 = vector.shape_cast %17 : vector<1x32x32xf32> to vector<32x32xf32>
    %cst_15 = arith.constant dense<0.000000e+00> : vector<16x32xf32>
    %19 = tpu.matmul %8, %18, %cst_15 {dimension_numbers = #tpu.dot_dimension_numbers<[1], [0], [0], [1], [0, 0, 1, 1], [], []>} : vector<16x32xf32>, vector<32x32xf32>, vector<16x32xf32> -> vector<16x32xf32>
    %c1_16 = arith.constant 1 : index
    %c0_17 = arith.constant 0 : index
    %c0_18 = arith.constant 0 : index
    %20 = vector.load %arg4[%c1_16, %c0_17, %c0_18] : memref<3x1x32xf32, #tpu.memory_space<vmem>>, vector<1x1x32xf32>
    %21 = vector.shape_cast %20 : vector<1x1x32xf32> to vector<1x32xf32>
    %22 = vector.broadcast %21 : vector<1x32xf32> to vector<16x32xf32>
    %23 = arith.addf %19, %22 : vector<16x32xf32>
    %c2 = arith.constant 2 : index
    %c0_19 = arith.constant 0 : index
    %c0_20 = arith.constant 0 : index
    %24 = vector.load %arg3[%c2, %c0_19, %c0_20] : memref<3x32x32xf32, #tpu.memory_space<vmem>>, vector<1x32x32xf32>
    %25 = vector.shape_cast %24 : vector<1x32x32xf32> to vector<32x32xf32>
    %cst_21 = arith.constant dense<0.000000e+00> : vector<16x32xf32>
    %26 = tpu.matmul %8, %25, %cst_21 {dimension_numbers = #tpu.dot_dimension_numbers<[1], [0], [0], [1], [0, 0, 1, 1], [], []>} : vector<16x32xf32>, vector<32x32xf32>, vector<16x32xf32> -> vector<16x32xf32>
    %c2_22 = arith.constant 2 : index
    %c0_23 = arith.constant 0 : index
    %c0_24 = arith.constant 0 : index
    %27 = vector.load %arg4[%c2_22, %c0_23, %c0_24] : memref<3x1x32xf32, #tpu.memory_space<vmem>>, vector<1x1x32xf32>
    %28 = vector.shape_cast %27 : vector<1x1x32xf32> to vector<1x32xf32>
    %29 = vector.broadcast %28 : vector<1x32xf32> to vector<16x32xf32>
    %30 = arith.addf %26, %29 : vector<16x32xf32>
    %31 = vector.extract_strided_slice %0 {offsets = [0, 0], sizes = [2, 1], strides = [1, 1]} : vector<16x1xf32> to vector<2x1xf32>
    %32 = vector.extract_strided_slice %16 {offsets = [0, 0], sizes = [2, 32], strides = [1, 1]} : vector<16x32xf32> to vector<2x32xf32>
    %33 = vector.extract_strided_slice %23 {offsets = [0, 0], sizes = [2, 32], strides = [1, 1]} : vector<16x32xf32> to vector<2x32xf32>
    %34 = vector.extract_strided_slice %30 {offsets = [0, 0], sizes = [2, 32], strides = [1, 1]} : vector<16x32xf32> to vector<2x32xf32>
    %c0_25 = arith.constant 0 : index
    %c0_26 = arith.constant 0 : index
    %c0_27 = arith.constant 0 : index
    %35 = vector.load %arg5[%c0_25, %c0_26, %c0_27] : memref<3x32x32xf32, #tpu.memory_space<vmem>>, vector<1x32x32xf32>
    %36 = vector.shape_cast %35 : vector<1x32x32xf32> to vector<32x32xf32>
    %cst_28 = arith.constant dense<0.000000e+00> : vector<2x32xf32>
    %37 = tpu.matmul %9, %36, %cst_28 {dimension_numbers = #tpu.dot_dimension_numbers<[1], [0], [0], [1], [0, 0, 1, 1], [], []>} : vector<2x32xf32>, vector<32x32xf32>, vector<2x32xf32> -> vector<2x32xf32>
    %c0_29 = arith.constant 0 : index
    %c0_30 = arith.constant 0 : index
    %c0_31 = arith.constant 0 : index
    %38 = vector.load %arg6[%c0_29, %c0_30, %c0_31] : memref<3x1x32xf32, #tpu.memory_space<vmem>>, vector<1x1x32xf32>
    %39 = vector.shape_cast %38 : vector<1x1x32xf32> to vector<1x32xf32>
    %40 = vector.broadcast %39 : vector<1x32xf32> to vector<2x32xf32>
    %41 = arith.addf %37, %40 : vector<2x32xf32>
    %c1_32 = arith.constant 1 : index
    %c0_33 = arith.constant 0 : index
    %c0_34 = arith.constant 0 : index
    %42 = vector.load %arg5[%c1_32, %c0_33, %c0_34] : memref<3x32x32xf32, #tpu.memory_space<vmem>>, vector<1x32x32xf32>
    %43 = vector.shape_cast %42 : vector<1x32x32xf32> to vector<32x32xf32>
    %cst_35 = arith.constant dense<0.000000e+00> : vector<2x32xf32>
    %44 = tpu.matmul %9, %43, %cst_35 {dimension_numbers = #tpu.dot_dimension_numbers<[1], [0], [0], [1], [0, 0, 1, 1], [], []>} : vector<2x32xf32>, vector<32x32xf32>, vector<2x32xf32> -> vector<2x32xf32>
    %c1_36 = arith.constant 1 : index
    %c0_37 = arith.constant 0 : index
    %c0_38 = arith.constant 0 : index
    %45 = vector.load %arg6[%c1_36, %c0_37, %c0_38] : memref<3x1x32xf32, #tpu.memory_space<vmem>>, vector<1x1x32xf32>
    %46 = vector.shape_cast %45 : vector<1x1x32xf32> to vector<1x32xf32>
    %47 = vector.broadcast %46 : vector<1x32xf32> to vector<2x32xf32>
    %48 = arith.addf %44, %47 : vector<2x32xf32>
    %c2_39 = arith.constant 2 : index
    %c0_40 = arith.constant 0 : index
    %c0_41 = arith.constant 0 : index
    %49 = vector.load %arg5[%c2_39, %c0_40, %c0_41] : memref<3x32x32xf32, #tpu.memory_space<vmem>>, vector<1x32x32xf32>
    %50 = vector.shape_cast %49 : vector<1x32x32xf32> to vector<32x32xf32>
    %cst_42 = arith.constant dense<0.000000e+00> : vector<2x32xf32>
    %51 = tpu.matmul %9, %50, %cst_42 {dimension_numbers = #tpu.dot_dimension_numbers<[1], [0], [0], [1], [0, 0, 1, 1], [], []>} : vector<2x32xf32>, vector<32x32xf32>, vector<2x32xf32> -> vector<2x32xf32>
    %c2_43 = arith.constant 2 : index
    %c0_44 = arith.constant 0 : index
    %c0_45 = arith.constant 0 : index
    %52 = vector.load %arg6[%c2_43, %c0_44, %c0_45] : memref<3x1x32xf32, #tpu.memory_space<vmem>>, vector<1x1x32xf32>
    %53 = vector.shape_cast %52 : vector<1x1x32xf32> to vector<1x32xf32>
    %54 = vector.broadcast %53 : vector<1x32xf32> to vector<2x32xf32>
    %55 = arith.addf %51, %54 : vector<2x32xf32>
    %56 = arith.addf %32, %41 : vector<2x32xf32>
    %57 = arith.negf %56 : vector<2x32xf32>
    %58 = math.exp %57 : vector<2x32xf32>
    %cst_46 = arith.constant 1.000000e+00 : f32
    %59 = vector.broadcast %cst_46 : f32 to vector<2x32xf32>
    %60 = arith.addf %59, %58 : vector<2x32xf32>
    %61 = arith.divf %59, %60 : vector<2x32xf32>
    %62 = arith.addf %33, %48 : vector<2x32xf32>
    %63 = arith.negf %62 : vector<2x32xf32>
    %64 = math.exp %63 : vector<2x32xf32>
    %cst_47 = arith.constant 1.000000e+00 : f32
    %65 = vector.broadcast %cst_47 : f32 to vector<2x32xf32>
    %66 = arith.addf %65, %64 : vector<2x32xf32>
    %67 = arith.divf %65, %66 : vector<2x32xf32>
    %68 = arith.mulf %61, %55 : vector<2x32xf32>
    %69 = arith.addf %34, %68 : vector<2x32xf32>
    %70 = math.tanh %69 : vector<2x32xf32>
    %cst_48 = arith.constant 1.000000e+00 : f32
    %71 = vector.broadcast %cst_48 : f32 to vector<2x32xf32>
    %72 = arith.subf %71, %67 : vector<2x32xf32>
    %73 = arith.mulf %72, %70 : vector<2x32xf32>
    %74 = arith.mulf %67, %9 : vector<2x32xf32>
    %75 = arith.addf %73, %74 : vector<2x32xf32>
    %76 = vector.broadcast %31 : vector<2x1xf32> to vector<2x32xf32>
    %77 = arith.mulf %76, %75 : vector<2x32xf32>
    %cst_49 = arith.constant 1.000000e+00 : f32
    %78 = vector.broadcast %cst_49 : f32 to vector<2x1xf32>
    %79 = arith.subf %78, %31 : vector<2x1xf32>
    %80 = vector.broadcast %79 : vector<2x1xf32> to vector<2x32xf32>
    %81 = arith.mulf %80, %9 : vector<2x32xf32>
    %82 = arith.addf %77, %81 : vector<2x32xf32>
    %83 = vector.broadcast %31 : vector<2x1xf32> to vector<2x32xf32>
    %84 = arith.mulf %83, %82 : vector<2x32xf32>
    %85 = vector.extract_strided_slice %0 {offsets = [2, 0], sizes = [2, 1], strides = [1, 1]} : vector<16x1xf32> to vector<2x1xf32>
    %86 = vector.extract_strided_slice %16 {offsets = [2, 0], sizes = [2, 32], strides = [1, 1]} : vector<16x32xf32> to vector<2x32xf32>
    %87 = vector.extract_strided_slice %23 {offsets = [2, 0], sizes = [2, 32], strides = [1, 1]} : vector<16x32xf32> to vector<2x32xf32>
    %88 = vector.extract_strided_slice %30 {offsets = [2, 0], sizes = [2, 32], strides = [1, 1]} : vector<16x32xf32> to vector<2x32xf32>
    %c0_50 = arith.constant 0 : index
    %c0_51 = arith.constant 0 : index
    %c0_52 = arith.constant 0 : index
    %89 = vector.load %arg5[%c0_50, %c0_51, %c0_52] : memref<3x32x32xf32, #tpu.memory_space<vmem>>, vector<1x32x32xf32>
    %90 = vector.shape_cast %89 : vector<1x32x32xf32> to vector<32x32xf32>
    %cst_53 = arith.constant dense<0.000000e+00> : vector<2x32xf32>
    %91 = tpu.matmul %82, %90, %cst_53 {dimension_numbers = #tpu.dot_dimension_numbers<[1], [0], [0], [1], [0, 0, 1, 1], [], []>} : vector<2x32xf32>, vector<32x32xf32>, vector<2x32xf32> -> vector<2x32xf32>
    %c0_54 = arith.constant 0 : index
    %c0_55 = arith.constant 0 : index
    %c0_56 = arith.constant 0 : index
    %92 = vector.load %arg6[%c0_54, %c0_55, %c0_56] : memref<3x1x32xf32, #tpu.memory_space<vmem>>, vector<1x1x32xf32>
    %93 = vector.shape_cast %92 : vector<1x1x32xf32> to vector<1x32xf32>
    %94 = vector.broadcast %93 : vector<1x32xf32> to vector<2x32xf32>
    %95 = arith.addf %91, %94 : vector<2x32xf32>
    %c1_57 = arith.constant 1 : index
    %c0_58 = arith.constant 0 : index
    %c0_59 = arith.constant 0 : index
    %96 = vector.load %arg5[%c1_57, %c0_58, %c0_59] : memref<3x32x32xf32, #tpu.memory_space<vmem>>, vector<1x32x32xf32>
    %97 = vector.shape_cast %96 : vector<1x32x32xf32> to vector<32x32xf32>
    %cst_60 = arith.constant dense<0.000000e+00> : vector<2x32xf32>
    %98 = tpu.matmul %82, %97, %cst_60 {dimension_numbers = #tpu.dot_dimension_numbers<[1], [0], [0], [1], [0, 0, 1, 1], [], []>} : vector<2x32xf32>, vector<32x32xf32>, vector<2x32xf32> -> vector<2x32xf32>
    %c1_61 = arith.constant 1 : index
    %c0_62 = arith.constant 0 : index
    %c0_63 = arith.constant 0 : index
    %99 = vector.load %arg6[%c1_61, %c0_62, %c0_63] : memref<3x1x32xf32, #tpu.memory_space<vmem>>, vector<1x1x32xf32>
    %100 = vector.shape_cast %99 : vector<1x1x32xf32> to vector<1x32xf32>
    %101 = vector.broadcast %100 : vector<1x32xf32> to vector<2x32xf32>
    %102 = arith.addf %98, %101 : vector<2x32xf32>
    %c2_64 = arith.constant 2 : index
    %c0_65 = arith.constant 0 : index
    %c0_66 = arith.constant 0 : index
    %103 = vector.load %arg5[%c2_64, %c0_65, %c0_66] : memref<3x32x32xf32, #tpu.memory_space<vmem>>, vector<1x32x32xf32>
    %104 = vector.shape_cast %103 : vector<1x32x32xf32> to vector<32x32xf32>
    %cst_67 = arith.constant dense<0.000000e+00> : vector<2x32xf32>
    %105 = tpu.matmul %82, %104, %cst_67 {dimension_numbers = #tpu.dot_dimension_numbers<[1], [0], [0], [1], [0, 0, 1, 1], [], []>} : vector<2x32xf32>, vector<32x32xf32>, vector<2x32xf32> -> vector<2x32xf32>
    %c2_68 = arith.constant 2 : index
    %c0_69 = arith.constant 0 : index
    %c0_70 = arith.constant 0 : index
    %106 = vector.load %arg6[%c2_68, %c0_69, %c0_70] : memref<3x1x32xf32, #tpu.memory_space<vmem>>, vector<1x1x32xf32>
    %107 = vector.shape_cast %106 : vector<1x1x32xf32> to vector<1x32xf32>
    %108 = vector.broadcast %107 : vector<1x32xf32> to vector<2x32xf32>
    %109 = arith.addf %105, %108 : vector<2x32xf32>
    %110 = arith.addf %86, %95 : vector<2x32xf32>
    %111 = arith.negf %110 : vector<2x32xf32>
    %112 = math.exp %111 : vector<2x32xf32>
    %cst_71 = arith.constant 1.000000e+00 : f32
    %113 = vector.broadcast %cst_71 : f32 to vector<2x32xf32>
    %114 = arith.addf %113, %112 : vector<2x32xf32>
    %115 = arith.divf %113, %114 : vector<2x32xf32>
    %116 = arith.addf %87, %102 : vector<2x32xf32>
    %117 = arith.negf %116 : vector<2x32xf32>
    %118 = math.exp %117 : vector<2x32xf32>
    %cst_72 = arith.constant 1.000000e+00 : f32
    %119 = vector.broadcast %cst_72 : f32 to vector<2x32xf32>
    %120 = arith.addf %119, %118 : vector<2x32xf32>
    %121 = arith.divf %119, %120 : vector<2x32xf32>
    %122 = arith.mulf %115, %109 : vector<2x32xf32>
    %123 = arith.addf %88, %122 : vector<2x32xf32>
    %124 = math.tanh %123 : vector<2x32xf32>
    %cst_73 = arith.constant 1.000000e+00 : f32
    %125 = vector.broadcast %cst_73 : f32 to vector<2x32xf32>
    %126 = arith.subf %125, %121 : vector<2x32xf32>
    %127 = arith.mulf %126, %124 : vector<2x32xf32>
    %128 = arith.mulf %121, %82 : vector<2x32xf32>
    %129 = arith.addf %127, %128 : vector<2x32xf32>
    %130 = vector.broadcast %85 : vector<2x1xf32> to vector<2x32xf32>
    %131 = arith.mulf %130, %129 : vector<2x32xf32>
    %cst_74 = arith.constant 1.000000e+00 : f32
    %132 = vector.broadcast %cst_74 : f32 to vector<2x1xf32>
    %133 = arith.subf %132, %85 : vector<2x1xf32>
    %134 = vector.broadcast %133 : vector<2x1xf32> to vector<2x32xf32>
    %135 = arith.mulf %134, %82 : vector<2x32xf32>
    %136 = arith.addf %131, %135 : vector<2x32xf32>
    %137 = vector.broadcast %85 : vector<2x1xf32> to vector<2x32xf32>
    %138 = arith.mulf %137, %136 : vector<2x32xf32>
    %139 = vector.extract_strided_slice %0 {offsets = [4, 0], sizes = [2, 1], strides = [1, 1]} : vector<16x1xf32> to vector<2x1xf32>
    %140 = vector.extract_strided_slice %16 {offsets = [4, 0], sizes = [2, 32], strides = [1, 1]} : vector<16x32xf32> to vector<2x32xf32>
    %141 = vector.extract_strided_slice %23 {offsets = [4, 0], sizes = [2, 32], strides = [1, 1]} : vector<16x32xf32> to vector<2x32xf32>
    %142 = vector.extract_strided_slice %30 {offsets = [4, 0], sizes = [2, 32], strides = [1, 1]} : vector<16x32xf32> to vector<2x32xf32>
    %c0_75 = arith.constant 0 : index
    %c0_76 = arith.constant 0 : index
    %c0_77 = arith.constant 0 : index
    %143 = vector.load %arg5[%c0_75, %c0_76, %c0_77] : memref<3x32x32xf32, #tpu.memory_space<vmem>>, vector<1x32x32xf32>
    %144 = vector.shape_cast %143 : vector<1x32x32xf32> to vector<32x32xf32>
    %cst_78 = arith.constant dense<0.000000e+00> : vector<2x32xf32>
    %145 = tpu.matmul %136, %144, %cst_78 {dimension_numbers = #tpu.dot_dimension_numbers<[1], [0], [0], [1], [0, 0, 1, 1], [], []>} : vector<2x32xf32>, vector<32x32xf32>, vector<2x32xf32> -> vector<2x32xf32>
    %c0_79 = arith.constant 0 : index
    %c0_80 = arith.constant 0 : index
    %c0_81 = arith.constant 0 : index
    %146 = vector.load %arg6[%c0_79, %c0_80, %c0_81] : memref<3x1x32xf32, #tpu.memory_space<vmem>>, vector<1x1x32xf32>
    %147 = vector.shape_cast %146 : vector<1x1x32xf32> to vector<1x32xf32>
    %148 = vector.broadcast %147 : vector<1x32xf32> to vector<2x32xf32>
    %149 = arith.addf %145, %148 : vector<2x32xf32>
    %c1_82 = arith.constant 1 : index
    %c0_83 = arith.constant 0 : index
    %c0_84 = arith.constant 0 : index
    %150 = vector.load %arg5[%c1_82, %c0_83, %c0_84] : memref<3x32x32xf32, #tpu.memory_space<vmem>>, vector<1x32x32xf32>
    %151 = vector.shape_cast %150 : vector<1x32x32xf32> to vector<32x32xf32>
    %cst_85 = arith.constant dense<0.000000e+00> : vector<2x32xf32>
    %152 = tpu.matmul %136, %151, %cst_85 {dimension_numbers = #tpu.dot_dimension_numbers<[1], [0], [0], [1], [0, 0, 1, 1], [], []>} : vector<2x32xf32>, vector<32x32xf32>, vector<2x32xf32> -> vector<2x32xf32>
    %c1_86 = arith.constant 1 : index
    %c0_87 = arith.constant 0 : index
    %c0_88 = arith.constant 0 : index
    %153 = vector.load %arg6[%c1_86, %c0_87, %c0_88] : memref<3x1x32xf32, #tpu.memory_space<vmem>>, vector<1x1x32xf32>
    %154 = vector.shape_cast %153 : vector<1x1x32xf32> to vector<1x32xf32>
    %155 = vector.broadcast %154 : vector<1x32xf32> to vector<2x32xf32>
    %156 = arith.addf %152, %155 : vector<2x32xf32>
    %c2_89 = arith.constant 2 : index
    %c0_90 = arith.constant 0 : index
    %c0_91 = arith.constant 0 : index
    %157 = vector.load %arg5[%c2_89, %c0_90, %c0_91] : memref<3x32x32xf32, #tpu.memory_space<vmem>>, vector<1x32x32xf32>
    %158 = vector.shape_cast %157 : vector<1x32x32xf32> to vector<32x32xf32>
    %cst_92 = arith.constant dense<0.000000e+00> : vector<2x32xf32>
    %159 = tpu.matmul %136, %158, %cst_92 {dimension_numbers = #tpu.dot_dimension_numbers<[1], [0], [0], [1], [0, 0, 1, 1], [], []>} : vector<2x32xf32>, vector<32x32xf32>, vector<2x32xf32> -> vector<2x32xf32>
    %c2_93 = arith.constant 2 : index
    %c0_94 = arith.constant 0 : index
    %c0_95 = arith.constant 0 : index
    %160 = vector.load %arg6[%c2_93, %c0_94, %c0_95] : memref<3x1x32xf32, #tpu.memory_space<vmem>>, vector<1x1x32xf32>
    %161 = vector.shape_cast %160 : vector<1x1x32xf32> to vector<1x32xf32>
    %162 = vector.broadcast %161 : vector<1x32xf32> to vector<2x32xf32>
    %163 = arith.addf %159, %162 : vector<2x32xf32>
    %164 = arith.addf %140, %149 : vector<2x32xf32>
    %165 = arith.negf %164 : vector<2x32xf32>
    %166 = math.exp %165 : vector<2x32xf32>
    %cst_96 = arith.constant 1.000000e+00 : f32
    %167 = vector.broadcast %cst_96 : f32 to vector<2x32xf32>
    %168 = arith.addf %167, %166 : vector<2x32xf32>
    %169 = arith.divf %167, %168 : vector<2x32xf32>
    %170 = arith.addf %141, %156 : vector<2x32xf32>
    %171 = arith.negf %170 : vector<2x32xf32>
    %172 = math.exp %171 : vector<2x32xf32>
    %cst_97 = arith.constant 1.000000e+00 : f32
    %173 = vector.broadcast %cst_97 : f32 to vector<2x32xf32>
    %174 = arith.addf %173, %172 : vector<2x32xf32>
    %175 = arith.divf %173, %174 : vector<2x32xf32>
    %176 = arith.mulf %169, %163 : vector<2x32xf32>
    %177 = arith.addf %142, %176 : vector<2x32xf32>
    %178 = math.tanh %177 : vector<2x32xf32>
    %cst_98 = arith.constant 1.000000e+00 : f32
    %179 = vector.broadcast %cst_98 : f32 to vector<2x32xf32>
    %180 = arith.subf %179, %175 : vector<2x32xf32>
    %181 = arith.mulf %180, %178 : vector<2x32xf32>
    %182 = arith.mulf %175, %136 : vector<2x32xf32>
    %183 = arith.addf %181, %182 : vector<2x32xf32>
    %184 = vector.broadcast %139 : vector<2x1xf32> to vector<2x32xf32>
    %185 = arith.mulf %184, %183 : vector<2x32xf32>
    %cst_99 = arith.constant 1.000000e+00 : f32
    %186 = vector.broadcast %cst_99 : f32 to vector<2x1xf32>
    %187 = arith.subf %186, %139 : vector<2x1xf32>
    %188 = vector.broadcast %187 : vector<2x1xf32> to vector<2x32xf32>
    %189 = arith.mulf %188, %136 : vector<2x32xf32>
    %190 = arith.addf %185, %189 : vector<2x32xf32>
    %191 = vector.broadcast %139 : vector<2x1xf32> to vector<2x32xf32>
    %192 = arith.mulf %191, %190 : vector<2x32xf32>
    %193 = vector.extract_strided_slice %0 {offsets = [6, 0], sizes = [2, 1], strides = [1, 1]} : vector<16x1xf32> to vector<2x1xf32>
    %194 = vector.extract_strided_slice %16 {offsets = [6, 0], sizes = [2, 32], strides = [1, 1]} : vector<16x32xf32> to vector<2x32xf32>
    %195 = vector.extract_strided_slice %23 {offsets = [6, 0], sizes = [2, 32], strides = [1, 1]} : vector<16x32xf32> to vector<2x32xf32>
    %196 = vector.extract_strided_slice %30 {offsets = [6, 0], sizes = [2, 32], strides = [1, 1]} : vector<16x32xf32> to vector<2x32xf32>
    %c0_100 = arith.constant 0 : index
    %c0_101 = arith.constant 0 : index
    %c0_102 = arith.constant 0 : index
    %197 = vector.load %arg5[%c0_100, %c0_101, %c0_102] : memref<3x32x32xf32, #tpu.memory_space<vmem>>, vector<1x32x32xf32>
    %198 = vector.shape_cast %197 : vector<1x32x32xf32> to vector<32x32xf32>
    %cst_103 = arith.constant dense<0.000000e+00> : vector<2x32xf32>
    %199 = tpu.matmul %190, %198, %cst_103 {dimension_numbers = #tpu.dot_dimension_numbers<[1], [0], [0], [1], [0, 0, 1, 1], [], []>} : vector<2x32xf32>, vector<32x32xf32>, vector<2x32xf32> -> vector<2x32xf32>
    %c0_104 = arith.constant 0 : index
    %c0_105 = arith.constant 0 : index
    %c0_106 = arith.constant 0 : index
    %200 = vector.load %arg6[%c0_104, %c0_105, %c0_106] : memref<3x1x32xf32, #tpu.memory_space<vmem>>, vector<1x1x32xf32>
    %201 = vector.shape_cast %200 : vector<1x1x32xf32> to vector<1x32xf32>
    %202 = vector.broadcast %201 : vector<1x32xf32> to vector<2x32xf32>
    %203 = arith.addf %199, %202 : vector<2x32xf32>
    %c1_107 = arith.constant 1 : index
    %c0_108 = arith.constant 0 : index
    %c0_109 = arith.constant 0 : index
    %204 = vector.load %arg5[%c1_107, %c0_108, %c0_109] : memref<3x32x32xf32, #tpu.memory_space<vmem>>, vector<1x32x32xf32>
    %205 = vector.shape_cast %204 : vector<1x32x32xf32> to vector<32x32xf32>
    %cst_110 = arith.constant dense<0.000000e+00> : vector<2x32xf32>
    %206 = tpu.matmul %190, %205, %cst_110 {dimension_numbers = #tpu.dot_dimension_numbers<[1], [0], [0], [1], [0, 0, 1, 1], [], []>} : vector<2x32xf32>, vector<32x32xf32>, vector<2x32xf32> -> vector<2x32xf32>
    %c1_111 = arith.constant 1 : index
    %c0_112 = arith.constant 0 : index
    %c0_113 = arith.constant 0 : index
    %207 = vector.load %arg6[%c1_111, %c0_112, %c0_113] : memref<3x1x32xf32, #tpu.memory_space<vmem>>, vector<1x1x32xf32>
    %208 = vector.shape_cast %207 : vector<1x1x32xf32> to vector<1x32xf32>
    %209 = vector.broadcast %208 : vector<1x32xf32> to vector<2x32xf32>
    %210 = arith.addf %206, %209 : vector<2x32xf32>
    %c2_114 = arith.constant 2 : index
    %c0_115 = arith.constant 0 : index
    %c0_116 = arith.constant 0 : index
    %211 = vector.load %arg5[%c2_114, %c0_115, %c0_116] : memref<3x32x32xf32, #tpu.memory_space<vmem>>, vector<1x32x32xf32>
    %212 = vector.shape_cast %211 : vector<1x32x32xf32> to vector<32x32xf32>
    %cst_117 = arith.constant dense<0.000000e+00> : vector<2x32xf32>
    %213 = tpu.matmul %190, %212, %cst_117 {dimension_numbers = #tpu.dot_dimension_numbers<[1], [0], [0], [1], [0, 0, 1, 1], [], []>} : vector<2x32xf32>, vector<32x32xf32>, vector<2x32xf32> -> vector<2x32xf32>
    %c2_118 = arith.constant 2 : index
    %c0_119 = arith.constant 0 : index
    %c0_120 = arith.constant 0 : index
    %214 = vector.load %arg6[%c2_118, %c0_119, %c0_120] : memref<3x1x32xf32, #tpu.memory_space<vmem>>, vector<1x1x32xf32>
    %215 = vector.shape_cast %214 : vector<1x1x32xf32> to vector<1x32xf32>
    %216 = vector.broadcast %215 : vector<1x32xf32> to vector<2x32xf32>
    %217 = arith.addf %213, %216 : vector<2x32xf32>
    %218 = arith.addf %194, %203 : vector<2x32xf32>
    %219 = arith.negf %218 : vector<2x32xf32>
    %220 = math.exp %219 : vector<2x32xf32>
    %cst_121 = arith.constant 1.000000e+00 : f32
    %221 = vector.broadcast %cst_121 : f32 to vector<2x32xf32>
    %222 = arith.addf %221, %220 : vector<2x32xf32>
    %223 = arith.divf %221, %222 : vector<2x32xf32>
    %224 = arith.addf %195, %210 : vector<2x32xf32>
    %225 = arith.negf %224 : vector<2x32xf32>
    %226 = math.exp %225 : vector<2x32xf32>
    %cst_122 = arith.constant 1.000000e+00 : f32
    %227 = vector.broadcast %cst_122 : f32 to vector<2x32xf32>
    %228 = arith.addf %227, %226 : vector<2x32xf32>
    %229 = arith.divf %227, %228 : vector<2x32xf32>
    %230 = arith.mulf %223, %217 : vector<2x32xf32>
    %231 = arith.addf %196, %230 : vector<2x32xf32>
    %232 = math.tanh %231 : vector<2x32xf32>
    %cst_123 = arith.constant 1.000000e+00 : f32
    %233 = vector.broadcast %cst_123 : f32 to vector<2x32xf32>
    %234 = arith.subf %233, %229 : vector<2x32xf32>
    %235 = arith.mulf %234, %232 : vector<2x32xf32>
    %236 = arith.mulf %229, %190 : vector<2x32xf32>
    %237 = arith.addf %235, %236 : vector<2x32xf32>
    %238 = vector.broadcast %193 : vector<2x1xf32> to vector<2x32xf32>
    %239 = arith.mulf %238, %237 : vector<2x32xf32>
    %cst_124 = arith.constant 1.000000e+00 : f32
    %240 = vector.broadcast %cst_124 : f32 to vector<2x1xf32>
    %241 = arith.subf %240, %193 : vector<2x1xf32>
    %242 = vector.broadcast %241 : vector<2x1xf32> to vector<2x32xf32>
    %243 = arith.mulf %242, %190 : vector<2x32xf32>
    %244 = arith.addf %239, %243 : vector<2x32xf32>
    %245 = vector.broadcast %193 : vector<2x1xf32> to vector<2x32xf32>
    %246 = arith.mulf %245, %244 : vector<2x32xf32>
    %247 = vector.extract_strided_slice %0 {offsets = [8, 0], sizes = [2, 1], strides = [1, 1]} : vector<16x1xf32> to vector<2x1xf32>
    %248 = vector.extract_strided_slice %16 {offsets = [8, 0], sizes = [2, 32], strides = [1, 1]} : vector<16x32xf32> to vector<2x32xf32>
    %249 = vector.extract_strided_slice %23 {offsets = [8, 0], sizes = [2, 32], strides = [1, 1]} : vector<16x32xf32> to vector<2x32xf32>
    %250 = vector.extract_strided_slice %30 {offsets = [8, 0], sizes = [2, 32], strides = [1, 1]} : vector<16x32xf32> to vector<2x32xf32>
    %c0_125 = arith.constant 0 : index
    %c0_126 = arith.constant 0 : index
    %c0_127 = arith.constant 0 : index
    %251 = vector.load %arg5[%c0_125, %c0_126, %c0_127] : memref<3x32x32xf32, #tpu.memory_space<vmem>>, vector<1x32x32xf32>
    %252 = vector.shape_cast %251 : vector<1x32x32xf32> to vector<32x32xf32>
    %cst_128 = arith.constant dense<0.000000e+00> : vector<2x32xf32>
    %253 = tpu.matmul %244, %252, %cst_128 {dimension_numbers = #tpu.dot_dimension_numbers<[1], [0], [0], [1], [0, 0, 1, 1], [], []>} : vector<2x32xf32>, vector<32x32xf32>, vector<2x32xf32> -> vector<2x32xf32>
    %c0_129 = arith.constant 0 : index
    %c0_130 = arith.constant 0 : index
    %c0_131 = arith.constant 0 : index
    %254 = vector.load %arg6[%c0_129, %c0_130, %c0_131] : memref<3x1x32xf32, #tpu.memory_space<vmem>>, vector<1x1x32xf32>
    %255 = vector.shape_cast %254 : vector<1x1x32xf32> to vector<1x32xf32>
    %256 = vector.broadcast %255 : vector<1x32xf32> to vector<2x32xf32>
    %257 = arith.addf %253, %256 : vector<2x32xf32>
    %c1_132 = arith.constant 1 : index
    %c0_133 = arith.constant 0 : index
    %c0_134 = arith.constant 0 : index
    %258 = vector.load %arg5[%c1_132, %c0_133, %c0_134] : memref<3x32x32xf32, #tpu.memory_space<vmem>>, vector<1x32x32xf32>
    %259 = vector.shape_cast %258 : vector<1x32x32xf32> to vector<32x32xf32>
    %cst_135 = arith.constant dense<0.000000e+00> : vector<2x32xf32>
    %260 = tpu.matmul %244, %259, %cst_135 {dimension_numbers = #tpu.dot_dimension_numbers<[1], [0], [0], [1], [0, 0, 1, 1], [], []>} : vector<2x32xf32>, vector<32x32xf32>, vector<2x32xf32> -> vector<2x32xf32>
    %c1_136 = arith.constant 1 : index
    %c0_137 = arith.constant 0 : index
    %c0_138 = arith.constant 0 : index
    %261 = vector.load %arg6[%c1_136, %c0_137, %c0_138] : memref<3x1x32xf32, #tpu.memory_space<vmem>>, vector<1x1x32xf32>
    %262 = vector.shape_cast %261 : vector<1x1x32xf32> to vector<1x32xf32>
    %263 = vector.broadcast %262 : vector<1x32xf32> to vector<2x32xf32>
    %264 = arith.addf %260, %263 : vector<2x32xf32>
    %c2_139 = arith.constant 2 : index
    %c0_140 = arith.constant 0 : index
    %c0_141 = arith.constant 0 : index
    %265 = vector.load %arg5[%c2_139, %c0_140, %c0_141] : memref<3x32x32xf32, #tpu.memory_space<vmem>>, vector<1x32x32xf32>
    %266 = vector.shape_cast %265 : vector<1x32x32xf32> to vector<32x32xf32>
    %cst_142 = arith.constant dense<0.000000e+00> : vector<2x32xf32>
    %267 = tpu.matmul %244, %266, %cst_142 {dimension_numbers = #tpu.dot_dimension_numbers<[1], [0], [0], [1], [0, 0, 1, 1], [], []>} : vector<2x32xf32>, vector<32x32xf32>, vector<2x32xf32> -> vector<2x32xf32>
    %c2_143 = arith.constant 2 : index
    %c0_144 = arith.constant 0 : index
    %c0_145 = arith.constant 0 : index
    %268 = vector.load %arg6[%c2_143, %c0_144, %c0_145] : memref<3x1x32xf32, #tpu.memory_space<vmem>>, vector<1x1x32xf32>
    %269 = vector.shape_cast %268 : vector<1x1x32xf32> to vector<1x32xf32>
    %270 = vector.broadcast %269 : vector<1x32xf32> to vector<2x32xf32>
    %271 = arith.addf %267, %270 : vector<2x32xf32>
    %272 = arith.addf %248, %257 : vector<2x32xf32>
    %273 = arith.negf %272 : vector<2x32xf32>
    %274 = math.exp %273 : vector<2x32xf32>
    %cst_146 = arith.constant 1.000000e+00 : f32
    %275 = vector.broadcast %cst_146 : f32 to vector<2x32xf32>
    %276 = arith.addf %275, %274 : vector<2x32xf32>
    %277 = arith.divf %275, %276 : vector<2x32xf32>
    %278 = arith.addf %249, %264 : vector<2x32xf32>
    %279 = arith.negf %278 : vector<2x32xf32>
    %280 = math.exp %279 : vector<2x32xf32>
    %cst_147 = arith.constant 1.000000e+00 : f32
    %281 = vector.broadcast %cst_147 : f32 to vector<2x32xf32>
    %282 = arith.addf %281, %280 : vector<2x32xf32>
    %283 = arith.divf %281, %282 : vector<2x32xf32>
    %284 = arith.mulf %277, %271 : vector<2x32xf32>
    %285 = arith.addf %250, %284 : vector<2x32xf32>
    %286 = math.tanh %285 : vector<2x32xf32>
    %cst_148 = arith.constant 1.000000e+00 : f32
    %287 = vector.broadcast %cst_148 : f32 to vector<2x32xf32>
    %288 = arith.subf %287, %283 : vector<2x32xf32>
    %289 = arith.mulf %288, %286 : vector<2x32xf32>
    %290 = arith.mulf %283, %244 : vector<2x32xf32>
    %291 = arith.addf %289, %290 : vector<2x32xf32>
    %292 = vector.broadcast %247 : vector<2x1xf32> to vector<2x32xf32>
    %293 = arith.mulf %292, %291 : vector<2x32xf32>
    %cst_149 = arith.constant 1.000000e+00 : f32
    %294 = vector.broadcast %cst_149 : f32 to vector<2x1xf32>
    %295 = arith.subf %294, %247 : vector<2x1xf32>
    %296 = vector.broadcast %295 : vector<2x1xf32> to vector<2x32xf32>
    %297 = arith.mulf %296, %244 : vector<2x32xf32>
    %298 = arith.addf %293, %297 : vector<2x32xf32>
    %299 = vector.broadcast %247 : vector<2x1xf32> to vector<2x32xf32>
    %300 = arith.mulf %299, %298 : vector<2x32xf32>
    %301 = vector.extract_strided_slice %0 {offsets = [10, 0], sizes = [2, 1], strides = [1, 1]} : vector<16x1xf32> to vector<2x1xf32>
    %302 = vector.extract_strided_slice %16 {offsets = [10, 0], sizes = [2, 32], strides = [1, 1]} : vector<16x32xf32> to vector<2x32xf32>
    %303 = vector.extract_strided_slice %23 {offsets = [10, 0], sizes = [2, 32], strides = [1, 1]} : vector<16x32xf32> to vector<2x32xf32>
    %304 = vector.extract_strided_slice %30 {offsets = [10, 0], sizes = [2, 32], strides = [1, 1]} : vector<16x32xf32> to vector<2x32xf32>
    %c0_150 = arith.constant 0 : index
    %c0_151 = arith.constant 0 : index
    %c0_152 = arith.constant 0 : index
    %305 = vector.load %arg5[%c0_150, %c0_151, %c0_152] : memref<3x32x32xf32, #tpu.memory_space<vmem>>, vector<1x32x32xf32>
    %306 = vector.shape_cast %305 : vector<1x32x32xf32> to vector<32x32xf32>
    %cst_153 = arith.constant dense<0.000000e+00> : vector<2x32xf32>
    %307 = tpu.matmul %298, %306, %cst_153 {dimension_numbers = #tpu.dot_dimension_numbers<[1], [0], [0], [1], [0, 0, 1, 1], [], []>} : vector<2x32xf32>, vector<32x32xf32>, vector<2x32xf32> -> vector<2x32xf32>
    %c0_154 = arith.constant 0 : index
    %c0_155 = arith.constant 0 : index
    %c0_156 = arith.constant 0 : index
    %308 = vector.load %arg6[%c0_154, %c0_155, %c0_156] : memref<3x1x32xf32, #tpu.memory_space<vmem>>, vector<1x1x32xf32>
    %309 = vector.shape_cast %308 : vector<1x1x32xf32> to vector<1x32xf32>
    %310 = vector.broadcast %309 : vector<1x32xf32> to vector<2x32xf32>
    %311 = arith.addf %307, %310 : vector<2x32xf32>
    %c1_157 = arith.constant 1 : index
    %c0_158 = arith.constant 0 : index
    %c0_159 = arith.constant 0 : index
    %312 = vector.load %arg5[%c1_157, %c0_158, %c0_159] : memref<3x32x32xf32, #tpu.memory_space<vmem>>, vector<1x32x32xf32>
    %313 = vector.shape_cast %312 : vector<1x32x32xf32> to vector<32x32xf32>
    %cst_160 = arith.constant dense<0.000000e+00> : vector<2x32xf32>
    %314 = tpu.matmul %298, %313, %cst_160 {dimension_numbers = #tpu.dot_dimension_numbers<[1], [0], [0], [1], [0, 0, 1, 1], [], []>} : vector<2x32xf32>, vector<32x32xf32>, vector<2x32xf32> -> vector<2x32xf32>
    %c1_161 = arith.constant 1 : index
    %c0_162 = arith.constant 0 : index
    %c0_163 = arith.constant 0 : index
    %315 = vector.load %arg6[%c1_161, %c0_162, %c0_163] : memref<3x1x32xf32, #tpu.memory_space<vmem>>, vector<1x1x32xf32>
    %316 = vector.shape_cast %315 : vector<1x1x32xf32> to vector<1x32xf32>
    %317 = vector.broadcast %316 : vector<1x32xf32> to vector<2x32xf32>
    %318 = arith.addf %314, %317 : vector<2x32xf32>
    %c2_164 = arith.constant 2 : index
    %c0_165 = arith.constant 0 : index
    %c0_166 = arith.constant 0 : index
    %319 = vector.load %arg5[%c2_164, %c0_165, %c0_166] : memref<3x32x32xf32, #tpu.memory_space<vmem>>, vector<1x32x32xf32>
    %320 = vector.shape_cast %319 : vector<1x32x32xf32> to vector<32x32xf32>
    %cst_167 = arith.constant dense<0.000000e+00> : vector<2x32xf32>
    %321 = tpu.matmul %298, %320, %cst_167 {dimension_numbers = #tpu.dot_dimension_numbers<[1], [0], [0], [1], [0, 0, 1, 1], [], []>} : vector<2x32xf32>, vector<32x32xf32>, vector<2x32xf32> -> vector<2x32xf32>
    %c2_168 = arith.constant 2 : index
    %c0_169 = arith.constant 0 : index
    %c0_170 = arith.constant 0 : index
    %322 = vector.load %arg6[%c2_168, %c0_169, %c0_170] : memref<3x1x32xf32, #tpu.memory_space<vmem>>, vector<1x1x32xf32>
    %323 = vector.shape_cast %322 : vector<1x1x32xf32> to vector<1x32xf32>
    %324 = vector.broadcast %323 : vector<1x32xf32> to vector<2x32xf32>
    %325 = arith.addf %321, %324 : vector<2x32xf32>
    %326 = arith.addf %302, %311 : vector<2x32xf32>
    %327 = arith.negf %326 : vector<2x32xf32>
    %328 = math.exp %327 : vector<2x32xf32>
    %cst_171 = arith.constant 1.000000e+00 : f32
    %329 = vector.broadcast %cst_171 : f32 to vector<2x32xf32>
    %330 = arith.addf %329, %328 : vector<2x32xf32>
    %331 = arith.divf %329, %330 : vector<2x32xf32>
    %332 = arith.addf %303, %318 : vector<2x32xf32>
    %333 = arith.negf %332 : vector<2x32xf32>
    %334 = math.exp %333 : vector<2x32xf32>
    %cst_172 = arith.constant 1.000000e+00 : f32
    %335 = vector.broadcast %cst_172 : f32 to vector<2x32xf32>
    %336 = arith.addf %335, %334 : vector<2x32xf32>
    %337 = arith.divf %335, %336 : vector<2x32xf32>
    %338 = arith.mulf %331, %325 : vector<2x32xf32>
    %339 = arith.addf %304, %338 : vector<2x32xf32>
    %340 = math.tanh %339 : vector<2x32xf32>
    %cst_173 = arith.constant 1.000000e+00 : f32
    %341 = vector.broadcast %cst_173 : f32 to vector<2x32xf32>
    %342 = arith.subf %341, %337 : vector<2x32xf32>
    %343 = arith.mulf %342, %340 : vector<2x32xf32>
    %344 = arith.mulf %337, %298 : vector<2x32xf32>
    %345 = arith.addf %343, %344 : vector<2x32xf32>
    %346 = vector.broadcast %301 : vector<2x1xf32> to vector<2x32xf32>
    %347 = arith.mulf %346, %345 : vector<2x32xf32>
    %cst_174 = arith.constant 1.000000e+00 : f32
    %348 = vector.broadcast %cst_174 : f32 to vector<2x1xf32>
    %349 = arith.subf %348, %301 : vector<2x1xf32>
    %350 = vector.broadcast %349 : vector<2x1xf32> to vector<2x32xf32>
    %351 = arith.mulf %350, %298 : vector<2x32xf32>
    %352 = arith.addf %347, %351 : vector<2x32xf32>
    %353 = vector.broadcast %301 : vector<2x1xf32> to vector<2x32xf32>
    %354 = arith.mulf %353, %352 : vector<2x32xf32>
    %355 = vector.extract_strided_slice %0 {offsets = [12, 0], sizes = [2, 1], strides = [1, 1]} : vector<16x1xf32> to vector<2x1xf32>
    %356 = vector.extract_strided_slice %16 {offsets = [12, 0], sizes = [2, 32], strides = [1, 1]} : vector<16x32xf32> to vector<2x32xf32>
    %357 = vector.extract_strided_slice %23 {offsets = [12, 0], sizes = [2, 32], strides = [1, 1]} : vector<16x32xf32> to vector<2x32xf32>
    %358 = vector.extract_strided_slice %30 {offsets = [12, 0], sizes = [2, 32], strides = [1, 1]} : vector<16x32xf32> to vector<2x32xf32>
    %c0_175 = arith.constant 0 : index
    %c0_176 = arith.constant 0 : index
    %c0_177 = arith.constant 0 : index
    %359 = vector.load %arg5[%c0_175, %c0_176, %c0_177] : memref<3x32x32xf32, #tpu.memory_space<vmem>>, vector<1x32x32xf32>
    %360 = vector.shape_cast %359 : vector<1x32x32xf32> to vector<32x32xf32>
    %cst_178 = arith.constant dense<0.000000e+00> : vector<2x32xf32>
    %361 = tpu.matmul %352, %360, %cst_178 {dimension_numbers = #tpu.dot_dimension_numbers<[1], [0], [0], [1], [0, 0, 1, 1], [], []>} : vector<2x32xf32>, vector<32x32xf32>, vector<2x32xf32> -> vector<2x32xf32>
    %c0_179 = arith.constant 0 : index
    %c0_180 = arith.constant 0 : index
    %c0_181 = arith.constant 0 : index
    %362 = vector.load %arg6[%c0_179, %c0_180, %c0_181] : memref<3x1x32xf32, #tpu.memory_space<vmem>>, vector<1x1x32xf32>
    %363 = vector.shape_cast %362 : vector<1x1x32xf32> to vector<1x32xf32>
    %364 = vector.broadcast %363 : vector<1x32xf32> to vector<2x32xf32>
    %365 = arith.addf %361, %364 : vector<2x32xf32>
    %c1_182 = arith.constant 1 : index
    %c0_183 = arith.constant 0 : index
    %c0_184 = arith.constant 0 : index
    %366 = vector.load %arg5[%c1_182, %c0_183, %c0_184] : memref<3x32x32xf32, #tpu.memory_space<vmem>>, vector<1x32x32xf32>
    %367 = vector.shape_cast %366 : vector<1x32x32xf32> to vector<32x32xf32>
    %cst_185 = arith.constant dense<0.000000e+00> : vector<2x32xf32>
    %368 = tpu.matmul %352, %367, %cst_185 {dimension_numbers = #tpu.dot_dimension_numbers<[1], [0], [0], [1], [0, 0, 1, 1], [], []>} : vector<2x32xf32>, vector<32x32xf32>, vector<2x32xf32> -> vector<2x32xf32>
    %c1_186 = arith.constant 1 : index
    %c0_187 = arith.constant 0 : index
    %c0_188 = arith.constant 0 : index
    %369 = vector.load %arg6[%c1_186, %c0_187, %c0_188] : memref<3x1x32xf32, #tpu.memory_space<vmem>>, vector<1x1x32xf32>
    %370 = vector.shape_cast %369 : vector<1x1x32xf32> to vector<1x32xf32>
    %371 = vector.broadcast %370 : vector<1x32xf32> to vector<2x32xf32>
    %372 = arith.addf %368, %371 : vector<2x32xf32>
    %c2_189 = arith.constant 2 : index
    %c0_190 = arith.constant 0 : index
    %c0_191 = arith.constant 0 : index
    %373 = vector.load %arg5[%c2_189, %c0_190, %c0_191] : memref<3x32x32xf32, #tpu.memory_space<vmem>>, vector<1x32x32xf32>
    %374 = vector.shape_cast %373 : vector<1x32x32xf32> to vector<32x32xf32>
    %cst_192 = arith.constant dense<0.000000e+00> : vector<2x32xf32>
    %375 = tpu.matmul %352, %374, %cst_192 {dimension_numbers = #tpu.dot_dimension_numbers<[1], [0], [0], [1], [0, 0, 1, 1], [], []>} : vector<2x32xf32>, vector<32x32xf32>, vector<2x32xf32> -> vector<2x32xf32>
    %c2_193 = arith.constant 2 : index
    %c0_194 = arith.constant 0 : index
    %c0_195 = arith.constant 0 : index
    %376 = vector.load %arg6[%c2_193, %c0_194, %c0_195] : memref<3x1x32xf32, #tpu.memory_space<vmem>>, vector<1x1x32xf32>
    %377 = vector.shape_cast %376 : vector<1x1x32xf32> to vector<1x32xf32>
    %378 = vector.broadcast %377 : vector<1x32xf32> to vector<2x32xf32>
    %379 = arith.addf %375, %378 : vector<2x32xf32>
    %380 = arith.addf %356, %365 : vector<2x32xf32>
    %381 = arith.negf %380 : vector<2x32xf32>
    %382 = math.exp %381 : vector<2x32xf32>
    %cst_196 = arith.constant 1.000000e+00 : f32
    %383 = vector.broadcast %cst_196 : f32 to vector<2x32xf32>
    %384 = arith.addf %383, %382 : vector<2x32xf32>
    %385 = arith.divf %383, %384 : vector<2x32xf32>
    %386 = arith.addf %357, %372 : vector<2x32xf32>
    %387 = arith.negf %386 : vector<2x32xf32>
    %388 = math.exp %387 : vector<2x32xf32>
    %cst_197 = arith.constant 1.000000e+00 : f32
    %389 = vector.broadcast %cst_197 : f32 to vector<2x32xf32>
    %390 = arith.addf %389, %388 : vector<2x32xf32>
    %391 = arith.divf %389, %390 : vector<2x32xf32>
    %392 = arith.mulf %385, %379 : vector<2x32xf32>
    %393 = arith.addf %358, %392 : vector<2x32xf32>
    %394 = math.tanh %393 : vector<2x32xf32>
    %cst_198 = arith.constant 1.000000e+00 : f32
    %395 = vector.broadcast %cst_198 : f32 to vector<2x32xf32>
    %396 = arith.subf %395, %391 : vector<2x32xf32>
    %397 = arith.mulf %396, %394 : vector<2x32xf32>
    %398 = arith.mulf %391, %352 : vector<2x32xf32>
    %399 = arith.addf %397, %398 : vector<2x32xf32>
    %400 = vector.broadcast %355 : vector<2x1xf32> to vector<2x32xf32>
    %401 = arith.mulf %400, %399 : vector<2x32xf32>
    %cst_199 = arith.constant 1.000000e+00 : f32
    %402 = vector.broadcast %cst_199 : f32 to vector<2x1xf32>
    %403 = arith.subf %402, %355 : vector<2x1xf32>
    %404 = vector.broadcast %403 : vector<2x1xf32> to vector<2x32xf32>
    %405 = arith.mulf %404, %352 : vector<2x32xf32>
    %406 = arith.addf %401, %405 : vector<2x32xf32>
    %407 = vector.broadcast %355 : vector<2x1xf32> to vector<2x32xf32>
    %408 = arith.mulf %407, %406 : vector<2x32xf32>
    %409 = vector.extract_strided_slice %0 {offsets = [14, 0], sizes = [2, 1], strides = [1, 1]} : vector<16x1xf32> to vector<2x1xf32>
    %410 = vector.extract_strided_slice %16 {offsets = [14, 0], sizes = [2, 32], strides = [1, 1]} : vector<16x32xf32> to vector<2x32xf32>
    %411 = vector.extract_strided_slice %23 {offsets = [14, 0], sizes = [2, 32], strides = [1, 1]} : vector<16x32xf32> to vector<2x32xf32>
    %412 = vector.extract_strided_slice %30 {offsets = [14, 0], sizes = [2, 32], strides = [1, 1]} : vector<16x32xf32> to vector<2x32xf32>
    %c0_200 = arith.constant 0 : index
    %c0_201 = arith.constant 0 : index
    %c0_202 = arith.constant 0 : index
    %413 = vector.load %arg5[%c0_200, %c0_201, %c0_202] : memref<3x32x32xf32, #tpu.memory_space<vmem>>, vector<1x32x32xf32>
    %414 = vector.shape_cast %413 : vector<1x32x32xf32> to vector<32x32xf32>
    %cst_203 = arith.constant dense<0.000000e+00> : vector<2x32xf32>
    %415 = tpu.matmul %406, %414, %cst_203 {dimension_numbers = #tpu.dot_dimension_numbers<[1], [0], [0], [1], [0, 0, 1, 1], [], []>} : vector<2x32xf32>, vector<32x32xf32>, vector<2x32xf32> -> vector<2x32xf32>
    %c0_204 = arith.constant 0 : index
    %c0_205 = arith.constant 0 : index
    %c0_206 = arith.constant 0 : index
    %416 = vector.load %arg6[%c0_204, %c0_205, %c0_206] : memref<3x1x32xf32, #tpu.memory_space<vmem>>, vector<1x1x32xf32>
    %417 = vector.shape_cast %416 : vector<1x1x32xf32> to vector<1x32xf32>
    %418 = vector.broadcast %417 : vector<1x32xf32> to vector<2x32xf32>
    %419 = arith.addf %415, %418 : vector<2x32xf32>
    %c1_207 = arith.constant 1 : index
    %c0_208 = arith.constant 0 : index
    %c0_209 = arith.constant 0 : index
    %420 = vector.load %arg5[%c1_207, %c0_208, %c0_209] : memref<3x32x32xf32, #tpu.memory_space<vmem>>, vector<1x32x32xf32>
    %421 = vector.shape_cast %420 : vector<1x32x32xf32> to vector<32x32xf32>
    %cst_210 = arith.constant dense<0.000000e+00> : vector<2x32xf32>
    %422 = tpu.matmul %406, %421, %cst_210 {dimension_numbers = #tpu.dot_dimension_numbers<[1], [0], [0], [1], [0, 0, 1, 1], [], []>} : vector<2x32xf32>, vector<32x32xf32>, vector<2x32xf32> -> vector<2x32xf32>
    %c1_211 = arith.constant 1 : index
    %c0_212 = arith.constant 0 : index
    %c0_213 = arith.constant 0 : index
    %423 = vector.load %arg6[%c1_211, %c0_212, %c0_213] : memref<3x1x32xf32, #tpu.memory_space<vmem>>, vector<1x1x32xf32>
    %424 = vector.shape_cast %423 : vector<1x1x32xf32> to vector<1x32xf32>
    %425 = vector.broadcast %424 : vector<1x32xf32> to vector<2x32xf32>
    %426 = arith.addf %422, %425 : vector<2x32xf32>
    %c2_214 = arith.constant 2 : index
    %c0_215 = arith.constant 0 : index
    %c0_216 = arith.constant 0 : index
    %427 = vector.load %arg5[%c2_214, %c0_215, %c0_216] : memref<3x32x32xf32, #tpu.memory_space<vmem>>, vector<1x32x32xf32>
    %428 = vector.shape_cast %427 : vector<1x32x32xf32> to vector<32x32xf32>
    %cst_217 = arith.constant dense<0.000000e+00> : vector<2x32xf32>
    %429 = tpu.matmul %406, %428, %cst_217 {dimension_numbers = #tpu.dot_dimension_numbers<[1], [0], [0], [1], [0, 0, 1, 1], [], []>} : vector<2x32xf32>, vector<32x32xf32>, vector<2x32xf32> -> vector<2x32xf32>
    %c2_218 = arith.constant 2 : index
    %c0_219 = arith.constant 0 : index
    %c0_220 = arith.constant 0 : index
    %430 = vector.load %arg6[%c2_218, %c0_219, %c0_220] : memref<3x1x32xf32, #tpu.memory_space<vmem>>, vector<1x1x32xf32>
    %431 = vector.shape_cast %430 : vector<1x1x32xf32> to vector<1x32xf32>
    %432 = vector.broadcast %431 : vector<1x32xf32> to vector<2x32xf32>
    %433 = arith.addf %429, %432 : vector<2x32xf32>
    %434 = arith.addf %410, %419 : vector<2x32xf32>
    %435 = arith.negf %434 : vector<2x32xf32>
    %436 = math.exp %435 : vector<2x32xf32>
    %cst_221 = arith.constant 1.000000e+00 : f32
    %437 = vector.broadcast %cst_221 : f32 to vector<2x32xf32>
    %438 = arith.addf %437, %436 : vector<2x32xf32>
    %439 = arith.divf %437, %438 : vector<2x32xf32>
    %440 = arith.addf %411, %426 : vector<2x32xf32>
    %441 = arith.negf %440 : vector<2x32xf32>
    %442 = math.exp %441 : vector<2x32xf32>
    %cst_222 = arith.constant 1.000000e+00 : f32
    %443 = vector.broadcast %cst_222 : f32 to vector<2x32xf32>
    %444 = arith.addf %443, %442 : vector<2x32xf32>
    %445 = arith.divf %443, %444 : vector<2x32xf32>
    %446 = arith.mulf %439, %433 : vector<2x32xf32>
    %447 = arith.addf %412, %446 : vector<2x32xf32>
    %448 = math.tanh %447 : vector<2x32xf32>
    %cst_223 = arith.constant 1.000000e+00 : f32
    %449 = vector.broadcast %cst_223 : f32 to vector<2x32xf32>
    %450 = arith.subf %449, %445 : vector<2x32xf32>
    %451 = arith.mulf %450, %448 : vector<2x32xf32>
    %452 = arith.mulf %445, %406 : vector<2x32xf32>
    %453 = arith.addf %451, %452 : vector<2x32xf32>
    %454 = vector.broadcast %409 : vector<2x1xf32> to vector<2x32xf32>
    %455 = arith.mulf %454, %453 : vector<2x32xf32>
    %cst_224 = arith.constant 1.000000e+00 : f32
    %456 = vector.broadcast %cst_224 : f32 to vector<2x1xf32>
    %457 = arith.subf %456, %409 : vector<2x1xf32>
    %458 = vector.broadcast %457 : vector<2x1xf32> to vector<2x32xf32>
    %459 = arith.mulf %458, %406 : vector<2x32xf32>
    %460 = arith.addf %455, %459 : vector<2x32xf32>
    %461 = vector.broadcast %409 : vector<2x1xf32> to vector<2x32xf32>
    %462 = arith.mulf %461, %460 : vector<2x32xf32>
    %463 = tpu.concatenate %84, %138, %192, %246, %300, %354, %408, %462 in 0 : vector<2x32xf32>, vector<2x32xf32>, vector<2x32xf32>, vector<2x32xf32>, vector<2x32xf32>, vector<2x32xf32>, vector<2x32xf32>, vector<2x32xf32> -> vector<16x32xf32>
    %c0_225 = arith.constant 0 : index
    %c0_226 = arith.constant 0 : index
    %c0_227 = arith.constant 0 : index
    %464 = vector.load %arg7[%c0_225, %c0_226, %c0_227] : memref<3x32x32xf32, #tpu.memory_space<vmem>>, vector<1x32x32xf32>
    %465 = vector.shape_cast %464 : vector<1x32x32xf32> to vector<32x32xf32>
    %cst_228 = arith.constant dense<0.000000e+00> : vector<16x32xf32>
    %466 = tpu.matmul %463, %465, %cst_228 {dimension_numbers = #tpu.dot_dimension_numbers<[1], [0], [0], [1], [0, 0, 1, 1], [], []>} : vector<16x32xf32>, vector<32x32xf32>, vector<16x32xf32> -> vector<16x32xf32>
    %c0_229 = arith.constant 0 : index
    %c0_230 = arith.constant 0 : index
    %c0_231 = arith.constant 0 : index
    %467 = vector.load %arg8[%c0_229, %c0_230, %c0_231] : memref<3x1x32xf32, #tpu.memory_space<vmem>>, vector<1x1x32xf32>
    %468 = vector.shape_cast %467 : vector<1x1x32xf32> to vector<1x32xf32>
    %469 = vector.broadcast %468 : vector<1x32xf32> to vector<16x32xf32>
    %470 = arith.addf %466, %469 : vector<16x32xf32>
    %c1_232 = arith.constant 1 : index
    %c0_233 = arith.constant 0 : index
    %c0_234 = arith.constant 0 : index
    %471 = vector.load %arg7[%c1_232, %c0_233, %c0_234] : memref<3x32x32xf32, #tpu.memory_space<vmem>>, vector<1x32x32xf32>
    %472 = vector.shape_cast %471 : vector<1x32x32xf32> to vector<32x32xf32>
    %cst_235 = arith.constant dense<0.000000e+00> : vector<16x32xf32>
    %473 = tpu.matmul %463, %472, %cst_235 {dimension_numbers = #tpu.dot_dimension_numbers<[1], [0], [0], [1], [0, 0, 1, 1], [], []>} : vector<16x32xf32>, vector<32x32xf32>, vector<16x32xf32> -> vector<16x32xf32>
    %c1_236 = arith.constant 1 : index
    %c0_237 = arith.constant 0 : index
    %c0_238 = arith.constant 0 : index
    %474 = vector.load %arg8[%c1_236, %c0_237, %c0_238] : memref<3x1x32xf32, #tpu.memory_space<vmem>>, vector<1x1x32xf32>
    %475 = vector.shape_cast %474 : vector<1x1x32xf32> to vector<1x32xf32>
    %476 = vector.broadcast %475 : vector<1x32xf32> to vector<16x32xf32>
    %477 = arith.addf %473, %476 : vector<16x32xf32>
    %c2_239 = arith.constant 2 : index
    %c0_240 = arith.constant 0 : index
    %c0_241 = arith.constant 0 : index
    %478 = vector.load %arg7[%c2_239, %c0_240, %c0_241] : memref<3x32x32xf32, #tpu.memory_space<vmem>>, vector<1x32x32xf32>
    %479 = vector.shape_cast %478 : vector<1x32x32xf32> to vector<32x32xf32>
    %cst_242 = arith.constant dense<0.000000e+00> : vector<16x32xf32>
    %480 = tpu.matmul %463, %479, %cst_242 {dimension_numbers = #tpu.dot_dimension_numbers<[1], [0], [0], [1], [0, 0, 1, 1], [], []>} : vector<16x32xf32>, vector<32x32xf32>, vector<16x32xf32> -> vector<16x32xf32>
    %c2_243 = arith.constant 2 : index
    %c0_244 = arith.constant 0 : index
    %c0_245 = arith.constant 0 : index
    %481 = vector.load %arg8[%c2_243, %c0_244, %c0_245] : memref<3x1x32xf32, #tpu.memory_space<vmem>>, vector<1x1x32xf32>
    %482 = vector.shape_cast %481 : vector<1x1x32xf32> to vector<1x32xf32>
    %483 = vector.broadcast %482 : vector<1x32xf32> to vector<16x32xf32>
    %484 = arith.addf %480, %483 : vector<16x32xf32>
    %485 = vector.extract_strided_slice %0 {offsets = [0, 0], sizes = [2, 1], strides = [1, 1]} : vector<16x1xf32> to vector<2x1xf32>
    %486 = vector.extract_strided_slice %470 {offsets = [0, 0], sizes = [2, 32], strides = [1, 1]} : vector<16x32xf32> to vector<2x32xf32>
    %487 = vector.extract_strided_slice %477 {offsets = [0, 0], sizes = [2, 32], strides = [1, 1]} : vector<16x32xf32> to vector<2x32xf32>
    %488 = vector.extract_strided_slice %484 {offsets = [0, 0], sizes = [2, 32], strides = [1, 1]} : vector<16x32xf32> to vector<2x32xf32>
    %c0_246 = arith.constant 0 : index
    %c0_247 = arith.constant 0 : index
    %c0_248 = arith.constant 0 : index
    %489 = vector.load %arg9[%c0_246, %c0_247, %c0_248] : memref<3x32x32xf32, #tpu.memory_space<vmem>>, vector<1x32x32xf32>
    %490 = vector.shape_cast %489 : vector<1x32x32xf32> to vector<32x32xf32>
    %cst_249 = arith.constant dense<0.000000e+00> : vector<2x32xf32>
    %491 = tpu.matmul %9, %490, %cst_249 {dimension_numbers = #tpu.dot_dimension_numbers<[1], [0], [0], [1], [0, 0, 1, 1], [], []>} : vector<2x32xf32>, vector<32x32xf32>, vector<2x32xf32> -> vector<2x32xf32>
    %c0_250 = arith.constant 0 : index
    %c0_251 = arith.constant 0 : index
    %c0_252 = arith.constant 0 : index
    %492 = vector.load %arg10[%c0_250, %c0_251, %c0_252] : memref<3x1x32xf32, #tpu.memory_space<vmem>>, vector<1x1x32xf32>
    %493 = vector.shape_cast %492 : vector<1x1x32xf32> to vector<1x32xf32>
    %494 = vector.broadcast %493 : vector<1x32xf32> to vector<2x32xf32>
    %495 = arith.addf %491, %494 : vector<2x32xf32>
    %c1_253 = arith.constant 1 : index
    %c0_254 = arith.constant 0 : index
    %c0_255 = arith.constant 0 : index
    %496 = vector.load %arg9[%c1_253, %c0_254, %c0_255] : memref<3x32x32xf32, #tpu.memory_space<vmem>>, vector<1x32x32xf32>
    %497 = vector.shape_cast %496 : vector<1x32x32xf32> to vector<32x32xf32>
    %cst_256 = arith.constant dense<0.000000e+00> : vector<2x32xf32>
    %498 = tpu.matmul %9, %497, %cst_256 {dimension_numbers = #tpu.dot_dimension_numbers<[1], [0], [0], [1], [0, 0, 1, 1], [], []>} : vector<2x32xf32>, vector<32x32xf32>, vector<2x32xf32> -> vector<2x32xf32>
    %c1_257 = arith.constant 1 : index
    %c0_258 = arith.constant 0 : index
    %c0_259 = arith.constant 0 : index
    %499 = vector.load %arg10[%c1_257, %c0_258, %c0_259] : memref<3x1x32xf32, #tpu.memory_space<vmem>>, vector<1x1x32xf32>
    %500 = vector.shape_cast %499 : vector<1x1x32xf32> to vector<1x32xf32>
    %501 = vector.broadcast %500 : vector<1x32xf32> to vector<2x32xf32>
    %502 = arith.addf %498, %501 : vector<2x32xf32>
    %c2_260 = arith.constant 2 : index
    %c0_261 = arith.constant 0 : index
    %c0_262 = arith.constant 0 : index
    %503 = vector.load %arg9[%c2_260, %c0_261, %c0_262] : memref<3x32x32xf32, #tpu.memory_space<vmem>>, vector<1x32x32xf32>
    %504 = vector.shape_cast %503 : vector<1x32x32xf32> to vector<32x32xf32>
    %cst_263 = arith.constant dense<0.000000e+00> : vector<2x32xf32>
    %505 = tpu.matmul %9, %504, %cst_263 {dimension_numbers = #tpu.dot_dimension_numbers<[1], [0], [0], [1], [0, 0, 1, 1], [], []>} : vector<2x32xf32>, vector<32x32xf32>, vector<2x32xf32> -> vector<2x32xf32>
    %c2_264 = arith.constant 2 : index
    %c0_265 = arith.constant 0 : index
    %c0_266 = arith.constant 0 : index
    %506 = vector.load %arg10[%c2_264, %c0_265, %c0_266] : memref<3x1x32xf32, #tpu.memory_space<vmem>>, vector<1x1x32xf32>
    %507 = vector.shape_cast %506 : vector<1x1x32xf32> to vector<1x32xf32>
    %508 = vector.broadcast %507 : vector<1x32xf32> to vector<2x32xf32>
    %509 = arith.addf %505, %508 : vector<2x32xf32>
    %510 = arith.addf %486, %495 : vector<2x32xf32>
    %511 = arith.negf %510 : vector<2x32xf32>
    %512 = math.exp %511 : vector<2x32xf32>
    %cst_267 = arith.constant 1.000000e+00 : f32
    %513 = vector.broadcast %cst_267 : f32 to vector<2x32xf32>
    %514 = arith.addf %513, %512 : vector<2x32xf32>
    %515 = arith.divf %513, %514 : vector<2x32xf32>
    %516 = arith.addf %487, %502 : vector<2x32xf32>
    %517 = arith.negf %516 : vector<2x32xf32>
    %518 = math.exp %517 : vector<2x32xf32>
    %cst_268 = arith.constant 1.000000e+00 : f32
    %519 = vector.broadcast %cst_268 : f32 to vector<2x32xf32>
    %520 = arith.addf %519, %518 : vector<2x32xf32>
    %521 = arith.divf %519, %520 : vector<2x32xf32>
    %522 = arith.mulf %515, %509 : vector<2x32xf32>
    %523 = arith.addf %488, %522 : vector<2x32xf32>
    %524 = math.tanh %523 : vector<2x32xf32>
    %cst_269 = arith.constant 1.000000e+00 : f32
    %525 = vector.broadcast %cst_269 : f32 to vector<2x32xf32>
    %526 = arith.subf %525, %521 : vector<2x32xf32>
    %527 = arith.mulf %526, %524 : vector<2x32xf32>
    %528 = arith.mulf %521, %9 : vector<2x32xf32>
    %529 = arith.addf %527, %528 : vector<2x32xf32>
    %530 = vector.broadcast %485 : vector<2x1xf32> to vector<2x32xf32>
    %531 = arith.mulf %530, %529 : vector<2x32xf32>
    %cst_270 = arith.constant 1.000000e+00 : f32
    %532 = vector.broadcast %cst_270 : f32 to vector<2x1xf32>
    %533 = arith.subf %532, %485 : vector<2x1xf32>
    %534 = vector.broadcast %533 : vector<2x1xf32> to vector<2x32xf32>
    %535 = arith.mulf %534, %9 : vector<2x32xf32>
    %536 = arith.addf %531, %535 : vector<2x32xf32>
    %537 = vector.extract_strided_slice %0 {offsets = [2, 0], sizes = [2, 1], strides = [1, 1]} : vector<16x1xf32> to vector<2x1xf32>
    %538 = vector.extract_strided_slice %470 {offsets = [2, 0], sizes = [2, 32], strides = [1, 1]} : vector<16x32xf32> to vector<2x32xf32>
    %539 = vector.extract_strided_slice %477 {offsets = [2, 0], sizes = [2, 32], strides = [1, 1]} : vector<16x32xf32> to vector<2x32xf32>
    %540 = vector.extract_strided_slice %484 {offsets = [2, 0], sizes = [2, 32], strides = [1, 1]} : vector<16x32xf32> to vector<2x32xf32>
    %c0_271 = arith.constant 0 : index
    %c0_272 = arith.constant 0 : index
    %c0_273 = arith.constant 0 : index
    %541 = vector.load %arg9[%c0_271, %c0_272, %c0_273] : memref<3x32x32xf32, #tpu.memory_space<vmem>>, vector<1x32x32xf32>
    %542 = vector.shape_cast %541 : vector<1x32x32xf32> to vector<32x32xf32>
    %cst_274 = arith.constant dense<0.000000e+00> : vector<2x32xf32>
    %543 = tpu.matmul %536, %542, %cst_274 {dimension_numbers = #tpu.dot_dimension_numbers<[1], [0], [0], [1], [0, 0, 1, 1], [], []>} : vector<2x32xf32>, vector<32x32xf32>, vector<2x32xf32> -> vector<2x32xf32>
    %c0_275 = arith.constant 0 : index
    %c0_276 = arith.constant 0 : index
    %c0_277 = arith.constant 0 : index
    %544 = vector.load %arg10[%c0_275, %c0_276, %c0_277] : memref<3x1x32xf32, #tpu.memory_space<vmem>>, vector<1x1x32xf32>
    %545 = vector.shape_cast %544 : vector<1x1x32xf32> to vector<1x32xf32>
    %546 = vector.broadcast %545 : vector<1x32xf32> to vector<2x32xf32>
    %547 = arith.addf %543, %546 : vector<2x32xf32>
    %c1_278 = arith.constant 1 : index
    %c0_279 = arith.constant 0 : index
    %c0_280 = arith.constant 0 : index
    %548 = vector.load %arg9[%c1_278, %c0_279, %c0_280] : memref<3x32x32xf32, #tpu.memory_space<vmem>>, vector<1x32x32xf32>
    %549 = vector.shape_cast %548 : vector<1x32x32xf32> to vector<32x32xf32>
    %cst_281 = arith.constant dense<0.000000e+00> : vector<2x32xf32>
    %550 = tpu.matmul %536, %549, %cst_281 {dimension_numbers = #tpu.dot_dimension_numbers<[1], [0], [0], [1], [0, 0, 1, 1], [], []>} : vector<2x32xf32>, vector<32x32xf32>, vector<2x32xf32> -> vector<2x32xf32>
    %c1_282 = arith.constant 1 : index
    %c0_283 = arith.constant 0 : index
    %c0_284 = arith.constant 0 : index
    %551 = vector.load %arg10[%c1_282, %c0_283, %c0_284] : memref<3x1x32xf32, #tpu.memory_space<vmem>>, vector<1x1x32xf32>
    %552 = vector.shape_cast %551 : vector<1x1x32xf32> to vector<1x32xf32>
    %553 = vector.broadcast %552 : vector<1x32xf32> to vector<2x32xf32>
    %554 = arith.addf %550, %553 : vector<2x32xf32>
    %c2_285 = arith.constant 2 : index
    %c0_286 = arith.constant 0 : index
    %c0_287 = arith.constant 0 : index
    %555 = vector.load %arg9[%c2_285, %c0_286, %c0_287] : memref<3x32x32xf32, #tpu.memory_space<vmem>>, vector<1x32x32xf32>
    %556 = vector.shape_cast %555 : vector<1x32x32xf32> to vector<32x32xf32>
    %cst_288 = arith.constant dense<0.000000e+00> : vector<2x32xf32>
    %557 = tpu.matmul %536, %556, %cst_288 {dimension_numbers = #tpu.dot_dimension_numbers<[1], [0], [0], [1], [0, 0, 1, 1], [], []>} : vector<2x32xf32>, vector<32x32xf32>, vector<2x32xf32> -> vector<2x32xf32>
    %c2_289 = arith.constant 2 : index
    %c0_290 = arith.constant 0 : index
    %c0_291 = arith.constant 0 : index
    %558 = vector.load %arg10[%c2_289, %c0_290, %c0_291] : memref<3x1x32xf32, #tpu.memory_space<vmem>>, vector<1x1x32xf32>
    %559 = vector.shape_cast %558 : vector<1x1x32xf32> to vector<1x32xf32>
    %560 = vector.broadcast %559 : vector<1x32xf32> to vector<2x32xf32>
    %561 = arith.addf %557, %560 : vector<2x32xf32>
    %562 = arith.addf %538, %547 : vector<2x32xf32>
    %563 = arith.negf %562 : vector<2x32xf32>
    %564 = math.exp %563 : vector<2x32xf32>
    %cst_292 = arith.constant 1.000000e+00 : f32
    %565 = vector.broadcast %cst_292 : f32 to vector<2x32xf32>
    %566 = arith.addf %565, %564 : vector<2x32xf32>
    %567 = arith.divf %565, %566 : vector<2x32xf32>
    %568 = arith.addf %539, %554 : vector<2x32xf32>
    %569 = arith.negf %568 : vector<2x32xf32>
    %570 = math.exp %569 : vector<2x32xf32>
    %cst_293 = arith.constant 1.000000e+00 : f32
    %571 = vector.broadcast %cst_293 : f32 to vector<2x32xf32>
    %572 = arith.addf %571, %570 : vector<2x32xf32>
    %573 = arith.divf %571, %572 : vector<2x32xf32>
    %574 = arith.mulf %567, %561 : vector<2x32xf32>
    %575 = arith.addf %540, %574 : vector<2x32xf32>
    %576 = math.tanh %575 : vector<2x32xf32>
    %cst_294 = arith.constant 1.000000e+00 : f32
    %577 = vector.broadcast %cst_294 : f32 to vector<2x32xf32>
    %578 = arith.subf %577, %573 : vector<2x32xf32>
    %579 = arith.mulf %578, %576 : vector<2x32xf32>
    %580 = arith.mulf %573, %536 : vector<2x32xf32>
    %581 = arith.addf %579, %580 : vector<2x32xf32>
    %582 = vector.broadcast %537 : vector<2x1xf32> to vector<2x32xf32>
    %583 = arith.mulf %582, %581 : vector<2x32xf32>
    %cst_295 = arith.constant 1.000000e+00 : f32
    %584 = vector.broadcast %cst_295 : f32 to vector<2x1xf32>
    %585 = arith.subf %584, %537 : vector<2x1xf32>
    %586 = vector.broadcast %585 : vector<2x1xf32> to vector<2x32xf32>
    %587 = arith.mulf %586, %536 : vector<2x32xf32>
    %588 = arith.addf %583, %587 : vector<2x32xf32>
    %589 = vector.extract_strided_slice %0 {offsets = [4, 0], sizes = [2, 1], strides = [1, 1]} : vector<16x1xf32> to vector<2x1xf32>
    %590 = vector.extract_strided_slice %470 {offsets = [4, 0], sizes = [2, 32], strides = [1, 1]} : vector<16x32xf32> to vector<2x32xf32>
    %591 = vector.extract_strided_slice %477 {offsets = [4, 0], sizes = [2, 32], strides = [1, 1]} : vector<16x32xf32> to vector<2x32xf32>
    %592 = vector.extract_strided_slice %484 {offsets = [4, 0], sizes = [2, 32], strides = [1, 1]} : vector<16x32xf32> to vector<2x32xf32>
    %c0_296 = arith.constant 0 : index
    %c0_297 = arith.constant 0 : index
    %c0_298 = arith.constant 0 : index
    %593 = vector.load %arg9[%c0_296, %c0_297, %c0_298] : memref<3x32x32xf32, #tpu.memory_space<vmem>>, vector<1x32x32xf32>
    %594 = vector.shape_cast %593 : vector<1x32x32xf32> to vector<32x32xf32>
    %cst_299 = arith.constant dense<0.000000e+00> : vector<2x32xf32>
    %595 = tpu.matmul %588, %594, %cst_299 {dimension_numbers = #tpu.dot_dimension_numbers<[1], [0], [0], [1], [0, 0, 1, 1], [], []>} : vector<2x32xf32>, vector<32x32xf32>, vector<2x32xf32> -> vector<2x32xf32>
    %c0_300 = arith.constant 0 : index
    %c0_301 = arith.constant 0 : index
    %c0_302 = arith.constant 0 : index
    %596 = vector.load %arg10[%c0_300, %c0_301, %c0_302] : memref<3x1x32xf32, #tpu.memory_space<vmem>>, vector<1x1x32xf32>
    %597 = vector.shape_cast %596 : vector<1x1x32xf32> to vector<1x32xf32>
    %598 = vector.broadcast %597 : vector<1x32xf32> to vector<2x32xf32>
    %599 = arith.addf %595, %598 : vector<2x32xf32>
    %c1_303 = arith.constant 1 : index
    %c0_304 = arith.constant 0 : index
    %c0_305 = arith.constant 0 : index
    %600 = vector.load %arg9[%c1_303, %c0_304, %c0_305] : memref<3x32x32xf32, #tpu.memory_space<vmem>>, vector<1x32x32xf32>
    %601 = vector.shape_cast %600 : vector<1x32x32xf32> to vector<32x32xf32>
    %cst_306 = arith.constant dense<0.000000e+00> : vector<2x32xf32>
    %602 = tpu.matmul %588, %601, %cst_306 {dimension_numbers = #tpu.dot_dimension_numbers<[1], [0], [0], [1], [0, 0, 1, 1], [], []>} : vector<2x32xf32>, vector<32x32xf32>, vector<2x32xf32> -> vector<2x32xf32>
    %c1_307 = arith.constant 1 : index
    %c0_308 = arith.constant 0 : index
    %c0_309 = arith.constant 0 : index
    %603 = vector.load %arg10[%c1_307, %c0_308, %c0_309] : memref<3x1x32xf32, #tpu.memory_space<vmem>>, vector<1x1x32xf32>
    %604 = vector.shape_cast %603 : vector<1x1x32xf32> to vector<1x32xf32>
    %605 = vector.broadcast %604 : vector<1x32xf32> to vector<2x32xf32>
    %606 = arith.addf %602, %605 : vector<2x32xf32>
    %c2_310 = arith.constant 2 : index
    %c0_311 = arith.constant 0 : index
    %c0_312 = arith.constant 0 : index
    %607 = vector.load %arg9[%c2_310, %c0_311, %c0_312] : memref<3x32x32xf32, #tpu.memory_space<vmem>>, vector<1x32x32xf32>
    %608 = vector.shape_cast %607 : vector<1x32x32xf32> to vector<32x32xf32>
    %cst_313 = arith.constant dense<0.000000e+00> : vector<2x32xf32>
    %609 = tpu.matmul %588, %608, %cst_313 {dimension_numbers = #tpu.dot_dimension_numbers<[1], [0], [0], [1], [0, 0, 1, 1], [], []>} : vector<2x32xf32>, vector<32x32xf32>, vector<2x32xf32> -> vector<2x32xf32>
    %c2_314 = arith.constant 2 : index
    %c0_315 = arith.constant 0 : index
    %c0_316 = arith.constant 0 : index
    %610 = vector.load %arg10[%c2_314, %c0_315, %c0_316] : memref<3x1x32xf32, #tpu.memory_space<vmem>>, vector<1x1x32xf32>
    %611 = vector.shape_cast %610 : vector<1x1x32xf32> to vector<1x32xf32>
    %612 = vector.broadcast %611 : vector<1x32xf32> to vector<2x32xf32>
    %613 = arith.addf %609, %612 : vector<2x32xf32>
    %614 = arith.addf %590, %599 : vector<2x32xf32>
    %615 = arith.negf %614 : vector<2x32xf32>
    %616 = math.exp %615 : vector<2x32xf32>
    %cst_317 = arith.constant 1.000000e+00 : f32
    %617 = vector.broadcast %cst_317 : f32 to vector<2x32xf32>
    %618 = arith.addf %617, %616 : vector<2x32xf32>
    %619 = arith.divf %617, %618 : vector<2x32xf32>
    %620 = arith.addf %591, %606 : vector<2x32xf32>
    %621 = arith.negf %620 : vector<2x32xf32>
    %622 = math.exp %621 : vector<2x32xf32>
    %cst_318 = arith.constant 1.000000e+00 : f32
    %623 = vector.broadcast %cst_318 : f32 to vector<2x32xf32>
    %624 = arith.addf %623, %622 : vector<2x32xf32>
    %625 = arith.divf %623, %624 : vector<2x32xf32>
    %626 = arith.mulf %619, %613 : vector<2x32xf32>
    %627 = arith.addf %592, %626 : vector<2x32xf32>
    %628 = math.tanh %627 : vector<2x32xf32>
    %cst_319 = arith.constant 1.000000e+00 : f32
    %629 = vector.broadcast %cst_319 : f32 to vector<2x32xf32>
    %630 = arith.subf %629, %625 : vector<2x32xf32>
    %631 = arith.mulf %630, %628 : vector<2x32xf32>
    %632 = arith.mulf %625, %588 : vector<2x32xf32>
    %633 = arith.addf %631, %632 : vector<2x32xf32>
    %634 = vector.broadcast %589 : vector<2x1xf32> to vector<2x32xf32>
    %635 = arith.mulf %634, %633 : vector<2x32xf32>
    %cst_320 = arith.constant 1.000000e+00 : f32
    %636 = vector.broadcast %cst_320 : f32 to vector<2x1xf32>
    %637 = arith.subf %636, %589 : vector<2x1xf32>
    %638 = vector.broadcast %637 : vector<2x1xf32> to vector<2x32xf32>
    %639 = arith.mulf %638, %588 : vector<2x32xf32>
    %640 = arith.addf %635, %639 : vector<2x32xf32>
    %641 = vector.extract_strided_slice %0 {offsets = [6, 0], sizes = [2, 1], strides = [1, 1]} : vector<16x1xf32> to vector<2x1xf32>
    %642 = vector.extract_strided_slice %470 {offsets = [6, 0], sizes = [2, 32], strides = [1, 1]} : vector<16x32xf32> to vector<2x32xf32>
    %643 = vector.extract_strided_slice %477 {offsets = [6, 0], sizes = [2, 32], strides = [1, 1]} : vector<16x32xf32> to vector<2x32xf32>
    %644 = vector.extract_strided_slice %484 {offsets = [6, 0], sizes = [2, 32], strides = [1, 1]} : vector<16x32xf32> to vector<2x32xf32>
    %c0_321 = arith.constant 0 : index
    %c0_322 = arith.constant 0 : index
    %c0_323 = arith.constant 0 : index
    %645 = vector.load %arg9[%c0_321, %c0_322, %c0_323] : memref<3x32x32xf32, #tpu.memory_space<vmem>>, vector<1x32x32xf32>
    %646 = vector.shape_cast %645 : vector<1x32x32xf32> to vector<32x32xf32>
    %cst_324 = arith.constant dense<0.000000e+00> : vector<2x32xf32>
    %647 = tpu.matmul %640, %646, %cst_324 {dimension_numbers = #tpu.dot_dimension_numbers<[1], [0], [0], [1], [0, 0, 1, 1], [], []>} : vector<2x32xf32>, vector<32x32xf32>, vector<2x32xf32> -> vector<2x32xf32>
    %c0_325 = arith.constant 0 : index
    %c0_326 = arith.constant 0 : index
    %c0_327 = arith.constant 0 : index
    %648 = vector.load %arg10[%c0_325, %c0_326, %c0_327] : memref<3x1x32xf32, #tpu.memory_space<vmem>>, vector<1x1x32xf32>
    %649 = vector.shape_cast %648 : vector<1x1x32xf32> to vector<1x32xf32>
    %650 = vector.broadcast %649 : vector<1x32xf32> to vector<2x32xf32>
    %651 = arith.addf %647, %650 : vector<2x32xf32>
    %c1_328 = arith.constant 1 : index
    %c0_329 = arith.constant 0 : index
    %c0_330 = arith.constant 0 : index
    %652 = vector.load %arg9[%c1_328, %c0_329, %c0_330] : memref<3x32x32xf32, #tpu.memory_space<vmem>>, vector<1x32x32xf32>
    %653 = vector.shape_cast %652 : vector<1x32x32xf32> to vector<32x32xf32>
    %cst_331 = arith.constant dense<0.000000e+00> : vector<2x32xf32>
    %654 = tpu.matmul %640, %653, %cst_331 {dimension_numbers = #tpu.dot_dimension_numbers<[1], [0], [0], [1], [0, 0, 1, 1], [], []>} : vector<2x32xf32>, vector<32x32xf32>, vector<2x32xf32> -> vector<2x32xf32>
    %c1_332 = arith.constant 1 : index
    %c0_333 = arith.constant 0 : index
    %c0_334 = arith.constant 0 : index
    %655 = vector.load %arg10[%c1_332, %c0_333, %c0_334] : memref<3x1x32xf32, #tpu.memory_space<vmem>>, vector<1x1x32xf32>
    %656 = vector.shape_cast %655 : vector<1x1x32xf32> to vector<1x32xf32>
    %657 = vector.broadcast %656 : vector<1x32xf32> to vector<2x32xf32>
    %658 = arith.addf %654, %657 : vector<2x32xf32>
    %c2_335 = arith.constant 2 : index
    %c0_336 = arith.constant 0 : index
    %c0_337 = arith.constant 0 : index
    %659 = vector.load %arg9[%c2_335, %c0_336, %c0_337] : memref<3x32x32xf32, #tpu.memory_space<vmem>>, vector<1x32x32xf32>
    %660 = vector.shape_cast %659 : vector<1x32x32xf32> to vector<32x32xf32>
    %cst_338 = arith.constant dense<0.000000e+00> : vector<2x32xf32>
    %661 = tpu.matmul %640, %660, %cst_338 {dimension_numbers = #tpu.dot_dimension_numbers<[1], [0], [0], [1], [0, 0, 1, 1], [], []>} : vector<2x32xf32>, vector<32x32xf32>, vector<2x32xf32> -> vector<2x32xf32>
    %c2_339 = arith.constant 2 : index
    %c0_340 = arith.constant 0 : index
    %c0_341 = arith.constant 0 : index
    %662 = vector.load %arg10[%c2_339, %c0_340, %c0_341] : memref<3x1x32xf32, #tpu.memory_space<vmem>>, vector<1x1x32xf32>
    %663 = vector.shape_cast %662 : vector<1x1x32xf32> to vector<1x32xf32>
    %664 = vector.broadcast %663 : vector<1x32xf32> to vector<2x32xf32>
    %665 = arith.addf %661, %664 : vector<2x32xf32>
    %666 = arith.addf %642, %651 : vector<2x32xf32>
    %667 = arith.negf %666 : vector<2x32xf32>
    %668 = math.exp %667 : vector<2x32xf32>
    %cst_342 = arith.constant 1.000000e+00 : f32
    %669 = vector.broadcast %cst_342 : f32 to vector<2x32xf32>
    %670 = arith.addf %669, %668 : vector<2x32xf32>
    %671 = arith.divf %669, %670 : vector<2x32xf32>
    %672 = arith.addf %643, %658 : vector<2x32xf32>
    %673 = arith.negf %672 : vector<2x32xf32>
    %674 = math.exp %673 : vector<2x32xf32>
    %cst_343 = arith.constant 1.000000e+00 : f32
    %675 = vector.broadcast %cst_343 : f32 to vector<2x32xf32>
    %676 = arith.addf %675, %674 : vector<2x32xf32>
    %677 = arith.divf %675, %676 : vector<2x32xf32>
    %678 = arith.mulf %671, %665 : vector<2x32xf32>
    %679 = arith.addf %644, %678 : vector<2x32xf32>
    %680 = math.tanh %679 : vector<2x32xf32>
    %cst_344 = arith.constant 1.000000e+00 : f32
    %681 = vector.broadcast %cst_344 : f32 to vector<2x32xf32>
    %682 = arith.subf %681, %677 : vector<2x32xf32>
    %683 = arith.mulf %682, %680 : vector<2x32xf32>
    %684 = arith.mulf %677, %640 : vector<2x32xf32>
    %685 = arith.addf %683, %684 : vector<2x32xf32>
    %686 = vector.broadcast %641 : vector<2x1xf32> to vector<2x32xf32>
    %687 = arith.mulf %686, %685 : vector<2x32xf32>
    %cst_345 = arith.constant 1.000000e+00 : f32
    %688 = vector.broadcast %cst_345 : f32 to vector<2x1xf32>
    %689 = arith.subf %688, %641 : vector<2x1xf32>
    %690 = vector.broadcast %689 : vector<2x1xf32> to vector<2x32xf32>
    %691 = arith.mulf %690, %640 : vector<2x32xf32>
    %692 = arith.addf %687, %691 : vector<2x32xf32>
    %693 = vector.extract_strided_slice %0 {offsets = [8, 0], sizes = [2, 1], strides = [1, 1]} : vector<16x1xf32> to vector<2x1xf32>
    %694 = vector.extract_strided_slice %470 {offsets = [8, 0], sizes = [2, 32], strides = [1, 1]} : vector<16x32xf32> to vector<2x32xf32>
    %695 = vector.extract_strided_slice %477 {offsets = [8, 0], sizes = [2, 32], strides = [1, 1]} : vector<16x32xf32> to vector<2x32xf32>
    %696 = vector.extract_strided_slice %484 {offsets = [8, 0], sizes = [2, 32], strides = [1, 1]} : vector<16x32xf32> to vector<2x32xf32>
    %c0_346 = arith.constant 0 : index
    %c0_347 = arith.constant 0 : index
    %c0_348 = arith.constant 0 : index
    %697 = vector.load %arg9[%c0_346, %c0_347, %c0_348] : memref<3x32x32xf32, #tpu.memory_space<vmem>>, vector<1x32x32xf32>
    %698 = vector.shape_cast %697 : vector<1x32x32xf32> to vector<32x32xf32>
    %cst_349 = arith.constant dense<0.000000e+00> : vector<2x32xf32>
    %699 = tpu.matmul %692, %698, %cst_349 {dimension_numbers = #tpu.dot_dimension_numbers<[1], [0], [0], [1], [0, 0, 1, 1], [], []>} : vector<2x32xf32>, vector<32x32xf32>, vector<2x32xf32> -> vector<2x32xf32>
    %c0_350 = arith.constant 0 : index
    %c0_351 = arith.constant 0 : index
    %c0_352 = arith.constant 0 : index
    %700 = vector.load %arg10[%c0_350, %c0_351, %c0_352] : memref<3x1x32xf32, #tpu.memory_space<vmem>>, vector<1x1x32xf32>
    %701 = vector.shape_cast %700 : vector<1x1x32xf32> to vector<1x32xf32>
    %702 = vector.broadcast %701 : vector<1x32xf32> to vector<2x32xf32>
    %703 = arith.addf %699, %702 : vector<2x32xf32>
    %c1_353 = arith.constant 1 : index
    %c0_354 = arith.constant 0 : index
    %c0_355 = arith.constant 0 : index
    %704 = vector.load %arg9[%c1_353, %c0_354, %c0_355] : memref<3x32x32xf32, #tpu.memory_space<vmem>>, vector<1x32x32xf32>
    %705 = vector.shape_cast %704 : vector<1x32x32xf32> to vector<32x32xf32>
    %cst_356 = arith.constant dense<0.000000e+00> : vector<2x32xf32>
    %706 = tpu.matmul %692, %705, %cst_356 {dimension_numbers = #tpu.dot_dimension_numbers<[1], [0], [0], [1], [0, 0, 1, 1], [], []>} : vector<2x32xf32>, vector<32x32xf32>, vector<2x32xf32> -> vector<2x32xf32>
    %c1_357 = arith.constant 1 : index
    %c0_358 = arith.constant 0 : index
    %c0_359 = arith.constant 0 : index
    %707 = vector.load %arg10[%c1_357, %c0_358, %c0_359] : memref<3x1x32xf32, #tpu.memory_space<vmem>>, vector<1x1x32xf32>
    %708 = vector.shape_cast %707 : vector<1x1x32xf32> to vector<1x32xf32>
    %709 = vector.broadcast %708 : vector<1x32xf32> to vector<2x32xf32>
    %710 = arith.addf %706, %709 : vector<2x32xf32>
    %c2_360 = arith.constant 2 : index
    %c0_361 = arith.constant 0 : index
    %c0_362 = arith.constant 0 : index
    %711 = vector.load %arg9[%c2_360, %c0_361, %c0_362] : memref<3x32x32xf32, #tpu.memory_space<vmem>>, vector<1x32x32xf32>
    %712 = vector.shape_cast %711 : vector<1x32x32xf32> to vector<32x32xf32>
    %cst_363 = arith.constant dense<0.000000e+00> : vector<2x32xf32>
    %713 = tpu.matmul %692, %712, %cst_363 {dimension_numbers = #tpu.dot_dimension_numbers<[1], [0], [0], [1], [0, 0, 1, 1], [], []>} : vector<2x32xf32>, vector<32x32xf32>, vector<2x32xf32> -> vector<2x32xf32>
    %c2_364 = arith.constant 2 : index
    %c0_365 = arith.constant 0 : index
    %c0_366 = arith.constant 0 : index
    %714 = vector.load %arg10[%c2_364, %c0_365, %c0_366] : memref<3x1x32xf32, #tpu.memory_space<vmem>>, vector<1x1x32xf32>
    %715 = vector.shape_cast %714 : vector<1x1x32xf32> to vector<1x32xf32>
    %716 = vector.broadcast %715 : vector<1x32xf32> to vector<2x32xf32>
    %717 = arith.addf %713, %716 : vector<2x32xf32>
    %718 = arith.addf %694, %703 : vector<2x32xf32>
    %719 = arith.negf %718 : vector<2x32xf32>
    %720 = math.exp %719 : vector<2x32xf32>
    %cst_367 = arith.constant 1.000000e+00 : f32
    %721 = vector.broadcast %cst_367 : f32 to vector<2x32xf32>
    %722 = arith.addf %721, %720 : vector<2x32xf32>
    %723 = arith.divf %721, %722 : vector<2x32xf32>
    %724 = arith.addf %695, %710 : vector<2x32xf32>
    %725 = arith.negf %724 : vector<2x32xf32>
    %726 = math.exp %725 : vector<2x32xf32>
    %cst_368 = arith.constant 1.000000e+00 : f32
    %727 = vector.broadcast %cst_368 : f32 to vector<2x32xf32>
    %728 = arith.addf %727, %726 : vector<2x32xf32>
    %729 = arith.divf %727, %728 : vector<2x32xf32>
    %730 = arith.mulf %723, %717 : vector<2x32xf32>
    %731 = arith.addf %696, %730 : vector<2x32xf32>
    %732 = math.tanh %731 : vector<2x32xf32>
    %cst_369 = arith.constant 1.000000e+00 : f32
    %733 = vector.broadcast %cst_369 : f32 to vector<2x32xf32>
    %734 = arith.subf %733, %729 : vector<2x32xf32>
    %735 = arith.mulf %734, %732 : vector<2x32xf32>
    %736 = arith.mulf %729, %692 : vector<2x32xf32>
    %737 = arith.addf %735, %736 : vector<2x32xf32>
    %738 = vector.broadcast %693 : vector<2x1xf32> to vector<2x32xf32>
    %739 = arith.mulf %738, %737 : vector<2x32xf32>
    %cst_370 = arith.constant 1.000000e+00 : f32
    %740 = vector.broadcast %cst_370 : f32 to vector<2x1xf32>
    %741 = arith.subf %740, %693 : vector<2x1xf32>
    %742 = vector.broadcast %741 : vector<2x1xf32> to vector<2x32xf32>
    %743 = arith.mulf %742, %692 : vector<2x32xf32>
    %744 = arith.addf %739, %743 : vector<2x32xf32>
    %745 = vector.extract_strided_slice %0 {offsets = [10, 0], sizes = [2, 1], strides = [1, 1]} : vector<16x1xf32> to vector<2x1xf32>
    %746 = vector.extract_strided_slice %470 {offsets = [10, 0], sizes = [2, 32], strides = [1, 1]} : vector<16x32xf32> to vector<2x32xf32>
    %747 = vector.extract_strided_slice %477 {offsets = [10, 0], sizes = [2, 32], strides = [1, 1]} : vector<16x32xf32> to vector<2x32xf32>
    %748 = vector.extract_strided_slice %484 {offsets = [10, 0], sizes = [2, 32], strides = [1, 1]} : vector<16x32xf32> to vector<2x32xf32>
    %c0_371 = arith.constant 0 : index
    %c0_372 = arith.constant 0 : index
    %c0_373 = arith.constant 0 : index
    %749 = vector.load %arg9[%c0_371, %c0_372, %c0_373] : memref<3x32x32xf32, #tpu.memory_space<vmem>>, vector<1x32x32xf32>
    %750 = vector.shape_cast %749 : vector<1x32x32xf32> to vector<32x32xf32>
    %cst_374 = arith.constant dense<0.000000e+00> : vector<2x32xf32>
    %751 = tpu.matmul %744, %750, %cst_374 {dimension_numbers = #tpu.dot_dimension_numbers<[1], [0], [0], [1], [0, 0, 1, 1], [], []>} : vector<2x32xf32>, vector<32x32xf32>, vector<2x32xf32> -> vector<2x32xf32>
    %c0_375 = arith.constant 0 : index
    %c0_376 = arith.constant 0 : index
    %c0_377 = arith.constant 0 : index
    %752 = vector.load %arg10[%c0_375, %c0_376, %c0_377] : memref<3x1x32xf32, #tpu.memory_space<vmem>>, vector<1x1x32xf32>
    %753 = vector.shape_cast %752 : vector<1x1x32xf32> to vector<1x32xf32>
    %754 = vector.broadcast %753 : vector<1x32xf32> to vector<2x32xf32>
    %755 = arith.addf %751, %754 : vector<2x32xf32>
    %c1_378 = arith.constant 1 : index
    %c0_379 = arith.constant 0 : index
    %c0_380 = arith.constant 0 : index
    %756 = vector.load %arg9[%c1_378, %c0_379, %c0_380] : memref<3x32x32xf32, #tpu.memory_space<vmem>>, vector<1x32x32xf32>
    %757 = vector.shape_cast %756 : vector<1x32x32xf32> to vector<32x32xf32>
    %cst_381 = arith.constant dense<0.000000e+00> : vector<2x32xf32>
    %758 = tpu.matmul %744, %757, %cst_381 {dimension_numbers = #tpu.dot_dimension_numbers<[1], [0], [0], [1], [0, 0, 1, 1], [], []>} : vector<2x32xf32>, vector<32x32xf32>, vector<2x32xf32> -> vector<2x32xf32>
    %c1_382 = arith.constant 1 : index
    %c0_383 = arith.constant 0 : index
    %c0_384 = arith.constant 0 : index
    %759 = vector.load %arg10[%c1_382, %c0_383, %c0_384] : memref<3x1x32xf32, #tpu.memory_space<vmem>>, vector<1x1x32xf32>
    %760 = vector.shape_cast %759 : vector<1x1x32xf32> to vector<1x32xf32>
    %761 = vector.broadcast %760 : vector<1x32xf32> to vector<2x32xf32>
    %762 = arith.addf %758, %761 : vector<2x32xf32>
    %c2_385 = arith.constant 2 : index
    %c0_386 = arith.constant 0 : index
    %c0_387 = arith.constant 0 : index
    %763 = vector.load %arg9[%c2_385, %c0_386, %c0_387] : memref<3x32x32xf32, #tpu.memory_space<vmem>>, vector<1x32x32xf32>
    %764 = vector.shape_cast %763 : vector<1x32x32xf32> to vector<32x32xf32>
    %cst_388 = arith.constant dense<0.000000e+00> : vector<2x32xf32>
    %765 = tpu.matmul %744, %764, %cst_388 {dimension_numbers = #tpu.dot_dimension_numbers<[1], [0], [0], [1], [0, 0, 1, 1], [], []>} : vector<2x32xf32>, vector<32x32xf32>, vector<2x32xf32> -> vector<2x32xf32>
    %c2_389 = arith.constant 2 : index
    %c0_390 = arith.constant 0 : index
    %c0_391 = arith.constant 0 : index
    %766 = vector.load %arg10[%c2_389, %c0_390, %c0_391] : memref<3x1x32xf32, #tpu.memory_space<vmem>>, vector<1x1x32xf32>
    %767 = vector.shape_cast %766 : vector<1x1x32xf32> to vector<1x32xf32>
    %768 = vector.broadcast %767 : vector<1x32xf32> to vector<2x32xf32>
    %769 = arith.addf %765, %768 : vector<2x32xf32>
    %770 = arith.addf %746, %755 : vector<2x32xf32>
    %771 = arith.negf %770 : vector<2x32xf32>
    %772 = math.exp %771 : vector<2x32xf32>
    %cst_392 = arith.constant 1.000000e+00 : f32
    %773 = vector.broadcast %cst_392 : f32 to vector<2x32xf32>
    %774 = arith.addf %773, %772 : vector<2x32xf32>
    %775 = arith.divf %773, %774 : vector<2x32xf32>
    %776 = arith.addf %747, %762 : vector<2x32xf32>
    %777 = arith.negf %776 : vector<2x32xf32>
    %778 = math.exp %777 : vector<2x32xf32>
    %cst_393 = arith.constant 1.000000e+00 : f32
    %779 = vector.broadcast %cst_393 : f32 to vector<2x32xf32>
    %780 = arith.addf %779, %778 : vector<2x32xf32>
    %781 = arith.divf %779, %780 : vector<2x32xf32>
    %782 = arith.mulf %775, %769 : vector<2x32xf32>
    %783 = arith.addf %748, %782 : vector<2x32xf32>
    %784 = math.tanh %783 : vector<2x32xf32>
    %cst_394 = arith.constant 1.000000e+00 : f32
    %785 = vector.broadcast %cst_394 : f32 to vector<2x32xf32>
    %786 = arith.subf %785, %781 : vector<2x32xf32>
    %787 = arith.mulf %786, %784 : vector<2x32xf32>
    %788 = arith.mulf %781, %744 : vector<2x32xf32>
    %789 = arith.addf %787, %788 : vector<2x32xf32>
    %790 = vector.broadcast %745 : vector<2x1xf32> to vector<2x32xf32>
    %791 = arith.mulf %790, %789 : vector<2x32xf32>
    %cst_395 = arith.constant 1.000000e+00 : f32
    %792 = vector.broadcast %cst_395 : f32 to vector<2x1xf32>
    %793 = arith.subf %792, %745 : vector<2x1xf32>
    %794 = vector.broadcast %793 : vector<2x1xf32> to vector<2x32xf32>
    %795 = arith.mulf %794, %744 : vector<2x32xf32>
    %796 = arith.addf %791, %795 : vector<2x32xf32>
    %797 = vector.extract_strided_slice %0 {offsets = [12, 0], sizes = [2, 1], strides = [1, 1]} : vector<16x1xf32> to vector<2x1xf32>
    %798 = vector.extract_strided_slice %470 {offsets = [12, 0], sizes = [2, 32], strides = [1, 1]} : vector<16x32xf32> to vector<2x32xf32>
    %799 = vector.extract_strided_slice %477 {offsets = [12, 0], sizes = [2, 32], strides = [1, 1]} : vector<16x32xf32> to vector<2x32xf32>
    %800 = vector.extract_strided_slice %484 {offsets = [12, 0], sizes = [2, 32], strides = [1, 1]} : vector<16x32xf32> to vector<2x32xf32>
    %c0_396 = arith.constant 0 : index
    %c0_397 = arith.constant 0 : index
    %c0_398 = arith.constant 0 : index
    %801 = vector.load %arg9[%c0_396, %c0_397, %c0_398] : memref<3x32x32xf32, #tpu.memory_space<vmem>>, vector<1x32x32xf32>
    %802 = vector.shape_cast %801 : vector<1x32x32xf32> to vector<32x32xf32>
    %cst_399 = arith.constant dense<0.000000e+00> : vector<2x32xf32>
    %803 = tpu.matmul %796, %802, %cst_399 {dimension_numbers = #tpu.dot_dimension_numbers<[1], [0], [0], [1], [0, 0, 1, 1], [], []>} : vector<2x32xf32>, vector<32x32xf32>, vector<2x32xf32> -> vector<2x32xf32>
    %c0_400 = arith.constant 0 : index
    %c0_401 = arith.constant 0 : index
    %c0_402 = arith.constant 0 : index
    %804 = vector.load %arg10[%c0_400, %c0_401, %c0_402] : memref<3x1x32xf32, #tpu.memory_space<vmem>>, vector<1x1x32xf32>
    %805 = vector.shape_cast %804 : vector<1x1x32xf32> to vector<1x32xf32>
    %806 = vector.broadcast %805 : vector<1x32xf32> to vector<2x32xf32>
    %807 = arith.addf %803, %806 : vector<2x32xf32>
    %c1_403 = arith.constant 1 : index
    %c0_404 = arith.constant 0 : index
    %c0_405 = arith.constant 0 : index
    %808 = vector.load %arg9[%c1_403, %c0_404, %c0_405] : memref<3x32x32xf32, #tpu.memory_space<vmem>>, vector<1x32x32xf32>
    %809 = vector.shape_cast %808 : vector<1x32x32xf32> to vector<32x32xf32>
    %cst_406 = arith.constant dense<0.000000e+00> : vector<2x32xf32>
    %810 = tpu.matmul %796, %809, %cst_406 {dimension_numbers = #tpu.dot_dimension_numbers<[1], [0], [0], [1], [0, 0, 1, 1], [], []>} : vector<2x32xf32>, vector<32x32xf32>, vector<2x32xf32> -> vector<2x32xf32>
    %c1_407 = arith.constant 1 : index
    %c0_408 = arith.constant 0 : index
    %c0_409 = arith.constant 0 : index
    %811 = vector.load %arg10[%c1_407, %c0_408, %c0_409] : memref<3x1x32xf32, #tpu.memory_space<vmem>>, vector<1x1x32xf32>
    %812 = vector.shape_cast %811 : vector<1x1x32xf32> to vector<1x32xf32>
    %813 = vector.broadcast %812 : vector<1x32xf32> to vector<2x32xf32>
    %814 = arith.addf %810, %813 : vector<2x32xf32>
    %c2_410 = arith.constant 2 : index
    %c0_411 = arith.constant 0 : index
    %c0_412 = arith.constant 0 : index
    %815 = vector.load %arg9[%c2_410, %c0_411, %c0_412] : memref<3x32x32xf32, #tpu.memory_space<vmem>>, vector<1x32x32xf32>
    %816 = vector.shape_cast %815 : vector<1x32x32xf32> to vector<32x32xf32>
    %cst_413 = arith.constant dense<0.000000e+00> : vector<2x32xf32>
    %817 = tpu.matmul %796, %816, %cst_413 {dimension_numbers = #tpu.dot_dimension_numbers<[1], [0], [0], [1], [0, 0, 1, 1], [], []>} : vector<2x32xf32>, vector<32x32xf32>, vector<2x32xf32> -> vector<2x32xf32>
    %c2_414 = arith.constant 2 : index
    %c0_415 = arith.constant 0 : index
    %c0_416 = arith.constant 0 : index
    %818 = vector.load %arg10[%c2_414, %c0_415, %c0_416] : memref<3x1x32xf32, #tpu.memory_space<vmem>>, vector<1x1x32xf32>
    %819 = vector.shape_cast %818 : vector<1x1x32xf32> to vector<1x32xf32>
    %820 = vector.broadcast %819 : vector<1x32xf32> to vector<2x32xf32>
    %821 = arith.addf %817, %820 : vector<2x32xf32>
    %822 = arith.addf %798, %807 : vector<2x32xf32>
    %823 = arith.negf %822 : vector<2x32xf32>
    %824 = math.exp %823 : vector<2x32xf32>
    %cst_417 = arith.constant 1.000000e+00 : f32
    %825 = vector.broadcast %cst_417 : f32 to vector<2x32xf32>
    %826 = arith.addf %825, %824 : vector<2x32xf32>
    %827 = arith.divf %825, %826 : vector<2x32xf32>
    %828 = arith.addf %799, %814 : vector<2x32xf32>
    %829 = arith.negf %828 : vector<2x32xf32>
    %830 = math.exp %829 : vector<2x32xf32>
    %cst_418 = arith.constant 1.000000e+00 : f32
    %831 = vector.broadcast %cst_418 : f32 to vector<2x32xf32>
    %832 = arith.addf %831, %830 : vector<2x32xf32>
    %833 = arith.divf %831, %832 : vector<2x32xf32>
    %834 = arith.mulf %827, %821 : vector<2x32xf32>
    %835 = arith.addf %800, %834 : vector<2x32xf32>
    %836 = math.tanh %835 : vector<2x32xf32>
    %cst_419 = arith.constant 1.000000e+00 : f32
    %837 = vector.broadcast %cst_419 : f32 to vector<2x32xf32>
    %838 = arith.subf %837, %833 : vector<2x32xf32>
    %839 = arith.mulf %838, %836 : vector<2x32xf32>
    %840 = arith.mulf %833, %796 : vector<2x32xf32>
    %841 = arith.addf %839, %840 : vector<2x32xf32>
    %842 = vector.broadcast %797 : vector<2x1xf32> to vector<2x32xf32>
    %843 = arith.mulf %842, %841 : vector<2x32xf32>
    %cst_420 = arith.constant 1.000000e+00 : f32
    %844 = vector.broadcast %cst_420 : f32 to vector<2x1xf32>
    %845 = arith.subf %844, %797 : vector<2x1xf32>
    %846 = vector.broadcast %845 : vector<2x1xf32> to vector<2x32xf32>
    %847 = arith.mulf %846, %796 : vector<2x32xf32>
    %848 = arith.addf %843, %847 : vector<2x32xf32>
    %849 = vector.extract_strided_slice %0 {offsets = [14, 0], sizes = [2, 1], strides = [1, 1]} : vector<16x1xf32> to vector<2x1xf32>
    %850 = vector.extract_strided_slice %470 {offsets = [14, 0], sizes = [2, 32], strides = [1, 1]} : vector<16x32xf32> to vector<2x32xf32>
    %851 = vector.extract_strided_slice %477 {offsets = [14, 0], sizes = [2, 32], strides = [1, 1]} : vector<16x32xf32> to vector<2x32xf32>
    %852 = vector.extract_strided_slice %484 {offsets = [14, 0], sizes = [2, 32], strides = [1, 1]} : vector<16x32xf32> to vector<2x32xf32>
    %c0_421 = arith.constant 0 : index
    %c0_422 = arith.constant 0 : index
    %c0_423 = arith.constant 0 : index
    %853 = vector.load %arg9[%c0_421, %c0_422, %c0_423] : memref<3x32x32xf32, #tpu.memory_space<vmem>>, vector<1x32x32xf32>
    %854 = vector.shape_cast %853 : vector<1x32x32xf32> to vector<32x32xf32>
    %cst_424 = arith.constant dense<0.000000e+00> : vector<2x32xf32>
    %855 = tpu.matmul %848, %854, %cst_424 {dimension_numbers = #tpu.dot_dimension_numbers<[1], [0], [0], [1], [0, 0, 1, 1], [], []>} : vector<2x32xf32>, vector<32x32xf32>, vector<2x32xf32> -> vector<2x32xf32>
    %c0_425 = arith.constant 0 : index
    %c0_426 = arith.constant 0 : index
    %c0_427 = arith.constant 0 : index
    %856 = vector.load %arg10[%c0_425, %c0_426, %c0_427] : memref<3x1x32xf32, #tpu.memory_space<vmem>>, vector<1x1x32xf32>
    %857 = vector.shape_cast %856 : vector<1x1x32xf32> to vector<1x32xf32>
    %858 = vector.broadcast %857 : vector<1x32xf32> to vector<2x32xf32>
    %859 = arith.addf %855, %858 : vector<2x32xf32>
    %c1_428 = arith.constant 1 : index
    %c0_429 = arith.constant 0 : index
    %c0_430 = arith.constant 0 : index
    %860 = vector.load %arg9[%c1_428, %c0_429, %c0_430] : memref<3x32x32xf32, #tpu.memory_space<vmem>>, vector<1x32x32xf32>
    %861 = vector.shape_cast %860 : vector<1x32x32xf32> to vector<32x32xf32>
    %cst_431 = arith.constant dense<0.000000e+00> : vector<2x32xf32>
    %862 = tpu.matmul %848, %861, %cst_431 {dimension_numbers = #tpu.dot_dimension_numbers<[1], [0], [0], [1], [0, 0, 1, 1], [], []>} : vector<2x32xf32>, vector<32x32xf32>, vector<2x32xf32> -> vector<2x32xf32>
    %c1_432 = arith.constant 1 : index
    %c0_433 = arith.constant 0 : index
    %c0_434 = arith.constant 0 : index
    %863 = vector.load %arg10[%c1_432, %c0_433, %c0_434] : memref<3x1x32xf32, #tpu.memory_space<vmem>>, vector<1x1x32xf32>
    %864 = vector.shape_cast %863 : vector<1x1x32xf32> to vector<1x32xf32>
    %865 = vector.broadcast %864 : vector<1x32xf32> to vector<2x32xf32>
    %866 = arith.addf %862, %865 : vector<2x32xf32>
    %c2_435 = arith.constant 2 : index
    %c0_436 = arith.constant 0 : index
    %c0_437 = arith.constant 0 : index
    %867 = vector.load %arg9[%c2_435, %c0_436, %c0_437] : memref<3x32x32xf32, #tpu.memory_space<vmem>>, vector<1x32x32xf32>
    %868 = vector.shape_cast %867 : vector<1x32x32xf32> to vector<32x32xf32>
    %cst_438 = arith.constant dense<0.000000e+00> : vector<2x32xf32>
    %869 = tpu.matmul %848, %868, %cst_438 {dimension_numbers = #tpu.dot_dimension_numbers<[1], [0], [0], [1], [0, 0, 1, 1], [], []>} : vector<2x32xf32>, vector<32x32xf32>, vector<2x32xf32> -> vector<2x32xf32>
    %c2_439 = arith.constant 2 : index
    %c0_440 = arith.constant 0 : index
    %c0_441 = arith.constant 0 : index
    %870 = vector.load %arg10[%c2_439, %c0_440, %c0_441] : memref<3x1x32xf32, #tpu.memory_space<vmem>>, vector<1x1x32xf32>
    %871 = vector.shape_cast %870 : vector<1x1x32xf32> to vector<1x32xf32>
    %872 = vector.broadcast %871 : vector<1x32xf32> to vector<2x32xf32>
    %873 = arith.addf %869, %872 : vector<2x32xf32>
    %874 = arith.addf %850, %859 : vector<2x32xf32>
    %875 = arith.negf %874 : vector<2x32xf32>
    %876 = math.exp %875 : vector<2x32xf32>
    %cst_442 = arith.constant 1.000000e+00 : f32
    %877 = vector.broadcast %cst_442 : f32 to vector<2x32xf32>
    %878 = arith.addf %877, %876 : vector<2x32xf32>
    %879 = arith.divf %877, %878 : vector<2x32xf32>
    %880 = arith.addf %851, %866 : vector<2x32xf32>
    %881 = arith.negf %880 : vector<2x32xf32>
    %882 = math.exp %881 : vector<2x32xf32>
    %cst_443 = arith.constant 1.000000e+00 : f32
    %883 = vector.broadcast %cst_443 : f32 to vector<2x32xf32>
    %884 = arith.addf %883, %882 : vector<2x32xf32>
    %885 = arith.divf %883, %884 : vector<2x32xf32>
    %886 = arith.mulf %879, %873 : vector<2x32xf32>
    %887 = arith.addf %852, %886 : vector<2x32xf32>
    %888 = math.tanh %887 : vector<2x32xf32>
    %cst_444 = arith.constant 1.000000e+00 : f32
    %889 = vector.broadcast %cst_444 : f32 to vector<2x32xf32>
    %890 = arith.subf %889, %885 : vector<2x32xf32>
    %891 = arith.mulf %890, %888 : vector<2x32xf32>
    %892 = arith.mulf %885, %848 : vector<2x32xf32>
    %893 = arith.addf %891, %892 : vector<2x32xf32>
    %894 = vector.broadcast %849 : vector<2x1xf32> to vector<2x32xf32>
    %895 = arith.mulf %894, %893 : vector<2x32xf32>
    %cst_445 = arith.constant 1.000000e+00 : f32
    %896 = vector.broadcast %cst_445 : f32 to vector<2x1xf32>
    %897 = arith.subf %896, %849 : vector<2x1xf32>
    %898 = vector.broadcast %897 : vector<2x1xf32> to vector<2x32xf32>
    %899 = arith.mulf %898, %848 : vector<2x32xf32>
    %900 = arith.addf %895, %899 : vector<2x32xf32>
    %901 = tpu.concatenate %460, %900 in 0 : vector<2x32xf32>, vector<2x32xf32> -> vector<4x32xf32>
    %c0_446 = arith.constant 0 : index
    %c0_447 = arith.constant 0 : index
    %c0_448 = arith.constant 0 : index
    %902 = vector.load %arg19[%c0_446, %c0_447, %c0_448] : memref<2x32x16xf32, #tpu.memory_space<vmem>>, vector<1x32x16xf32>
    %903 = vector.shape_cast %902 : vector<1x32x16xf32> to vector<32x16xf32>
    %cst_449 = arith.constant dense<0.000000e+00> : vector<4x16xf32>
    %904 = tpu.matmul %901, %903, %cst_449 {dimension_numbers = #tpu.dot_dimension_numbers<[1], [0], [0], [1], [0, 0, 1, 1], [], []>} : vector<4x32xf32>, vector<32x16xf32>, vector<4x16xf32> -> vector<4x16xf32>
    %c1_450 = arith.constant 1 : index
    %c0_451 = arith.constant 0 : index
    %c0_452 = arith.constant 0 : index
    %905 = vector.load %arg19[%c1_450, %c0_451, %c0_452] : memref<2x32x16xf32, #tpu.memory_space<vmem>>, vector<1x32x16xf32>
    %906 = vector.shape_cast %905 : vector<1x32x16xf32> to vector<32x16xf32>
    %cst_453 = arith.constant dense<0.000000e+00> : vector<4x16xf32>
    %907 = tpu.matmul %901, %906, %cst_453 {dimension_numbers = #tpu.dot_dimension_numbers<[1], [0], [0], [1], [0, 0, 1, 1], [], []>} : vector<4x32xf32>, vector<32x16xf32>, vector<4x16xf32> -> vector<4x16xf32>
    %908 = vector.extract_strided_slice %904 {offsets = [0, 0], sizes = [1, 16], strides = [1, 1]} : vector<4x16xf32> to vector<1x16xf32>
    %909 = vector.extract_strided_slice %907 {offsets = [1, 0], sizes = [1, 16], strides = [1, 1]} : vector<4x16xf32> to vector<1x16xf32>
    %910 = arith.addf %908, %909 : vector<1x16xf32>
    %911 = vector.extract_strided_slice %904 {offsets = [2, 0], sizes = [1, 16], strides = [1, 1]} : vector<4x16xf32> to vector<1x16xf32>
    %912 = vector.extract_strided_slice %907 {offsets = [3, 0], sizes = [1, 16], strides = [1, 1]} : vector<4x16xf32> to vector<1x16xf32>
    %913 = arith.addf %911, %912 : vector<1x16xf32>
    %914 = tpu.concatenate %910, %913 in 0 : vector<1x16xf32>, vector<1x16xf32> -> vector<2x16xf32>
    %c0_454 = arith.constant 0 : index
    %c0_455 = arith.constant 0 : index
    %915 = vector.load %arg20[%c0_454, %c0_455] : memref<1x16xf32, #tpu.memory_space<vmem>>, vector<1x16xf32>
    %916 = vector.broadcast %915 : vector<1x16xf32> to vector<2x16xf32>
    %917 = arith.addf %914, %916 : vector<2x16xf32>
    %c0_456 = arith.constant 0 : index
    %c0_457 = arith.constant 0 : index
    %c0_458 = arith.constant 0 : index
    %918 = vector.load %arg21[%c0_456, %c0_457, %c0_458] : memref<2x32x16xf32, #tpu.memory_space<vmem>>, vector<1x32x16xf32>
    %919 = vector.shape_cast %918 : vector<1x32x16xf32> to vector<32x16xf32>
    %cst_459 = arith.constant dense<0.000000e+00> : vector<4x16xf32>
    %920 = tpu.matmul %901, %919, %cst_459 {dimension_numbers = #tpu.dot_dimension_numbers<[1], [0], [0], [1], [0, 0, 1, 1], [], []>} : vector<4x32xf32>, vector<32x16xf32>, vector<4x16xf32> -> vector<4x16xf32>
    %c1_460 = arith.constant 1 : index
    %c0_461 = arith.constant 0 : index
    %c0_462 = arith.constant 0 : index
    %921 = vector.load %arg21[%c1_460, %c0_461, %c0_462] : memref<2x32x16xf32, #tpu.memory_space<vmem>>, vector<1x32x16xf32>
    %922 = vector.shape_cast %921 : vector<1x32x16xf32> to vector<32x16xf32>
    %cst_463 = arith.constant dense<0.000000e+00> : vector<4x16xf32>
    %923 = tpu.matmul %901, %922, %cst_463 {dimension_numbers = #tpu.dot_dimension_numbers<[1], [0], [0], [1], [0, 0, 1, 1], [], []>} : vector<4x32xf32>, vector<32x16xf32>, vector<4x16xf32> -> vector<4x16xf32>
    %924 = vector.extract_strided_slice %920 {offsets = [0, 0], sizes = [1, 16], strides = [1, 1]} : vector<4x16xf32> to vector<1x16xf32>
    %925 = vector.extract_strided_slice %923 {offsets = [1, 0], sizes = [1, 16], strides = [1, 1]} : vector<4x16xf32> to vector<1x16xf32>
    %926 = arith.addf %924, %925 : vector<1x16xf32>
    %927 = vector.extract_strided_slice %920 {offsets = [2, 0], sizes = [1, 16], strides = [1, 1]} : vector<4x16xf32> to vector<1x16xf32>
    %928 = vector.extract_strided_slice %923 {offsets = [3, 0], sizes = [1, 16], strides = [1, 1]} : vector<4x16xf32> to vector<1x16xf32>
    %929 = arith.addf %927, %928 : vector<1x16xf32>
    %930 = tpu.concatenate %926, %929 in 0 : vector<1x16xf32>, vector<1x16xf32> -> vector<2x16xf32>
    %c0_464 = arith.constant 0 : index
    %c0_465 = arith.constant 0 : index
    %931 = vector.load %arg22[%c0_464, %c0_465] : memref<1x16xf32, #tpu.memory_space<vmem>>, vector<1x16xf32>
    %932 = vector.broadcast %931 : vector<1x16xf32> to vector<2x16xf32>
    %933 = arith.addf %930, %932 : vector<2x16xf32>
    %cst_466 = arith.constant 5.000000e-01 : f32
    %934 = vector.broadcast %cst_466 : f32 to vector<2x16xf32>
    %935 = arith.mulf %934, %933 : vector<2x16xf32>
    %936 = math.exp %935 : vector<2x16xf32>
    %c0_467 = arith.constant 0 : index
    %c0_468 = arith.constant 0 : index
    %937 = vector.load %arg27[%c0_467, %c0_468] : memref<2x16xf32, #tpu.memory_space<vmem>>, vector<2x16xf32>
    %938 = arith.mulf %937, %936 : vector<2x16xf32>
    %939 = arith.addf %938, %917 : vector<2x16xf32>
    %c0_469 = arith.constant 0 : index
    %c0_470 = arith.constant 0 : index
    %940 = vector.load %arg29[%c0_469, %c0_470] : memref<2x16xf32, #tpu.memory_space<vmem>>, vector<2x16xf32>
    tpu.vector_store %arg29[%c0_469, %c0_470], %917 {strides = array<i32>} : memref<2x16xf32, #tpu.memory_space<vmem>>, vector<2x16xf32>,
    %c0_471 = arith.constant 0 : index
    %c0_472 = arith.constant 0 : index
    %941 = vector.load %arg30[%c0_471, %c0_472] : memref<2x16xf32, #tpu.memory_space<vmem>>, vector<2x16xf32>
    tpu.vector_store %arg30[%c0_471, %c0_472], %936 {strides = array<i32>} : memref<2x16xf32, #tpu.memory_space<vmem>>, vector<2x16xf32>,
    %c0_473 = arith.constant 0 : index
    %c0_474 = arith.constant 0 : index
    %942 = vector.load %arg31[%c0_473, %c0_474] : memref<2x16xf32, #tpu.memory_space<vmem>>, vector<2x16xf32>
    tpu.vector_store %arg31[%c0_473, %c0_474], %939 {strides = array<i32>} : memref<2x16xf32, #tpu.memory_space<vmem>>, vector<2x16xf32>,
    %c0_475 = arith.constant 0 : index
    %c0_476 = arith.constant 0 : index
    %c0_477 = arith.constant 0 : index
    %943 = vector.load %arg23[%c0_475, %c0_476, %c0_477] : memref<2x16x32xf32, #tpu.memory_space<vmem>>, vector<1x16x32xf32>
    %944 = vector.shape_cast %943 : vector<1x16x32xf32> to vector<16x32xf32>
    %cst_478 = arith.constant dense<0.000000e+00> : vector<2x32xf32>
    %945 = tpu.matmul %939, %944, %cst_478 {dimension_numbers = #tpu.dot_dimension_numbers<[1], [0], [0], [1], [0, 0, 1, 1], [], []>} : vector<2x16xf32>, vector<16x32xf32>, vector<2x32xf32> -> vector<2x32xf32>
    %c0_479 = arith.constant 0 : index
    %c0_480 = arith.constant 0 : index
    %c0_481 = arith.constant 0 : index
    %946 = vector.load %arg24[%c0_479, %c0_480, %c0_481] : memref<2x1x32xf32, #tpu.memory_space<vmem>>, vector<1x1x32xf32>
    %947 = vector.shape_cast %946 : vector<1x1x32xf32> to vector<1x32xf32>
    %948 = vector.broadcast %947 : vector<1x32xf32> to vector<2x32xf32>
    %949 = arith.addf %945, %948 : vector<2x32xf32>
    %c1_482 = arith.constant 1 : index
    %c0_483 = arith.constant 0 : index
    %c0_484 = arith.constant 0 : index
    %950 = vector.load %arg23[%c1_482, %c0_483, %c0_484] : memref<2x16x32xf32, #tpu.memory_space<vmem>>, vector<1x16x32xf32>
    %951 = vector.shape_cast %950 : vector<1x16x32xf32> to vector<16x32xf32>
    %cst_485 = arith.constant dense<0.000000e+00> : vector<2x32xf32>
    %952 = tpu.matmul %939, %951, %cst_485 {dimension_numbers = #tpu.dot_dimension_numbers<[1], [0], [0], [1], [0, 0, 1, 1], [], []>} : vector<2x16xf32>, vector<16x32xf32>, vector<2x32xf32> -> vector<2x32xf32>
    %c1_486 = arith.constant 1 : index
    %c0_487 = arith.constant 0 : index
    %c0_488 = arith.constant 0 : index
    %953 = vector.load %arg24[%c1_486, %c0_487, %c0_488] : memref<2x1x32xf32, #tpu.memory_space<vmem>>, vector<1x1x32xf32>
    %954 = vector.shape_cast %953 : vector<1x1x32xf32> to vector<1x32xf32>
    %955 = vector.broadcast %954 : vector<1x32xf32> to vector<2x32xf32>
    %956 = arith.addf %952, %955 : vector<2x32xf32>
    %c0_489 = arith.constant 0 : index
    %c0_490 = arith.constant 0 : index
    %c0_491 = arith.constant 0 : index
    %957 = vector.load %arg11[%c0_489, %c0_490, %c0_491] : memref<3x32x32xf32, #tpu.memory_space<vmem>>, vector<1x32x32xf32>
    %958 = vector.shape_cast %957 : vector<1x32x32xf32> to vector<32x32xf32>
    %cst_492 = arith.constant dense<0.000000e+00> : vector<16x32xf32>
    %959 = tpu.matmul %8, %958, %cst_492 {dimension_numbers = #tpu.dot_dimension_numbers<[1], [0], [0], [1], [0, 0, 1, 1], [], []>} : vector<16x32xf32>, vector<32x32xf32>, vector<16x32xf32> -> vector<16x32xf32>
    %c0_493 = arith.constant 0 : index
    %c0_494 = arith.constant 0 : index
    %c0_495 = arith.constant 0 : index
    %960 = vector.load %arg12[%c0_493, %c0_494, %c0_495] : memref<3x1x32xf32, #tpu.memory_space<vmem>>, vector<1x1x32xf32>
    %961 = vector.shape_cast %960 : vector<1x1x32xf32> to vector<1x32xf32>
    %962 = vector.broadcast %961 : vector<1x32xf32> to vector<16x32xf32>
    %963 = arith.addf %959, %962 : vector<16x32xf32>
    %c1_496 = arith.constant 1 : index
    %c0_497 = arith.constant 0 : index
    %c0_498 = arith.constant 0 : index
    %964 = vector.load %arg11[%c1_496, %c0_497, %c0_498] : memref<3x32x32xf32, #tpu.memory_space<vmem>>, vector<1x32x32xf32>
    %965 = vector.shape_cast %964 : vector<1x32x32xf32> to vector<32x32xf32>
    %cst_499 = arith.constant dense<0.000000e+00> : vector<16x32xf32>
    %966 = tpu.matmul %8, %965, %cst_499 {dimension_numbers = #tpu.dot_dimension_numbers<[1], [0], [0], [1], [0, 0, 1, 1], [], []>} : vector<16x32xf32>, vector<32x32xf32>, vector<16x32xf32> -> vector<16x32xf32>
    %c1_500 = arith.constant 1 : index
    %c0_501 = arith.constant 0 : index
    %c0_502 = arith.constant 0 : index
    %967 = vector.load %arg12[%c1_500, %c0_501, %c0_502] : memref<3x1x32xf32, #tpu.memory_space<vmem>>, vector<1x1x32xf32>
    %968 = vector.shape_cast %967 : vector<1x1x32xf32> to vector<1x32xf32>
    %969 = vector.broadcast %968 : vector<1x32xf32> to vector<16x32xf32>
    %970 = arith.addf %966, %969 : vector<16x32xf32>
    %c2_503 = arith.constant 2 : index
    %c0_504 = arith.constant 0 : index
    %c0_505 = arith.constant 0 : index
    %971 = vector.load %arg11[%c2_503, %c0_504, %c0_505] : memref<3x32x32xf32, #tpu.memory_space<vmem>>, vector<1x32x32xf32>
    %972 = vector.shape_cast %971 : vector<1x32x32xf32> to vector<32x32xf32>
    %cst_506 = arith.constant dense<0.000000e+00> : vector<16x32xf32>
    %973 = tpu.matmul %8, %972, %cst_506 {dimension_numbers = #tpu.dot_dimension_numbers<[1], [0], [0], [1], [0, 0, 1, 1], [], []>} : vector<16x32xf32>, vector<32x32xf32>, vector<16x32xf32> -> vector<16x32xf32>
    %c2_507 = arith.constant 2 : index
    %c0_508 = arith.constant 0 : index
    %c0_509 = arith.constant 0 : index
    %974 = vector.load %arg12[%c2_507, %c0_508, %c0_509] : memref<3x1x32xf32, #tpu.memory_space<vmem>>, vector<1x1x32xf32>
    %975 = vector.shape_cast %974 : vector<1x1x32xf32> to vector<1x32xf32>
    %976 = vector.broadcast %975 : vector<1x32xf32> to vector<16x32xf32>
    %977 = arith.addf %973, %976 : vector<16x32xf32>
    %978 = vector.extract_strided_slice %0 {offsets = [0, 0], sizes = [2, 1], strides = [1, 1]} : vector<16x1xf32> to vector<2x1xf32>
    %979 = vector.extract_strided_slice %963 {offsets = [0, 0], sizes = [2, 32], strides = [1, 1]} : vector<16x32xf32> to vector<2x32xf32>
    %980 = vector.extract_strided_slice %970 {offsets = [0, 0], sizes = [2, 32], strides = [1, 1]} : vector<16x32xf32> to vector<2x32xf32>
    %981 = vector.extract_strided_slice %977 {offsets = [0, 0], sizes = [2, 32], strides = [1, 1]} : vector<16x32xf32> to vector<2x32xf32>
    %c0_510 = arith.constant 0 : index
    %c0_511 = arith.constant 0 : index
    %c0_512 = arith.constant 0 : index
    %982 = vector.load %arg13[%c0_510, %c0_511, %c0_512] : memref<3x32x32xf32, #tpu.memory_space<vmem>>, vector<1x32x32xf32>
    %983 = vector.shape_cast %982 : vector<1x32x32xf32> to vector<32x32xf32>
    %cst_513 = arith.constant dense<0.000000e+00> : vector<2x32xf32>
    %984 = tpu.matmul %949, %983, %cst_513 {dimension_numbers = #tpu.dot_dimension_numbers<[1], [0], [0], [1], [0, 0, 1, 1], [], []>} : vector<2x32xf32>, vector<32x32xf32>, vector<2x32xf32> -> vector<2x32xf32>
    %c0_514 = arith.constant 0 : index
    %c0_515 = arith.constant 0 : index
    %c0_516 = arith.constant 0 : index
    %985 = vector.load %arg14[%c0_514, %c0_515, %c0_516] : memref<3x1x32xf32, #tpu.memory_space<vmem>>, vector<1x1x32xf32>
    %986 = vector.shape_cast %985 : vector<1x1x32xf32> to vector<1x32xf32>
    %987 = vector.broadcast %986 : vector<1x32xf32> to vector<2x32xf32>
    %988 = arith.addf %984, %987 : vector<2x32xf32>
    %c1_517 = arith.constant 1 : index
    %c0_518 = arith.constant 0 : index
    %c0_519 = arith.constant 0 : index
    %989 = vector.load %arg13[%c1_517, %c0_518, %c0_519] : memref<3x32x32xf32, #tpu.memory_space<vmem>>, vector<1x32x32xf32>
    %990 = vector.shape_cast %989 : vector<1x32x32xf32> to vector<32x32xf32>
    %cst_520 = arith.constant dense<0.000000e+00> : vector<2x32xf32>
    %991 = tpu.matmul %949, %990, %cst_520 {dimension_numbers = #tpu.dot_dimension_numbers<[1], [0], [0], [1], [0, 0, 1, 1], [], []>} : vector<2x32xf32>, vector<32x32xf32>, vector<2x32xf32> -> vector<2x32xf32>
    %c1_521 = arith.constant 1 : index
    %c0_522 = arith.constant 0 : index
    %c0_523 = arith.constant 0 : index
    %992 = vector.load %arg14[%c1_521, %c0_522, %c0_523] : memref<3x1x32xf32, #tpu.memory_space<vmem>>, vector<1x1x32xf32>
    %993 = vector.shape_cast %992 : vector<1x1x32xf32> to vector<1x32xf32>
    %994 = vector.broadcast %993 : vector<1x32xf32> to vector<2x32xf32>
    %995 = arith.addf %991, %994 : vector<2x32xf32>
    %c2_524 = arith.constant 2 : index
    %c0_525 = arith.constant 0 : index
    %c0_526 = arith.constant 0 : index
    %996 = vector.load %arg13[%c2_524, %c0_525, %c0_526] : memref<3x32x32xf32, #tpu.memory_space<vmem>>, vector<1x32x32xf32>
    %997 = vector.shape_cast %996 : vector<1x32x32xf32> to vector<32x32xf32>
    %cst_527 = arith.constant dense<0.000000e+00> : vector<2x32xf32>
    %998 = tpu.matmul %949, %997, %cst_527 {dimension_numbers = #tpu.dot_dimension_numbers<[1], [0], [0], [1], [0, 0, 1, 1], [], []>} : vector<2x32xf32>, vector<32x32xf32>, vector<2x32xf32> -> vector<2x32xf32>
    %c2_528 = arith.constant 2 : index
    %c0_529 = arith.constant 0 : index
    %c0_530 = arith.constant 0 : index
    %999 = vector.load %arg14[%c2_528, %c0_529, %c0_530] : memref<3x1x32xf32, #tpu.memory_space<vmem>>, vector<1x1x32xf32>
    %1000 = vector.shape_cast %999 : vector<1x1x32xf32> to vector<1x32xf32>
    %1001 = vector.broadcast %1000 : vector<1x32xf32> to vector<2x32xf32>
    %1002 = arith.addf %998, %1001 : vector<2x32xf32>
    %1003 = arith.addf %979, %988 : vector<2x32xf32>
    %1004 = arith.negf %1003 : vector<2x32xf32>
    %1005 = math.exp %1004 : vector<2x32xf32>
    %cst_531 = arith.constant 1.000000e+00 : f32
    %1006 = vector.broadcast %cst_531 : f32 to vector<2x32xf32>
    %1007 = arith.addf %1006, %1005 : vector<2x32xf32>
    %1008 = arith.divf %1006, %1007 : vector<2x32xf32>
    %1009 = arith.addf %980, %995 : vector<2x32xf32>
    %1010 = arith.negf %1009 : vector<2x32xf32>
    %1011 = math.exp %1010 : vector<2x32xf32>
    %cst_532 = arith.constant 1.000000e+00 : f32
    %1012 = vector.broadcast %cst_532 : f32 to vector<2x32xf32>
    %1013 = arith.addf %1012, %1011 : vector<2x32xf32>
    %1014 = arith.divf %1012, %1013 : vector<2x32xf32>
    %1015 = arith.mulf %1008, %1002 : vector<2x32xf32>
    %1016 = arith.addf %981, %1015 : vector<2x32xf32>
    %1017 = math.tanh %1016 : vector<2x32xf32>
    %cst_533 = arith.constant 1.000000e+00 : f32
    %1018 = vector.broadcast %cst_533 : f32 to vector<2x32xf32>
    %1019 = arith.subf %1018, %1014 : vector<2x32xf32>
    %1020 = arith.mulf %1019, %1017 : vector<2x32xf32>
    %1021 = arith.mulf %1014, %949 : vector<2x32xf32>
    %1022 = arith.addf %1020, %1021 : vector<2x32xf32>
    %1023 = vector.broadcast %978 : vector<2x1xf32> to vector<2x32xf32>
    %1024 = arith.mulf %1023, %1022 : vector<2x32xf32>
    %cst_534 = arith.constant 1.000000e+00 : f32
    %1025 = vector.broadcast %cst_534 : f32 to vector<2x1xf32>
    %1026 = arith.subf %1025, %978 : vector<2x1xf32>
    %1027 = vector.broadcast %1026 : vector<2x1xf32> to vector<2x32xf32>
    %1028 = arith.mulf %1027, %949 : vector<2x32xf32>
    %1029 = arith.addf %1024, %1028 : vector<2x32xf32>
    %1030 = vector.broadcast %978 : vector<2x1xf32> to vector<2x32xf32>
    %1031 = arith.mulf %1030, %1029 : vector<2x32xf32>
    %1032 = vector.extract_strided_slice %0 {offsets = [2, 0], sizes = [2, 1], strides = [1, 1]} : vector<16x1xf32> to vector<2x1xf32>
    %1033 = vector.extract_strided_slice %963 {offsets = [2, 0], sizes = [2, 32], strides = [1, 1]} : vector<16x32xf32> to vector<2x32xf32>
    %1034 = vector.extract_strided_slice %970 {offsets = [2, 0], sizes = [2, 32], strides = [1, 1]} : vector<16x32xf32> to vector<2x32xf32>
    %1035 = vector.extract_strided_slice %977 {offsets = [2, 0], sizes = [2, 32], strides = [1, 1]} : vector<16x32xf32> to vector<2x32xf32>
    %c0_535 = arith.constant 0 : index
    %c0_536 = arith.constant 0 : index
    %c0_537 = arith.constant 0 : index
    %1036 = vector.load %arg13[%c0_535, %c0_536, %c0_537] : memref<3x32x32xf32, #tpu.memory_space<vmem>>, vector<1x32x32xf32>
    %1037 = vector.shape_cast %1036 : vector<1x32x32xf32> to vector<32x32xf32>
    %cst_538 = arith.constant dense<0.000000e+00> : vector<2x32xf32>
    %1038 = tpu.matmul %1029, %1037, %cst_538 {dimension_numbers = #tpu.dot_dimension_numbers<[1], [0], [0], [1], [0, 0, 1, 1], [], []>} : vector<2x32xf32>, vector<32x32xf32>, vector<2x32xf32> -> vector<2x32xf32>
    %c0_539 = arith.constant 0 : index
    %c0_540 = arith.constant 0 : index
    %c0_541 = arith.constant 0 : index
    %1039 = vector.load %arg14[%c0_539, %c0_540, %c0_541] : memref<3x1x32xf32, #tpu.memory_space<vmem>>, vector<1x1x32xf32>
    %1040 = vector.shape_cast %1039 : vector<1x1x32xf32> to vector<1x32xf32>
    %1041 = vector.broadcast %1040 : vector<1x32xf32> to vector<2x32xf32>
    %1042 = arith.addf %1038, %1041 : vector<2x32xf32>
    %c1_542 = arith.constant 1 : index
    %c0_543 = arith.constant 0 : index
    %c0_544 = arith.constant 0 : index
    %1043 = vector.load %arg13[%c1_542, %c0_543, %c0_544] : memref<3x32x32xf32, #tpu.memory_space<vmem>>, vector<1x32x32xf32>
    %1044 = vector.shape_cast %1043 : vector<1x32x32xf32> to vector<32x32xf32>
    %cst_545 = arith.constant dense<0.000000e+00> : vector<2x32xf32>
    %1045 = tpu.matmul %1029, %1044, %cst_545 {dimension_numbers = #tpu.dot_dimension_numbers<[1], [0], [0], [1], [0, 0, 1, 1], [], []>} : vector<2x32xf32>, vector<32x32xf32>, vector<2x32xf32> -> vector<2x32xf32>
    %c1_546 = arith.constant 1 : index
    %c0_547 = arith.constant 0 : index
    %c0_548 = arith.constant 0 : index
    %1046 = vector.load %arg14[%c1_546, %c0_547, %c0_548] : memref<3x1x32xf32, #tpu.memory_space<vmem>>, vector<1x1x32xf32>
    %1047 = vector.shape_cast %1046 : vector<1x1x32xf32> to vector<1x32xf32>
    %1048 = vector.broadcast %1047 : vector<1x32xf32> to vector<2x32xf32>
    %1049 = arith.addf %1045, %1048 : vector<2x32xf32>
    %c2_549 = arith.constant 2 : index
    %c0_550 = arith.constant 0 : index
    %c0_551 = arith.constant 0 : index
    %1050 = vector.load %arg13[%c2_549, %c0_550, %c0_551] : memref<3x32x32xf32, #tpu.memory_space<vmem>>, vector<1x32x32xf32>
    %1051 = vector.shape_cast %1050 : vector<1x32x32xf32> to vector<32x32xf32>
    %cst_552 = arith.constant dense<0.000000e+00> : vector<2x32xf32>
    %1052 = tpu.matmul %1029, %1051, %cst_552 {dimension_numbers = #tpu.dot_dimension_numbers<[1], [0], [0], [1], [0, 0, 1, 1], [], []>} : vector<2x32xf32>, vector<32x32xf32>, vector<2x32xf32> -> vector<2x32xf32>
    %c2_553 = arith.constant 2 : index
    %c0_554 = arith.constant 0 : index
    %c0_555 = arith.constant 0 : index
    %1053 = vector.load %arg14[%c2_553, %c0_554, %c0_555] : memref<3x1x32xf32, #tpu.memory_space<vmem>>, vector<1x1x32xf32>
    %1054 = vector.shape_cast %1053 : vector<1x1x32xf32> to vector<1x32xf32>
    %1055 = vector.broadcast %1054 : vector<1x32xf32> to vector<2x32xf32>
    %1056 = arith.addf %1052, %1055 : vector<2x32xf32>
    %1057 = arith.addf %1033, %1042 : vector<2x32xf32>
    %1058 = arith.negf %1057 : vector<2x32xf32>
    %1059 = math.exp %1058 : vector<2x32xf32>
    %cst_556 = arith.constant 1.000000e+00 : f32
    %1060 = vector.broadcast %cst_556 : f32 to vector<2x32xf32>
    %1061 = arith.addf %1060, %1059 : vector<2x32xf32>
    %1062 = arith.divf %1060, %1061 : vector<2x32xf32>
    %1063 = arith.addf %1034, %1049 : vector<2x32xf32>
    %1064 = arith.negf %1063 : vector<2x32xf32>
    %1065 = math.exp %1064 : vector<2x32xf32>
    %cst_557 = arith.constant 1.000000e+00 : f32
    %1066 = vector.broadcast %cst_557 : f32 to vector<2x32xf32>
    %1067 = arith.addf %1066, %1065 : vector<2x32xf32>
    %1068 = arith.divf %1066, %1067 : vector<2x32xf32>
    %1069 = arith.mulf %1062, %1056 : vector<2x32xf32>
    %1070 = arith.addf %1035, %1069 : vector<2x32xf32>
    %1071 = math.tanh %1070 : vector<2x32xf32>
    %cst_558 = arith.constant 1.000000e+00 : f32
    %1072 = vector.broadcast %cst_558 : f32 to vector<2x32xf32>
    %1073 = arith.subf %1072, %1068 : vector<2x32xf32>
    %1074 = arith.mulf %1073, %1071 : vector<2x32xf32>
    %1075 = arith.mulf %1068, %1029 : vector<2x32xf32>
    %1076 = arith.addf %1074, %1075 : vector<2x32xf32>
    %1077 = vector.broadcast %1032 : vector<2x1xf32> to vector<2x32xf32>
    %1078 = arith.mulf %1077, %1076 : vector<2x32xf32>
    %cst_559 = arith.constant 1.000000e+00 : f32
    %1079 = vector.broadcast %cst_559 : f32 to vector<2x1xf32>
    %1080 = arith.subf %1079, %1032 : vector<2x1xf32>
    %1081 = vector.broadcast %1080 : vector<2x1xf32> to vector<2x32xf32>
    %1082 = arith.mulf %1081, %1029 : vector<2x32xf32>
    %1083 = arith.addf %1078, %1082 : vector<2x32xf32>
    %1084 = vector.broadcast %1032 : vector<2x1xf32> to vector<2x32xf32>
    %1085 = arith.mulf %1084, %1083 : vector<2x32xf32>
    %1086 = vector.extract_strided_slice %0 {offsets = [4, 0], sizes = [2, 1], strides = [1, 1]} : vector<16x1xf32> to vector<2x1xf32>
    %1087 = vector.extract_strided_slice %963 {offsets = [4, 0], sizes = [2, 32], strides = [1, 1]} : vector<16x32xf32> to vector<2x32xf32>
    %1088 = vector.extract_strided_slice %970 {offsets = [4, 0], sizes = [2, 32], strides = [1, 1]} : vector<16x32xf32> to vector<2x32xf32>
    %1089 = vector.extract_strided_slice %977 {offsets = [4, 0], sizes = [2, 32], strides = [1, 1]} : vector<16x32xf32> to vector<2x32xf32>
    %c0_560 = arith.constant 0 : index
    %c0_561 = arith.constant 0 : index
    %c0_562 = arith.constant 0 : index
    %1090 = vector.load %arg13[%c0_560, %c0_561, %c0_562] : memref<3x32x32xf32, #tpu.memory_space<vmem>>, vector<1x32x32xf32>
    %1091 = vector.shape_cast %1090 : vector<1x32x32xf32> to vector<32x32xf32>
    %cst_563 = arith.constant dense<0.000000e+00> : vector<2x32xf32>
    %1092 = tpu.matmul %1083, %1091, %cst_563 {dimension_numbers = #tpu.dot_dimension_numbers<[1], [0], [0], [1], [0, 0, 1, 1], [], []>} : vector<2x32xf32>, vector<32x32xf32>, vector<2x32xf32> -> vector<2x32xf32>
    %c0_564 = arith.constant 0 : index
    %c0_565 = arith.constant 0 : index
    %c0_566 = arith.constant 0 : index
    %1093 = vector.load %arg14[%c0_564, %c0_565, %c0_566] : memref<3x1x32xf32, #tpu.memory_space<vmem>>, vector<1x1x32xf32>
    %1094 = vector.shape_cast %1093 : vector<1x1x32xf32> to vector<1x32xf32>
    %1095 = vector.broadcast %1094 : vector<1x32xf32> to vector<2x32xf32>
    %1096 = arith.addf %1092, %1095 : vector<2x32xf32>
    %c1_567 = arith.constant 1 : index
    %c0_568 = arith.constant 0 : index
    %c0_569 = arith.constant 0 : index
    %1097 = vector.load %arg13[%c1_567, %c0_568, %c0_569] : memref<3x32x32xf32, #tpu.memory_space<vmem>>, vector<1x32x32xf32>
    %1098 = vector.shape_cast %1097 : vector<1x32x32xf32> to vector<32x32xf32>
    %cst_570 = arith.constant dense<0.000000e+00> : vector<2x32xf32>
    %1099 = tpu.matmul %1083, %1098, %cst_570 {dimension_numbers = #tpu.dot_dimension_numbers<[1], [0], [0], [1], [0, 0, 1, 1], [], []>} : vector<2x32xf32>, vector<32x32xf32>, vector<2x32xf32> -> vector<2x32xf32>
    %c1_571 = arith.constant 1 : index
    %c0_572 = arith.constant 0 : index
    %c0_573 = arith.constant 0 : index
    %1100 = vector.load %arg14[%c1_571, %c0_572, %c0_573] : memref<3x1x32xf32, #tpu.memory_space<vmem>>, vector<1x1x32xf32>
    %1101 = vector.shape_cast %1100 : vector<1x1x32xf32> to vector<1x32xf32>
    %1102 = vector.broadcast %1101 : vector<1x32xf32> to vector<2x32xf32>
    %1103 = arith.addf %1099, %1102 : vector<2x32xf32>
    %c2_574 = arith.constant 2 : index
    %c0_575 = arith.constant 0 : index
    %c0_576 = arith.constant 0 : index
    %1104 = vector.load %arg13[%c2_574, %c0_575, %c0_576] : memref<3x32x32xf32, #tpu.memory_space<vmem>>, vector<1x32x32xf32>
    %1105 = vector.shape_cast %1104 : vector<1x32x32xf32> to vector<32x32xf32>
    %cst_577 = arith.constant dense<0.000000e+00> : vector<2x32xf32>
    %1106 = tpu.matmul %1083, %1105, %cst_577 {dimension_numbers = #tpu.dot_dimension_numbers<[1], [0], [0], [1], [0, 0, 1, 1], [], []>} : vector<2x32xf32>, vector<32x32xf32>, vector<2x32xf32> -> vector<2x32xf32>
    %c2_578 = arith.constant 2 : index
    %c0_579 = arith.constant 0 : index
    %c0_580 = arith.constant 0 : index
    %1107 = vector.load %arg14[%c2_578, %c0_579, %c0_580] : memref<3x1x32xf32, #tpu.memory_space<vmem>>, vector<1x1x32xf32>
    %1108 = vector.shape_cast %1107 : vector<1x1x32xf32> to vector<1x32xf32>
    %1109 = vector.broadcast %1108 : vector<1x32xf32> to vector<2x32xf32>
    %1110 = arith.addf %1106, %1109 : vector<2x32xf32>
    %1111 = arith.addf %1087, %1096 : vector<2x32xf32>
    %1112 = arith.negf %1111 : vector<2x32xf32>
    %1113 = math.exp %1112 : vector<2x32xf32>
    %cst_581 = arith.constant 1.000000e+00 : f32
    %1114 = vector.broadcast %cst_581 : f32 to vector<2x32xf32>
    %1115 = arith.addf %1114, %1113 : vector<2x32xf32>
    %1116 = arith.divf %1114, %1115 : vector<2x32xf32>
    %1117 = arith.addf %1088, %1103 : vector<2x32xf32>
    %1118 = arith.negf %1117 : vector<2x32xf32>
    %1119 = math.exp %1118 : vector<2x32xf32>
    %cst_582 = arith.constant 1.000000e+00 : f32
    %1120 = vector.broadcast %cst_582 : f32 to vector<2x32xf32>
    %1121 = arith.addf %1120, %1119 : vector<2x32xf32>
    %1122 = arith.divf %1120, %1121 : vector<2x32xf32>
    %1123 = arith.mulf %1116, %1110 : vector<2x32xf32>
    %1124 = arith.addf %1089, %1123 : vector<2x32xf32>
    %1125 = math.tanh %1124 : vector<2x32xf32>
    %cst_583 = arith.constant 1.000000e+00 : f32
    %1126 = vector.broadcast %cst_583 : f32 to vector<2x32xf32>
    %1127 = arith.subf %1126, %1122 : vector<2x32xf32>
    %1128 = arith.mulf %1127, %1125 : vector<2x32xf32>
    %1129 = arith.mulf %1122, %1083 : vector<2x32xf32>
    %1130 = arith.addf %1128, %1129 : vector<2x32xf32>
    %1131 = vector.broadcast %1086 : vector<2x1xf32> to vector<2x32xf32>
    %1132 = arith.mulf %1131, %1130 : vector<2x32xf32>
    %cst_584 = arith.constant 1.000000e+00 : f32
    %1133 = vector.broadcast %cst_584 : f32 to vector<2x1xf32>
    %1134 = arith.subf %1133, %1086 : vector<2x1xf32>
    %1135 = vector.broadcast %1134 : vector<2x1xf32> to vector<2x32xf32>
    %1136 = arith.mulf %1135, %1083 : vector<2x32xf32>
    %1137 = arith.addf %1132, %1136 : vector<2x32xf32>
    %1138 = vector.broadcast %1086 : vector<2x1xf32> to vector<2x32xf32>
    %1139 = arith.mulf %1138, %1137 : vector<2x32xf32>
    %1140 = vector.extract_strided_slice %0 {offsets = [6, 0], sizes = [2, 1], strides = [1, 1]} : vector<16x1xf32> to vector<2x1xf32>
    %1141 = vector.extract_strided_slice %963 {offsets = [6, 0], sizes = [2, 32], strides = [1, 1]} : vector<16x32xf32> to vector<2x32xf32>
    %1142 = vector.extract_strided_slice %970 {offsets = [6, 0], sizes = [2, 32], strides = [1, 1]} : vector<16x32xf32> to vector<2x32xf32>
    %1143 = vector.extract_strided_slice %977 {offsets = [6, 0], sizes = [2, 32], strides = [1, 1]} : vector<16x32xf32> to vector<2x32xf32>
    %c0_585 = arith.constant 0 : index
    %c0_586 = arith.constant 0 : index
    %c0_587 = arith.constant 0 : index
    %1144 = vector.load %arg13[%c0_585, %c0_586, %c0_587] : memref<3x32x32xf32, #tpu.memory_space<vmem>>, vector<1x32x32xf32>
    %1145 = vector.shape_cast %1144 : vector<1x32x32xf32> to vector<32x32xf32>
    %cst_588 = arith.constant dense<0.000000e+00> : vector<2x32xf32>
    %1146 = tpu.matmul %1137, %1145, %cst_588 {dimension_numbers = #tpu.dot_dimension_numbers<[1], [0], [0], [1], [0, 0, 1, 1], [], []>} : vector<2x32xf32>, vector<32x32xf32>, vector<2x32xf32> -> vector<2x32xf32>
    %c0_589 = arith.constant 0 : index
    %c0_590 = arith.constant 0 : index
    %c0_591 = arith.constant 0 : index
    %1147 = vector.load %arg14[%c0_589, %c0_590, %c0_591] : memref<3x1x32xf32, #tpu.memory_space<vmem>>, vector<1x1x32xf32>
    %1148 = vector.shape_cast %1147 : vector<1x1x32xf32> to vector<1x32xf32>
    %1149 = vector.broadcast %1148 : vector<1x32xf32> to vector<2x32xf32>
    %1150 = arith.addf %1146, %1149 : vector<2x32xf32>
    %c1_592 = arith.constant 1 : index
    %c0_593 = arith.constant 0 : index
    %c0_594 = arith.constant 0 : index
    %1151 = vector.load %arg13[%c1_592, %c0_593, %c0_594] : memref<3x32x32xf32, #tpu.memory_space<vmem>>, vector<1x32x32xf32>
    %1152 = vector.shape_cast %1151 : vector<1x32x32xf32> to vector<32x32xf32>
    %cst_595 = arith.constant dense<0.000000e+00> : vector<2x32xf32>
    %1153 = tpu.matmul %1137, %1152, %cst_595 {dimension_numbers = #tpu.dot_dimension_numbers<[1], [0], [0], [1], [0, 0, 1, 1], [], []>} : vector<2x32xf32>, vector<32x32xf32>, vector<2x32xf32> -> vector<2x32xf32>
    %c1_596 = arith.constant 1 : index
    %c0_597 = arith.constant 0 : index
    %c0_598 = arith.constant 0 : index
    %1154 = vector.load %arg14[%c1_596, %c0_597, %c0_598] : memref<3x1x32xf32, #tpu.memory_space<vmem>>, vector<1x1x32xf32>
    %1155 = vector.shape_cast %1154 : vector<1x1x32xf32> to vector<1x32xf32>
    %1156 = vector.broadcast %1155 : vector<1x32xf32> to vector<2x32xf32>
    %1157 = arith.addf %1153, %1156 : vector<2x32xf32>
    %c2_599 = arith.constant 2 : index
    %c0_600 = arith.constant 0 : index
    %c0_601 = arith.constant 0 : index
    %1158 = vector.load %arg13[%c2_599, %c0_600, %c0_601] : memref<3x32x32xf32, #tpu.memory_space<vmem>>, vector<1x32x32xf32>
    %1159 = vector.shape_cast %1158 : vector<1x32x32xf32> to vector<32x32xf32>
    %cst_602 = arith.constant dense<0.000000e+00> : vector<2x32xf32>
    %1160 = tpu.matmul %1137, %1159, %cst_602 {dimension_numbers = #tpu.dot_dimension_numbers<[1], [0], [0], [1], [0, 0, 1, 1], [], []>} : vector<2x32xf32>, vector<32x32xf32>, vector<2x32xf32> -> vector<2x32xf32>
    %c2_603 = arith.constant 2 : index
    %c0_604 = arith.constant 0 : index
    %c0_605 = arith.constant 0 : index
    %1161 = vector.load %arg14[%c2_603, %c0_604, %c0_605] : memref<3x1x32xf32, #tpu.memory_space<vmem>>, vector<1x1x32xf32>
    %1162 = vector.shape_cast %1161 : vector<1x1x32xf32> to vector<1x32xf32>
    %1163 = vector.broadcast %1162 : vector<1x32xf32> to vector<2x32xf32>
    %1164 = arith.addf %1160, %1163 : vector<2x32xf32>
    %1165 = arith.addf %1141, %1150 : vector<2x32xf32>
    %1166 = arith.negf %1165 : vector<2x32xf32>
    %1167 = math.exp %1166 : vector<2x32xf32>
    %cst_606 = arith.constant 1.000000e+00 : f32
    %1168 = vector.broadcast %cst_606 : f32 to vector<2x32xf32>
    %1169 = arith.addf %1168, %1167 : vector<2x32xf32>
    %1170 = arith.divf %1168, %1169 : vector<2x32xf32>
    %1171 = arith.addf %1142, %1157 : vector<2x32xf32>
    %1172 = arith.negf %1171 : vector<2x32xf32>
    %1173 = math.exp %1172 : vector<2x32xf32>
    %cst_607 = arith.constant 1.000000e+00 : f32
    %1174 = vector.broadcast %cst_607 : f32 to vector<2x32xf32>
    %1175 = arith.addf %1174, %1173 : vector<2x32xf32>
    %1176 = arith.divf %1174, %1175 : vector<2x32xf32>
    %1177 = arith.mulf %1170, %1164 : vector<2x32xf32>
    %1178 = arith.addf %1143, %1177 : vector<2x32xf32>
    %1179 = math.tanh %1178 : vector<2x32xf32>
    %cst_608 = arith.constant 1.000000e+00 : f32
    %1180 = vector.broadcast %cst_608 : f32 to vector<2x32xf32>
    %1181 = arith.subf %1180, %1176 : vector<2x32xf32>
    %1182 = arith.mulf %1181, %1179 : vector<2x32xf32>
    %1183 = arith.mulf %1176, %1137 : vector<2x32xf32>
    %1184 = arith.addf %1182, %1183 : vector<2x32xf32>
    %1185 = vector.broadcast %1140 : vector<2x1xf32> to vector<2x32xf32>
    %1186 = arith.mulf %1185, %1184 : vector<2x32xf32>
    %cst_609 = arith.constant 1.000000e+00 : f32
    %1187 = vector.broadcast %cst_609 : f32 to vector<2x1xf32>
    %1188 = arith.subf %1187, %1140 : vector<2x1xf32>
    %1189 = vector.broadcast %1188 : vector<2x1xf32> to vector<2x32xf32>
    %1190 = arith.mulf %1189, %1137 : vector<2x32xf32>
    %1191 = arith.addf %1186, %1190 : vector<2x32xf32>
    %1192 = vector.broadcast %1140 : vector<2x1xf32> to vector<2x32xf32>
    %1193 = arith.mulf %1192, %1191 : vector<2x32xf32>
    %1194 = vector.extract_strided_slice %0 {offsets = [8, 0], sizes = [2, 1], strides = [1, 1]} : vector<16x1xf32> to vector<2x1xf32>
    %1195 = vector.extract_strided_slice %963 {offsets = [8, 0], sizes = [2, 32], strides = [1, 1]} : vector<16x32xf32> to vector<2x32xf32>
    %1196 = vector.extract_strided_slice %970 {offsets = [8, 0], sizes = [2, 32], strides = [1, 1]} : vector<16x32xf32> to vector<2x32xf32>
    %1197 = vector.extract_strided_slice %977 {offsets = [8, 0], sizes = [2, 32], strides = [1, 1]} : vector<16x32xf32> to vector<2x32xf32>
    %c0_610 = arith.constant 0 : index
    %c0_611 = arith.constant 0 : index
    %c0_612 = arith.constant 0 : index
    %1198 = vector.load %arg13[%c0_610, %c0_611, %c0_612] : memref<3x32x32xf32, #tpu.memory_space<vmem>>, vector<1x32x32xf32>
    %1199 = vector.shape_cast %1198 : vector<1x32x32xf32> to vector<32x32xf32>
    %cst_613 = arith.constant dense<0.000000e+00> : vector<2x32xf32>
    %1200 = tpu.matmul %1191, %1199, %cst_613 {dimension_numbers = #tpu.dot_dimension_numbers<[1], [0], [0], [1], [0, 0, 1, 1], [], []>} : vector<2x32xf32>, vector<32x32xf32>, vector<2x32xf32> -> vector<2x32xf32>
    %c0_614 = arith.constant 0 : index
    %c0_615 = arith.constant 0 : index
    %c0_616 = arith.constant 0 : index
    %1201 = vector.load %arg14[%c0_614, %c0_615, %c0_616] : memref<3x1x32xf32, #tpu.memory_space<vmem>>, vector<1x1x32xf32>
    %1202 = vector.shape_cast %1201 : vector<1x1x32xf32> to vector<1x32xf32>
    %1203 = vector.broadcast %1202 : vector<1x32xf32> to vector<2x32xf32>
    %1204 = arith.addf %1200, %1203 : vector<2x32xf32>
    %c1_617 = arith.constant 1 : index
    %c0_618 = arith.constant 0 : index
    %c0_619 = arith.constant 0 : index
    %1205 = vector.load %arg13[%c1_617, %c0_618, %c0_619] : memref<3x32x32xf32, #tpu.memory_space<vmem>>, vector<1x32x32xf32>
    %1206 = vector.shape_cast %1205 : vector<1x32x32xf32> to vector<32x32xf32>
    %cst_620 = arith.constant dense<0.000000e+00> : vector<2x32xf32>
    %1207 = tpu.matmul %1191, %1206, %cst_620 {dimension_numbers = #tpu.dot_dimension_numbers<[1], [0], [0], [1], [0, 0, 1, 1], [], []>} : vector<2x32xf32>, vector<32x32xf32>, vector<2x32xf32> -> vector<2x32xf32>
    %c1_621 = arith.constant 1 : index
    %c0_622 = arith.constant 0 : index
    %c0_623 = arith.constant 0 : index
    %1208 = vector.load %arg14[%c1_621, %c0_622, %c0_623] : memref<3x1x32xf32, #tpu.memory_space<vmem>>, vector<1x1x32xf32>
    %1209 = vector.shape_cast %1208 : vector<1x1x32xf32> to vector<1x32xf32>
    %1210 = vector.broadcast %1209 : vector<1x32xf32> to vector<2x32xf32>
    %1211 = arith.addf %1207, %1210 : vector<2x32xf32>
    %c2_624 = arith.constant 2 : index
    %c0_625 = arith.constant 0 : index
    %c0_626 = arith.constant 0 : index
    %1212 = vector.load %arg13[%c2_624, %c0_625, %c0_626] : memref<3x32x32xf32, #tpu.memory_space<vmem>>, vector<1x32x32xf32>
    %1213 = vector.shape_cast %1212 : vector<1x32x32xf32> to vector<32x32xf32>
    %cst_627 = arith.constant dense<0.000000e+00> : vector<2x32xf32>
    %1214 = tpu.matmul %1191, %1213, %cst_627 {dimension_numbers = #tpu.dot_dimension_numbers<[1], [0], [0], [1], [0, 0, 1, 1], [], []>} : vector<2x32xf32>, vector<32x32xf32>, vector<2x32xf32> -> vector<2x32xf32>
    %c2_628 = arith.constant 2 : index
    %c0_629 = arith.constant 0 : index
    %c0_630 = arith.constant 0 : index
    %1215 = vector.load %arg14[%c2_628, %c0_629, %c0_630] : memref<3x1x32xf32, #tpu.memory_space<vmem>>, vector<1x1x32xf32>
    %1216 = vector.shape_cast %1215 : vector<1x1x32xf32> to vector<1x32xf32>
    %1217 = vector.broadcast %1216 : vector<1x32xf32> to vector<2x32xf32>
    %1218 = arith.addf %1214, %1217 : vector<2x32xf32>
    %1219 = arith.addf %1195, %1204 : vector<2x32xf32>
    %1220 = arith.negf %1219 : vector<2x32xf32>
    %1221 = math.exp %1220 : vector<2x32xf32>
    %cst_631 = arith.constant 1.000000e+00 : f32
    %1222 = vector.broadcast %cst_631 : f32 to vector<2x32xf32>
    %1223 = arith.addf %1222, %1221 : vector<2x32xf32>
    %1224 = arith.divf %1222, %1223 : vector<2x32xf32>
    %1225 = arith.addf %1196, %1211 : vector<2x32xf32>
    %1226 = arith.negf %1225 : vector<2x32xf32>
    %1227 = math.exp %1226 : vector<2x32xf32>
    %cst_632 = arith.constant 1.000000e+00 : f32
    %1228 = vector.broadcast %cst_632 : f32 to vector<2x32xf32>
    %1229 = arith.addf %1228, %1227 : vector<2x32xf32>
    %1230 = arith.divf %1228, %1229 : vector<2x32xf32>
    %1231 = arith.mulf %1224, %1218 : vector<2x32xf32>
    %1232 = arith.addf %1197, %1231 : vector<2x32xf32>
    %1233 = math.tanh %1232 : vector<2x32xf32>
    %cst_633 = arith.constant 1.000000e+00 : f32
    %1234 = vector.broadcast %cst_633 : f32 to vector<2x32xf32>
    %1235 = arith.subf %1234, %1230 : vector<2x32xf32>
    %1236 = arith.mulf %1235, %1233 : vector<2x32xf32>
    %1237 = arith.mulf %1230, %1191 : vector<2x32xf32>
    %1238 = arith.addf %1236, %1237 : vector<2x32xf32>
    %1239 = vector.broadcast %1194 : vector<2x1xf32> to vector<2x32xf32>
    %1240 = arith.mulf %1239, %1238 : vector<2x32xf32>
    %cst_634 = arith.constant 1.000000e+00 : f32
    %1241 = vector.broadcast %cst_634 : f32 to vector<2x1xf32>
    %1242 = arith.subf %1241, %1194 : vector<2x1xf32>
    %1243 = vector.broadcast %1242 : vector<2x1xf32> to vector<2x32xf32>
    %1244 = arith.mulf %1243, %1191 : vector<2x32xf32>
    %1245 = arith.addf %1240, %1244 : vector<2x32xf32>
    %1246 = vector.broadcast %1194 : vector<2x1xf32> to vector<2x32xf32>
    %1247 = arith.mulf %1246, %1245 : vector<2x32xf32>
    %1248 = vector.extract_strided_slice %0 {offsets = [10, 0], sizes = [2, 1], strides = [1, 1]} : vector<16x1xf32> to vector<2x1xf32>
    %1249 = vector.extract_strided_slice %963 {offsets = [10, 0], sizes = [2, 32], strides = [1, 1]} : vector<16x32xf32> to vector<2x32xf32>
    %1250 = vector.extract_strided_slice %970 {offsets = [10, 0], sizes = [2, 32], strides = [1, 1]} : vector<16x32xf32> to vector<2x32xf32>
    %1251 = vector.extract_strided_slice %977 {offsets = [10, 0], sizes = [2, 32], strides = [1, 1]} : vector<16x32xf32> to vector<2x32xf32>
    %c0_635 = arith.constant 0 : index
    %c0_636 = arith.constant 0 : index
    %c0_637 = arith.constant 0 : index
    %1252 = vector.load %arg13[%c0_635, %c0_636, %c0_637] : memref<3x32x32xf32, #tpu.memory_space<vmem>>, vector<1x32x32xf32>
    %1253 = vector.shape_cast %1252 : vector<1x32x32xf32> to vector<32x32xf32>
    %cst_638 = arith.constant dense<0.000000e+00> : vector<2x32xf32>
    %1254 = tpu.matmul %1245, %1253, %cst_638 {dimension_numbers = #tpu.dot_dimension_numbers<[1], [0], [0], [1], [0, 0, 1, 1], [], []>} : vector<2x32xf32>, vector<32x32xf32>, vector<2x32xf32> -> vector<2x32xf32>
    %c0_639 = arith.constant 0 : index
    %c0_640 = arith.constant 0 : index
    %c0_641 = arith.constant 0 : index
    %1255 = vector.load %arg14[%c0_639, %c0_640, %c0_641] : memref<3x1x32xf32, #tpu.memory_space<vmem>>, vector<1x1x32xf32>
    %1256 = vector.shape_cast %1255 : vector<1x1x32xf32> to vector<1x32xf32>
    %1257 = vector.broadcast %1256 : vector<1x32xf32> to vector<2x32xf32>
    %1258 = arith.addf %1254, %1257 : vector<2x32xf32>
    %c1_642 = arith.constant 1 : index
    %c0_643 = arith.constant 0 : index
    %c0_644 = arith.constant 0 : index
    %1259 = vector.load %arg13[%c1_642, %c0_643, %c0_644] : memref<3x32x32xf32, #tpu.memory_space<vmem>>, vector<1x32x32xf32>
    %1260 = vector.shape_cast %1259 : vector<1x32x32xf32> to vector<32x32xf32>
    %cst_645 = arith.constant dense<0.000000e+00> : vector<2x32xf32>
    %1261 = tpu.matmul %1245, %1260, %cst_645 {dimension_numbers = #tpu.dot_dimension_numbers<[1], [0], [0], [1], [0, 0, 1, 1], [], []>} : vector<2x32xf32>, vector<32x32xf32>, vector<2x32xf32> -> vector<2x32xf32>
    %c1_646 = arith.constant 1 : index
    %c0_647 = arith.constant 0 : index
    %c0_648 = arith.constant 0 : index
    %1262 = vector.load %arg14[%c1_646, %c0_647, %c0_648] : memref<3x1x32xf32, #tpu.memory_space<vmem>>, vector<1x1x32xf32>
    %1263 = vector.shape_cast %1262 : vector<1x1x32xf32> to vector<1x32xf32>
    %1264 = vector.broadcast %1263 : vector<1x32xf32> to vector<2x32xf32>
    %1265 = arith.addf %1261, %1264 : vector<2x32xf32>
    %c2_649 = arith.constant 2 : index
    %c0_650 = arith.constant 0 : index
    %c0_651 = arith.constant 0 : index
    %1266 = vector.load %arg13[%c2_649, %c0_650, %c0_651] : memref<3x32x32xf32, #tpu.memory_space<vmem>>, vector<1x32x32xf32>
    %1267 = vector.shape_cast %1266 : vector<1x32x32xf32> to vector<32x32xf32>
    %cst_652 = arith.constant dense<0.000000e+00> : vector<2x32xf32>
    %1268 = tpu.matmul %1245, %1267, %cst_652 {dimension_numbers = #tpu.dot_dimension_numbers<[1], [0], [0], [1], [0, 0, 1, 1], [], []>} : vector<2x32xf32>, vector<32x32xf32>, vector<2x32xf32> -> vector<2x32xf32>
    %c2_653 = arith.constant 2 : index
    %c0_654 = arith.constant 0 : index
    %c0_655 = arith.constant 0 : index
    %1269 = vector.load %arg14[%c2_653, %c0_654, %c0_655] : memref<3x1x32xf32, #tpu.memory_space<vmem>>, vector<1x1x32xf32>
    %1270 = vector.shape_cast %1269 : vector<1x1x32xf32> to vector<1x32xf32>
    %1271 = vector.broadcast %1270 : vector<1x32xf32> to vector<2x32xf32>
    %1272 = arith.addf %1268, %1271 : vector<2x32xf32>
    %1273 = arith.addf %1249, %1258 : vector<2x32xf32>
    %1274 = arith.negf %1273 : vector<2x32xf32>
    %1275 = math.exp %1274 : vector<2x32xf32>
    %cst_656 = arith.constant 1.000000e+00 : f32
    %1276 = vector.broadcast %cst_656 : f32 to vector<2x32xf32>
    %1277 = arith.addf %1276, %1275 : vector<2x32xf32>
    %1278 = arith.divf %1276, %1277 : vector<2x32xf32>
    %1279 = arith.addf %1250, %1265 : vector<2x32xf32>
    %1280 = arith.negf %1279 : vector<2x32xf32>
    %1281 = math.exp %1280 : vector<2x32xf32>
    %cst_657 = arith.constant 1.000000e+00 : f32
    %1282 = vector.broadcast %cst_657 : f32 to vector<2x32xf32>
    %1283 = arith.addf %1282, %1281 : vector<2x32xf32>
    %1284 = arith.divf %1282, %1283 : vector<2x32xf32>
    %1285 = arith.mulf %1278, %1272 : vector<2x32xf32>
    %1286 = arith.addf %1251, %1285 : vector<2x32xf32>
    %1287 = math.tanh %1286 : vector<2x32xf32>
    %cst_658 = arith.constant 1.000000e+00 : f32
    %1288 = vector.broadcast %cst_658 : f32 to vector<2x32xf32>
    %1289 = arith.subf %1288, %1284 : vector<2x32xf32>
    %1290 = arith.mulf %1289, %1287 : vector<2x32xf32>
    %1291 = arith.mulf %1284, %1245 : vector<2x32xf32>
    %1292 = arith.addf %1290, %1291 : vector<2x32xf32>
    %1293 = vector.broadcast %1248 : vector<2x1xf32> to vector<2x32xf32>
    %1294 = arith.mulf %1293, %1292 : vector<2x32xf32>
    %cst_659 = arith.constant 1.000000e+00 : f32
    %1295 = vector.broadcast %cst_659 : f32 to vector<2x1xf32>
    %1296 = arith.subf %1295, %1248 : vector<2x1xf32>
    %1297 = vector.broadcast %1296 : vector<2x1xf32> to vector<2x32xf32>
    %1298 = arith.mulf %1297, %1245 : vector<2x32xf32>
    %1299 = arith.addf %1294, %1298 : vector<2x32xf32>
    %1300 = vector.broadcast %1248 : vector<2x1xf32> to vector<2x32xf32>
    %1301 = arith.mulf %1300, %1299 : vector<2x32xf32>
    %1302 = vector.extract_strided_slice %0 {offsets = [12, 0], sizes = [2, 1], strides = [1, 1]} : vector<16x1xf32> to vector<2x1xf32>
    %1303 = vector.extract_strided_slice %963 {offsets = [12, 0], sizes = [2, 32], strides = [1, 1]} : vector<16x32xf32> to vector<2x32xf32>
    %1304 = vector.extract_strided_slice %970 {offsets = [12, 0], sizes = [2, 32], strides = [1, 1]} : vector<16x32xf32> to vector<2x32xf32>
    %1305 = vector.extract_strided_slice %977 {offsets = [12, 0], sizes = [2, 32], strides = [1, 1]} : vector<16x32xf32> to vector<2x32xf32>
    %c0_660 = arith.constant 0 : index
    %c0_661 = arith.constant 0 : index
    %c0_662 = arith.constant 0 : index
    %1306 = vector.load %arg13[%c0_660, %c0_661, %c0_662] : memref<3x32x32xf32, #tpu.memory_space<vmem>>, vector<1x32x32xf32>
    %1307 = vector.shape_cast %1306 : vector<1x32x32xf32> to vector<32x32xf32>
    %cst_663 = arith.constant dense<0.000000e+00> : vector<2x32xf32>
    %1308 = tpu.matmul %1299, %1307, %cst_663 {dimension_numbers = #tpu.dot_dimension_numbers<[1], [0], [0], [1], [0, 0, 1, 1], [], []>} : vector<2x32xf32>, vector<32x32xf32>, vector<2x32xf32> -> vector<2x32xf32>
    %c0_664 = arith.constant 0 : index
    %c0_665 = arith.constant 0 : index
    %c0_666 = arith.constant 0 : index
    %1309 = vector.load %arg14[%c0_664, %c0_665, %c0_666] : memref<3x1x32xf32, #tpu.memory_space<vmem>>, vector<1x1x32xf32>
    %1310 = vector.shape_cast %1309 : vector<1x1x32xf32> to vector<1x32xf32>
    %1311 = vector.broadcast %1310 : vector<1x32xf32> to vector<2x32xf32>
    %1312 = arith.addf %1308, %1311 : vector<2x32xf32>
    %c1_667 = arith.constant 1 : index
    %c0_668 = arith.constant 0 : index
    %c0_669 = arith.constant 0 : index
    %1313 = vector.load %arg13[%c1_667, %c0_668, %c0_669] : memref<3x32x32xf32, #tpu.memory_space<vmem>>, vector<1x32x32xf32>
    %1314 = vector.shape_cast %1313 : vector<1x32x32xf32> to vector<32x32xf32>
    %cst_670 = arith.constant dense<0.000000e+00> : vector<2x32xf32>
    %1315 = tpu.matmul %1299, %1314, %cst_670 {dimension_numbers = #tpu.dot_dimension_numbers<[1], [0], [0], [1], [0, 0, 1, 1], [], []>} : vector<2x32xf32>, vector<32x32xf32>, vector<2x32xf32> -> vector<2x32xf32>
    %c1_671 = arith.constant 1 : index
    %c0_672 = arith.constant 0 : index
    %c0_673 = arith.constant 0 : index
    %1316 = vector.load %arg14[%c1_671, %c0_672, %c0_673] : memref<3x1x32xf32, #tpu.memory_space<vmem>>, vector<1x1x32xf32>
    %1317 = vector.shape_cast %1316 : vector<1x1x32xf32> to vector<1x32xf32>
    %1318 = vector.broadcast %1317 : vector<1x32xf32> to vector<2x32xf32>
    %1319 = arith.addf %1315, %1318 : vector<2x32xf32>
    %c2_674 = arith.constant 2 : index
    %c0_675 = arith.constant 0 : index
    %c0_676 = arith.constant 0 : index
    %1320 = vector.load %arg13[%c2_674, %c0_675, %c0_676] : memref<3x32x32xf32, #tpu.memory_space<vmem>>, vector<1x32x32xf32>
    %1321 = vector.shape_cast %1320 : vector<1x32x32xf32> to vector<32x32xf32>
    %cst_677 = arith.constant dense<0.000000e+00> : vector<2x32xf32>
    %1322 = tpu.matmul %1299, %1321, %cst_677 {dimension_numbers = #tpu.dot_dimension_numbers<[1], [0], [0], [1], [0, 0, 1, 1], [], []>} : vector<2x32xf32>, vector<32x32xf32>, vector<2x32xf32> -> vector<2x32xf32>
    %c2_678 = arith.constant 2 : index
    %c0_679 = arith.constant 0 : index
    %c0_680 = arith.constant 0 : index
    %1323 = vector.load %arg14[%c2_678, %c0_679, %c0_680] : memref<3x1x32xf32, #tpu.memory_space<vmem>>, vector<1x1x32xf32>
    %1324 = vector.shape_cast %1323 : vector<1x1x32xf32> to vector<1x32xf32>
    %1325 = vector.broadcast %1324 : vector<1x32xf32> to vector<2x32xf32>
    %1326 = arith.addf %1322, %1325 : vector<2x32xf32>
    %1327 = arith.addf %1303, %1312 : vector<2x32xf32>
    %1328 = arith.negf %1327 : vector<2x32xf32>
    %1329 = math.exp %1328 : vector<2x32xf32>
    %cst_681 = arith.constant 1.000000e+00 : f32
    %1330 = vector.broadcast %cst_681 : f32 to vector<2x32xf32>
    %1331 = arith.addf %1330, %1329 : vector<2x32xf32>
    %1332 = arith.divf %1330, %1331 : vector<2x32xf32>
    %1333 = arith.addf %1304, %1319 : vector<2x32xf32>
    %1334 = arith.negf %1333 : vector<2x32xf32>
    %1335 = math.exp %1334 : vector<2x32xf32>
    %cst_682 = arith.constant 1.000000e+00 : f32
    %1336 = vector.broadcast %cst_682 : f32 to vector<2x32xf32>
    %1337 = arith.addf %1336, %1335 : vector<2x32xf32>
    %1338 = arith.divf %1336, %1337 : vector<2x32xf32>
    %1339 = arith.mulf %1332, %1326 : vector<2x32xf32>
    %1340 = arith.addf %1305, %1339 : vector<2x32xf32>
    %1341 = math.tanh %1340 : vector<2x32xf32>
    %cst_683 = arith.constant 1.000000e+00 : f32
    %1342 = vector.broadcast %cst_683 : f32 to vector<2x32xf32>
    %1343 = arith.subf %1342, %1338 : vector<2x32xf32>
    %1344 = arith.mulf %1343, %1341 : vector<2x32xf32>
    %1345 = arith.mulf %1338, %1299 : vector<2x32xf32>
    %1346 = arith.addf %1344, %1345 : vector<2x32xf32>
    %1347 = vector.broadcast %1302 : vector<2x1xf32> to vector<2x32xf32>
    %1348 = arith.mulf %1347, %1346 : vector<2x32xf32>
    %cst_684 = arith.constant 1.000000e+00 : f32
    %1349 = vector.broadcast %cst_684 : f32 to vector<2x1xf32>
    %1350 = arith.subf %1349, %1302 : vector<2x1xf32>
    %1351 = vector.broadcast %1350 : vector<2x1xf32> to vector<2x32xf32>
    %1352 = arith.mulf %1351, %1299 : vector<2x32xf32>
    %1353 = arith.addf %1348, %1352 : vector<2x32xf32>
    %1354 = vector.broadcast %1302 : vector<2x1xf32> to vector<2x32xf32>
    %1355 = arith.mulf %1354, %1353 : vector<2x32xf32>
    %1356 = vector.extract_strided_slice %0 {offsets = [14, 0], sizes = [2, 1], strides = [1, 1]} : vector<16x1xf32> to vector<2x1xf32>
    %1357 = vector.extract_strided_slice %963 {offsets = [14, 0], sizes = [2, 32], strides = [1, 1]} : vector<16x32xf32> to vector<2x32xf32>
    %1358 = vector.extract_strided_slice %970 {offsets = [14, 0], sizes = [2, 32], strides = [1, 1]} : vector<16x32xf32> to vector<2x32xf32>
    %1359 = vector.extract_strided_slice %977 {offsets = [14, 0], sizes = [2, 32], strides = [1, 1]} : vector<16x32xf32> to vector<2x32xf32>
    %c0_685 = arith.constant 0 : index
    %c0_686 = arith.constant 0 : index
    %c0_687 = arith.constant 0 : index
    %1360 = vector.load %arg13[%c0_685, %c0_686, %c0_687] : memref<3x32x32xf32, #tpu.memory_space<vmem>>, vector<1x32x32xf32>
    %1361 = vector.shape_cast %1360 : vector<1x32x32xf32> to vector<32x32xf32>
    %cst_688 = arith.constant dense<0.000000e+00> : vector<2x32xf32>
    %1362 = tpu.matmul %1353, %1361, %cst_688 {dimension_numbers = #tpu.dot_dimension_numbers<[1], [0], [0], [1], [0, 0, 1, 1], [], []>} : vector<2x32xf32>, vector<32x32xf32>, vector<2x32xf32> -> vector<2x32xf32>
    %c0_689 = arith.constant 0 : index
    %c0_690 = arith.constant 0 : index
    %c0_691 = arith.constant 0 : index
    %1363 = vector.load %arg14[%c0_689, %c0_690, %c0_691] : memref<3x1x32xf32, #tpu.memory_space<vmem>>, vector<1x1x32xf32>
    %1364 = vector.shape_cast %1363 : vector<1x1x32xf32> to vector<1x32xf32>
    %1365 = vector.broadcast %1364 : vector<1x32xf32> to vector<2x32xf32>
    %1366 = arith.addf %1362, %1365 : vector<2x32xf32>
    %c1_692 = arith.constant 1 : index
    %c0_693 = arith.constant 0 : index
    %c0_694 = arith.constant 0 : index
    %1367 = vector.load %arg13[%c1_692, %c0_693, %c0_694] : memref<3x32x32xf32, #tpu.memory_space<vmem>>, vector<1x32x32xf32>
    %1368 = vector.shape_cast %1367 : vector<1x32x32xf32> to vector<32x32xf32>
    %cst_695 = arith.constant dense<0.000000e+00> : vector<2x32xf32>
    %1369 = tpu.matmul %1353, %1368, %cst_695 {dimension_numbers = #tpu.dot_dimension_numbers<[1], [0], [0], [1], [0, 0, 1, 1], [], []>} : vector<2x32xf32>, vector<32x32xf32>, vector<2x32xf32> -> vector<2x32xf32>
    %c1_696 = arith.constant 1 : index
    %c0_697 = arith.constant 0 : index
    %c0_698 = arith.constant 0 : index
    %1370 = vector.load %arg14[%c1_696, %c0_697, %c0_698] : memref<3x1x32xf32, #tpu.memory_space<vmem>>, vector<1x1x32xf32>
    %1371 = vector.shape_cast %1370 : vector<1x1x32xf32> to vector<1x32xf32>
    %1372 = vector.broadcast %1371 : vector<1x32xf32> to vector<2x32xf32>
    %1373 = arith.addf %1369, %1372 : vector<2x32xf32>
    %c2_699 = arith.constant 2 : index
    %c0_700 = arith.constant 0 : index
    %c0_701 = arith.constant 0 : index
    %1374 = vector.load %arg13[%c2_699, %c0_700, %c0_701] : memref<3x32x32xf32, #tpu.memory_space<vmem>>, vector<1x32x32xf32>
    %1375 = vector.shape_cast %1374 : vector<1x32x32xf32> to vector<32x32xf32>
    %cst_702 = arith.constant dense<0.000000e+00> : vector<2x32xf32>
    %1376 = tpu.matmul %1353, %1375, %cst_702 {dimension_numbers = #tpu.dot_dimension_numbers<[1], [0], [0], [1], [0, 0, 1, 1], [], []>} : vector<2x32xf32>, vector<32x32xf32>, vector<2x32xf32> -> vector<2x32xf32>
    %c2_703 = arith.constant 2 : index
    %c0_704 = arith.constant 0 : index
    %c0_705 = arith.constant 0 : index
    %1377 = vector.load %arg14[%c2_703, %c0_704, %c0_705] : memref<3x1x32xf32, #tpu.memory_space<vmem>>, vector<1x1x32xf32>
    %1378 = vector.shape_cast %1377 : vector<1x1x32xf32> to vector<1x32xf32>
    %1379 = vector.broadcast %1378 : vector<1x32xf32> to vector<2x32xf32>
    %1380 = arith.addf %1376, %1379 : vector<2x32xf32>
    %1381 = arith.addf %1357, %1366 : vector<2x32xf32>
    %1382 = arith.negf %1381 : vector<2x32xf32>
    %1383 = math.exp %1382 : vector<2x32xf32>
    %cst_706 = arith.constant 1.000000e+00 : f32
    %1384 = vector.broadcast %cst_706 : f32 to vector<2x32xf32>
    %1385 = arith.addf %1384, %1383 : vector<2x32xf32>
    %1386 = arith.divf %1384, %1385 : vector<2x32xf32>
    %1387 = arith.addf %1358, %1373 : vector<2x32xf32>
    %1388 = arith.negf %1387 : vector<2x32xf32>
    %1389 = math.exp %1388 : vector<2x32xf32>
    %cst_707 = arith.constant 1.000000e+00 : f32
    %1390 = vector.broadcast %cst_707 : f32 to vector<2x32xf32>
    %1391 = arith.addf %1390, %1389 : vector<2x32xf32>
    %1392 = arith.divf %1390, %1391 : vector<2x32xf32>
    %1393 = arith.mulf %1386, %1380 : vector<2x32xf32>
    %1394 = arith.addf %1359, %1393 : vector<2x32xf32>
    %1395 = math.tanh %1394 : vector<2x32xf32>
    %cst_708 = arith.constant 1.000000e+00 : f32
    %1396 = vector.broadcast %cst_708 : f32 to vector<2x32xf32>
    %1397 = arith.subf %1396, %1392 : vector<2x32xf32>
    %1398 = arith.mulf %1397, %1395 : vector<2x32xf32>
    %1399 = arith.mulf %1392, %1353 : vector<2x32xf32>
    %1400 = arith.addf %1398, %1399 : vector<2x32xf32>
    %1401 = vector.broadcast %1356 : vector<2x1xf32> to vector<2x32xf32>
    %1402 = arith.mulf %1401, %1400 : vector<2x32xf32>
    %cst_709 = arith.constant 1.000000e+00 : f32
    %1403 = vector.broadcast %cst_709 : f32 to vector<2x1xf32>
    %1404 = arith.subf %1403, %1356 : vector<2x1xf32>
    %1405 = vector.broadcast %1404 : vector<2x1xf32> to vector<2x32xf32>
    %1406 = arith.mulf %1405, %1353 : vector<2x32xf32>
    %1407 = arith.addf %1402, %1406 : vector<2x32xf32>
    %1408 = vector.broadcast %1356 : vector<2x1xf32> to vector<2x32xf32>
    %1409 = arith.mulf %1408, %1407 : vector<2x32xf32>
    %1410 = tpu.concatenate %1031, %1085, %1139, %1193, %1247, %1301, %1355, %1409 in 0 : vector<2x32xf32>, vector<2x32xf32>, vector<2x32xf32>, vector<2x32xf32>, vector<2x32xf32>, vector<2x32xf32>, vector<2x32xf32>, vector<2x32xf32> -> vector<16x32xf32>
    %c0_710 = arith.constant 0 : index
    %c0_711 = arith.constant 0 : index
    %c0_712 = arith.constant 0 : index
    %1411 = vector.load %arg15[%c0_710, %c0_711, %c0_712] : memref<3x32x32xf32, #tpu.memory_space<vmem>>, vector<1x32x32xf32>
    %1412 = vector.shape_cast %1411 : vector<1x32x32xf32> to vector<32x32xf32>
    %cst_713 = arith.constant dense<0.000000e+00> : vector<16x32xf32>
    %1413 = tpu.matmul %1410, %1412, %cst_713 {dimension_numbers = #tpu.dot_dimension_numbers<[1], [0], [0], [1], [0, 0, 1, 1], [], []>} : vector<16x32xf32>, vector<32x32xf32>, vector<16x32xf32> -> vector<16x32xf32>
    %c0_714 = arith.constant 0 : index
    %c0_715 = arith.constant 0 : index
    %c0_716 = arith.constant 0 : index
    %1414 = vector.load %arg16[%c0_714, %c0_715, %c0_716] : memref<3x1x32xf32, #tpu.memory_space<vmem>>, vector<1x1x32xf32>
    %1415 = vector.shape_cast %1414 : vector<1x1x32xf32> to vector<1x32xf32>
    %1416 = vector.broadcast %1415 : vector<1x32xf32> to vector<16x32xf32>
    %1417 = arith.addf %1413, %1416 : vector<16x32xf32>
    %c1_717 = arith.constant 1 : index
    %c0_718 = arith.constant 0 : index
    %c0_719 = arith.constant 0 : index
    %1418 = vector.load %arg15[%c1_717, %c0_718, %c0_719] : memref<3x32x32xf32, #tpu.memory_space<vmem>>, vector<1x32x32xf32>
    %1419 = vector.shape_cast %1418 : vector<1x32x32xf32> to vector<32x32xf32>
    %cst_720 = arith.constant dense<0.000000e+00> : vector<16x32xf32>
    %1420 = tpu.matmul %1410, %1419, %cst_720 {dimension_numbers = #tpu.dot_dimension_numbers<[1], [0], [0], [1], [0, 0, 1, 1], [], []>} : vector<16x32xf32>, vector<32x32xf32>, vector<16x32xf32> -> vector<16x32xf32>
    %c1_721 = arith.constant 1 : index
    %c0_722 = arith.constant 0 : index
    %c0_723 = arith.constant 0 : index
    %1421 = vector.load %arg16[%c1_721, %c0_722, %c0_723] : memref<3x1x32xf32, #tpu.memory_space<vmem>>, vector<1x1x32xf32>
    %1422 = vector.shape_cast %1421 : vector<1x1x32xf32> to vector<1x32xf32>
    %1423 = vector.broadcast %1422 : vector<1x32xf32> to vector<16x32xf32>
    %1424 = arith.addf %1420, %1423 : vector<16x32xf32>
    %c2_724 = arith.constant 2 : index
    %c0_725 = arith.constant 0 : index
    %c0_726 = arith.constant 0 : index
    %1425 = vector.load %arg15[%c2_724, %c0_725, %c0_726] : memref<3x32x32xf32, #tpu.memory_space<vmem>>, vector<1x32x32xf32>
    %1426 = vector.shape_cast %1425 : vector<1x32x32xf32> to vector<32x32xf32>
    %cst_727 = arith.constant dense<0.000000e+00> : vector<16x32xf32>
    %1427 = tpu.matmul %1410, %1426, %cst_727 {dimension_numbers = #tpu.dot_dimension_numbers<[1], [0], [0], [1], [0, 0, 1, 1], [], []>} : vector<16x32xf32>, vector<32x32xf32>, vector<16x32xf32> -> vector<16x32xf32>
    %c2_728 = arith.constant 2 : index
    %c0_729 = arith.constant 0 : index
    %c0_730 = arith.constant 0 : index
    %1428 = vector.load %arg16[%c2_728, %c0_729, %c0_730] : memref<3x1x32xf32, #tpu.memory_space<vmem>>, vector<1x1x32xf32>
    %1429 = vector.shape_cast %1428 : vector<1x1x32xf32> to vector<1x32xf32>
    %1430 = vector.broadcast %1429 : vector<1x32xf32> to vector<16x32xf32>
    %1431 = arith.addf %1427, %1430 : vector<16x32xf32>
    %1432 = vector.extract_strided_slice %0 {offsets = [0, 0], sizes = [2, 1], strides = [1, 1]} : vector<16x1xf32> to vector<2x1xf32>
    %1433 = vector.extract_strided_slice %1417 {offsets = [0, 0], sizes = [2, 32], strides = [1, 1]} : vector<16x32xf32> to vector<2x32xf32>
    %1434 = vector.extract_strided_slice %1424 {offsets = [0, 0], sizes = [2, 32], strides = [1, 1]} : vector<16x32xf32> to vector<2x32xf32>
    %1435 = vector.extract_strided_slice %1431 {offsets = [0, 0], sizes = [2, 32], strides = [1, 1]} : vector<16x32xf32> to vector<2x32xf32>
    %c0_731 = arith.constant 0 : index
    %c0_732 = arith.constant 0 : index
    %c0_733 = arith.constant 0 : index
    %1436 = vector.load %arg17[%c0_731, %c0_732, %c0_733] : memref<3x32x32xf32, #tpu.memory_space<vmem>>, vector<1x32x32xf32>
    %1437 = vector.shape_cast %1436 : vector<1x32x32xf32> to vector<32x32xf32>
    %cst_734 = arith.constant dense<0.000000e+00> : vector<2x32xf32>
    %1438 = tpu.matmul %956, %1437, %cst_734 {dimension_numbers = #tpu.dot_dimension_numbers<[1], [0], [0], [1], [0, 0, 1, 1], [], []>} : vector<2x32xf32>, vector<32x32xf32>, vector<2x32xf32> -> vector<2x32xf32>
    %c0_735 = arith.constant 0 : index
    %c0_736 = arith.constant 0 : index
    %c0_737 = arith.constant 0 : index
    %1439 = vector.load %arg18[%c0_735, %c0_736, %c0_737] : memref<3x1x32xf32, #tpu.memory_space<vmem>>, vector<1x1x32xf32>
    %1440 = vector.shape_cast %1439 : vector<1x1x32xf32> to vector<1x32xf32>
    %1441 = vector.broadcast %1440 : vector<1x32xf32> to vector<2x32xf32>
    %1442 = arith.addf %1438, %1441 : vector<2x32xf32>
    %c1_738 = arith.constant 1 : index
    %c0_739 = arith.constant 0 : index
    %c0_740 = arith.constant 0 : index
    %1443 = vector.load %arg17[%c1_738, %c0_739, %c0_740] : memref<3x32x32xf32, #tpu.memory_space<vmem>>, vector<1x32x32xf32>
    %1444 = vector.shape_cast %1443 : vector<1x32x32xf32> to vector<32x32xf32>
    %cst_741 = arith.constant dense<0.000000e+00> : vector<2x32xf32>
    %1445 = tpu.matmul %956, %1444, %cst_741 {dimension_numbers = #tpu.dot_dimension_numbers<[1], [0], [0], [1], [0, 0, 1, 1], [], []>} : vector<2x32xf32>, vector<32x32xf32>, vector<2x32xf32> -> vector<2x32xf32>
    %c1_742 = arith.constant 1 : index
    %c0_743 = arith.constant 0 : index
    %c0_744 = arith.constant 0 : index
    %1446 = vector.load %arg18[%c1_742, %c0_743, %c0_744] : memref<3x1x32xf32, #tpu.memory_space<vmem>>, vector<1x1x32xf32>
    %1447 = vector.shape_cast %1446 : vector<1x1x32xf32> to vector<1x32xf32>
    %1448 = vector.broadcast %1447 : vector<1x32xf32> to vector<2x32xf32>
    %1449 = arith.addf %1445, %1448 : vector<2x32xf32>
    %c2_745 = arith.constant 2 : index
    %c0_746 = arith.constant 0 : index
    %c0_747 = arith.constant 0 : index
    %1450 = vector.load %arg17[%c2_745, %c0_746, %c0_747] : memref<3x32x32xf32, #tpu.memory_space<vmem>>, vector<1x32x32xf32>
    %1451 = vector.shape_cast %1450 : vector<1x32x32xf32> to vector<32x32xf32>
    %cst_748 = arith.constant dense<0.000000e+00> : vector<2x32xf32>
    %1452 = tpu.matmul %956, %1451, %cst_748 {dimension_numbers = #tpu.dot_dimension_numbers<[1], [0], [0], [1], [0, 0, 1, 1], [], []>} : vector<2x32xf32>, vector<32x32xf32>, vector<2x32xf32> -> vector<2x32xf32>
    %c2_749 = arith.constant 2 : index
    %c0_750 = arith.constant 0 : index
    %c0_751 = arith.constant 0 : index
    %1453 = vector.load %arg18[%c2_749, %c0_750, %c0_751] : memref<3x1x32xf32, #tpu.memory_space<vmem>>, vector<1x1x32xf32>
    %1454 = vector.shape_cast %1453 : vector<1x1x32xf32> to vector<1x32xf32>
    %1455 = vector.broadcast %1454 : vector<1x32xf32> to vector<2x32xf32>
    %1456 = arith.addf %1452, %1455 : vector<2x32xf32>
    %1457 = arith.addf %1433, %1442 : vector<2x32xf32>
    %1458 = arith.negf %1457 : vector<2x32xf32>
    %1459 = math.exp %1458 : vector<2x32xf32>
    %cst_752 = arith.constant 1.000000e+00 : f32
    %1460 = vector.broadcast %cst_752 : f32 to vector<2x32xf32>
    %1461 = arith.addf %1460, %1459 : vector<2x32xf32>
    %1462 = arith.divf %1460, %1461 : vector<2x32xf32>
    %1463 = arith.addf %1434, %1449 : vector<2x32xf32>
    %1464 = arith.negf %1463 : vector<2x32xf32>
    %1465 = math.exp %1464 : vector<2x32xf32>
    %cst_753 = arith.constant 1.000000e+00 : f32
    %1466 = vector.broadcast %cst_753 : f32 to vector<2x32xf32>
    %1467 = arith.addf %1466, %1465 : vector<2x32xf32>
    %1468 = arith.divf %1466, %1467 : vector<2x32xf32>
    %1469 = arith.mulf %1462, %1456 : vector<2x32xf32>
    %1470 = arith.addf %1435, %1469 : vector<2x32xf32>
    %1471 = math.tanh %1470 : vector<2x32xf32>
    %cst_754 = arith.constant 1.000000e+00 : f32
    %1472 = vector.broadcast %cst_754 : f32 to vector<2x32xf32>
    %1473 = arith.subf %1472, %1468 : vector<2x32xf32>
    %1474 = arith.mulf %1473, %1471 : vector<2x32xf32>
    %1475 = arith.mulf %1468, %956 : vector<2x32xf32>
    %1476 = arith.addf %1474, %1475 : vector<2x32xf32>
    %1477 = vector.broadcast %1432 : vector<2x1xf32> to vector<2x32xf32>
    %1478 = arith.mulf %1477, %1476 : vector<2x32xf32>
    %cst_755 = arith.constant 1.000000e+00 : f32
    %1479 = vector.broadcast %cst_755 : f32 to vector<2x1xf32>
    %1480 = arith.subf %1479, %1432 : vector<2x1xf32>
    %1481 = vector.broadcast %1480 : vector<2x1xf32> to vector<2x32xf32>
    %1482 = arith.mulf %1481, %956 : vector<2x32xf32>
    %1483 = arith.addf %1478, %1482 : vector<2x32xf32>
    %1484 = vector.broadcast %1432 : vector<2x1xf32> to vector<2x32xf32>
    %1485 = arith.mulf %1484, %1483 : vector<2x32xf32>
    %1486 = vector.extract_strided_slice %0 {offsets = [2, 0], sizes = [2, 1], strides = [1, 1]} : vector<16x1xf32> to vector<2x1xf32>
    %1487 = vector.extract_strided_slice %1417 {offsets = [2, 0], sizes = [2, 32], strides = [1, 1]} : vector<16x32xf32> to vector<2x32xf32>
    %1488 = vector.extract_strided_slice %1424 {offsets = [2, 0], sizes = [2, 32], strides = [1, 1]} : vector<16x32xf32> to vector<2x32xf32>
    %1489 = vector.extract_strided_slice %1431 {offsets = [2, 0], sizes = [2, 32], strides = [1, 1]} : vector<16x32xf32> to vector<2x32xf32>
    %c0_756 = arith.constant 0 : index
    %c0_757 = arith.constant 0 : index
    %c0_758 = arith.constant 0 : index
    %1490 = vector.load %arg17[%c0_756, %c0_757, %c0_758] : memref<3x32x32xf32, #tpu.memory_space<vmem>>, vector<1x32x32xf32>
    %1491 = vector.shape_cast %1490 : vector<1x32x32xf32> to vector<32x32xf32>
    %cst_759 = arith.constant dense<0.000000e+00> : vector<2x32xf32>
    %1492 = tpu.matmul %1483, %1491, %cst_759 {dimension_numbers = #tpu.dot_dimension_numbers<[1], [0], [0], [1], [0, 0, 1, 1], [], []>} : vector<2x32xf32>, vector<32x32xf32>, vector<2x32xf32> -> vector<2x32xf32>
    %c0_760 = arith.constant 0 : index
    %c0_761 = arith.constant 0 : index
    %c0_762 = arith.constant 0 : index
    %1493 = vector.load %arg18[%c0_760, %c0_761, %c0_762] : memref<3x1x32xf32, #tpu.memory_space<vmem>>, vector<1x1x32xf32>
    %1494 = vector.shape_cast %1493 : vector<1x1x32xf32> to vector<1x32xf32>
    %1495 = vector.broadcast %1494 : vector<1x32xf32> to vector<2x32xf32>
    %1496 = arith.addf %1492, %1495 : vector<2x32xf32>
    %c1_763 = arith.constant 1 : index
    %c0_764 = arith.constant 0 : index
    %c0_765 = arith.constant 0 : index
    %1497 = vector.load %arg17[%c1_763, %c0_764, %c0_765] : memref<3x32x32xf32, #tpu.memory_space<vmem>>, vector<1x32x32xf32>
    %1498 = vector.shape_cast %1497 : vector<1x32x32xf32> to vector<32x32xf32>
    %cst_766 = arith.constant dense<0.000000e+00> : vector<2x32xf32>
    %1499 = tpu.matmul %1483, %1498, %cst_766 {dimension_numbers = #tpu.dot_dimension_numbers<[1], [0], [0], [1], [0, 0, 1, 1], [], []>} : vector<2x32xf32>, vector<32x32xf32>, vector<2x32xf32> -> vector<2x32xf32>
    %c1_767 = arith.constant 1 : index
    %c0_768 = arith.constant 0 : index
    %c0_769 = arith.constant 0 : index
    %1500 = vector.load %arg18[%c1_767, %c0_768, %c0_769] : memref<3x1x32xf32, #tpu.memory_space<vmem>>, vector<1x1x32xf32>
    %1501 = vector.shape_cast %1500 : vector<1x1x32xf32> to vector<1x32xf32>
    %1502 = vector.broadcast %1501 : vector<1x32xf32> to vector<2x32xf32>
    %1503 = arith.addf %1499, %1502 : vector<2x32xf32>
    %c2_770 = arith.constant 2 : index
    %c0_771 = arith.constant 0 : index
    %c0_772 = arith.constant 0 : index
    %1504 = vector.load %arg17[%c2_770, %c0_771, %c0_772] : memref<3x32x32xf32, #tpu.memory_space<vmem>>, vector<1x32x32xf32>
    %1505 = vector.shape_cast %1504 : vector<1x32x32xf32> to vector<32x32xf32>
    %cst_773 = arith.constant dense<0.000000e+00> : vector<2x32xf32>
    %1506 = tpu.matmul %1483, %1505, %cst_773 {dimension_numbers = #tpu.dot_dimension_numbers<[1], [0], [0], [1], [0, 0, 1, 1], [], []>} : vector<2x32xf32>, vector<32x32xf32>, vector<2x32xf32> -> vector<2x32xf32>
    %c2_774 = arith.constant 2 : index
    %c0_775 = arith.constant 0 : index
    %c0_776 = arith.constant 0 : index
    %1507 = vector.load %arg18[%c2_774, %c0_775, %c0_776] : memref<3x1x32xf32, #tpu.memory_space<vmem>>, vector<1x1x32xf32>
    %1508 = vector.shape_cast %1507 : vector<1x1x32xf32> to vector<1x32xf32>
    %1509 = vector.broadcast %1508 : vector<1x32xf32> to vector<2x32xf32>
    %1510 = arith.addf %1506, %1509 : vector<2x32xf32>
    %1511 = arith.addf %1487, %1496 : vector<2x32xf32>
    %1512 = arith.negf %1511 : vector<2x32xf32>
    %1513 = math.exp %1512 : vector<2x32xf32>
    %cst_777 = arith.constant 1.000000e+00 : f32
    %1514 = vector.broadcast %cst_777 : f32 to vector<2x32xf32>
    %1515 = arith.addf %1514, %1513 : vector<2x32xf32>
    %1516 = arith.divf %1514, %1515 : vector<2x32xf32>
    %1517 = arith.addf %1488, %1503 : vector<2x32xf32>
    %1518 = arith.negf %1517 : vector<2x32xf32>
    %1519 = math.exp %1518 : vector<2x32xf32>
    %cst_778 = arith.constant 1.000000e+00 : f32
    %1520 = vector.broadcast %cst_778 : f32 to vector<2x32xf32>
    %1521 = arith.addf %1520, %1519 : vector<2x32xf32>
    %1522 = arith.divf %1520, %1521 : vector<2x32xf32>
    %1523 = arith.mulf %1516, %1510 : vector<2x32xf32>
    %1524 = arith.addf %1489, %1523 : vector<2x32xf32>
    %1525 = math.tanh %1524 : vector<2x32xf32>
    %cst_779 = arith.constant 1.000000e+00 : f32
    %1526 = vector.broadcast %cst_779 : f32 to vector<2x32xf32>
    %1527 = arith.subf %1526, %1522 : vector<2x32xf32>
    %1528 = arith.mulf %1527, %1525 : vector<2x32xf32>
    %1529 = arith.mulf %1522, %1483 : vector<2x32xf32>
    %1530 = arith.addf %1528, %1529 : vector<2x32xf32>
    %1531 = vector.broadcast %1486 : vector<2x1xf32> to vector<2x32xf32>
    %1532 = arith.mulf %1531, %1530 : vector<2x32xf32>
    %cst_780 = arith.constant 1.000000e+00 : f32
    %1533 = vector.broadcast %cst_780 : f32 to vector<2x1xf32>
    %1534 = arith.subf %1533, %1486 : vector<2x1xf32>
    %1535 = vector.broadcast %1534 : vector<2x1xf32> to vector<2x32xf32>
    %1536 = arith.mulf %1535, %1483 : vector<2x32xf32>
    %1537 = arith.addf %1532, %1536 : vector<2x32xf32>
    %1538 = vector.broadcast %1486 : vector<2x1xf32> to vector<2x32xf32>
    %1539 = arith.mulf %1538, %1537 : vector<2x32xf32>
    %1540 = vector.extract_strided_slice %0 {offsets = [4, 0], sizes = [2, 1], strides = [1, 1]} : vector<16x1xf32> to vector<2x1xf32>
    %1541 = vector.extract_strided_slice %1417 {offsets = [4, 0], sizes = [2, 32], strides = [1, 1]} : vector<16x32xf32> to vector<2x32xf32>
    %1542 = vector.extract_strided_slice %1424 {offsets = [4, 0], sizes = [2, 32], strides = [1, 1]} : vector<16x32xf32> to vector<2x32xf32>
    %1543 = vector.extract_strided_slice %1431 {offsets = [4, 0], sizes = [2, 32], strides = [1, 1]} : vector<16x32xf32> to vector<2x32xf32>
    %c0_781 = arith.constant 0 : index
    %c0_782 = arith.constant 0 : index
    %c0_783 = arith.constant 0 : index
    %1544 = vector.load %arg17[%c0_781, %c0_782, %c0_783] : memref<3x32x32xf32, #tpu.memory_space<vmem>>, vector<1x32x32xf32>
    %1545 = vector.shape_cast %1544 : vector<1x32x32xf32> to vector<32x32xf32>
    %cst_784 = arith.constant dense<0.000000e+00> : vector<2x32xf32>
    %1546 = tpu.matmul %1537, %1545, %cst_784 {dimension_numbers = #tpu.dot_dimension_numbers<[1], [0], [0], [1], [0, 0, 1, 1], [], []>} : vector<2x32xf32>, vector<32x32xf32>, vector<2x32xf32> -> vector<2x32xf32>
    %c0_785 = arith.constant 0 : index
    %c0_786 = arith.constant 0 : index
    %c0_787 = arith.constant 0 : index
    %1547 = vector.load %arg18[%c0_785, %c0_786, %c0_787] : memref<3x1x32xf32, #tpu.memory_space<vmem>>, vector<1x1x32xf32>
    %1548 = vector.shape_cast %1547 : vector<1x1x32xf32> to vector<1x32xf32>
    %1549 = vector.broadcast %1548 : vector<1x32xf32> to vector<2x32xf32>
    %1550 = arith.addf %1546, %1549 : vector<2x32xf32>
    %c1_788 = arith.constant 1 : index
    %c0_789 = arith.constant 0 : index
    %c0_790 = arith.constant 0 : index
    %1551 = vector.load %arg17[%c1_788, %c0_789, %c0_790] : memref<3x32x32xf32, #tpu.memory_space<vmem>>, vector<1x32x32xf32>
    %1552 = vector.shape_cast %1551 : vector<1x32x32xf32> to vector<32x32xf32>
    %cst_791 = arith.constant dense<0.000000e+00> : vector<2x32xf32>
    %1553 = tpu.matmul %1537, %1552, %cst_791 {dimension_numbers = #tpu.dot_dimension_numbers<[1], [0], [0], [1], [0, 0, 1, 1], [], []>} : vector<2x32xf32>, vector<32x32xf32>, vector<2x32xf32> -> vector<2x32xf32>
    %c1_792 = arith.constant 1 : index
    %c0_793 = arith.constant 0 : index
    %c0_794 = arith.constant 0 : index
    %1554 = vector.load %arg18[%c1_792, %c0_793, %c0_794] : memref<3x1x32xf32, #tpu.memory_space<vmem>>, vector<1x1x32xf32>
    %1555 = vector.shape_cast %1554 : vector<1x1x32xf32> to vector<1x32xf32>
    %1556 = vector.broadcast %1555 : vector<1x32xf32> to vector<2x32xf32>
    %1557 = arith.addf %1553, %1556 : vector<2x32xf32>
    %c2_795 = arith.constant 2 : index
    %c0_796 = arith.constant 0 : index
    %c0_797 = arith.constant 0 : index
    %1558 = vector.load %arg17[%c2_795, %c0_796, %c0_797] : memref<3x32x32xf32, #tpu.memory_space<vmem>>, vector<1x32x32xf32>
    %1559 = vector.shape_cast %1558 : vector<1x32x32xf32> to vector<32x32xf32>
    %cst_798 = arith.constant dense<0.000000e+00> : vector<2x32xf32>
    %1560 = tpu.matmul %1537, %1559, %cst_798 {dimension_numbers = #tpu.dot_dimension_numbers<[1], [0], [0], [1], [0, 0, 1, 1], [], []>} : vector<2x32xf32>, vector<32x32xf32>, vector<2x32xf32> -> vector<2x32xf32>
    %c2_799 = arith.constant 2 : index
    %c0_800 = arith.constant 0 : index
    %c0_801 = arith.constant 0 : index
    %1561 = vector.load %arg18[%c2_799, %c0_800, %c0_801] : memref<3x1x32xf32, #tpu.memory_space<vmem>>, vector<1x1x32xf32>
    %1562 = vector.shape_cast %1561 : vector<1x1x32xf32> to vector<1x32xf32>
    %1563 = vector.broadcast %1562 : vector<1x32xf32> to vector<2x32xf32>
    %1564 = arith.addf %1560, %1563 : vector<2x32xf32>
    %1565 = arith.addf %1541, %1550 : vector<2x32xf32>
    %1566 = arith.negf %1565 : vector<2x32xf32>
    %1567 = math.exp %1566 : vector<2x32xf32>
    %cst_802 = arith.constant 1.000000e+00 : f32
    %1568 = vector.broadcast %cst_802 : f32 to vector<2x32xf32>
    %1569 = arith.addf %1568, %1567 : vector<2x32xf32>
    %1570 = arith.divf %1568, %1569 : vector<2x32xf32>
    %1571 = arith.addf %1542, %1557 : vector<2x32xf32>
    %1572 = arith.negf %1571 : vector<2x32xf32>
    %1573 = math.exp %1572 : vector<2x32xf32>
    %cst_803 = arith.constant 1.000000e+00 : f32
    %1574 = vector.broadcast %cst_803 : f32 to vector<2x32xf32>
    %1575 = arith.addf %1574, %1573 : vector<2x32xf32>
    %1576 = arith.divf %1574, %1575 : vector<2x32xf32>
    %1577 = arith.mulf %1570, %1564 : vector<2x32xf32>
    %1578 = arith.addf %1543, %1577 : vector<2x32xf32>
    %1579 = math.tanh %1578 : vector<2x32xf32>
    %cst_804 = arith.constant 1.000000e+00 : f32
    %1580 = vector.broadcast %cst_804 : f32 to vector<2x32xf32>
    %1581 = arith.subf %1580, %1576 : vector<2x32xf32>
    %1582 = arith.mulf %1581, %1579 : vector<2x32xf32>
    %1583 = arith.mulf %1576, %1537 : vector<2x32xf32>
    %1584 = arith.addf %1582, %1583 : vector<2x32xf32>
    %1585 = vector.broadcast %1540 : vector<2x1xf32> to vector<2x32xf32>
    %1586 = arith.mulf %1585, %1584 : vector<2x32xf32>
    %cst_805 = arith.constant 1.000000e+00 : f32
    %1587 = vector.broadcast %cst_805 : f32 to vector<2x1xf32>
    %1588 = arith.subf %1587, %1540 : vector<2x1xf32>
    %1589 = vector.broadcast %1588 : vector<2x1xf32> to vector<2x32xf32>
    %1590 = arith.mulf %1589, %1537 : vector<2x32xf32>
    %1591 = arith.addf %1586, %1590 : vector<2x32xf32>
    %1592 = vector.broadcast %1540 : vector<2x1xf32> to vector<2x32xf32>
    %1593 = arith.mulf %1592, %1591 : vector<2x32xf32>
    %1594 = vector.extract_strided_slice %0 {offsets = [6, 0], sizes = [2, 1], strides = [1, 1]} : vector<16x1xf32> to vector<2x1xf32>
    %1595 = vector.extract_strided_slice %1417 {offsets = [6, 0], sizes = [2, 32], strides = [1, 1]} : vector<16x32xf32> to vector<2x32xf32>
    %1596 = vector.extract_strided_slice %1424 {offsets = [6, 0], sizes = [2, 32], strides = [1, 1]} : vector<16x32xf32> to vector<2x32xf32>
    %1597 = vector.extract_strided_slice %1431 {offsets = [6, 0], sizes = [2, 32], strides = [1, 1]} : vector<16x32xf32> to vector<2x32xf32>
    %c0_806 = arith.constant 0 : index
    %c0_807 = arith.constant 0 : index
    %c0_808 = arith.constant 0 : index
    %1598 = vector.load %arg17[%c0_806, %c0_807, %c0_808] : memref<3x32x32xf32, #tpu.memory_space<vmem>>, vector<1x32x32xf32>
    %1599 = vector.shape_cast %1598 : vector<1x32x32xf32> to vector<32x32xf32>
    %cst_809 = arith.constant dense<0.000000e+00> : vector<2x32xf32>
    %1600 = tpu.matmul %1591, %1599, %cst_809 {dimension_numbers = #tpu.dot_dimension_numbers<[1], [0], [0], [1], [0, 0, 1, 1], [], []>} : vector<2x32xf32>, vector<32x32xf32>, vector<2x32xf32> -> vector<2x32xf32>
    %c0_810 = arith.constant 0 : index
    %c0_811 = arith.constant 0 : index
    %c0_812 = arith.constant 0 : index
    %1601 = vector.load %arg18[%c0_810, %c0_811, %c0_812] : memref<3x1x32xf32, #tpu.memory_space<vmem>>, vector<1x1x32xf32>
    %1602 = vector.shape_cast %1601 : vector<1x1x32xf32> to vector<1x32xf32>
    %1603 = vector.broadcast %1602 : vector<1x32xf32> to vector<2x32xf32>
    %1604 = arith.addf %1600, %1603 : vector<2x32xf32>
    %c1_813 = arith.constant 1 : index
    %c0_814 = arith.constant 0 : index
    %c0_815 = arith.constant 0 : index
    %1605 = vector.load %arg17[%c1_813, %c0_814, %c0_815] : memref<3x32x32xf32, #tpu.memory_space<vmem>>, vector<1x32x32xf32>
    %1606 = vector.shape_cast %1605 : vector<1x32x32xf32> to vector<32x32xf32>
    %cst_816 = arith.constant dense<0.000000e+00> : vector<2x32xf32>
    %1607 = tpu.matmul %1591, %1606, %cst_816 {dimension_numbers = #tpu.dot_dimension_numbers<[1], [0], [0], [1], [0, 0, 1, 1], [], []>} : vector<2x32xf32>, vector<32x32xf32>, vector<2x32xf32> -> vector<2x32xf32>
    %c1_817 = arith.constant 1 : index
    %c0_818 = arith.constant 0 : index
    %c0_819 = arith.constant 0 : index
    %1608 = vector.load %arg18[%c1_817, %c0_818, %c0_819] : memref<3x1x32xf32, #tpu.memory_space<vmem>>, vector<1x1x32xf32>
    %1609 = vector.shape_cast %1608 : vector<1x1x32xf32> to vector<1x32xf32>
    %1610 = vector.broadcast %1609 : vector<1x32xf32> to vector<2x32xf32>
    %1611 = arith.addf %1607, %1610 : vector<2x32xf32>
    %c2_820 = arith.constant 2 : index
    %c0_821 = arith.constant 0 : index
    %c0_822 = arith.constant 0 : index
    %1612 = vector.load %arg17[%c2_820, %c0_821, %c0_822] : memref<3x32x32xf32, #tpu.memory_space<vmem>>, vector<1x32x32xf32>
    %1613 = vector.shape_cast %1612 : vector<1x32x32xf32> to vector<32x32xf32>
    %cst_823 = arith.constant dense<0.000000e+00> : vector<2x32xf32>
    %1614 = tpu.matmul %1591, %1613, %cst_823 {dimension_numbers = #tpu.dot_dimension_numbers<[1], [0], [0], [1], [0, 0, 1, 1], [], []>} : vector<2x32xf32>, vector<32x32xf32>, vector<2x32xf32> -> vector<2x32xf32>
    %c2_824 = arith.constant 2 : index
    %c0_825 = arith.constant 0 : index
    %c0_826 = arith.constant 0 : index
    %1615 = vector.load %arg18[%c2_824, %c0_825, %c0_826] : memref<3x1x32xf32, #tpu.memory_space<vmem>>, vector<1x1x32xf32>
    %1616 = vector.shape_cast %1615 : vector<1x1x32xf32> to vector<1x32xf32>
    %1617 = vector.broadcast %1616 : vector<1x32xf32> to vector<2x32xf32>
    %1618 = arith.addf %1614, %1617 : vector<2x32xf32>
    %1619 = arith.addf %1595, %1604 : vector<2x32xf32>
    %1620 = arith.negf %1619 : vector<2x32xf32>
    %1621 = math.exp %1620 : vector<2x32xf32>
    %cst_827 = arith.constant 1.000000e+00 : f32
    %1622 = vector.broadcast %cst_827 : f32 to vector<2x32xf32>
    %1623 = arith.addf %1622, %1621 : vector<2x32xf32>
    %1624 = arith.divf %1622, %1623 : vector<2x32xf32>
    %1625 = arith.addf %1596, %1611 : vector<2x32xf32>
    %1626 = arith.negf %1625 : vector<2x32xf32>
    %1627 = math.exp %1626 : vector<2x32xf32>
    %cst_828 = arith.constant 1.000000e+00 : f32
    %1628 = vector.broadcast %cst_828 : f32 to vector<2x32xf32>
    %1629 = arith.addf %1628, %1627 : vector<2x32xf32>
    %1630 = arith.divf %1628, %1629 : vector<2x32xf32>
    %1631 = arith.mulf %1624, %1618 : vector<2x32xf32>
    %1632 = arith.addf %1597, %1631 : vector<2x32xf32>
    %1633 = math.tanh %1632 : vector<2x32xf32>
    %cst_829 = arith.constant 1.000000e+00 : f32
    %1634 = vector.broadcast %cst_829 : f32 to vector<2x32xf32>
    %1635 = arith.subf %1634, %1630 : vector<2x32xf32>
    %1636 = arith.mulf %1635, %1633 : vector<2x32xf32>
    %1637 = arith.mulf %1630, %1591 : vector<2x32xf32>
    %1638 = arith.addf %1636, %1637 : vector<2x32xf32>
    %1639 = vector.broadcast %1594 : vector<2x1xf32> to vector<2x32xf32>
    %1640 = arith.mulf %1639, %1638 : vector<2x32xf32>
    %cst_830 = arith.constant 1.000000e+00 : f32
    %1641 = vector.broadcast %cst_830 : f32 to vector<2x1xf32>
    %1642 = arith.subf %1641, %1594 : vector<2x1xf32>
    %1643 = vector.broadcast %1642 : vector<2x1xf32> to vector<2x32xf32>
    %1644 = arith.mulf %1643, %1591 : vector<2x32xf32>
    %1645 = arith.addf %1640, %1644 : vector<2x32xf32>
    %1646 = vector.broadcast %1594 : vector<2x1xf32> to vector<2x32xf32>
    %1647 = arith.mulf %1646, %1645 : vector<2x32xf32>
    %1648 = vector.extract_strided_slice %0 {offsets = [8, 0], sizes = [2, 1], strides = [1, 1]} : vector<16x1xf32> to vector<2x1xf32>
    %1649 = vector.extract_strided_slice %1417 {offsets = [8, 0], sizes = [2, 32], strides = [1, 1]} : vector<16x32xf32> to vector<2x32xf32>
    %1650 = vector.extract_strided_slice %1424 {offsets = [8, 0], sizes = [2, 32], strides = [1, 1]} : vector<16x32xf32> to vector<2x32xf32>
    %1651 = vector.extract_strided_slice %1431 {offsets = [8, 0], sizes = [2, 32], strides = [1, 1]} : vector<16x32xf32> to vector<2x32xf32>
    %c0_831 = arith.constant 0 : index
    %c0_832 = arith.constant 0 : index
    %c0_833 = arith.constant 0 : index
    %1652 = vector.load %arg17[%c0_831, %c0_832, %c0_833] : memref<3x32x32xf32, #tpu.memory_space<vmem>>, vector<1x32x32xf32>
    %1653 = vector.shape_cast %1652 : vector<1x32x32xf32> to vector<32x32xf32>
    %cst_834 = arith.constant dense<0.000000e+00> : vector<2x32xf32>
    %1654 = tpu.matmul %1645, %1653, %cst_834 {dimension_numbers = #tpu.dot_dimension_numbers<[1], [0], [0], [1], [0, 0, 1, 1], [], []>} : vector<2x32xf32>, vector<32x32xf32>, vector<2x32xf32> -> vector<2x32xf32>
    %c0_835 = arith.constant 0 : index
    %c0_836 = arith.constant 0 : index
    %c0_837 = arith.constant 0 : index
    %1655 = vector.load %arg18[%c0_835, %c0_836, %c0_837] : memref<3x1x32xf32, #tpu.memory_space<vmem>>, vector<1x1x32xf32>
    %1656 = vector.shape_cast %1655 : vector<1x1x32xf32> to vector<1x32xf32>
    %1657 = vector.broadcast %1656 : vector<1x32xf32> to vector<2x32xf32>
    %1658 = arith.addf %1654, %1657 : vector<2x32xf32>
    %c1_838 = arith.constant 1 : index
    %c0_839 = arith.constant 0 : index
    %c0_840 = arith.constant 0 : index
    %1659 = vector.load %arg17[%c1_838, %c0_839, %c0_840] : memref<3x32x32xf32, #tpu.memory_space<vmem>>, vector<1x32x32xf32>
    %1660 = vector.shape_cast %1659 : vector<1x32x32xf32> to vector<32x32xf32>
    %cst_841 = arith.constant dense<0.000000e+00> : vector<2x32xf32>
    %1661 = tpu.matmul %1645, %1660, %cst_841 {dimension_numbers = #tpu.dot_dimension_numbers<[1], [0], [0], [1], [0, 0, 1, 1], [], []>} : vector<2x32xf32>, vector<32x32xf32>, vector<2x32xf32> -> vector<2x32xf32>
    %c1_842 = arith.constant 1 : index
    %c0_843 = arith.constant 0 : index
    %c0_844 = arith.constant 0 : index
    %1662 = vector.load %arg18[%c1_842, %c0_843, %c0_844] : memref<3x1x32xf32, #tpu.memory_space<vmem>>, vector<1x1x32xf32>
    %1663 = vector.shape_cast %1662 : vector<1x1x32xf32> to vector<1x32xf32>
    %1664 = vector.broadcast %1663 : vector<1x32xf32> to vector<2x32xf32>
    %1665 = arith.addf %1661, %1664 : vector<2x32xf32>
    %c2_845 = arith.constant 2 : index
    %c0_846 = arith.constant 0 : index
    %c0_847 = arith.constant 0 : index
    %1666 = vector.load %arg17[%c2_845, %c0_846, %c0_847] : memref<3x32x32xf32, #tpu.memory_space<vmem>>, vector<1x32x32xf32>
    %1667 = vector.shape_cast %1666 : vector<1x32x32xf32> to vector<32x32xf32>
    %cst_848 = arith.constant dense<0.000000e+00> : vector<2x32xf32>
    %1668 = tpu.matmul %1645, %1667, %cst_848 {dimension_numbers = #tpu.dot_dimension_numbers<[1], [0], [0], [1], [0, 0, 1, 1], [], []>} : vector<2x32xf32>, vector<32x32xf32>, vector<2x32xf32> -> vector<2x32xf32>
    %c2_849 = arith.constant 2 : index
    %c0_850 = arith.constant 0 : index
    %c0_851 = arith.constant 0 : index
    %1669 = vector.load %arg18[%c2_849, %c0_850, %c0_851] : memref<3x1x32xf32, #tpu.memory_space<vmem>>, vector<1x1x32xf32>
    %1670 = vector.shape_cast %1669 : vector<1x1x32xf32> to vector<1x32xf32>
    %1671 = vector.broadcast %1670 : vector<1x32xf32> to vector<2x32xf32>
    %1672 = arith.addf %1668, %1671 : vector<2x32xf32>
    %1673 = arith.addf %1649, %1658 : vector<2x32xf32>
    %1674 = arith.negf %1673 : vector<2x32xf32>
    %1675 = math.exp %1674 : vector<2x32xf32>
    %cst_852 = arith.constant 1.000000e+00 : f32
    %1676 = vector.broadcast %cst_852 : f32 to vector<2x32xf32>
    %1677 = arith.addf %1676, %1675 : vector<2x32xf32>
    %1678 = arith.divf %1676, %1677 : vector<2x32xf32>
    %1679 = arith.addf %1650, %1665 : vector<2x32xf32>
    %1680 = arith.negf %1679 : vector<2x32xf32>
    %1681 = math.exp %1680 : vector<2x32xf32>
    %cst_853 = arith.constant 1.000000e+00 : f32
    %1682 = vector.broadcast %cst_853 : f32 to vector<2x32xf32>
    %1683 = arith.addf %1682, %1681 : vector<2x32xf32>
    %1684 = arith.divf %1682, %1683 : vector<2x32xf32>
    %1685 = arith.mulf %1678, %1672 : vector<2x32xf32>
    %1686 = arith.addf %1651, %1685 : vector<2x32xf32>
    %1687 = math.tanh %1686 : vector<2x32xf32>
    %cst_854 = arith.constant 1.000000e+00 : f32
    %1688 = vector.broadcast %cst_854 : f32 to vector<2x32xf32>
    %1689 = arith.subf %1688, %1684 : vector<2x32xf32>
    %1690 = arith.mulf %1689, %1687 : vector<2x32xf32>
    %1691 = arith.mulf %1684, %1645 : vector<2x32xf32>
    %1692 = arith.addf %1690, %1691 : vector<2x32xf32>
    %1693 = vector.broadcast %1648 : vector<2x1xf32> to vector<2x32xf32>
    %1694 = arith.mulf %1693, %1692 : vector<2x32xf32>
    %cst_855 = arith.constant 1.000000e+00 : f32
    %1695 = vector.broadcast %cst_855 : f32 to vector<2x1xf32>
    %1696 = arith.subf %1695, %1648 : vector<2x1xf32>
    %1697 = vector.broadcast %1696 : vector<2x1xf32> to vector<2x32xf32>
    %1698 = arith.mulf %1697, %1645 : vector<2x32xf32>
    %1699 = arith.addf %1694, %1698 : vector<2x32xf32>
    %1700 = vector.broadcast %1648 : vector<2x1xf32> to vector<2x32xf32>
    %1701 = arith.mulf %1700, %1699 : vector<2x32xf32>
    %1702 = vector.extract_strided_slice %0 {offsets = [10, 0], sizes = [2, 1], strides = [1, 1]} : vector<16x1xf32> to vector<2x1xf32>
    %1703 = vector.extract_strided_slice %1417 {offsets = [10, 0], sizes = [2, 32], strides = [1, 1]} : vector<16x32xf32> to vector<2x32xf32>
    %1704 = vector.extract_strided_slice %1424 {offsets = [10, 0], sizes = [2, 32], strides = [1, 1]} : vector<16x32xf32> to vector<2x32xf32>
    %1705 = vector.extract_strided_slice %1431 {offsets = [10, 0], sizes = [2, 32], strides = [1, 1]} : vector<16x32xf32> to vector<2x32xf32>
    %c0_856 = arith.constant 0 : index
    %c0_857 = arith.constant 0 : index
    %c0_858 = arith.constant 0 : index
    %1706 = vector.load %arg17[%c0_856, %c0_857, %c0_858] : memref<3x32x32xf32, #tpu.memory_space<vmem>>, vector<1x32x32xf32>
    %1707 = vector.shape_cast %1706 : vector<1x32x32xf32> to vector<32x32xf32>
    %cst_859 = arith.constant dense<0.000000e+00> : vector<2x32xf32>
    %1708 = tpu.matmul %1699, %1707, %cst_859 {dimension_numbers = #tpu.dot_dimension_numbers<[1], [0], [0], [1], [0, 0, 1, 1], [], []>} : vector<2x32xf32>, vector<32x32xf32>, vector<2x32xf32> -> vector<2x32xf32>
    %c0_860 = arith.constant 0 : index
    %c0_861 = arith.constant 0 : index
    %c0_862 = arith.constant 0 : index
    %1709 = vector.load %arg18[%c0_860, %c0_861, %c0_862] : memref<3x1x32xf32, #tpu.memory_space<vmem>>, vector<1x1x32xf32>
    %1710 = vector.shape_cast %1709 : vector<1x1x32xf32> to vector<1x32xf32>
    %1711 = vector.broadcast %1710 : vector<1x32xf32> to vector<2x32xf32>
    %1712 = arith.addf %1708, %1711 : vector<2x32xf32>
    %c1_863 = arith.constant 1 : index
    %c0_864 = arith.constant 0 : index
    %c0_865 = arith.constant 0 : index
    %1713 = vector.load %arg17[%c1_863, %c0_864, %c0_865] : memref<3x32x32xf32, #tpu.memory_space<vmem>>, vector<1x32x32xf32>
    %1714 = vector.shape_cast %1713 : vector<1x32x32xf32> to vector<32x32xf32>
    %cst_866 = arith.constant dense<0.000000e+00> : vector<2x32xf32>
    %1715 = tpu.matmul %1699, %1714, %cst_866 {dimension_numbers = #tpu.dot_dimension_numbers<[1], [0], [0], [1], [0, 0, 1, 1], [], []>} : vector<2x32xf32>, vector<32x32xf32>, vector<2x32xf32> -> vector<2x32xf32>
    %c1_867 = arith.constant 1 : index
    %c0_868 = arith.constant 0 : index
    %c0_869 = arith.constant 0 : index
    %1716 = vector.load %arg18[%c1_867, %c0_868, %c0_869] : memref<3x1x32xf32, #tpu.memory_space<vmem>>, vector<1x1x32xf32>
    %1717 = vector.shape_cast %1716 : vector<1x1x32xf32> to vector<1x32xf32>
    %1718 = vector.broadcast %1717 : vector<1x32xf32> to vector<2x32xf32>
    %1719 = arith.addf %1715, %1718 : vector<2x32xf32>
    %c2_870 = arith.constant 2 : index
    %c0_871 = arith.constant 0 : index
    %c0_872 = arith.constant 0 : index
    %1720 = vector.load %arg17[%c2_870, %c0_871, %c0_872] : memref<3x32x32xf32, #tpu.memory_space<vmem>>, vector<1x32x32xf32>
    %1721 = vector.shape_cast %1720 : vector<1x32x32xf32> to vector<32x32xf32>
    %cst_873 = arith.constant dense<0.000000e+00> : vector<2x32xf32>
    %1722 = tpu.matmul %1699, %1721, %cst_873 {dimension_numbers = #tpu.dot_dimension_numbers<[1], [0], [0], [1], [0, 0, 1, 1], [], []>} : vector<2x32xf32>, vector<32x32xf32>, vector<2x32xf32> -> vector<2x32xf32>
    %c2_874 = arith.constant 2 : index
    %c0_875 = arith.constant 0 : index
    %c0_876 = arith.constant 0 : index
    %1723 = vector.load %arg18[%c2_874, %c0_875, %c0_876] : memref<3x1x32xf32, #tpu.memory_space<vmem>>, vector<1x1x32xf32>
    %1724 = vector.shape_cast %1723 : vector<1x1x32xf32> to vector<1x32xf32>
    %1725 = vector.broadcast %1724 : vector<1x32xf32> to vector<2x32xf32>
    %1726 = arith.addf %1722, %1725 : vector<2x32xf32>
    %1727 = arith.addf %1703, %1712 : vector<2x32xf32>
    %1728 = arith.negf %1727 : vector<2x32xf32>
    %1729 = math.exp %1728 : vector<2x32xf32>
    %cst_877 = arith.constant 1.000000e+00 : f32
    %1730 = vector.broadcast %cst_877 : f32 to vector<2x32xf32>
    %1731 = arith.addf %1730, %1729 : vector<2x32xf32>
    %1732 = arith.divf %1730, %1731 : vector<2x32xf32>
    %1733 = arith.addf %1704, %1719 : vector<2x32xf32>
    %1734 = arith.negf %1733 : vector<2x32xf32>
    %1735 = math.exp %1734 : vector<2x32xf32>
    %cst_878 = arith.constant 1.000000e+00 : f32
    %1736 = vector.broadcast %cst_878 : f32 to vector<2x32xf32>
    %1737 = arith.addf %1736, %1735 : vector<2x32xf32>
    %1738 = arith.divf %1736, %1737 : vector<2x32xf32>
    %1739 = arith.mulf %1732, %1726 : vector<2x32xf32>
    %1740 = arith.addf %1705, %1739 : vector<2x32xf32>
    %1741 = math.tanh %1740 : vector<2x32xf32>
    %cst_879 = arith.constant 1.000000e+00 : f32
    %1742 = vector.broadcast %cst_879 : f32 to vector<2x32xf32>
    %1743 = arith.subf %1742, %1738 : vector<2x32xf32>
    %1744 = arith.mulf %1743, %1741 : vector<2x32xf32>
    %1745 = arith.mulf %1738, %1699 : vector<2x32xf32>
    %1746 = arith.addf %1744, %1745 : vector<2x32xf32>
    %1747 = vector.broadcast %1702 : vector<2x1xf32> to vector<2x32xf32>
    %1748 = arith.mulf %1747, %1746 : vector<2x32xf32>
    %cst_880 = arith.constant 1.000000e+00 : f32
    %1749 = vector.broadcast %cst_880 : f32 to vector<2x1xf32>
    %1750 = arith.subf %1749, %1702 : vector<2x1xf32>
    %1751 = vector.broadcast %1750 : vector<2x1xf32> to vector<2x32xf32>
    %1752 = arith.mulf %1751, %1699 : vector<2x32xf32>
    %1753 = arith.addf %1748, %1752 : vector<2x32xf32>
    %1754 = vector.broadcast %1702 : vector<2x1xf32> to vector<2x32xf32>
    %1755 = arith.mulf %1754, %1753 : vector<2x32xf32>
    %1756 = vector.extract_strided_slice %0 {offsets = [12, 0], sizes = [2, 1], strides = [1, 1]} : vector<16x1xf32> to vector<2x1xf32>
    %1757 = vector.extract_strided_slice %1417 {offsets = [12, 0], sizes = [2, 32], strides = [1, 1]} : vector<16x32xf32> to vector<2x32xf32>
    %1758 = vector.extract_strided_slice %1424 {offsets = [12, 0], sizes = [2, 32], strides = [1, 1]} : vector<16x32xf32> to vector<2x32xf32>
    %1759 = vector.extract_strided_slice %1431 {offsets = [12, 0], sizes = [2, 32], strides = [1, 1]} : vector<16x32xf32> to vector<2x32xf32>
    %c0_881 = arith.constant 0 : index
    %c0_882 = arith.constant 0 : index
    %c0_883 = arith.constant 0 : index
    %1760 = vector.load %arg17[%c0_881, %c0_882, %c0_883] : memref<3x32x32xf32, #tpu.memory_space<vmem>>, vector<1x32x32xf32>
    %1761 = vector.shape_cast %1760 : vector<1x32x32xf32> to vector<32x32xf32>
    %cst_884 = arith.constant dense<0.000000e+00> : vector<2x32xf32>
    %1762 = tpu.matmul %1753, %1761, %cst_884 {dimension_numbers = #tpu.dot_dimension_numbers<[1], [0], [0], [1], [0, 0, 1, 1], [], []>} : vector<2x32xf32>, vector<32x32xf32>, vector<2x32xf32> -> vector<2x32xf32>
    %c0_885 = arith.constant 0 : index
    %c0_886 = arith.constant 0 : index
    %c0_887 = arith.constant 0 : index
    %1763 = vector.load %arg18[%c0_885, %c0_886, %c0_887] : memref<3x1x32xf32, #tpu.memory_space<vmem>>, vector<1x1x32xf32>
    %1764 = vector.shape_cast %1763 : vector<1x1x32xf32> to vector<1x32xf32>
    %1765 = vector.broadcast %1764 : vector<1x32xf32> to vector<2x32xf32>
    %1766 = arith.addf %1762, %1765 : vector<2x32xf32>
    %c1_888 = arith.constant 1 : index
    %c0_889 = arith.constant 0 : index
    %c0_890 = arith.constant 0 : index
    %1767 = vector.load %arg17[%c1_888, %c0_889, %c0_890] : memref<3x32x32xf32, #tpu.memory_space<vmem>>, vector<1x32x32xf32>
    %1768 = vector.shape_cast %1767 : vector<1x32x32xf32> to vector<32x32xf32>
    %cst_891 = arith.constant dense<0.000000e+00> : vector<2x32xf32>
    %1769 = tpu.matmul %1753, %1768, %cst_891 {dimension_numbers = #tpu.dot_dimension_numbers<[1], [0], [0], [1], [0, 0, 1, 1], [], []>} : vector<2x32xf32>, vector<32x32xf32>, vector<2x32xf32> -> vector<2x32xf32>
    %c1_892 = arith.constant 1 : index
    %c0_893 = arith.constant 0 : index
    %c0_894 = arith.constant 0 : index
    %1770 = vector.load %arg18[%c1_892, %c0_893, %c0_894] : memref<3x1x32xf32, #tpu.memory_space<vmem>>, vector<1x1x32xf32>
    %1771 = vector.shape_cast %1770 : vector<1x1x32xf32> to vector<1x32xf32>
    %1772 = vector.broadcast %1771 : vector<1x32xf32> to vector<2x32xf32>
    %1773 = arith.addf %1769, %1772 : vector<2x32xf32>
    %c2_895 = arith.constant 2 : index
    %c0_896 = arith.constant 0 : index
    %c0_897 = arith.constant 0 : index
    %1774 = vector.load %arg17[%c2_895, %c0_896, %c0_897] : memref<3x32x32xf32, #tpu.memory_space<vmem>>, vector<1x32x32xf32>
    %1775 = vector.shape_cast %1774 : vector<1x32x32xf32> to vector<32x32xf32>
    %cst_898 = arith.constant dense<0.000000e+00> : vector<2x32xf32>
    %1776 = tpu.matmul %1753, %1775, %cst_898 {dimension_numbers = #tpu.dot_dimension_numbers<[1], [0], [0], [1], [0, 0, 1, 1], [], []>} : vector<2x32xf32>, vector<32x32xf32>, vector<2x32xf32> -> vector<2x32xf32>
    %c2_899 = arith.constant 2 : index
    %c0_900 = arith.constant 0 : index
    %c0_901 = arith.constant 0 : index
    %1777 = vector.load %arg18[%c2_899, %c0_900, %c0_901] : memref<3x1x32xf32, #tpu.memory_space<vmem>>, vector<1x1x32xf32>
    %1778 = vector.shape_cast %1777 : vector<1x1x32xf32> to vector<1x32xf32>
    %1779 = vector.broadcast %1778 : vector<1x32xf32> to vector<2x32xf32>
    %1780 = arith.addf %1776, %1779 : vector<2x32xf32>
    %1781 = arith.addf %1757, %1766 : vector<2x32xf32>
    %1782 = arith.negf %1781 : vector<2x32xf32>
    %1783 = math.exp %1782 : vector<2x32xf32>
    %cst_902 = arith.constant 1.000000e+00 : f32
    %1784 = vector.broadcast %cst_902 : f32 to vector<2x32xf32>
    %1785 = arith.addf %1784, %1783 : vector<2x32xf32>
    %1786 = arith.divf %1784, %1785 : vector<2x32xf32>
    %1787 = arith.addf %1758, %1773 : vector<2x32xf32>
    %1788 = arith.negf %1787 : vector<2x32xf32>
    %1789 = math.exp %1788 : vector<2x32xf32>
    %cst_903 = arith.constant 1.000000e+00 : f32
    %1790 = vector.broadcast %cst_903 : f32 to vector<2x32xf32>
    %1791 = arith.addf %1790, %1789 : vector<2x32xf32>
    %1792 = arith.divf %1790, %1791 : vector<2x32xf32>
    %1793 = arith.mulf %1786, %1780 : vector<2x32xf32>
    %1794 = arith.addf %1759, %1793 : vector<2x32xf32>
    %1795 = math.tanh %1794 : vector<2x32xf32>
    %cst_904 = arith.constant 1.000000e+00 : f32
    %1796 = vector.broadcast %cst_904 : f32 to vector<2x32xf32>
    %1797 = arith.subf %1796, %1792 : vector<2x32xf32>
    %1798 = arith.mulf %1797, %1795 : vector<2x32xf32>
    %1799 = arith.mulf %1792, %1753 : vector<2x32xf32>
    %1800 = arith.addf %1798, %1799 : vector<2x32xf32>
    %1801 = vector.broadcast %1756 : vector<2x1xf32> to vector<2x32xf32>
    %1802 = arith.mulf %1801, %1800 : vector<2x32xf32>
    %cst_905 = arith.constant 1.000000e+00 : f32
    %1803 = vector.broadcast %cst_905 : f32 to vector<2x1xf32>
    %1804 = arith.subf %1803, %1756 : vector<2x1xf32>
    %1805 = vector.broadcast %1804 : vector<2x1xf32> to vector<2x32xf32>
    %1806 = arith.mulf %1805, %1753 : vector<2x32xf32>
    %1807 = arith.addf %1802, %1806 : vector<2x32xf32>
    %1808 = vector.broadcast %1756 : vector<2x1xf32> to vector<2x32xf32>
    %1809 = arith.mulf %1808, %1807 : vector<2x32xf32>
    %1810 = vector.extract_strided_slice %0 {offsets = [14, 0], sizes = [2, 1], strides = [1, 1]} : vector<16x1xf32> to vector<2x1xf32>
    %1811 = vector.extract_strided_slice %1417 {offsets = [14, 0], sizes = [2, 32], strides = [1, 1]} : vector<16x32xf32> to vector<2x32xf32>
    %1812 = vector.extract_strided_slice %1424 {offsets = [14, 0], sizes = [2, 32], strides = [1, 1]} : vector<16x32xf32> to vector<2x32xf32>
    %1813 = vector.extract_strided_slice %1431 {offsets = [14, 0], sizes = [2, 32], strides = [1, 1]} : vector<16x32xf32> to vector<2x32xf32>
    %c0_906 = arith.constant 0 : index
    %c0_907 = arith.constant 0 : index
    %c0_908 = arith.constant 0 : index
    %1814 = vector.load %arg17[%c0_906, %c0_907, %c0_908] : memref<3x32x32xf32, #tpu.memory_space<vmem>>, vector<1x32x32xf32>
    %1815 = vector.shape_cast %1814 : vector<1x32x32xf32> to vector<32x32xf32>
    %cst_909 = arith.constant dense<0.000000e+00> : vector<2x32xf32>
    %1816 = tpu.matmul %1807, %1815, %cst_909 {dimension_numbers = #tpu.dot_dimension_numbers<[1], [0], [0], [1], [0, 0, 1, 1], [], []>} : vector<2x32xf32>, vector<32x32xf32>, vector<2x32xf32> -> vector<2x32xf32>
    %c0_910 = arith.constant 0 : index
    %c0_911 = arith.constant 0 : index
    %c0_912 = arith.constant 0 : index
    %1817 = vector.load %arg18[%c0_910, %c0_911, %c0_912] : memref<3x1x32xf32, #tpu.memory_space<vmem>>, vector<1x1x32xf32>
    %1818 = vector.shape_cast %1817 : vector<1x1x32xf32> to vector<1x32xf32>
    %1819 = vector.broadcast %1818 : vector<1x32xf32> to vector<2x32xf32>
    %1820 = arith.addf %1816, %1819 : vector<2x32xf32>
    %c1_913 = arith.constant 1 : index
    %c0_914 = arith.constant 0 : index
    %c0_915 = arith.constant 0 : index
    %1821 = vector.load %arg17[%c1_913, %c0_914, %c0_915] : memref<3x32x32xf32, #tpu.memory_space<vmem>>, vector<1x32x32xf32>
    %1822 = vector.shape_cast %1821 : vector<1x32x32xf32> to vector<32x32xf32>
    %cst_916 = arith.constant dense<0.000000e+00> : vector<2x32xf32>
    %1823 = tpu.matmul %1807, %1822, %cst_916 {dimension_numbers = #tpu.dot_dimension_numbers<[1], [0], [0], [1], [0, 0, 1, 1], [], []>} : vector<2x32xf32>, vector<32x32xf32>, vector<2x32xf32> -> vector<2x32xf32>
    %c1_917 = arith.constant 1 : index
    %c0_918 = arith.constant 0 : index
    %c0_919 = arith.constant 0 : index
    %1824 = vector.load %arg18[%c1_917, %c0_918, %c0_919] : memref<3x1x32xf32, #tpu.memory_space<vmem>>, vector<1x1x32xf32>
    %1825 = vector.shape_cast %1824 : vector<1x1x32xf32> to vector<1x32xf32>
    %1826 = vector.broadcast %1825 : vector<1x32xf32> to vector<2x32xf32>
    %1827 = arith.addf %1823, %1826 : vector<2x32xf32>
    %c2_920 = arith.constant 2 : index
    %c0_921 = arith.constant 0 : index
    %c0_922 = arith.constant 0 : index
    %1828 = vector.load %arg17[%c2_920, %c0_921, %c0_922] : memref<3x32x32xf32, #tpu.memory_space<vmem>>, vector<1x32x32xf32>
    %1829 = vector.shape_cast %1828 : vector<1x32x32xf32> to vector<32x32xf32>
    %cst_923 = arith.constant dense<0.000000e+00> : vector<2x32xf32>
    %1830 = tpu.matmul %1807, %1829, %cst_923 {dimension_numbers = #tpu.dot_dimension_numbers<[1], [0], [0], [1], [0, 0, 1, 1], [], []>} : vector<2x32xf32>, vector<32x32xf32>, vector<2x32xf32> -> vector<2x32xf32>
    %c2_924 = arith.constant 2 : index
    %c0_925 = arith.constant 0 : index
    %c0_926 = arith.constant 0 : index
    %1831 = vector.load %arg18[%c2_924, %c0_925, %c0_926] : memref<3x1x32xf32, #tpu.memory_space<vmem>>, vector<1x1x32xf32>
    %1832 = vector.shape_cast %1831 : vector<1x1x32xf32> to vector<1x32xf32>
    %1833 = vector.broadcast %1832 : vector<1x32xf32> to vector<2x32xf32>
    %1834 = arith.addf %1830, %1833 : vector<2x32xf32>
    %1835 = arith.addf %1811, %1820 : vector<2x32xf32>
    %1836 = arith.negf %1835 : vector<2x32xf32>
    %1837 = math.exp %1836 : vector<2x32xf32>
    %cst_927 = arith.constant 1.000000e+00 : f32
    %1838 = vector.broadcast %cst_927 : f32 to vector<2x32xf32>
    %1839 = arith.addf %1838, %1837 : vector<2x32xf32>
    %1840 = arith.divf %1838, %1839 : vector<2x32xf32>
    %1841 = arith.addf %1812, %1827 : vector<2x32xf32>
    %1842 = arith.negf %1841 : vector<2x32xf32>
    %1843 = math.exp %1842 : vector<2x32xf32>
    %cst_928 = arith.constant 1.000000e+00 : f32
    %1844 = vector.broadcast %cst_928 : f32 to vector<2x32xf32>
    %1845 = arith.addf %1844, %1843 : vector<2x32xf32>
    %1846 = arith.divf %1844, %1845 : vector<2x32xf32>
    %1847 = arith.mulf %1840, %1834 : vector<2x32xf32>
    %1848 = arith.addf %1813, %1847 : vector<2x32xf32>
    %1849 = math.tanh %1848 : vector<2x32xf32>
    %cst_929 = arith.constant 1.000000e+00 : f32
    %1850 = vector.broadcast %cst_929 : f32 to vector<2x32xf32>
    %1851 = arith.subf %1850, %1846 : vector<2x32xf32>
    %1852 = arith.mulf %1851, %1849 : vector<2x32xf32>
    %1853 = arith.mulf %1846, %1807 : vector<2x32xf32>
    %1854 = arith.addf %1852, %1853 : vector<2x32xf32>
    %1855 = vector.broadcast %1810 : vector<2x1xf32> to vector<2x32xf32>
    %1856 = arith.mulf %1855, %1854 : vector<2x32xf32>
    %cst_930 = arith.constant 1.000000e+00 : f32
    %1857 = vector.broadcast %cst_930 : f32 to vector<2x1xf32>
    %1858 = arith.subf %1857, %1810 : vector<2x1xf32>
    %1859 = vector.broadcast %1858 : vector<2x1xf32> to vector<2x32xf32>
    %1860 = arith.mulf %1859, %1807 : vector<2x32xf32>
    %1861 = arith.addf %1856, %1860 : vector<2x32xf32>
    %1862 = vector.broadcast %1810 : vector<2x1xf32> to vector<2x32xf32>
    %1863 = arith.mulf %1862, %1861 : vector<2x32xf32>
    %1864 = tpu.concatenate %1485, %1539, %1593, %1647, %1701, %1755, %1809, %1863 in 0 : vector<2x32xf32>, vector<2x32xf32>, vector<2x32xf32>, vector<2x32xf32>, vector<2x32xf32>, vector<2x32xf32>, vector<2x32xf32>, vector<2x32xf32> -> vector<16x32xf32>
    %c0_931 = arith.constant 0 : index
    %c0_932 = arith.constant 0 : index
    %1865 = vector.load %arg25[%c0_931, %c0_932] : memref<32x128xf32, #tpu.memory_space<vmem>>, vector<32x128xf32>
    %cst_933 = arith.constant dense<0.000000e+00> : vector<16x128xf32>
    %1866 = tpu.matmul %1864, %1865, %cst_933 {dimension_numbers = #tpu.dot_dimension_numbers<[1], [0], [0], [1], [0, 0, 1, 1], [], []>} : vector<16x32xf32>, vector<32x128xf32>, vector<16x128xf32> -> vector<16x128xf32>
    %c0_934 = arith.constant 0 : index
    %c0_935 = arith.constant 0 : index
    %1867 = vector.load %arg26[%c0_934, %c0_935] : memref<1x128xf32, #tpu.memory_space<vmem>>, vector<1x128xf32>
    %1868 = vector.broadcast %1867 : vector<1x128xf32> to vector<16x128xf32>
    %1869 = arith.addf %1866, %1868 : vector<16x128xf32>
    %c0_936 = arith.constant 0 : index
    %c0_937 = arith.constant 0 : index
    %1870 = vector.load %arg28[%c0_936, %c0_937] : memref<16x128xf32, #tpu.memory_space<vmem>>, vector<16x128xf32>
    tpu.vector_store %arg28[%c0_936, %c0_937], %1869 {strides = array<i32>} : memref<16x128xf32, #tpu.memory_space<vmem>>, vector<16x128xf32>,
    return
  }
}

</mosaic_0001>

<bundles_post_ra>
// kernel: frag2mol_forward.1
= control target key start
LH: loop header
LB: loop body
LE: loop exit
PB: predicated region body
PF: predicated region fallthrough
CT: control target
= control target key end

     0   :  { %s13798_s6 = smov 1   ;;  %s13799_s10 = smov 2   ;;  %s15461_s0 = inlined_call_operand.smem [shape: u32[32], index: -1, kind: input, shape index: {}] }
   0x1   :  { %s13860_s5 = sld [smem:[%s15461_s0]]   ;;  %s13800_s14 = smov 3  }
   0x2   :  { %s13865_s9 = sld [smem:[%s15461_s0 + %s13798_s6]]   ;;  %s13801_s18 = smov 4  }
   0x3   :  { %s13870_s13 = sld [smem:[%s15461_s0 + %s13799_s10]]   ;;  %s13802_s22 = smov 5  }
   0x4   :  { %s13875_s17 = sld [smem:[%s15461_s0 + %s13800_s14]]   ;;  %s13803_s26 = smov 6  }
   0x5   :  { %s13880_s21 = sld [smem:[%s15461_s0 + %s13801_s18]]   ;;  %s13804_s30 = smov 7  }
   0x6   :  { %s13885_s25 = sld [smem:[%s15461_s0 + %s13802_s22]]   ;;  %s13805_s4 = smov 8  }
   0x7   :  { %s13890_s29 = sld [smem:[%s15461_s0 + %s13803_s26]]   ;;  %s13806_s10 = smov 9  }
   0x8   :  { %15472 = sst [smem:[#allocation35_spill]] %s13865_s9  ;;  %s13807_s15 = smov 10  }
   0x9   :  { %s13895_s3 = sld [smem:[%s15461_s0 + %s13804_s30]]   ;;  %s13808_s20 = smov 11  }
   0xa   :  { %15473 = sst [smem:[#allocation36_spill]] %s13875_s17  ;;  %s13809_s26 = smov 12  }
   0xb   :  { %s13900_s8 = sld [smem:[%s15461_s0 + %s13805_s4]]   ;;  %s13810_s1 = smov 13  }
   0xc   :  { %15474 = sst [smem:[#allocation37_spill]] %s13885_s25  ;;  %s13811_s7 = smov 14  }
   0xd   :  { %s13905_s14 = sld [smem:[%s15461_s0 + %s13806_s10]]   ;;  %s13813_s22 = smov 16  }
   0xe   :  { %s13910_s19 = sld [smem:[%s15461_s0 + %s13807_s15]]   ;;  %s13812_s15 = smov 15  }
   0xf   :  { %15475 = sst [smem:[#allocation38_spill]] %s13895_s3  ;;  %s13814_s28 = smov 17  }
  0x10   :  { %s13915_s24 = sld [smem:[%s15461_s0 + %s13808_s20]]  }
  0x11   :  { %s13920_s30 = sld [smem:[%s15461_s0 + %s13809_s26]]  }
  0x12   :  { %s13925_s6 = sld [smem:[%s15461_s0 + %s13810_s1]]  }
  0x13   :  { %15476 = sst [smem:[#allocation39_spill]] %s13905_s14 }
  0x14   :  { %s13930_s12 = sld [smem:[%s15461_s0 + %s13811_s7]]   ;;  %s13815_s7 = smov 18  }
  0x15   :  { %s13935_s20 = sld [smem:[%s15461_s0 + %s13812_s15]]   ;;  %s13816_s15 = smov 19  }
  0x16   :  { %15477 = sst [smem:[#allocation40_spill]] %s13915_s24 }
  0x17   :  { %s13940_s27 = sld [smem:[%s15461_s0 + %s13813_s22]]   ;;  %s13817_s22 = smov 20  }
  0x18   :  { %s13945_s4 = sld [smem:[%s15461_s0 + %s13814_s28]]   ;;  %s13818_s28 = smov 21  }
  0x19   :  { %s13950_s24 = sld [smem:[%s15461_s0 + %s13815_s7]]   ;;  %s13819_s7 = smov 22  }
  0x1a   :  { %s13955_s14 = sld [smem:[%s15461_s0 + %s13816_s15]]   ;;  %s13820_s15 = smov 23  }
  0x1b   :  { %s13960_s3 = sld [smem:[%s15461_s0 + %s13817_s22]]   ;;  %s13821_s22 = smov 24  }
  0x1c   :  { %s13965_s25 = sld [smem:[%s15461_s0 + %s13818_s28]]   ;;  %s13822_s28 = smov 25  }
  0x1d   :  { %s13970_s17 = sld [smem:[%s15461_s0 + %s13819_s7]]   ;;  %s13823_s7 = smov 26  }
  0x20   :  { %15478 = sst [smem:[#allocation41_spill]] %s13955_s14 }
  0x21   :  { %15479 = sst [smem:[#allocation42_spill]] %s13960_s3 }
  0x22   :  { %15480 = sst [smem:[#allocation43_spill]] %s13965_s25 }
  0x23   :  { %15481 = sst [smem:[#allocation44_spill]] %s13970_s17 }
  0x24   :  { %s13975_s14 = sld [smem:[%s15461_s0 + %s13820_s15]]   ;;  %s13824_s15 = smov 27  }
  0x25   :  { %s13980_s3 = sld [smem:[%s15461_s0 + %s13821_s22]]   ;;  %s13825_s22 = smov 28  }
  0x26   :  { %s13985_s25 = sld [smem:[%s15461_s0 + %s13822_s28]]   ;;  %s13826_s28 = smov 29  }
  0x27   :  { %s13990_s17 = sld [smem:[%s15461_s0 + %s13823_s7]]   ;;  %s13827_s7 = smov 30  }
  0x28   :  { %s13995_s9 = sld [smem:[%s15461_s0 + %s13824_s15]]   ;;  %s13828_s15 = smov 31  }
  0x2b   :  { %15482 = sst [smem:[#allocation45_spill]] %s13980_s3 }
  0x2c   :  { %15483 = sst [smem:[#allocation46_spill]] %s13985_s25 }
  0x2d   :  { %15484 = sst [smem:[#allocation47_spill]] %s13990_s17 }
  0x2e   :  { %15485 = sst [smem:[#allocation48_spill]] %s13995_s9 }
  0x2f   :  { %s14000_s3 = sld [smem:[%s15461_s0 + %s13825_s22]]  }
  0x30   :  { %s14005_s25 = sld [smem:[%s15461_s0 + %s13826_s28]]  }
  0x31   :  { %s14010_s17 = sld [smem:[%s15461_s0 + %s13827_s7]]  }
  0x32   :  { %s14015_s9 = sld [smem:[%s15461_s0 + %s13828_s15]]  }
  0x33   :  { %69 = vsyncpa [#allocation3], 0 }
  0x34   :  { %70 = vsyncpa [#allocation6], 0 }
  0x35   :  { %71 = vsyncpa [#allocation9], 0 }
  0x36   :  { %72 = vsyncpa [#allocation12], 0 }
  0x37   :  { %73 = vsyncpa [#allocation15], 0 }
  0x38   :  { %74 = vsyncpa [#allocation18], 0 }
  0x39   :  { %75 = vsyncpa [#allocation21], 0 }
  0x3a   :  { %76 = vsyncpa [#allocation4], 0 }
  0x3b   :  { %77 = vsyncpa [#allocation24], 0  ;;  %s13829_s22 = smov [#allocation5]   ;;  %s13830_s26 = smov [#allocation8]  }
  0x3c   :  { %s105_s23 = sshll.u32 %s13829_s22, 4  ;;  %s133_s28 = sshll.u32 %s13830_s26, 4  ;;  %s106_s23 = int_to_ptr.vmem [resolvable:$true] %s105_s23  ;;  %s14017_s28 = int_to_ptr.vmem [resolvable:$true] %s133_s28 }
  0x3d   :  { %s13450_s0 = scalar_lea.hbm %s13890_s29, 48 }
  0x3e   :  { %p13451_p0 = scmp.ne.s32.totalorder %s13890_s29, %s13450_s0  ;;  %p13454_p1 = scmp.lt.u32.totalorder %s13450_s0, %s13890_s29 }
  0x40   :  { %p13456_p2 = pnand %p13454_p1, %p13451_p0 }
  0x42   :  { %13459 = shalt.err (!%p13456_p2)
}
  0x43   :  { %s13460_s1 = scalar_lea.vmem %s106_s23, 48  ;;  %s13464_s2 = scalar_lea.vmem %s106_s23, 64 }
  0x44   :  { %p13461_p3 = scmp.ne.s32.totalorder %s106_s23, %s13460_s1  ;;  %p13465_p4 = scmp.lt.s32.totalorder %s106_s23, %s106_s23 }
  0x45   :  { %p13466_p5 = scmp.lt.s32.totalorder %s13464_s2, %s13460_s1 }
  0x47   :  { %p13467_p6 = por %p13466_p5, %p13465_p4 }
  0x49   :  { %p13468_p7 = pnand %p13467_p6, %p13461_p3 }
  0x4b   :  { %13471 = shalt.err (!%p13468_p7)
}
  0x4c   :  { %s13831_s7 = smov 16   ;;  %s13832_s10 = smov 1  }
  0x4d   :  { %111 = dma.hbm_to_vmem [thread:$0]  %s13890_s29, 48, %s106_s23, [#allocation6], %s13831_s7, %s13831_s7, %s13832_s10  }
  0x4e   :  { %s13472_s11 = scalar_lea.hbm %s13910_s19, 48 }
  0x4f   :  { %p13473_p8 = scmp.ne.s32.totalorder %s13910_s19, %s13472_s11  ;;  %p13476_p9 = scmp.lt.u32.totalorder %s13472_s11, %s13910_s19 }
  0x51   :  { %p13478_p10 = pnand %p13476_p9, %p13473_p8 }
  0x53   :  { %13481 = shalt.err (!%p13478_p10)
}
  0x54   :  { %s13482_s15 = scalar_lea.vmem %s14017_s28, 48  ;;  %s13486_s16 = scalar_lea.vmem %s14017_s28, 64 }
  0x55   :  { %p13483_p11 = scmp.ne.s32.totalorder %s14017_s28, %s13482_s15  ;;  %p13487_p12 = scmp.lt.s32.totalorder %s14017_s28, %s14017_s28 }
  0x56   :  { %p13488_p13 = scmp.lt.s32.totalorder %s13486_s16, %s13482_s15 }
  0x58   :  { %p13489_p0 = por %p13488_p13, %p13487_p12 }
  0x5a   :  { %p13490_p1 = pnand %p13489_p0, %p13483_p11 }
  0x5c   :  { %13493 = shalt.err (!%p13490_p1)
}
  0x5d   :  { %139 = dma.hbm_to_vmem [thread:$0]  %s13910_s19, 48, %s14017_s28, [#allocation9], %s13831_s7, %s13831_s7, %s13832_s10  }
  0x5e   :  { %s13833_s29 = smov [#allocation11]   ;;  %s13494_s22 = scalar_lea.hbm %s13925_s6, 1536 }
  0x5f   :  { %s159_s18 = sshll.u32 %s13833_s29, 4  ;;  %p13495_p2 = scmp.ne.s32.totalorder %s13925_s6, %s13494_s22  ;;  %s160_s18 = int_to_ptr.vmem [resolvable:$true] %s159_s18 }
  0x60   :  { %p13498_p3 = scmp.lt.u32.totalorder %s13494_s22, %s13925_s6 }
  0x62   :  { %p13500_p4 = pnand %p13498_p3, %p13495_p2 }
  0x64   :  { %13503 = shalt.err (!%p13500_p4)
}
  0x65   :  { %s13504_s23 = scalar_lea.vmem %s160_s18, 1536  ;;  %p13509_p6 = scmp.lt.s32.totalorder %s160_s18, %s160_s18 }
  0x66   :  { %p13505_p5 = scmp.ne.s32.totalorder %s160_s18, %s13504_s23  ;;  %p13510_p7 = scmp.lt.s32.totalorder %s13504_s23, %s13504_s23 }
  0x68   :  { %p13511_p8 = por %p13510_p7, %p13509_p6 }
  0x6a   :  { %p13512_p9 = pnand %p13511_p8, %p13505_p5 }
  0x6c   :  { %13515 = shalt.err (!%p13512_p9)
}
  0x6d   :  { %s13834_s26 = smov 128   ;;  %s13835_s19 = smov 8  }
  0x6e   :  { %165 = dma.hbm_to_vmem [thread:$0]  %s13925_s6, 1536, %s160_s18, [#allocation12], %s13834_s26, %s13834_s26, %s13835_s19  }
  0x6f   :  { %s13836_s28 = smov [#allocation14]   ;;  %s13837_s1 = smov [#allocation17]  }
  0x70   :  { %s183_s0 = sshll.u32 %s13836_s28, 4  ;;  %s207_s2 = sshll.u32 %s13837_s1, 4  ;;  %s184_s0 = int_to_ptr.vmem [resolvable:$true] %s183_s0  ;;  %s208_s2 = int_to_ptr.vmem [resolvable:$true] %s207_s2 }
  0x71   :  { %s13516_s11 = scalar_lea.hbm %s13935_s20, 1536 }
  0x72   :  { %p13517_p10 = scmp.ne.s32.totalorder %s13935_s20, %s13516_s11  ;;  %p13520_p11 = scmp.lt.u32.totalorder %s13516_s11, %s13935_s20 }
  0x74   :  { %p13522_p12 = pnand %p13520_p11, %p13517_p10 }
  0x76   :  { %13525 = shalt.err (!%p13522_p12)
}
  0x77   :  { %s13526_s15 = scalar_lea.vmem %s184_s0, 1536  ;;  %p13531_p0 = scmp.lt.s32.totalorder %s184_s0, %s184_s0 }
  0x78   :  { %p13527_p13 = scmp.ne.s32.totalorder %s184_s0, %s13526_s15  ;;  %p13532_p1 = scmp.lt.s32.totalorder %s13526_s15, %s13526_s15 }
  0x7a   :  { %p13533_p2 = por %p13532_p1, %p13531_p0 }
  0x7c   :  { %p13534_p3 = pnand %p13533_p2, %p13527_p13 }
  0x7e   :  { %13537 = shalt.err (!%p13534_p3)
}
  0x7f   :  { %189 = dma.hbm_to_vmem [thread:$0]  %s13935_s20, 1536, %s184_s0, [#allocation15], %s13834_s26, %s13834_s26, %s13835_s19  }
  0x80   :  { %s13538_s6 = scalar_lea.hbm %s13945_s4, 1536 }
  0x81   :  { %p13539_p4 = scmp.ne.s32.totalorder %s13945_s4, %s13538_s6  ;;  %p13542_p5 = scmp.lt.u32.totalorder %s13538_s6, %s13945_s4 }
  0x83   :  { %p13544_p6 = pnand %p13542_p5, %p13539_p4 }
  0x85   :  { %13547 = shalt.err (!%p13544_p6)
}
  0x86   :  { %s13548_s16 = scalar_lea.vmem %s208_s2, 1536  ;;  %p13553_p8 = scmp.lt.s32.totalorder %s208_s2, %s208_s2 }
  0x87   :  { %p13549_p7 = scmp.ne.s32.totalorder %s208_s2, %s13548_s16  ;;  %p13554_p9 = scmp.lt.s32.totalorder %s13548_s16, %s13548_s16 }
  0x89   :  { %p13555_p10 = por %p13554_p9, %p13553_p8 }
  0x8b   :  { %p13556_p11 = pnand %p13555_p10, %p13549_p7 }
  0x8d   :  { %13559 = shalt.err (!%p13556_p11)
}
  0x8e   :  { %213 = dma.hbm_to_vmem [thread:$0]  %s13945_s4, 1536, %s208_s2, [#allocation18], %s13834_s26, %s13834_s26, %s13835_s19  }
  0x8f   :  { %s13838_s20 = smov [#allocation2]   ;;  %s13839_s18 = smov [#allocation7]  }
  0x90   :  { %s91_s29 = sshll.u32 %s13838_s20, 4  ;;  %s119_s22 = sshll.u32 %s13839_s18, 4  ;;  %s92_s29 = int_to_ptr.vmem [resolvable:$true] %s91_s29  ;;  %s120_s22 = int_to_ptr.vmem [resolvable:$true] %s119_s22 }
  0x91   :  { %s13560_s23 = scalar_lea.hbm %s13880_s21, 48 }
  0x92   :  { %p13561_p12 = scmp.ne.s32.totalorder %s13880_s21, %s13560_s23  ;;  %p13564_p13 = scmp.lt.u32.totalorder %s13560_s23, %s13880_s21 }
  0x94   :  { %p13566_p0 = pnand %p13564_p13, %p13561_p12 }
  0x96   :  { %13569 = shalt.err (!%p13566_p0)
}
  0x97   :  { %s13570_s28 = scalar_lea.vmem %s92_s29, 48  ;;  %s13574_s0 = scalar_lea.vmem %s92_s29, 64 }
  0x98   :  { %p13571_p1 = scmp.ne.s32.totalorder %s92_s29, %s13570_s28  ;;  %p13575_p2 = scmp.lt.s32.totalorder %s92_s29, %s92_s29 }
  0x99   :  { %p13576_p3 = scmp.lt.s32.totalorder %s13574_s0, %s13570_s28 }
  0x9b   :  { %p13577_p4 = por %p13576_p3, %p13575_p2 }
  0x9d   :  { %p13578_p5 = pnand %p13577_p4, %p13571_p1 }
  0x9f   :  { %13581 = shalt.err (!%p13578_p5)
}
  0xa0   :  { %97 = dma.hbm_to_vmem [thread:$0]  %s13880_s21, 48, %s92_s29, [#allocation3], %s13831_s7, %s13831_s7, %s13832_s10  }
  0xa1   :  { %s13582_s4 = scalar_lea.hbm %s13900_s8, 48 }
  0xa2   :  { %p13583_p6 = scmp.ne.s32.totalorder %s13900_s8, %s13582_s4  ;;  %p13586_p7 = scmp.lt.u32.totalorder %s13582_s4, %s13900_s8 }
  0xa4   :  { %p13588_p8 = pnand %p13586_p7, %p13583_p6 }
  0xa6   :  { %13591 = shalt.err (!%p13588_p8)
}
  0xa7   :  { %s13592_s1 = scalar_lea.vmem %s120_s22, 48  ;;  %s13596_s2 = scalar_lea.vmem %s120_s22, 64 }
  0xa8   :  { %p13593_p9 = scmp.ne.s32.totalorder %s120_s22, %s13592_s1  ;;  %p13597_p10 = scmp.lt.s32.totalorder %s120_s22, %s120_s22 }
  0xa9   :  { %p13598_p11 = scmp.lt.s32.totalorder %s13596_s2, %s13592_s1 }
  0xab   :  { %p13599_p12 = por %p13598_p11, %p13597_p10 }
  0xad   :  { %p13600_p13 = pnand %p13599_p12, %p13593_p9 }
  0xaf   :  { %13603 = shalt.err (!%p13600_p13)
}
  0xb0   :  { %125 = dma.hbm_to_vmem [thread:$0]  %s13900_s8, 48, %s120_s22, [#allocation6], %s13831_s7, %s13831_s7, %s13832_s10  }
  0xb1   :  { %s13840_s21 = smov [#allocation10]   ;;  %s13841_s15 = smov [#allocation13]  }
  0xb2   :  { %s147_s11 = sshll.u32 %s13840_s21, 4  ;;  %s171_s6 = sshll.u32 %s13841_s15, 4  ;;  %s148_s11 = int_to_ptr.vmem [resolvable:$true] %s147_s11  ;;  %s172_s6 = int_to_ptr.vmem [resolvable:$true] %s171_s6 }
  0xb3   :  { %s13604_s16 = scalar_lea.hbm %s13920_s30, 48 }
  0xb4   :  { %p13605_p0 = scmp.ne.s32.totalorder %s13920_s30, %s13604_s16  ;;  %p13608_p1 = scmp.lt.u32.totalorder %s13604_s16, %s13920_s30 }
  0xb6   :  { %p13610_p2 = pnand %p13608_p1, %p13605_p0 }
  0xb8   :  { %13613 = shalt.err (!%p13610_p2)
}
  0xb9   :  { %s13614_s20 = scalar_lea.vmem %s148_s11, 48  ;;  %s13618_s29 = scalar_lea.vmem %s148_s11, 64 }
  0xba   :  { %p13615_p3 = scmp.ne.s32.totalorder %s148_s11, %s13614_s20  ;;  %p13619_p4 = scmp.lt.s32.totalorder %s148_s11, %s148_s11 }
  0xbb   :  { %p13620_p5 = scmp.lt.s32.totalorder %s13618_s29, %s13614_s20 }
  0xbd   :  { %p13621_p6 = por %p13620_p5, %p13619_p4 }
  0xbf   :  { %p13622_p7 = pnand %p13621_p6, %p13615_p3 }
  0xc1   :  { %13625 = shalt.err (!%p13622_p7)
}
  0xc2   :  { %153 = dma.hbm_to_vmem [thread:$0]  %s13920_s30, 48, %s148_s11, [#allocation9], %s13831_s7, %s13831_s7, %s13832_s10  }
  0xc3   :  { %s13626_s8 = scalar_lea.hbm %s13930_s12, 48 }
  0xc4   :  { %p13627_p8 = scmp.ne.s32.totalorder %s13930_s12, %s13626_s8  ;;  %p13630_p9 = scmp.lt.u32.totalorder %s13626_s8, %s13930_s12 }
  0xc6   :  { %p13632_p10 = pnand %p13630_p9, %p13627_p8 }
  0xc8   :  { %13635 = shalt.err (!%p13632_p10)
}
  0xc9   :  { %s13636_s18 = scalar_lea.vmem %s172_s6, 48  ;;  %s13640_s22 = scalar_lea.vmem %s172_s6, 64 }
  0xca   :  { %p13637_p11 = scmp.ne.s32.totalorder %s172_s6, %s13636_s18  ;;  %p13641_p12 = scmp.lt.s32.totalorder %s172_s6, %s172_s6 }
  0xcb   :  { %p13642_p13 = scmp.lt.s32.totalorder %s13640_s22, %s13636_s18 }
  0xcd   :  { %p13643_p0 = por %p13642_p13, %p13641_p12 }
  0xcf   :  { %p13644_p1 = pnand %p13643_p0, %p13637_p11 }
  0xd1   :  { %13647 = shalt.err (!%p13644_p1)
}
  0xd2   :  { %177 = dma.hbm_to_vmem [thread:$0]  %s13930_s12, 48, %s172_s6, [#allocation12], %s13831_s7, %s13831_s7, %s13832_s10  }
  0xd3   :  { %s13842_s30 = smov [#allocation16]   ;;  %s13843_s28 = smov [#allocation19]  }
  0xd4   :  { %s195_s23 = sshll.u32 %s13842_s30, 4  ;;  %s219_s0 = sshll.u32 %s13843_s28, 4  ;;  %s196_s23 = int_to_ptr.vmem [resolvable:$true] %s195_s23  ;;  %s220_s0 = int_to_ptr.vmem [resolvable:$true] %s219_s0 }
  0xd5   :  { %s13648_s4 = scalar_lea.hbm %s13940_s27, 48 }
  0xd6   :  { %p13649_p2 = scmp.ne.s32.totalorder %s13940_s27, %s13648_s4  ;;  %p13652_p3 = scmp.lt.u32.totalorder %s13648_s4, %s13940_s27 }
  0xd8   :  { %p13654_p4 = pnand %p13652_p3, %p13649_p2 }
  0xda   :  { %13657 = shalt.err (!%p13654_p4)
}
  0xdb   :  { %s13658_s1 = scalar_lea.vmem %s196_s23, 48  ;;  %s13662_s2 = scalar_lea.vmem %s196_s23, 64 }
  0xdc   :  { %p13659_p5 = scmp.ne.s32.totalorder %s196_s23, %s13658_s1  ;;  %p13663_p6 = scmp.lt.s32.totalorder %s196_s23, %s196_s23 }
  0xdd   :  { %p13664_p7 = scmp.lt.s32.totalorder %s13662_s2, %s13658_s1 }
  0xdf   :  { %p13665_p8 = por %p13664_p7, %p13663_p6 }
  0xe1   :  { %p13666_p9 = pnand %p13665_p8, %p13659_p5 }
  0xe3   :  { %13669 = shalt.err (!%p13666_p9)
}
  0xe4   :  { %201 = dma.hbm_to_vmem [thread:$0]  %s13940_s27, 48, %s196_s23, [#allocation15], %s13831_s7, %s13831_s7, %s13832_s10  }
  0xe5   :  { %s13670_s12 = scalar_lea.hbm %s13950_s24, 48 }
  0xe6   :  { %p13671_p10 = scmp.ne.s32.totalorder %s13950_s24, %s13670_s12  ;;  %p13674_p11 = scmp.lt.u32.totalorder %s13670_s12, %s13950_s24 }
  0xe8   :  { %p13676_p12 = pnand %p13674_p11, %p13671_p10 }
  0xea   :  { %13679 = shalt.err (!%p13676_p12)
}
  0xeb   :  { %s13680_s21 = scalar_lea.vmem %s220_s0, 48  ;;  %s13684_s11 = scalar_lea.vmem %s220_s0, 64 }
  0xec   :  { %p13681_p13 = scmp.ne.s32.totalorder %s220_s0, %s13680_s21  ;;  %p13685_p0 = scmp.lt.s32.totalorder %s220_s0, %s220_s0 }
  0xed   :  { %p13686_p1 = scmp.lt.s32.totalorder %s13684_s11, %s13680_s21 }
  0xef   :  { %p13687_p2 = por %p13686_p1, %p13685_p0 }
  0xf1   :  { %p13688_p3 = pnand %p13687_p2, %p13681_p13 }
  0xf3   :  { %13691 = shalt.err (!%p13688_p3)
}
  0xf4   :  { %225 = dma.hbm_to_vmem [thread:$0]  %s13950_s24, 48, %s220_s0, [#allocation18], %s13831_s7, %s13831_s7, %s13832_s10  }
  0xf5   :  { %s13844_s27 = smov [#allocation20]   ;;  %s13692_s6 = scalar_lea.hbm %s13975_s14, 512 }
  0xf6   :  { %s239_s15 = sshll.u32 %s13844_s27, 4  ;;  %p13693_p4 = scmp.ne.s32.totalorder %s13975_s14, %s13692_s6  ;;  %s240_s15 = int_to_ptr.vmem [resolvable:$true] %s239_s15 }
  0xf7   :  { %p13696_p5 = scmp.lt.u32.totalorder %s13692_s6, %s13975_s14 }
  0xf9   :  { %p13698_p6 = pnand %p13696_p5, %p13693_p4 }
  0xfb   :  { %13701 = shalt.err (!%p13698_p6)
}
  0xfc   :  { %s13702_s16 = scalar_lea.vmem %s240_s15, 512  ;;  %p13707_p8 = scmp.lt.s32.totalorder %s240_s15, %s240_s15 }
  0xfd   :  { %p13703_p7 = scmp.ne.s32.totalorder %s240_s15, %s13702_s16  ;;  %p13708_p9 = scmp.lt.s32.totalorder %s13702_s16, %s13702_s16 }
  0xff   :  { %p13709_p10 = por %p13708_p9, %p13707_p8 }
 0x101   :  { %p13710_p11 = pnand %p13709_p10, %p13703_p7 }
 0x103   :  { %13713 = shalt.err (!%p13710_p11)
}
 0x104   :  { %245 = dma.hbm_to_vmem [thread:$0]  %s13975_s14, 512, %s240_s15, [#allocation21], %s13834_s26, %s13834_s26, %s13835_s19  }
 0x105   :  { %13780 = dma.done.wait [#allocation3], 48  }
 0x106   :  { %13781 = vsyncadd [#allocation3], 4294967248 }
 0x107   :  { %13782 = dma.done.wait [#allocation6], 96  }
 0x108   :  { %13783 = vsyncadd [#allocation6], 4294967200 }
 0x109   :  { %13784 = dma.done.wait [#allocation9], 96  }
 0x10a   :  { %13785 = vsyncadd [#allocation9], 4294967200 }
 0x10b   :  { %13786 = dma.done.wait [#allocation12], 1584  }
 0x10c   :  { %13787 = vsyncadd [#allocation12], 4294965712 }
 0x10d   :  { %13788 = dma.done.wait [#allocation15], 1584  }
 0x10e   :  { %13789 = vsyncadd [#allocation15], 4294965712 }
 0x10f   :  { %13790 = dma.done.wait [#allocation18], 1584  }
 0x110   :  { %13791 = vsyncadd [#allocation18], 4294965712 }
 0x111   :  { %13792 = dma.done.wait [#allocation21], 512  }
 0x112   :  { %13793 = vsyncadd [#allocation21], 4294966784  ;;  %s15486_s14 = sld [smem:[#allocation35_spill]]  ;;  %s15487_s24 = sld [smem:[#allocation36_spill]]  ;;  %v13845_v0 = vmov 0   ;;  %v292_v1 = vld [vmem:[%s13860_s5] sm:$0xff]  ;;  %v294_v17 = vlaneseq }
 0x113   :  { %13126 = vset.pattern.permute.xlu0 %v13845_v0  ;;  %13127 = vset.pattern.permute.xlu1 %v13845_v0  ;;  %v308_v2 = vld [vmem:[%s13870_s13] sm:$0xff]  ;;  %v309_v3 = vld [vmem:[%s13870_s13 + $0x8] sm:$0xff]  ;;  %v310_v6 = vld [vmem:[%s13870_s13 + $0x10] sm:$0xff]  ;;  %vm311_vm0 = vcmask 195584   ;;  %v13846_v20 = vmov 0.0   ;;  %v13847_v30 = vmov 0.0|0.0  }
 0x114   :  { %297 = vperm.xlu0 %13126, %v292_v1   ;;  %v293_v4 = vld [vmem:[%s13860_s5 + $0x8] sm:$0xff]  ;;  %v12358_v5 = vpack.c.bf16 %v309_v3, %v308_v2  ;;  %v295_v18 = vand.u32 127, %v294_v17  ;;  %s15488_s5 = sld [smem:[#allocation37_spill]]  ;;  %vm404_vm3 = vcmask 261120   ;;  %vm13848_vm4 = vmmov 0   ;;  %s15489_s13 = sld [smem:[#allocation38_spill]] }
 0x115   :  { %v10239_v57 = vld [vmem:[#allocation2] ss:$0 sm:$0xff]  ;;  %v10246_v58 = vld [vmem:[#allocation2 + $0x1] ss:$0 sm:$0xff]  ;;  %v10253_v1 = vld [vmem:[#allocation2 + $0x2] ss:$0 sm:$0xff] }
 0x116   :  { %12359 = vmatprep.subr.bf16.mxu0 %v12358_v5  ;;  %v14209_v2 = vld [vmem:[#allocation5] ss:$0 sm:$0xff]  ;;  %vm2697_vm5 = vcmask 1041408   ;;  %vm2699_vm6 = vcmask 1043456   ;;  %vm2701_vm7 = vcmask 1045504   ;;  %s15490_s7 = sld [smem:[#allocation39_spill]] }
 0x117   :  { %12361 = vmatpush3.bf16.msra.mxu0 %v12358_v5  ;;  %s15491_s10 = sld [smem:[#allocation41_spill]]  ;;  %s15492_s26 = sld [smem:[#allocation43_spill]]  ;;  %vm5141_vm8 = vcmask 1040384   ;;  %vm5322_vm9 = vcmask 123904   ;;  %vm5335_vm10 = vcmask 130048  }
 0x118   :  { %300 = vperm.xlu0 %13126, %v293_v4   ;;  %v291_v7 = vld [vmem:[%s15486_s14 + $0x8] sm:$0xff]  ;;  %11096 = vmatprep.subr.mxu0 %v310_v6  ;;  %v393_v8 = vld [vmem:[%s15487_s24] sm:$0xff]  ;;  %v395_v13 = vld [vmem:[%s15487_s24 + $0x10] sm:$0xff]  ;;  %s15493_s19 = sld [smem:[#allocation40_spill]]  ;;  %s15494_s20 = sld [smem:[#allocation42_spill]] }
 0x119   :  { %v394_v9 = vld [vmem:[%s15487_s24 + $0x8] sm:$0xff]  ;;  %v10242_v10 = vld [vmem:[%s15487_s24 + $0x20] sm:$0xff]  ;;  %v396_v14 = vld [vmem:[%s15487_s24 + $0x18] sm:$0xff]  ;;  %v1939_v33 = vsub.f32 1.0, %v291_v7  ;;  %s15495_s29 = sld [smem:[#allocation44_spill]]  ;;  %s15496_s8 = sld [smem:[#allocation48_spill]] }
 0x11a   :  { %v12362_v11 = vpack.c.bf16 %v394_v9, %v393_v8  ;;  %v10243_v12 = vld [vmem:[%s15487_s24 + $0x28] sm:$0xff]  ;;  %v12366_v16 = vpack.c.bf16 %v396_v14, %v395_v13  ;;  %v10244_v22 = vld [vmem:[%s15487_s24 + $0x30] sm:$0xff]  ;;  %v10245_v23 = vld [vmem:[%s15487_s24 + $0x38] sm:$0xff]  ;;  %s15497_s18 = sld [smem:[#allocation45_spill]]  ;;  %s15498_s22 = sld [smem:[#allocation46_spill]] }
 0x11b   :  { %11097 = vmatpush3.msra.mxu0 %v310_v6  ;;  %v12370_v15 = vpack.c.bf16 %v10243_v12, %v10242_v10  ;;  %v12374_v25 = vpack.c.bf16 %v10245_v23, %v10244_v22  ;;  %v10249_v27 = vld [vmem:[%s15487_s24 + $0x40] sm:$0xff]  ;;  %v10250_v28 = vld [vmem:[%s15487_s24 + $0x48] sm:$0xff]  ;;  %v10251_v36 = vld [vmem:[%s15487_s24 + $0x50] sm:$0xff]  ;;  %s13849_s30 = smov [#allocation23]   ;;  %s13850_s28 = smov [#allocation22]  }
 0x11c   :  { %1935 = vperm.xlu0 %13126, %v291_v7   ;;  %12363 = vmatprep.subr.bf16.mxu1 %v12362_v11  ;;  %v12378_v29 = vpack.c.bf16 %v10250_v28, %v10249_v27  ;;  %v290_v31 = vld [vmem:[%s15486_s14] sm:$0xff]  ;;  %v663_v35 = vld [vmem:[%s15488_s5 + $0x8] sm:$0xff]  ;;  %v10252_v37 = vld [vmem:[%s15487_s24 + $0x58] sm:$0xff]  ;;  %s10170_s23 = sshll.u32 %s13849_s30, 4  ;;  %s10160_s0 = sshll.u32 %s13850_s28, 4  ;;  %s10171_s23 = int_to_ptr.vmem [resolvable:$true] %s10170_s23  ;;  %s10161_s0 = int_to_ptr.vmem [resolvable:$true] %s10160_s0 }
 0x11d   :  { %12371 = vmatprep.subr.bf16.mxu0 %v12370_v15  ;;  %12365 = vmatpush3.bf16.msra.mxu1 %v12362_v11  ;;  %v939_v32 = vsub.f32 1.0, %v290_v31  ;;  %v662_v34 = vld [vmem:[%s15488_s5] sm:$0xff]  ;;  %v12382_v41 = vpack.c.bf16 %v10252_v37, %v10251_v36  ;;  %v664_v42 = vld [vmem:[%s15488_s5 + $0x10] sm:$0xff]  ;;  %v665_v43 = vld [vmem:[%s15488_s5 + $0x18] sm:$0xff]  ;;  %s13714_s4 = scalar_lea.vmem %s10171_s23, 32  ;;  %p13719_p13 = scmp.lt.s32.totalorder %s10171_s23, %s10171_s23 }
 0x11e   :  { %12367 = vmatprep.subr.bf16.mxu1 %v12366_v16  ;;  %935 = vperm.xlu1 %13127, %v290_v31   ;;  %v14135_v39 = vpack.c.bf16 %v663_v35, %v662_v34  ;;  %v14150_v44 = vpack.c.bf16 %v665_v43, %v664_v42  ;;  %v10257_v45 = vld [vmem:[%s15488_s5 + $0x20] sm:$0xff]  ;;  %v10258_v46 = vld [vmem:[%s15488_s5 + $0x28] sm:$0xff]  ;;  %v10259_v50 = vld [vmem:[%s15488_s5 + $0x30] sm:$0xff]  ;;  %p13715_p12 = scmp.ne.s32.totalorder %s10171_s23, %s13714_s4  ;;  %p13720_p0 = scmp.lt.s32.totalorder %s13714_s4, %s13714_s4 }
 0x11f   :  { %v10262_v47 = vld [vmem:[%s15488_s5 + $0x40] sm:$0xff]  ;;  %v10263_v48 = vld [vmem:[%s15488_s5 + $0x48] sm:$0xff]  ;;  %v14162_v49 = vpack.c.bf16 %v10258_v46, %v10257_v45  ;;  %v10260_v51 = vld [vmem:[%s15488_s5 + $0x38] sm:$0xff] }
 0x120   :  { %v14168_v52 = vpack.c.bf16 %v10263_v48, %v10262_v47  ;;  %v10264_v53 = vld [vmem:[%s15488_s5 + $0x50] sm:$0xff]  ;;  %v10265_v54 = vld [vmem:[%s15488_s5 + $0x58] sm:$0xff]  ;;  %v14176_v55 = vpack.c.bf16 %v10260_v51, %v10259_v50  ;;  %v14217_v12 = vld [vmem:[#allocation5 + $0x1] ss:$0 sm:$0xff]  ;;  %p13721_p1 = por %p13720_p0, %p13719_p13 }
 0x121   :  { %12369 = vmatpush3.bf16.msra.mxu1 %v12366_v16  ;;  %v14182_v56 = vpack.c.bf16 %v10265_v54, %v10264_v53 }
 0x122   :  { %12379 = vmatprep.subr.bf16.mxu1 %v12378_v29  ;;  %942 = vperm.xlu1 %13127, %v939_v32   ;;  %p13722_p2 = pnand %p13721_p1, %p13715_p12 }
 0x126   :  { %1942 = vperm.xlu1 %13127, %v1939_v33  }
 0x193   :  { %v298_v19 = vpop.permute.xlu0 %297 }
 0x194   :  { %vm302_vm1 = vcmp.eq.s32.totalorder %v295_v18, %v298_v19 }
 0x195   :  { %v10235_v21 = vsel %vm302_vm1, 1.0, %v13846_v20 }
 0x196   :  { %11098 = vmatprep.mubr.msk.f32.mxu0 %vm311_vm0, %v10235_v21 }
 0x197   :  { %v301_v24 = vpop.permute.xlu0 %300 }
 0x198   :  { %vm303_vm2 = vcmp.eq.s32.totalorder %v295_v18, %v301_v24  ;;  %v14223_v24 = vld [vmem:[#allocation5 + $0x2] ss:$0 sm:$0xff] }
 0x199   :  { %v10236_v26 = vsel %vm303_vm2, 1.0, %v13846_v20 }
 0x19a   :  { %11099 = vmatmul.mubr.msk.f32.vlgmr.msra.gmra.mrb[0].mxu0 %vm311_vm0, %v10236_v26 }
 0x19b   :  { %12373 = vmatpush3.bf16.msra.mxu0 %v12370_v15 }
 0x19c   :  { %12375 = vmatprep.subr.bf16.mxu0 %v12374_v25 }
 0x19d   :  { %v14229_v34 = vpop.permute.xlu1 %935 }
 0x19f   :  { %12377 = vmatpush3.bf16.msra.mxu0 %v12374_v25 }
 0x1a0   :  { %12386 = vmatprep.subr.bf16.mxu0 %v13847_v30 }
 0x1a1   :  { %v14231_v43 = vpop.permute.xlu1 %942 }
 0x1a2   :  { %v14235_v46 = vmul.f32 0.0, %v14231_v43 }
 0x26d   :  { %v14133_v38 = vpop.f32.mrb[0].mxu0 }
 0x26e   :  { %v14137_v40 = vpop.f32.mrb[1].mxu0 }
 0x26f   :  { %11109 = vmatprep.mubr.msk.f32.mxu1 %vm404_vm3, %v14137_v40  ;;  %11120 = vmatprep.mubr.msk.f32.mxu0 %vm404_vm3, %v14137_v40 }
 0x270   :  { %11110 = vmatmul.mubr.msk.f32.vlgmr.msra.gmra.mrb[0].mxu1 %vm404_vm3, %v14133_v38  ;;  %11121 = vmatmul.mubr.msk.f32.vlgmr.msra.gmra.mrb[2].mxu0 %vm404_vm3, %v14133_v38 }
 0x271   :  { %12381 = vmatpush3.bf16.msra.mxu1 %v12378_v29  ;;  %12388 = vmatpush3.bf16.msra.mxu0 %v14135_v39 }
 0x272   :  { %11131 = vmatprep.mubr.msk.f32.mxu1 %vm404_vm3, %v14137_v40  ;;  %12383 = vmatprep.subr.bf16.mxu1 %v12382_v41 }
 0x273   :  { %12389 = vmatprep.subr.bf16.mxu0 %v13847_v30  ;;  %11142 = vmatprep.mubr.msk.f32.mxu0 %vm13848_vm4, %v13846_v20 }
 0x275   :  { %12385 = vmatpush3.bf16.msra.mxu1 %v12382_v41  ;;  %12391 = vmatpush3.bf16.msra.mxu0 %v14150_v44 }
 0x276   :  { %12392 = vmatprep.subr.bf16.mxu1 %v13847_v30  ;;  %12398 = vmatprep.subr.bf16.mxu0 %v13847_v30 }
 0x278   :  { %11132 = vmatmul.mubr.msk.f32.vlgmr.msra.gmra.mrb[2].mxu1 %vm404_vm3, %v14133_v38  ;;  %11143 = vmatmul.mubr.f32.vlgmr.msra.gmra.mrb[4].mxu0 %v13846_v20 }
 0x279   :  { %12394 = vmatpush3.bf16.msra.mxu1 %v14162_v49  ;;  %11153 = vmatprep.mubr.msk.f32.mxu1 %vm13848_vm4, %v13846_v20 }
 0x27a   :  { %12395 = vmatprep.subr.bf16.mxu1 %v13847_v30  ;;  %12400 = vmatpush3.bf16.msra.mxu0 %v14168_v52 }
 0x27b   :  { %12401 = vmatprep.subr.bf16.mxu0 %v13847_v30  ;;  %11164 = vmatprep.mubr.msk.f32.mxu0 %vm13848_vm4, %v13846_v20 }
 0x27d   :  { %12397 = vmatpush3.bf16.msra.mxu1 %v14176_v55 }
 0x27e   :  { %12403 = vmatpush3.bf16.msra.mxu0 %v14182_v56  ;;  %12404 = vmatprep.subr.bf16.mxu1 %v13847_v30 }
 0x27f   :  { %12410 = vmatprep.subr.bf16.mxu0 %v13847_v30 }
 0x280   :  { %11154 = vmatmul.mubr.f32.vlgmr.msra.gmra.mrb[4].mxu1 %v13846_v20 }
 0x281   :  { %11165 = vmatmul.mubr.f32.vlgmr.msra.gmra.mrb[6].mxu0 %v13846_v20  ;;  %12406 = vmatpush3.bf16.msra.mxu1 %v14135_v39 }
 0x282   :  { %12412 = vmatpush3.bf16.msra.mxu0 %v14162_v49  ;;  %12407 = vmatprep.subr.bf16.mxu1 %v13847_v30 }
 0x283   :  { %12413 = vmatprep.subr.bf16.mxu0 %v13847_v30  ;;  %11175 = vmatprep.mubr.msk.f32.mxu1 %vm13848_vm4, %v13846_v20 }
 0x284   :  { %11186 = vmatprep.mubr.msk.f32.mxu0 %vm13848_vm4, %v13846_v20 }
 0x285   :  { %12409 = vmatpush3.bf16.msra.mxu1 %v14150_v44 }
 0x286   :  { %12415 = vmatpush3.bf16.msra.mxu0 %v14176_v55  ;;  %12416 = vmatprep.subr.bf16.mxu1 %v13847_v30 }
 0x287   :  { %12422 = vmatprep.subr.bf16.mxu0 %v13847_v30 }
 0x343   :  { %v11111_v59 = vpop.f32.mrb[0].mxu1  ;;  %v11122_v60 = vpop.f32.mrb[2].mxu0 }
 0x344   :  { %v14205_v61 = vadd.f32 %v11111_v59, %v10239_v57  ;;  %v14207_v62 = vadd.f32 %v11122_v60, %v10246_v58  ;;  %v477_v63 = vpop.f32.mrb[1].mxu1  ;;  %v565_v0 = vpop.f32.mrb[3].mxu0 }
 0x345   :  { %v14211_v5 = vadd.f32 %v10239_v57, %v477_v63  ;;  %v14219_v14 = vadd.f32 %v10246_v58, %v565_v0 }
 0x34b   :  { %v11133_v3 = vpop.f32.mrb[2].mxu1  ;;  %v742_v4 = vpop.f32.mrb[4].mxu0 }
 0x34c   :  { %v14213_v6 = vadd.f32 %v11133_v3, %v10253_v1  ;;  %v743_v7 = vadd.f32 %v14209_v2, %v742_v4  ;;  %v653_v8 = vpop.f32.mrb[3].mxu1  ;;  %v11144_v9 = vpop.f32.mrb[5].mxu0 }
 0x34d   :  { %v14226_v29 = vadd.f32 %v10253_v1, %v653_v8 }
 0x34e   :  { %v912_v10 = vadd.f32 %v743_v7, %v14211_v5 }
 0x350   :  { %v10267_v11 = vmul.f32 -1.442695, %v912_v10 }
 0x352   :  { %13128 = vpow2.f32 %v10267_v11 }
 0x353   :  { %v825_v13 = vpop.f32.mrb[4].mxu1 }
 0x354   :  { %v826_v15 = vadd.f32 %v14217_v12, %v825_v13  ;;  %v11155_v16 = vpop.f32.mrb[5].mxu1  ;;  %v908_v17 = vpop.f32.mrb[6].mxu0 }
 0x355   :  { %v11166_v18 = vpop.f32.mrb[7].mxu0  ;;  %v909_v27 = vadd.f32 %v14223_v24, %v908_v17 }
 0x356   :  { %v919_v19 = vadd.f32 %v826_v15, %v14219_v14 }
 0x358   :  { %v10268_v21 = vmul.f32 -1.442695, %v919_v19 }
 0x35a   :  { %13130 = vpow2.f32 %v10268_v21 }
 0x35c   :  { %v13129_v22 = vpop.eup %13128 }
 0x35d   :  { %v916_v23 = vadd.f32 1.0, %v13129_v22 }
 0x35f   :  { %13132 = vrcp.f32 %v916_v23 }
 0x364   :  { %v13131_v25 = vpop.eup %13130 }
 0x365   :  { %v923_v26 = vadd.f32 1.0, %v13131_v25 }
 0x367   :  { %13134 = vrcp.f32 %v923_v26 }
 0x369   :  { %v13133_v28 = vpop.eup %13132 }
 0x36a   :  { %v926_v31 = vmul.f32 %v13133_v28, %v909_v27 }
 0x36c   :  { %v927_v32 = vadd.f32 %v926_v31, %v14226_v29 }
 0x36e   :  { %13136 = vtanh.f32 %v927_v32 }
 0x371   :  { %v13135_v33 = vpop.eup %13134 }
 0x372   :  { %v929_v35 = vsub.f32 1.0, %v13135_v33  ;;  %v931_v37 = vmul.f32 0.0, %v13135_v33 }
 0x378   :  { %v13137_v36 = vpop.eup %13136 }
 0x379   :  { %v930_v41 = vmul.f32 %v13137_v36, %v929_v35 }
 0x37b   :  { %v932_v42 = vadd.f32 %v931_v37, %v930_v41 }
 0x37d   :  { %v938_v45 = vmul.f32 %v14229_v34, %v932_v42 }
 0x37f   :  { %v946_v47 = vadd.f32 %v14235_v46, %v938_v45 }
 0x381   :  { %11176 = vmatmul.mubr.msk.f32.vlgmr.msra.gmra.mrb[6].mxu1 %vm404_vm3, %v946_v47  ;;  %11187 = vmatmul.mubr.msk.f32.vlgmr.msra.gmra.mrb[8].mxu0 %vm404_vm3, %v946_v47  ;;  %v1189_v16 = vrot.slane %v946_v47, 6  ;;  %v947_v33 = vmul.f32 %v946_v47, %v14229_v34 }
 0x382   :  { %12418 = vmatpush3.bf16.msra.mxu1 %v14168_v52  ;;  %11197 = vmatprep.mubr.msk.f32.mxu1 %vm13848_vm4, %v13846_v20 }
 0x383   :  { %12419 = vmatprep.subr.bf16.mxu1 %v13847_v30  ;;  %12424 = vmatpush3.bf16.msra.mxu0 %v14135_v39  ;;  %v1194_v28 = vmul.f32 %v1189_v16, %v14231_v43 }
 0x384   :  { %12425 = vmatprep.subr.bf16.mxu0 %v13847_v30  ;;  %11208 = vmatprep.mubr.msk.f32.mxu0 %vm13848_vm4, %v13846_v20 }
 0x386   :  { %12421 = vmatpush3.bf16.msra.mxu1 %v14182_v56 }
 0x387   :  { %12428 = vmatprep.subr.bf16.mxu1 %v13847_v30  ;;  %12427 = vmatpush3.bf16.msra.mxu0 %v14150_v44 }
 0x388   :  { %12434 = vmatprep.subr.bf16.mxu0 %v13847_v30 }
 0x389   :  { %11198 = vmatmul.mubr.msk.f32.vlgmr.msra.gmra.mrb[8].mxu1 %vm404_vm3, %v946_v47 }
 0x38a   :  { %12430 = vmatpush3.bf16.msra.mxu1 %v14162_v49  ;;  %11219 = vmatprep.mubr.msk.f32.mxu1 %vm13848_vm4, %v13846_v20 }
 0x38b   :  { %12431 = vmatprep.subr.bf16.mxu1 %v13847_v30 }
 0x38e   :  { %12433 = vmatpush3.bf16.msra.mxu1 %v14176_v55 }
 0x38f   :  { %12440 = vmatprep.subr.bf16.mxu1 %v13847_v30 }
 0x454   :  { %v1017_v48 = vpop.f32.mrb[6].mxu1  ;;  %v1087_v50 = vpop.f32.mrb[8].mxu0 }
 0x455   :  { %v1018_v51 = vadd.f32 %v14209_v2, %v1017_v48  ;;  %v1088_v53 = vadd.f32 %v14217_v12, %v1087_v50  ;;  %v11177_v54 = vpop.f32.mrb[7].mxu1  ;;  %v11188_v57 = vpop.f32.mrb[9].mxu0 }
 0x457   :  { %v1162_v58 = vrot.slane %v1018_v51, 6  ;;  %v1172_v59 = vrot.slane %v1088_v53, 6 }
 0x459   :  { %v1164_v60 = vadd.f32 %v1162_v58, %v14211_v5  ;;  %v1174_v63 = vadd.f32 %v1172_v59, %v14219_v14 }
 0x45b   :  { %v10272_v0 = vmul.f32 -1.442695, %v1164_v60  ;;  %v10273_v1 = vmul.f32 -1.442695, %v1174_v63 }
 0x45c   :  { %v1157_v3 = vpop.f32.mrb[8].mxu1 }
 0x45d   :  { %13138 = vpow2.f32 %v10272_v0  ;;  %v11199_v4 = vpop.f32.mrb[9].mxu1  ;;  %v1158_v11 = vadd.f32 %v14223_v24, %v1157_v3 }
 0x45e   :  { %13140 = vpow2.f32 %v10273_v1 }
 0x45f   :  { %v1182_v13 = vrot.slane %v1158_v11, 6 }
 0x467   :  { %v13139_v7 = vpop.eup %13138 }
 0x468   :  { %v13141_v8 = vpop.eup %13140  ;;  %v1168_v9 = vadd.f32 1.0, %v13139_v7 }
 0x469   :  { %v1178_v10 = vadd.f32 1.0, %v13141_v8 }
 0x46a   :  { %13142 = vrcp.f32 %v1168_v9 }
 0x46b   :  { %13144 = vrcp.f32 %v1178_v10 }
 0x474   :  { %v13143_v15 = vpop.eup %13142 }
 0x475   :  { %v13145_v17 = vpop.eup %13144  ;;  %v1184_v18 = vmul.f32 %v13143_v15, %v1182_v13 }
 0x476   :  { %v1191_v19 = vmul.f32 %v13145_v17, %v1189_v16  ;;  %v1187_v22 = vsub.f32 1.0, %v13145_v17 }
 0x477   :  { %v1185_v21 = vadd.f32 %v1184_v18, %v14226_v29 }
 0x479   :  { %13146 = vtanh.f32 %v1185_v21 }
 0x483   :  { %v13147_v23 = vpop.eup %13146 }
 0x484   :  { %v1188_v25 = vmul.f32 %v13147_v23, %v1187_v22 }
 0x486   :  { %v1192_v26 = vadd.f32 %v1191_v19, %v1188_v25 }
 0x488   :  { %v1193_v27 = vmul.f32 %v1192_v26, %v14229_v34 }
 0x48a   :  { %v1195_v31 = vadd.f32 %v1194_v28, %v1193_v27 }
 0x48c   :  { %v1198_v32 = vrot.slane %v1195_v31, 2  ;;  %v1196_v35 = vmul.f32 %v1195_v31, %v14229_v34  ;;  %v1439_v9 = vrot.slane %v1195_v31, 6 }
 0x48e   :  { %11209 = vmatmul.mubr.msk.f32.vlgmr.msra.gmra.mrb[10].mxu0 %vm404_vm3, %v1198_v32  ;;  %11220 = vmatmul.mubr.msk.f32.vlgmr.msra.gmra.mrb[10].mxu1 %vm404_vm3, %v1198_v32  ;;  %v2698_v36 = vsel %vm2697_vm5, %v947_v33, %v1196_v35  ;;  %v1444_v22 = vmul.f32 %v1439_v9, %v14231_v43 }
 0x48f   :  { %12436 = vmatpush3.bf16.msra.mxu0 %v14168_v52  ;;  %11230 = vmatprep.mubr.msk.f32.mxu0 %vm13848_vm4, %v13846_v20 }
 0x490   :  { %12437 = vmatprep.subr.bf16.mxu0 %v13847_v30  ;;  %12442 = vmatpush3.bf16.msra.mxu1 %v14135_v39 }
 0x491   :  { %12443 = vmatprep.subr.bf16.mxu1 %v13847_v30  ;;  %11241 = vmatprep.mubr.msk.f32.mxu1 %vm13848_vm4, %v13846_v20 }
 0x493   :  { %12439 = vmatpush3.bf16.msra.mxu0 %v14182_v56 }
 0x494   :  { %12446 = vmatprep.subr.bf16.mxu0 %v13847_v30  ;;  %12445 = vmatpush3.bf16.msra.mxu1 %v14150_v44 }
 0x495   :  { %12452 = vmatprep.subr.bf16.mxu1 %v13847_v30 }
 0x496   :  { %11231 = vmatmul.mubr.msk.f32.vlgmr.msra.gmra.mrb[12].mxu0 %vm404_vm3, %v1198_v32 }
 0x497   :  { %12448 = vmatpush3.bf16.msra.mxu0 %v14162_v49  ;;  %11252 = vmatprep.mubr.msk.f32.mxu0 %vm13848_vm4, %v13846_v20 }
 0x498   :  { %12449 = vmatprep.subr.bf16.mxu0 %v13847_v30 }
 0x49b   :  { %12451 = vmatpush3.bf16.msra.mxu0 %v14176_v55 }
 0x49c   :  { %12458 = vmatprep.subr.bf16.mxu0 %v13847_v30 }
 0x561   :  { %v1267_v37 = vpop.f32.mrb[10].mxu0  ;;  %v1337_v41 = vpop.f32.mrb[10].mxu1 }
 0x562   :  { %v1268_v42 = vadd.f32 %v14209_v2, %v1267_v37  ;;  %v1338_v45 = vadd.f32 %v14217_v12, %v1337_v41  ;;  %v11210_v47 = vpop.f32.mrb[11].mxu0  ;;  %v11221_v48 = vpop.f32.mrb[11].mxu1 }
 0x564   :  { %v1412_v50 = vrot.slane %v1268_v42, 4  ;;  %v1422_v51 = vrot.slane %v1338_v45, 4 }
 0x566   :  { %v1414_v53 = vadd.f32 %v1412_v50, %v14211_v5  ;;  %v1424_v54 = vadd.f32 %v1422_v51, %v14219_v14 }
 0x568   :  { %v10277_v57 = vmul.f32 -1.442695, %v1414_v53  ;;  %v10278_v58 = vmul.f32 -1.442695, %v1424_v54 }
 0x569   :  { %v1407_v59 = vpop.f32.mrb[12].mxu0 }
 0x56a   :  { %13148 = vpow2.f32 %v10277_v57  ;;  %v11232_v60 = vpop.f32.mrb[13].mxu0  ;;  %v1408_v4 = vadd.f32 %v14223_v24, %v1407_v59 }
 0x56b   :  { %13150 = vpow2.f32 %v10278_v58 }
 0x56c   :  { %v1432_v7 = vrot.slane %v1408_v4, 4 }
 0x574   :  { %v13149_v63 = vpop.eup %13148 }
 0x575   :  { %v13151_v0 = vpop.eup %13150  ;;  %v1418_v1 = vadd.f32 1.0, %v13149_v63 }
 0x576   :  { %v1428_v3 = vadd.f32 1.0, %v13151_v0 }
 0x577   :  { %13152 = vrcp.f32 %v1418_v1 }
 0x578   :  { %13154 = vrcp.f32 %v1428_v3 }
 0x581   :  { %v13153_v8 = vpop.eup %13152 }
 0x582   :  { %v13155_v10 = vpop.eup %13154  ;;  %v1434_v11 = vmul.f32 %v13153_v8, %v1432_v7 }
 0x583   :  { %v1441_v13 = vmul.f32 %v13155_v10, %v1439_v9  ;;  %v1437_v16 = vsub.f32 1.0, %v13155_v10 }
 0x584   :  { %v1435_v15 = vadd.f32 %v1434_v11, %v14226_v29 }
 0x586   :  { %13156 = vtanh.f32 %v1435_v15 }
 0x590   :  { %v13157_v17 = vpop.eup %13156 }
 0x591   :  { %v1438_v18 = vmul.f32 %v13157_v17, %v1437_v16 }
 0x593   :  { %v1442_v19 = vadd.f32 %v1441_v13, %v1438_v18 }
 0x595   :  { %v1443_v21 = vmul.f32 %v1442_v19, %v14229_v34 }
 0x597   :  { %v1445_v23 = vadd.f32 %v1444_v22, %v1443_v21 }
 0x599   :  { %v1448_v25 = vrot.slane %v1445_v23, 4  ;;  %v1446_v26 = vmul.f32 %v1445_v23, %v14229_v34  ;;  %v1689_v0 = vrot.slane %v1445_v23, 6 }
 0x59b   :  { %11242 = vmatmul.mubr.msk.f32.vlgmr.msra.gmra.mrb[12].mxu1 %vm404_vm3, %v1448_v25  ;;  %11253 = vmatmul.mubr.msk.f32.vlgmr.msra.gmra.mrb[14].mxu0 %vm404_vm3, %v1448_v25  ;;  %v2700_v27 = vsel %vm2699_vm6, %v2698_v36, %v1446_v26  ;;  %v1694_v11 = vmul.f32 %v1689_v0, %v14231_v43 }
 0x59c   :  { %12454 = vmatpush3.bf16.msra.mxu1 %v14168_v52  ;;  %11263 = vmatprep.mubr.msk.f32.mxu1 %vm13848_vm4, %v13846_v20 }
 0x59d   :  { %12455 = vmatprep.subr.bf16.mxu1 %v13847_v30  ;;  %12460 = vmatpush3.bf16.msra.mxu0 %v14135_v39 }
 0x59e   :  { %12461 = vmatprep.subr.bf16.mxu0 %v13847_v30  ;;  %11274 = vmatprep.mubr.msk.f32.mxu0 %vm13848_vm4, %v13846_v20 }
 0x5a0   :  { %12457 = vmatpush3.bf16.msra.mxu1 %v14182_v56 }
 0x5a1   :  { %12464 = vmatprep.subr.bf16.mxu1 %v13847_v30  ;;  %12463 = vmatpush3.bf16.msra.mxu0 %v14150_v44 }
 0x5a2   :  { %12470 = vmatprep.subr.bf16.mxu0 %v13847_v30 }
 0x5a3   :  { %11264 = vmatmul.mubr.msk.f32.vlgmr.msra.gmra.mrb[14].mxu1 %vm404_vm3, %v1448_v25 }
 0x5a4   :  { %12466 = vmatpush3.bf16.msra.mxu1 %v14162_v49  ;;  %11285 = vmatprep.mubr.msk.f32.mxu1 %vm13848_vm4, %v13846_v20 }
 0x5a5   :  { %12467 = vmatprep.subr.bf16.mxu1 %v13847_v30 }
 0x5a8   :  { %12469 = vmatpush3.bf16.msra.mxu1 %v14176_v55 }
 0x5a9   :  { %12476 = vmatprep.subr.bf16.mxu1 %v13847_v30 }
 0x66e   :  { %v1517_v28 = vpop.f32.mrb[12].mxu1  ;;  %v1587_v31 = vpop.f32.mrb[14].mxu0 }
 0x66f   :  { %v1518_v32 = vadd.f32 %v14209_v2, %v1517_v28  ;;  %v1588_v33 = vadd.f32 %v14217_v12, %v1587_v31  ;;  %v11243_v35 = vpop.f32.mrb[13].mxu1  ;;  %v11254_v36 = vpop.f32.mrb[15].mxu0 }
 0x671   :  { %v1662_v37 = vrot.slane %v1518_v32, 2  ;;  %v1672_v41 = vrot.slane %v1588_v33, 2 }
 0x673   :  { %v1664_v42 = vadd.f32 %v1662_v37, %v14211_v5  ;;  %v1674_v45 = vadd.f32 %v1672_v41, %v14219_v14 }
 0x675   :  { %v10282_v47 = vmul.f32 -1.442695, %v1664_v42  ;;  %v10283_v48 = vmul.f32 -1.442695, %v1674_v45 }
 0x676   :  { %v1657_v50 = vpop.f32.mrb[14].mxu1 }
 0x677   :  { %13158 = vpow2.f32 %v10282_v47  ;;  %v11265_v51 = vpop.f32.mrb[15].mxu1  ;;  %v1658_v59 = vadd.f32 %v14223_v24, %v1657_v50 }
 0x678   :  { %13160 = vpow2.f32 %v10283_v48 }
 0x679   :  { %v1682_v60 = vrot.slane %v1658_v59, 2  ;;  %v14363_v59 = vpop.permute.xlu1 %1942 }
 0x681   :  { %v13159_v53 = vpop.eup %13158 }
 0x682   :  { %v13161_v54 = vpop.eup %13160  ;;  %v1668_v57 = vadd.f32 1.0, %v13159_v53 }
 0x683   :  { %v1678_v58 = vadd.f32 1.0, %v13161_v54 }
 0x684   :  { %13162 = vrcp.f32 %v1668_v57 }
 0x685   :  { %13164 = vrcp.f32 %v1678_v58  ;;  %v14361_v58 = vpop.permute.xlu0 %1935 }
 0x68e   :  { %v13163_v63 = vpop.eup %13162 }
 0x68f   :  { %v13165_v5 = vpop.eup %13164  ;;  %v1684_v1 = vmul.f32 %v13163_v63, %v1682_v60 }
 0x690   :  { %v1691_v14 = vmul.f32 %v13165_v5, %v1689_v0  ;;  %v1687_v4 = vsub.f32 1.0, %v13165_v5 }
 0x691   :  { %v1685_v3 = vadd.f32 %v1684_v1, %v14226_v29 }
 0x693   :  { %13166 = vtanh.f32 %v1685_v3 }
 0x69d   :  { %v13167_v7 = vpop.eup %13166 }
 0x69e   :  { %v1688_v8 = vmul.f32 %v13167_v7, %v1687_v4 }
 0x6a0   :  { %v1692_v9 = vadd.f32 %v1691_v14, %v1688_v8 }
 0x6a2   :  { %v1693_v10 = vmul.f32 %v1692_v9, %v14229_v34 }
 0x6a4   :  { %v1695_v13 = vadd.f32 %v1694_v11, %v1693_v10 }
 0x6a6   :  { %v1698_v15 = vrot.slane %v1695_v13, 6  ;;  %v1696_v16 = vmul.f32 %v1695_v13, %v14229_v34 }
 0x6a8   :  { %11275 = vmatmul.mubr.msk.f32.vlgmr.msra.gmra.mrb[16].mxu0 %vm404_vm3, %v1698_v15  ;;  %11286 = vmatmul.mubr.msk.f32.vlgmr.msra.gmra.mrb[16].mxu1 %vm404_vm3, %v1698_v15  ;;  %v14334_v29 = vsel %vm2701_vm7, %v2700_v27, %v1696_v16  ;;  %v1945_v63 = vmul.f32 %v14363_v59, %v1698_v15 }
 0x6a9   :  { %12472 = vmatpush3.bf16.msra.mxu0 %v14168_v52  ;;  %11296 = vmatprep.mubr.msk.f32.mxu0 %vm13848_vm4, %v13846_v20 }
 0x6aa   :  { %12473 = vmatprep.subr.bf16.mxu0 %v13847_v30  ;;  %12478 = vmatpush3.bf16.msra.mxu1 %v14135_v39 }
 0x6ab   :  { %12479 = vmatprep.subr.bf16.mxu1 %v13847_v30  ;;  %11307 = vmatprep.mubr.msk.f32.mxu1 %vm13848_vm4, %v13846_v20 }
 0x6ad   :  { %12475 = vmatpush3.bf16.msra.mxu0 %v14182_v56 }
 0x6ae   :  { %12482 = vmatprep.subr.bf16.mxu0 %v13847_v30  ;;  %12481 = vmatpush3.bf16.msra.mxu1 %v14150_v44 }
 0x6af   :  { %12488 = vmatprep.subr.bf16.mxu1 %v13847_v30 }
 0x6b0   :  { %11297 = vmatmul.mubr.msk.f32.vlgmr.msra.gmra.mrb[18].mxu0 %vm404_vm3, %v1698_v15 }
 0x6b1   :  { %12484 = vmatpush3.bf16.msra.mxu0 %v14162_v49  ;;  %11318 = vmatprep.mubr.msk.f32.mxu0 %vm13848_vm4, %v13846_v20 }
 0x6b2   :  { %12485 = vmatprep.subr.bf16.mxu0 %v13847_v30 }
 0x6b5   :  { %12487 = vmatpush3.bf16.msra.mxu0 %v14176_v55 }
 0x6b6   :  { %12494 = vmatprep.subr.bf16.mxu0 %v13847_v30 }
 0x77b   :  { %v1767_v17 = vpop.f32.mrb[16].mxu0  ;;  %v1837_v18 = vpop.f32.mrb[16].mxu1 }
 0x77c   :  { %v1768_v19 = vadd.f32 %v14209_v2, %v1767_v17  ;;  %v11276_v21 = vpop.f32.mrb[17].mxu0  ;;  %v11287_v22 = vpop.f32.mrb[17].mxu1  ;;  %v1838_v23 = vadd.f32 %v14217_v12, %v1837_v18 }
 0x77e   :  { %v1911_v25 = vadd.f32 %v1768_v19, %v14205_v61  ;;  %v1918_v27 = vadd.f32 %v1838_v23, %v14207_v62 }
 0x780   :  { %v10287_v26 = vmul.f32 -1.442695, %v1911_v25  ;;  %v10288_v32 = vmul.f32 -1.442695, %v1918_v27 }
 0x782   :  { %13168 = vpow2.f32 %v10287_v26 }
 0x783   :  { %v1907_v28 = vpop.f32.mrb[18].mxu0  ;;  %13170 = vpow2.f32 %v10288_v32 }
 0x784   :  { %v11298_v31 = vpop.f32.mrb[19].mxu0  ;;  %v1908_v41 = vadd.f32 %v14223_v24, %v1907_v28 }
 0x78c   :  { %v13169_v33 = vpop.eup %13168 }
 0x78d   :  { %v1915_v35 = vadd.f32 1.0, %v13169_v33  ;;  %v13171_v36 = vpop.eup %13170 }
 0x78e   :  { %v1922_v37 = vadd.f32 1.0, %v13171_v36 }
 0x78f   :  { %13172 = vrcp.f32 %v1915_v35 }
 0x790   :  { %13174 = vrcp.f32 %v1922_v37 }
 0x799   :  { %v13173_v42 = vpop.eup %13172 }
 0x79a   :  { %v1925_v45 = vmul.f32 %v13173_v42, %v1908_v41  ;;  %v13175_v48 = vpop.eup %13174 }
 0x79b   :  { %v1928_v50 = vsub.f32 1.0, %v13175_v48  ;;  %v1931_v53 = vmul.f32 %v13175_v48, %v1698_v15 }
 0x79c   :  { %v1926_v47 = vadd.f32 %v1925_v45, %v14213_v6 }
 0x79e   :  { %13176 = vtanh.f32 %v1926_v47 }
 0x7a8   :  { %v13177_v51 = vpop.eup %13176 }
 0x7a9   :  { %v1929_v54 = vmul.f32 %v13177_v51, %v1928_v50 }
 0x7ab   :  { %v1932_v57 = vadd.f32 %v1931_v53, %v1929_v54 }
 0x7ad   :  { %v1938_v60 = vmul.f32 %v14361_v58, %v1932_v57 }
 0x7af   :  { %v1946_v0 = vadd.f32 %v1945_v63, %v1938_v60 }
 0x7b1   :  { %11308 = vmatmul.mubr.msk.f32.vlgmr.msra.gmra.mrb[18].mxu1 %vm404_vm3, %v1946_v0  ;;  %11319 = vmatmul.mubr.msk.f32.vlgmr.msra.gmra.mrb[20].mxu0 %vm404_vm3, %v1946_v0  ;;  %v2189_v27 = vrot.slane %v1946_v0, 6  ;;  %v1947_v50 = vmul.f32 %v1946_v0, %v14361_v58 }
 0x7b2   :  { %12490 = vmatpush3.bf16.msra.mxu1 %v14168_v52  ;;  %11329 = vmatprep.mubr.msk.f32.mxu1 %vm13848_vm4, %v13846_v20 }
 0x7b3   :  { %12491 = vmatprep.subr.bf16.mxu1 %v13847_v30  ;;  %12496 = vmatpush3.bf16.msra.mxu0 %v14135_v39  ;;  %v2194_v45 = vmul.f32 %v2189_v27, %v14363_v59 }
 0x7b4   :  { %12497 = vmatprep.subr.bf16.mxu0 %v13847_v30  ;;  %11340 = vmatprep.mubr.msk.f32.mxu0 %vm13848_vm4, %v13846_v20 }
 0x7b6   :  { %12493 = vmatpush3.bf16.msra.mxu1 %v14182_v56 }
 0x7b7   :  { %12500 = vmatprep.subr.bf16.mxu1 %v13847_v30  ;;  %12499 = vmatpush3.bf16.msra.mxu0 %v14150_v44 }
 0x7b8   :  { %12506 = vmatprep.subr.bf16.mxu0 %v13847_v30 }
 0x7b9   :  { %11330 = vmatmul.mubr.msk.f32.vlgmr.msra.gmra.mrb[20].mxu1 %vm404_vm3, %v1946_v0 }
 0x7ba   :  { %12502 = vmatpush3.bf16.msra.mxu1 %v14162_v49  ;;  %11351 = vmatprep.mubr.msk.f32.mxu1 %vm13848_vm4, %v13846_v20 }
 0x7bb   :  { %12503 = vmatprep.subr.bf16.mxu1 %v13847_v30 }
 0x7be   :  { %12505 = vmatpush3.bf16.msra.mxu1 %v14176_v55 }
 0x7bf   :  { %12512 = vmatprep.subr.bf16.mxu1 %v13847_v30 }
 0x884   :  { %v2017_v5 = vpop.f32.mrb[18].mxu1  ;;  %v2087_v1 = vpop.f32.mrb[20].mxu0 }
 0x885   :  { %v2018_v14 = vadd.f32 %v14209_v2, %v2017_v5  ;;  %v2088_v3 = vadd.f32 %v14217_v12, %v2087_v1  ;;  %v11309_v4 = vpop.f32.mrb[19].mxu1  ;;  %v11320_v7 = vpop.f32.mrb[21].mxu0 }
 0x887   :  { %v2162_v8 = vrot.slane %v2018_v14, 6  ;;  %v2172_v9 = vrot.slane %v2088_v3, 6 }
 0x889   :  { %v2164_v10 = vadd.f32 %v2162_v8, %v14205_v61  ;;  %v2174_v11 = vadd.f32 %v2172_v9, %v14207_v62 }
 0x88b   :  { %v10292_v13 = vmul.f32 -1.442695, %v2164_v10  ;;  %v10293_v15 = vmul.f32 -1.442695, %v2174_v11 }
 0x88c   :  { %v2157_v16 = vpop.f32.mrb[20].mxu1 }
 0x88d   :  { %13178 = vpow2.f32 %v10292_v13  ;;  %v11331_v17 = vpop.f32.mrb[21].mxu1  ;;  %v2158_v23 = vadd.f32 %v14223_v24, %v2157_v16 }
 0x88e   :  { %13180 = vpow2.f32 %v10293_v15 }
 0x88f   :  { %v2182_v25 = vrot.slane %v2158_v23, 6 }
 0x897   :  { %v13179_v18 = vpop.eup %13178 }
 0x898   :  { %v13181_v19 = vpop.eup %13180  ;;  %v2168_v21 = vadd.f32 1.0, %v13179_v18 }
 0x899   :  { %v2178_v22 = vadd.f32 1.0, %v13181_v19 }
 0x89a   :  { %13182 = vrcp.f32 %v2168_v21 }
 0x89b   :  { %13184 = vrcp.f32 %v2178_v22 }
 0x8a4   :  { %v13183_v26 = vpop.eup %13182 }
 0x8a5   :  { %v13185_v28 = vpop.eup %13184  ;;  %v2184_v31 = vmul.f32 %v13183_v26, %v2182_v25 }
 0x8a6   :  { %v2191_v32 = vmul.f32 %v13185_v28, %v2189_v27  ;;  %v2187_v35 = vsub.f32 1.0, %v13185_v28 }
 0x8a7   :  { %v2185_v33 = vadd.f32 %v2184_v31, %v14213_v6 }
 0x8a9   :  { %13186 = vtanh.f32 %v2185_v33 }
 0x8b3   :  { %v13187_v36 = vpop.eup %13186 }
 0x8b4   :  { %v2188_v37 = vmul.f32 %v13187_v36, %v2187_v35  ;;  %v2707_v36 = vld [vmem:[%s15489_s13 + $0x8] sm:$0xff] }
 0x8b6   :  { %v2192_v41 = vadd.f32 %v2191_v32, %v2188_v37  ;;  %v10307_v37 = vld [vmem:[%s15489_s13 + $0x20] sm:$0xff] }
 0x8b8   :  { %v2193_v42 = vmul.f32 %v2192_v41, %v14361_v58 }
 0x8ba   :  { %v2195_v47 = vadd.f32 %v2194_v45, %v2193_v42  ;;  %v10308_v42 = vld [vmem:[%s15489_s13 + $0x28] sm:$0xff]  ;;  %v2708_v45 = vld [vmem:[%s15489_s13 + $0x10] sm:$0xff] }
 0x8bc   :  { %v2198_v48 = vrot.slane %v2195_v47, 2  ;;  %v2196_v51 = vmul.f32 %v2195_v47, %v14361_v58  ;;  %v2439_v16 = vrot.slane %v2195_v47, 6  ;;  %v2709_v47 = vld [vmem:[%s15489_s13 + $0x18] sm:$0xff] }
 0x8be   :  { %11341 = vmatmul.mubr.msk.f32.vlgmr.msra.gmra.mrb[22].mxu0 %vm404_vm3, %v2198_v48  ;;  %11352 = vmatmul.mubr.msk.f32.vlgmr.msra.gmra.mrb[22].mxu1 %vm404_vm3, %v2198_v48  ;;  %v2703_v53 = vsel %vm2697_vm5, %v1947_v50, %v2196_v51  ;;  %v2444_v28 = vmul.f32 %v2439_v16, %v14363_v59  ;;  %v12534_v50 = vpack.c.bf16 %v2709_v47, %v2708_v45  ;;  %v10309_v51 = vld [vmem:[%s15489_s13 + $0x30] sm:$0xff]  ;;  %v10322_v47 = vld [vmem:[%s15490_s7 + $0x20] sm:$0xff] }
 0x8bf   :  { %12508 = vmatpush3.bf16.msra.mxu0 %v14168_v52  ;;  %11362 = vmatprep.mubr.msk.f32.mxu0 %vm13848_vm4, %v13846_v20 }
 0x8c0   :  { %12509 = vmatprep.subr.bf16.mxu0 %v13847_v30  ;;  %12514 = vmatpush3.bf16.msra.mxu1 %v14135_v39 }
 0x8c1   :  { %12515 = vmatprep.subr.bf16.mxu1 %v13847_v30  ;;  %11373 = vmatprep.mubr.msk.f32.mxu1 %vm13848_vm4, %v13846_v20 }
 0x8c3   :  { %12511 = vmatpush3.bf16.msra.mxu0 %v14182_v56 }
 0x8c4   :  { %12518 = vmatprep.subr.bf16.mxu0 %v13847_v30  ;;  %12517 = vmatpush3.bf16.msra.mxu1 %v14150_v44 }
 0x8c5   :  { %12524 = vmatprep.subr.bf16.mxu1 %v13847_v30 }
 0x8c6   :  { %11363 = vmatmul.mubr.msk.f32.vlgmr.msra.gmra.mrb[24].mxu0 %vm404_vm3, %v2198_v48  ;;  %v12538_v48 = vpack.c.bf16 %v10308_v42, %v10307_v37  ;;  %v2976_v37 = vld [vmem:[%s15490_s7 + $0x10] sm:$0xff] }
 0x8c7   :  { %12520 = vmatpush3.bf16.msra.mxu0 %v14162_v49  ;;  %11384 = vmatprep.mubr.msk.f32.mxu0 %vm13848_vm4, %v13846_v20 }
 0x8c8   :  { %12521 = vmatprep.subr.bf16.mxu0 %v13847_v30 }
 0x8cb   :  { %12523 = vmatpush3.bf16.msra.mxu0 %v14176_v55 }
 0x991   :  { %v2267_v39 = vpop.f32.mrb[22].mxu0  ;;  %v2337_v54 = vpop.f32.mrb[22].mxu1 }
 0x992   :  { %v2268_v57 = vadd.f32 %v14209_v2, %v2267_v39  ;;  %v2338_v60 = vadd.f32 %v14217_v12, %v2337_v54  ;;  %v11342_v44 = vpop.f32.mrb[23].mxu0  ;;  %v11353_v63 = vpop.f32.mrb[23].mxu1  ;;  %v10314_v39 = vld [vmem:[%s15489_s13 + $0x40] sm:$0xff]  ;;  %v10315_v54 = vld [vmem:[%s15489_s13 + $0x48] sm:$0xff] }
 0x994   :  { %v2412_v0 = vrot.slane %v2268_v57, 4  ;;  %v2422_v5 = vrot.slane %v2338_v60, 4  ;;  %v12546_v57 = vpack.c.bf16 %v10315_v54, %v10314_v39  ;;  %v10330_v54 = vld [vmem:[%s15490_s7 + $0x58] sm:$0xff] }
 0x996   :  { %v2414_v1 = vadd.f32 %v2412_v0, %v14205_v61  ;;  %v2424_v49 = vadd.f32 %v2422_v5, %v14207_v62 }
 0x998   :  { %v10297_v14 = vmul.f32 -1.442695, %v2414_v1  ;;  %v10298_v3 = vmul.f32 -1.442695, %v2424_v49 }
 0x999   :  { %v2407_v4 = vpop.f32.mrb[24].mxu0 }
 0x99a   :  { %13188 = vpow2.f32 %v10297_v14  ;;  %v11364_v7 = vpop.f32.mrb[25].mxu0  ;;  %v2408_v11 = vadd.f32 %v14223_v24, %v2407_v4 }
 0x99b   :  { %13190 = vpow2.f32 %v10298_v3 }
 0x99c   :  { %v2432_v13 = vrot.slane %v2408_v11, 4 }
 0x9a4   :  { %v13189_v55 = vpop.eup %13188 }
 0x9a5   :  { %v13191_v8 = vpop.eup %13190  ;;  %v2418_v9 = vadd.f32 1.0, %v13189_v55 }
 0x9a6   :  { %v2428_v10 = vadd.f32 1.0, %v13191_v8 }
 0x9a7   :  { %13192 = vrcp.f32 %v2418_v9 }
 0x9a8   :  { %13194 = vrcp.f32 %v2428_v10 }
 0x9b1   :  { %v13193_v15 = vpop.eup %13192 }
 0x9b2   :  { %v13195_v17 = vpop.eup %13194  ;;  %v2434_v18 = vmul.f32 %v13193_v15, %v2432_v13 }
 0x9b3   :  { %v2441_v19 = vmul.f32 %v13195_v17, %v2439_v16  ;;  %v2437_v22 = vsub.f32 1.0, %v13195_v17 }
 0x9b4   :  { %v2435_v21 = vadd.f32 %v2434_v18, %v14213_v6 }
 0x9b6   :  { %13196 = vtanh.f32 %v2435_v21 }
 0x9c0   :  { %v13197_v23 = vpop.eup %13196 }
 0x9c1   :  { %v2438_v25 = vmul.f32 %v13197_v23, %v2437_v22 }
 0x9c3   :  { %v2442_v26 = vadd.f32 %v2441_v19, %v2438_v25 }
 0x9c5   :  { %v2443_v27 = vmul.f32 %v2442_v26, %v14361_v58 }
 0x9c7   :  { %v14427_v31 = vadd.f32 %v2444_v28, %v2443_v27  ;;  %v2974_v27 = vld [vmem:[%s15490_s7] sm:$0xff]  ;;  %v2975_v28 = vld [vmem:[%s15490_s7 + $0x8] sm:$0xff] }
 0x9c9   :  { %v2448_v32 = vrot.slane %v14427_v31, 4  ;;  %v2446_v33 = vmul.f32 %v14427_v31, %v14361_v58 }
 0x9cb   :  { %11374 = vmatmul.mubr.msk.f32.vlgmr.msra.gmra.mrb[24].mxu1 %vm404_vm3, %v2448_v32  ;;  %11385 = vmatmul.mubr.msk.f32.vlgmr.msra.gmra.mrb[26].mxu0 %vm404_vm3, %v2448_v32  ;;  %v14435_v35 = vsel %vm2699_vm6, %v2703_v53, %v2446_v33  ;;  %v10310_v53 = vld [vmem:[%s15489_s13 + $0x38] sm:$0xff] }
 0x9cc   :  { %12526 = vmatpush3.bf16.msra.mxu1 %v14168_v52  ;;  %11406 = vmatprep.mubr.msk.f32.mxu0 %vm404_vm3, %v14334_v29  ;;  %v2706_v52 = vld [vmem:[%s15489_s13] sm:$0xff]  ;;  %v10317_v33 = vld [vmem:[%s15489_s13 + $0x58] sm:$0xff] }
 0x9cd   :  { %12527 = vmatprep.subr.bf16.mxu1 %v13847_v30  ;;  %11395 = vmatprep.mubr.msk.f32.mxu1 %vm13848_vm4, %v13846_v20  ;;  %v12530_v41 = vpack.c.bf16 %v2707_v36, %v2706_v52  ;;  %v14475_v52 = vpack.c.bf16 %v2975_v28, %v2974_v27 }
 0x9cf   :  { %12531 = vmatprep.subr.bf16.mxu0 %v12530_v41 }
 0x9d0   :  { %12529 = vmatpush3.bf16.msra.mxu1 %v14182_v56  ;;  %v12542_v56 = vpack.c.bf16 %v10310_v53, %v10309_v51  ;;  %12533 = vmatpush3.bf16.msra.mxu0 %v12530_v41  ;;  %v2977_v41 = vld [vmem:[%s15490_s7 + $0x18] sm:$0xff] }
 0x9d1   :  { %12539 = vmatprep.subr.bf16.mxu1 %v12538_v48  ;;  %12535 = vmatprep.subr.bf16.mxu0 %v12534_v50  ;;  %v14484_v45 = vpack.c.bf16 %v2977_v41, %v2976_v37  ;;  %v10325_v53 = vld [vmem:[%s15490_s7 + $0x38] sm:$0xff] }
 0x9d3   :  { %11396 = vmatmul.mubr.msk.f32.vlgmr.msra.gmra.mrb[26].mxu1 %vm404_vm3, %v2448_v32  ;;  %v10316_v32 = vld [vmem:[%s15489_s13 + $0x50] sm:$0xff] }
 0x9d4   :  { %11417 = vmatprep.mubr.msk.f32.mxu1 %vm404_vm3, %v14334_v29  ;;  %12541 = vmatpush3.bf16.msra.mxu1 %v12538_v48  ;;  %v12550_v36 = vpack.c.bf16 %v10317_v33, %v10316_v32  ;;  %v10323_v48 = vld [vmem:[%s15490_s7 + $0x28] sm:$0xff] }
 0x9d5   :  { %12543 = vmatprep.subr.bf16.mxu1 %v12542_v56  ;;  %12537 = vmatpush3.bf16.msra.mxu0 %v12534_v50  ;;  %v10328_v50 = vld [vmem:[%s15490_s7 + $0x48] sm:$0xff]  ;;  %v14496_v51 = vpack.c.bf16 %v10323_v48, %v10322_v47 }
 0x9d6   :  { %12547 = vmatprep.subr.bf16.mxu0 %v12546_v57 }
 0x9d8   :  { %12545 = vmatpush3.bf16.msra.mxu1 %v12542_v56  ;;  %v10329_v56 = vld [vmem:[%s15490_s7 + $0x50] sm:$0xff] }
 0x9d9   :  { %12554 = vmatprep.subr.bf16.mxu1 %v13847_v30 }
 0xa9e   :  { %v2517_v60 = vpop.f32.mrb[24].mxu1  ;;  %v2587_v44 = vpop.f32.mrb[26].mxu0 }
 0xa9f   :  { %v2518_v63 = vadd.f32 %v14209_v2, %v2517_v60  ;;  %v2588_v0 = vadd.f32 %v14217_v12, %v2587_v44  ;;  %v11375_v5 = vpop.f32.mrb[25].mxu1  ;;  %v11386_v1 = vpop.f32.mrb[27].mxu0  ;;  %v14515_v60 = vpack.c.bf16 %v10330_v54, %v10329_v56  ;;  %v10304_v44 = vld [vmem:[#allocation7] ss:$0 sm:$0xff] }
 0xaa1   :  { %v2662_v49 = vrot.slane %v2518_v63, 2  ;;  %v2672_v14 = vrot.slane %v2588_v0, 2  ;;  %v10311_v63 = vld [vmem:[#allocation7 + $0x1] ss:$0 sm:$0xff] }
 0xaa3   :  { %v2664_v3 = vadd.f32 %v2662_v49, %v14205_v61  ;;  %v2674_v4 = vadd.f32 %v2672_v14, %v14207_v62  ;;  %v2689_v62 = vrot.slane %v14427_v31, 6 }
 0xaa5   :  { %v10302_v7 = vmul.f32 -1.442695, %v2664_v3  ;;  %v10303_v55 = vmul.f32 -1.442695, %v2674_v4  ;;  %v2694_v26 = vmul.f32 %v2689_v62, %v14363_v59  ;;  %v10318_v4 = vld [vmem:[#allocation7 + $0x2] ss:$0 sm:$0xff] }
 0xaa6   :  { %v2657_v8 = vpop.f32.mrb[26].mxu1 }
 0xaa7   :  { %13198 = vpow2.f32 %v10302_v7  ;;  %v11397_v9 = vpop.f32.mrb[27].mxu1  ;;  %v2658_v12 = vadd.f32 %v14223_v24, %v2657_v8  ;;  %v14542_v7 = vld [vmem:[#allocation8] ss:$0 sm:$0xff] }
 0xaa8   :  { %13200 = vpow2.f32 %v10303_v55 }
 0xaa9   :  { %v2682_v15 = vrot.slane %v2658_v12, 2 }
 0xab1   :  { %v13199_v10 = vpop.eup %13198 }
 0xab2   :  { %v13201_v11 = vpop.eup %13200  ;;  %v2668_v13 = vadd.f32 1.0, %v13199_v10 }
 0xab3   :  { %v2678_v2 = vadd.f32 1.0, %v13201_v11 }
 0xab4   :  { %13202 = vrcp.f32 %v2668_v13 }
 0xab5   :  { %13204 = vrcp.f32 %v2678_v2 }
 0xabe   :  { %v13203_v61 = vpop.eup %13202 }
 0xabf   :  { %v13205_v16 = vpop.eup %13204  ;;  %v2684_v17 = vmul.f32 %v13203_v61, %v2682_v15  ;;  %v14550_v61 = vld [vmem:[#allocation8 + $0x1] ss:$0 sm:$0xff] }
 0xac0   :  { %v2691_v18 = vmul.f32 %v13205_v16, %v2689_v62  ;;  %v2687_v21 = vsub.f32 1.0, %v13205_v16 }
 0xac1   :  { %v2685_v19 = vadd.f32 %v2684_v17, %v14213_v6 }
 0xac3   :  { %13206 = vtanh.f32 %v2685_v19 }
 0xacd   :  { %v13207_v22 = vpop.eup %13206 }
 0xace   :  { %v2688_v23 = vmul.f32 %v13207_v22, %v2687_v21 }
 0xad0   :  { %v2692_v25 = vadd.f32 %v2691_v18, %v2688_v23 }
 0xad2   :  { %v2693_v24 = vmul.f32 %v2692_v25, %v14361_v58 }
 0xad4   :  { %v14469_v31 = vadd.f32 %v2694_v26, %v2693_v24  ;;  %v14556_v26 = vld [vmem:[#allocation8 + $0x2] ss:$0 sm:$0xff] }
 0xad6   :  { %v2696_v6 = vmul.f32 %v14469_v31, %v14361_v58 }
 0xad8   :  { %v2705_v42 = vsel %vm2701_vm7, %v14435_v35, %v2696_v6  ;;  %v10327_v35 = vld [vmem:[%s15490_s7 + $0x40] sm:$0xff] }
 0xad9   :  { %11407 = vmatmul.mubr.msk.f32.vlgmr.msra.gmra.mrb[28].mxu0 %vm404_vm3, %v2705_v42  ;;  %11418 = vmatmul.mubr.msk.f32.vlgmr.msra.gmra.mrb[28].mxu1 %vm404_vm3, %v2705_v42  ;;  %v14502_v39 = vpack.c.bf16 %v10328_v50, %v10327_v35 }
 0xada   :  { %12549 = vmatpush3.bf16.msra.mxu0 %v12546_v57  ;;  %12556 = vmatpush3.bf16.msra.mxu1 %v14475_v52 }
 0xadb   :  { %11428 = vmatprep.mubr.msk.f32.mxu0 %vm404_vm3, %v14334_v29  ;;  %12551 = vmatprep.subr.bf16.mxu0 %v12550_v36  ;;  %v10324_v29 = vld [vmem:[%s15490_s7 + $0x30] sm:$0xff] }
 0xadc   :  { %12557 = vmatprep.subr.bf16.mxu1 %v13847_v30  ;;  %11439 = vmatprep.mubr.msk.f32.mxu1 %vm13848_vm4, %v13846_v20  ;;  %v14509_v57 = vpack.c.bf16 %v10325_v53, %v10324_v29 }
 0xade   :  { %12553 = vmatpush3.bf16.msra.mxu0 %v12550_v36  ;;  %12559 = vmatpush3.bf16.msra.mxu1 %v14484_v45 }
 0xadf   :  { %12560 = vmatprep.subr.bf16.mxu0 %v13847_v30  ;;  %12566 = vmatprep.subr.bf16.mxu1 %v13847_v30 }
 0xae1   :  { %11429 = vmatmul.mubr.msk.f32.vlgmr.msra.gmra.mrb[30].mxu0 %vm404_vm3, %v2705_v42  ;;  %11440 = vmatmul.mubr.f32.vlgmr.msra.gmra.mrb[30].mxu1 %v13846_v20 }
 0xae2   :  { %12562 = vmatpush3.bf16.msra.mxu0 %v14496_v51  ;;  %11450 = vmatprep.mubr.msk.f32.mxu0 %vm13848_vm4, %v13846_v20 }
 0xae3   :  { %12563 = vmatprep.subr.bf16.mxu0 %v13847_v30  ;;  %12568 = vmatpush3.bf16.msra.mxu1 %v14502_v39 }
 0xae4   :  { %12569 = vmatprep.subr.bf16.mxu1 %v13847_v30  ;;  %11461 = vmatprep.mubr.msk.f32.mxu1 %vm13848_vm4, %v13846_v20 }
 0xae6   :  { %12565 = vmatpush3.bf16.msra.mxu0 %v14509_v57 }
 0xae7   :  { %12571 = vmatpush3.bf16.msra.mxu1 %v14515_v60  ;;  %12572 = vmatprep.subr.bf16.mxu0 %v13847_v30 }
 0xae8   :  { %12578 = vmatprep.subr.bf16.mxu1 %v13847_v30 }
 0xae9   :  { %11451 = vmatmul.mubr.f32.vlgmr.msra.gmra.mrb[32].mxu0 %v13846_v20 }
 0xaea   :  { %11462 = vmatmul.mubr.f32.vlgmr.msra.gmra.mrb[32].mxu1 %v13846_v20  ;;  %12574 = vmatpush3.bf16.msra.mxu0 %v14475_v52 }
 0xaeb   :  { %12580 = vmatpush3.bf16.msra.mxu1 %v14496_v51  ;;  %12575 = vmatprep.subr.bf16.mxu0 %v13847_v30 }
 0xaec   :  { %12581 = vmatprep.subr.bf16.mxu1 %v13847_v30  ;;  %11472 = vmatprep.mubr.msk.f32.mxu0 %vm13848_vm4, %v13846_v20 }
 0xaed   :  { %11483 = vmatprep.mubr.msk.f32.mxu1 %vm13848_vm4, %v13846_v20 }
 0xaee   :  { %12577 = vmatpush3.bf16.msra.mxu0 %v14484_v45 }
 0xaef   :  { %12583 = vmatpush3.bf16.msra.mxu1 %v14509_v57  ;;  %12584 = vmatprep.subr.bf16.mxu0 %v13847_v30 }
 0xaf0   :  { %12590 = vmatprep.subr.bf16.mxu1 %v13847_v30 }
 0xbac   :  { %v11408_v0 = vpop.f32.mrb[28].mxu0  ;;  %v11419_v5 = vpop.f32.mrb[28].mxu1 }
 0xbad   :  { %v14538_v1 = vadd.f32 %v11408_v0, %v10304_v44  ;;  %v14540_v49 = vadd.f32 %v11419_v5, %v10311_v63  ;;  %v2789_v14 = vpop.f32.mrb[29].mxu0  ;;  %v2877_v3 = vpop.f32.mrb[29].mxu1 }
 0xbae   :  { %v14544_v9 = vadd.f32 %v10304_v44, %v2789_v14  ;;  %v14552_v16 = vadd.f32 %v10311_v63, %v2877_v3 }
 0xbb4   :  { %v11430_v55 = vpop.f32.mrb[30].mxu0  ;;  %v3051_v8 = vpop.f32.mrb[30].mxu1 }
 0xbb5   :  { %v14546_v10 = vadd.f32 %v11430_v55, %v10318_v4  ;;  %v3052_v11 = vadd.f32 %v14542_v7, %v3051_v8  ;;  %v2965_v13 = vpop.f32.mrb[31].mxu0  ;;  %v11441_v2 = vpop.f32.mrb[31].mxu1 }
 0xbb6   :  { %v14559_v6 = vadd.f32 %v10318_v4, %v2965_v13 }
 0xbb7   :  { %v3221_v12 = vadd.f32 %v3052_v11, %v14544_v9 }
 0xbb9   :  { %v10332_v15 = vmul.f32 -1.442695, %v3221_v12 }
 0xbbb   :  { %13208 = vpow2.f32 %v10332_v15 }
 0xbbc   :  { %v3134_v62 = vpop.f32.mrb[32].mxu0 }
 0xbbd   :  { %v3135_v17 = vadd.f32 %v14550_v61, %v3134_v62  ;;  %v11452_v18 = vpop.f32.mrb[33].mxu0  ;;  %v3217_v19 = vpop.f32.mrb[32].mxu1 }
 0xbbe   :  { %v11463_v21 = vpop.f32.mrb[33].mxu1  ;;  %v3218_v32 = vadd.f32 %v14556_v26, %v3217_v19 }
 0xbbf   :  { %v3228_v22 = vadd.f32 %v3135_v17, %v14552_v16 }
 0xbc1   :  { %v10333_v23 = vmul.f32 -1.442695, %v3228_v22 }
 0xbc3   :  { %13210 = vpow2.f32 %v10333_v23 }
 0xbc5   :  { %v13209_v25 = vpop.eup %13208 }
 0xbc6   :  { %v3225_v24 = vadd.f32 1.0, %v13209_v25 }
 0xbc8   :  { %13212 = vrcp.f32 %v3225_v24 }
 0xbcd   :  { %v13211_v27 = vpop.eup %13210 }
 0xbce   :  { %v3232_v28 = vadd.f32 1.0, %v13211_v27 }
 0xbd0   :  { %13214 = vrcp.f32 %v3232_v28 }
 0xbd2   :  { %v13213_v33 = vpop.eup %13212 }
 0xbd3   :  { %v3235_v36 = vmul.f32 %v13213_v33, %v3218_v32 }
 0xbd5   :  { %v3236_v37 = vadd.f32 %v3235_v36, %v14559_v6 }
 0xbd7   :  { %13216 = vtanh.f32 %v3236_v37 }
 0xbda   :  { %v13215_v41 = vpop.eup %13214 }
 0xbdb   :  { %v3238_v42 = vsub.f32 1.0, %v13215_v41  ;;  %v3240_v48 = vmul.f32 0.0, %v13215_v41 }
 0xbe1   :  { %v13217_v47 = vpop.eup %13216 }
 0xbe2   :  { %v3239_v35 = vmul.f32 %v13217_v47, %v3238_v42 }
 0xbe4   :  { %v3241_v50 = vadd.f32 %v3240_v48, %v3239_v35 }
 0xbe6   :  { %v3242_v29 = vmul.f32 %v3241_v50, %v14229_v34 }
 0xbe8   :  { %v3243_v53 = vadd.f32 %v3242_v29, %v14235_v46 }
 0xbea   :  { %11473 = vmatmul.mubr.msk.f32.vlgmr.msra.gmra.mrb[34].mxu0 %vm404_vm3, %v3243_v53  ;;  %11484 = vmatmul.mubr.msk.f32.vlgmr.msra.gmra.mrb[34].mxu1 %vm404_vm3, %v3243_v53  ;;  %v3485_v21 = vrot.slane %v3243_v53, 6 }
 0xbeb   :  { %12586 = vmatpush3.bf16.msra.mxu0 %v14502_v39  ;;  %11494 = vmatprep.mubr.msk.f32.mxu0 %vm13848_vm4, %v13846_v20 }
 0xbec   :  { %12587 = vmatprep.subr.bf16.mxu0 %v13847_v30  ;;  %12592 = vmatpush3.bf16.msra.mxu1 %v14475_v52  ;;  %v3490_v37 = vmul.f32 %v3485_v21, %v14231_v43 }
 0xbed   :  { %12593 = vmatprep.subr.bf16.mxu1 %v13847_v30  ;;  %11505 = vmatprep.mubr.msk.f32.mxu1 %vm13848_vm4, %v13846_v20 }
 0xbef   :  { %12589 = vmatpush3.bf16.msra.mxu0 %v14515_v60 }
 0xbf0   :  { %12596 = vmatprep.subr.bf16.mxu0 %v13847_v30  ;;  %12595 = vmatpush3.bf16.msra.mxu1 %v14484_v45 }
 0xbf1   :  { %12602 = vmatprep.subr.bf16.mxu1 %v13847_v30 }
 0xbf2   :  { %11495 = vmatmul.mubr.msk.f32.vlgmr.msra.gmra.mrb[36].mxu0 %vm404_vm3, %v3243_v53 }
 0xbf3   :  { %12598 = vmatpush3.bf16.msra.mxu0 %v14496_v51  ;;  %11516 = vmatprep.mubr.msk.f32.mxu0 %vm13848_vm4, %v13846_v20 }
 0xbf4   :  { %12599 = vmatprep.subr.bf16.mxu0 %v13847_v30 }
 0xbf7   :  { %12601 = vmatpush3.bf16.msra.mxu0 %v14509_v57 }
 0xbf8   :  { %12608 = vmatprep.subr.bf16.mxu0 %v13847_v30 }
 0xcbd   :  { %v3313_v46 = vpop.f32.mrb[34].mxu0  ;;  %v3383_v56 = vpop.f32.mrb[34].mxu1 }
 0xcbe   :  { %v3314_v54 = vadd.f32 %v14542_v7, %v3313_v46  ;;  %v3384_v44 = vadd.f32 %v14550_v61, %v3383_v56  ;;  %v11474_v63 = vpop.f32.mrb[35].mxu0  ;;  %v11485_v0 = vpop.f32.mrb[35].mxu1 }
 0xcc0   :  { %v3458_v5 = vrot.slane %v3314_v54, 6  ;;  %v3468_v14 = vrot.slane %v3384_v44, 6 }
 0xcc2   :  { %v3460_v3 = vadd.f32 %v3458_v5, %v14544_v9  ;;  %v3470_v4 = vadd.f32 %v3468_v14, %v14552_v16 }
 0xcc4   :  { %v10337_v55 = vmul.f32 -1.442695, %v3460_v3  ;;  %v10338_v8 = vmul.f32 -1.442695, %v3470_v4 }
 0xcc5   :  { %v3453_v11 = vpop.f32.mrb[36].mxu0 }
 0xcc6   :  { %13218 = vpow2.f32 %v10337_v55  ;;  %v11496_v13 = vpop.f32.mrb[37].mxu0  ;;  %v3454_v17 = vadd.f32 %v14556_v26, %v3453_v11 }
 0xcc7   :  { %13220 = vpow2.f32 %v10338_v8 }
 0xcc8   :  { %v3478_v18 = vrot.slane %v3454_v17, 6 }
 0xcd0   :  { %v13219_v2 = vpop.eup %13218 }
 0xcd1   :  { %v13221_v12 = vpop.eup %13220  ;;  %v3464_v15 = vadd.f32 1.0, %v13219_v2 }
 0xcd2   :  { %v3474_v62 = vadd.f32 1.0, %v13221_v12 }
 0xcd3   :  { %13222 = vrcp.f32 %v3464_v15 }
 0xcd4   :  { %13224 = vrcp.f32 %v3474_v62 }
 0xcdd   :  { %v13223_v19 = vpop.eup %13222 }
 0xcde   :  { %v13225_v22 = vpop.eup %13224  ;;  %v3480_v23 = vmul.f32 %v13223_v19, %v3478_v18 }
 0xcdf   :  { %v3487_v25 = vmul.f32 %v13225_v22, %v3485_v21  ;;  %v3483_v27 = vsub.f32 1.0, %v13225_v22 }
 0xce0   :  { %v3481_v24 = vadd.f32 %v3480_v23, %v14559_v6 }
 0xce2   :  { %13226 = vtanh.f32 %v3481_v24 }
 0xcec   :  { %v13227_v28 = vpop.eup %13226 }
 0xced   :  { %v3484_v32 = vmul.f32 %v13227_v28, %v3483_v27 }
 0xcef   :  { %v3488_v33 = vadd.f32 %v3487_v25, %v3484_v32 }
 0xcf1   :  { %v3489_v36 = vmul.f32 %v3488_v33, %v14229_v34 }
 0xcf3   :  { %v3491_v41 = vadd.f32 %v3490_v37, %v3489_v36 }
 0xcf5   :  { %v3493_v42 = vrot.slane %v3491_v41, 2  ;;  %v3734_v12 = vrot.slane %v3491_v41, 6 }
 0xcf7   :  { %11506 = vmatmul.mubr.msk.f32.vlgmr.msra.gmra.mrb[36].mxu1 %vm404_vm3, %v3493_v42  ;;  %11517 = vmatmul.mubr.msk.f32.vlgmr.msra.gmra.mrb[38].mxu0 %vm404_vm3, %v3493_v42  ;;  %v3739_v24 = vmul.f32 %v3734_v12, %v14231_v43 }
 0xcf8   :  { %12604 = vmatpush3.bf16.msra.mxu1 %v14502_v39  ;;  %11527 = vmatprep.mubr.msk.f32.mxu1 %vm13848_vm4, %v13846_v20 }
 0xcf9   :  { %12605 = vmatprep.subr.bf16.mxu1 %v13847_v30  ;;  %12610 = vmatpush3.bf16.msra.mxu0 %v14475_v52 }
 0xcfa   :  { %12611 = vmatprep.subr.bf16.mxu0 %v13847_v30  ;;  %11538 = vmatprep.mubr.msk.f32.mxu0 %vm13848_vm4, %v13846_v20 }
 0xcfc   :  { %12607 = vmatpush3.bf16.msra.mxu1 %v14515_v60 }
 0xcfd   :  { %12614 = vmatprep.subr.bf16.mxu1 %v13847_v30  ;;  %12613 = vmatpush3.bf16.msra.mxu0 %v14484_v45 }
 0xcfe   :  { %12620 = vmatprep.subr.bf16.mxu0 %v13847_v30 }
 0xcff   :  { %11528 = vmatmul.mubr.msk.f32.vlgmr.msra.gmra.mrb[38].mxu1 %vm404_vm3, %v3493_v42 }
 0xd00   :  { %12616 = vmatpush3.bf16.msra.mxu1 %v14496_v51  ;;  %11549 = vmatprep.mubr.msk.f32.mxu1 %vm13848_vm4, %v13846_v20 }
 0xd01   :  { %12617 = vmatprep.subr.bf16.mxu1 %v13847_v30 }
 0xd04   :  { %12619 = vmatpush3.bf16.msra.mxu1 %v14509_v57 }
 0xd05   :  { %12626 = vmatprep.subr.bf16.mxu1 %v13847_v30 }
 0xdca   :  { %v3562_v47 = vpop.f32.mrb[36].mxu1  ;;  %v3632_v48 = vpop.f32.mrb[38].mxu0 }
 0xdcb   :  { %v3563_v35 = vadd.f32 %v14542_v7, %v3562_v47  ;;  %v3633_v50 = vadd.f32 %v14550_v61, %v3632_v48  ;;  %v11507_v29 = vpop.f32.mrb[37].mxu1  ;;  %v11518_v53 = vpop.f32.mrb[39].mxu0 }
 0xdcd   :  { %v3707_v46 = vrot.slane %v3563_v35, 4  ;;  %v3717_v56 = vrot.slane %v3633_v50, 4 }
 0xdcf   :  { %v3709_v54 = vadd.f32 %v3707_v46, %v14544_v9  ;;  %v3719_v44 = vadd.f32 %v3717_v56, %v14552_v16 }
 0xdd1   :  { %v10342_v63 = vmul.f32 -1.442695, %v3709_v54  ;;  %v10343_v0 = vmul.f32 -1.442695, %v3719_v44 }
 0xdd2   :  { %v3702_v5 = vpop.f32.mrb[38].mxu1 }
 0xdd3   :  { %13228 = vpow2.f32 %v10342_v63  ;;  %v11529_v14 = vpop.f32.mrb[39].mxu1  ;;  %v3703_v11 = vadd.f32 %v14556_v26, %v3702_v5 }
 0xdd4   :  { %13230 = vpow2.f32 %v10343_v0 }
 0xdd5   :  { %v3727_v13 = vrot.slane %v3703_v11, 4 }
 0xddd   :  { %v13229_v3 = vpop.eup %13228 }
 0xdde   :  { %v13231_v4 = vpop.eup %13230  ;;  %v3713_v55 = vadd.f32 1.0, %v13229_v3 }
 0xddf   :  { %v3723_v8 = vadd.f32 1.0, %v13231_v4 }
 0xde0   :  { %13232 = vrcp.f32 %v3713_v55 }
 0xde1   :  { %13234 = vrcp.f32 %v3723_v8 }
 0xdea   :  { %v13233_v2 = vpop.eup %13232 }
 0xdeb   :  { %v13235_v15 = vpop.eup %13234  ;;  %v3729_v62 = vmul.f32 %v13233_v2, %v3727_v13 }
 0xdec   :  { %v3736_v17 = vmul.f32 %v13235_v15, %v3734_v12  ;;  %v3732_v19 = vsub.f32 1.0, %v13235_v15 }
 0xded   :  { %v3730_v18 = vadd.f32 %v3729_v62, %v14559_v6 }
 0xdef   :  { %13236 = vtanh.f32 %v3730_v18 }
 0xdf9   :  { %v13237_v21 = vpop.eup %13236 }
 0xdfa   :  { %v3733_v22 = vmul.f32 %v13237_v21, %v3732_v19 }
 0xdfc   :  { %v3737_v23 = vadd.f32 %v3736_v17, %v3733_v22 }
 0xdfe   :  { %v3738_v25 = vmul.f32 %v3737_v23, %v14229_v34 }
 0xe00   :  { %v3740_v27 = vadd.f32 %v3739_v24, %v3738_v25 }
 0xe02   :  { %v3742_v28 = vrot.slane %v3740_v27, 4  ;;  %v3983_v4 = vrot.slane %v3740_v27, 6 }
 0xe04   :  { %11539 = vmatmul.mubr.msk.f32.vlgmr.msra.gmra.mrb[40].mxu0 %vm404_vm3, %v3742_v28  ;;  %11550 = vmatmul.mubr.msk.f32.vlgmr.msra.gmra.mrb[40].mxu1 %vm404_vm3, %v3742_v28  ;;  %v3988_v62 = vmul.f32 %v3983_v4, %v14231_v43 }
 0xe05   :  { %12622 = vmatpush3.bf16.msra.mxu0 %v14502_v39  ;;  %11560 = vmatprep.mubr.msk.f32.mxu0 %vm13848_vm4, %v13846_v20 }
 0xe06   :  { %12623 = vmatprep.subr.bf16.mxu0 %v13847_v30  ;;  %12628 = vmatpush3.bf16.msra.mxu1 %v14475_v52 }
 0xe07   :  { %12629 = vmatprep.subr.bf16.mxu1 %v13847_v30  ;;  %11571 = vmatprep.mubr.msk.f32.mxu1 %vm13848_vm4, %v13846_v20 }
 0xe09   :  { %12625 = vmatpush3.bf16.msra.mxu0 %v14515_v60 }
 0xe0a   :  { %12632 = vmatprep.subr.bf16.mxu0 %v13847_v30  ;;  %12631 = vmatpush3.bf16.msra.mxu1 %v14484_v45 }
 0xe0b   :  { %12638 = vmatprep.subr.bf16.mxu1 %v13847_v30 }
 0xe0c   :  { %11561 = vmatmul.mubr.msk.f32.vlgmr.msra.gmra.mrb[42].mxu0 %vm404_vm3, %v3742_v28 }
 0xe0d   :  { %12634 = vmatpush3.bf16.msra.mxu0 %v14496_v51  ;;  %11582 = vmatprep.mubr.msk.f32.mxu0 %vm13848_vm4, %v13846_v20 }
 0xe0e   :  { %12635 = vmatprep.subr.bf16.mxu0 %v13847_v30 }
 0xe11   :  { %12637 = vmatpush3.bf16.msra.mxu0 %v14509_v57 }
 0xe12   :  { %12644 = vmatprep.subr.bf16.mxu0 %v13847_v30 }
 0xed7   :  { %v3811_v32 = vpop.f32.mrb[40].mxu0  ;;  %v3881_v33 = vpop.f32.mrb[40].mxu1 }
 0xed8   :  { %v3812_v36 = vadd.f32 %v14542_v7, %v3811_v32  ;;  %v3882_v37 = vadd.f32 %v14550_v61, %v3881_v33  ;;  %v11540_v41 = vpop.f32.mrb[41].mxu0  ;;  %v11551_v42 = vpop.f32.mrb[41].mxu1 }
 0xeda   :  { %v3956_v47 = vrot.slane %v3812_v36, 2  ;;  %v3966_v48 = vrot.slane %v3882_v37, 2 }
 0xedc   :  { %v3958_v35 = vadd.f32 %v3956_v47, %v14544_v9  ;;  %v3968_v50 = vadd.f32 %v3966_v48, %v14552_v16 }
 0xede   :  { %v10347_v29 = vmul.f32 -1.442695, %v3958_v35  ;;  %v10348_v53 = vmul.f32 -1.442695, %v3968_v50 }
 0xedf   :  { %v3951_v46 = vpop.f32.mrb[42].mxu0 }
 0xee0   :  { %13238 = vpow2.f32 %v10347_v29  ;;  %v11562_v56 = vpop.f32.mrb[43].mxu0  ;;  %v3952_v5 = vadd.f32 %v14556_v26, %v3951_v46 }
 0xee1   :  { %13240 = vpow2.f32 %v10348_v53 }
 0xee2   :  { %v3976_v14 = vrot.slane %v3952_v5, 2 }
 0xeea   :  { %v13239_v54 = vpop.eup %13238 }
 0xeeb   :  { %v13241_v44 = vpop.eup %13240  ;;  %v3962_v63 = vadd.f32 1.0, %v13239_v54 }
 0xeec   :  { %v3972_v0 = vadd.f32 1.0, %v13241_v44 }
 0xeed   :  { %13242 = vrcp.f32 %v3962_v63 }
 0xeee   :  { %13244 = vrcp.f32 %v3972_v0 }
 0xef7   :  { %v13243_v3 = vpop.eup %13242 }
 0xef8   :  { %v13245_v9 = vpop.eup %13244  ;;  %v3978_v55 = vmul.f32 %v13243_v3, %v3976_v14 }
 0xef9   :  { %v3985_v16 = vmul.f32 %v13245_v9, %v3983_v4  ;;  %v3981_v11 = vsub.f32 1.0, %v13245_v9 }
 0xefa   :  { %v3979_v8 = vadd.f32 %v3978_v55, %v14559_v6 }
 0xefc   :  { %13246 = vtanh.f32 %v3979_v8 }
 0xf06   :  { %v13247_v13 = vpop.eup %13246 }
 0xf07   :  { %v3982_v2 = vmul.f32 %v13247_v13, %v3981_v11 }
 0xf09   :  { %v3986_v12 = vadd.f32 %v3985_v16, %v3982_v2 }
 0xf0b   :  { %v3987_v15 = vmul.f32 %v3986_v12, %v14229_v34 }
 0xf0d   :  { %v3989_v17 = vadd.f32 %v3988_v62, %v3987_v15 }
 0xf0f   :  { %v3991_v18 = vrot.slane %v3989_v17, 6 }
 0xf11   :  { %11572 = vmatmul.mubr.msk.f32.vlgmr.msra.gmra.mrb[42].mxu1 %vm404_vm3, %v3991_v18  ;;  %11583 = vmatmul.mubr.msk.f32.vlgmr.msra.gmra.mrb[44].mxu0 %vm404_vm3, %v3991_v18  ;;  %v4227_v5 = vmul.f32 %v3991_v18, %v14363_v59 }
 0xf12   :  { %12640 = vmatpush3.bf16.msra.mxu1 %v14502_v39  ;;  %11593 = vmatprep.mubr.msk.f32.mxu1 %vm13848_vm4, %v13846_v20 }
 0xf13   :  { %12641 = vmatprep.subr.bf16.mxu1 %v13847_v30  ;;  %12646 = vmatpush3.bf16.msra.mxu0 %v14475_v52 }
 0xf14   :  { %12647 = vmatprep.subr.bf16.mxu0 %v13847_v30  ;;  %11604 = vmatprep.mubr.msk.f32.mxu0 %vm13848_vm4, %v13846_v20 }
 0xf16   :  { %12643 = vmatpush3.bf16.msra.mxu1 %v14515_v60 }
 0xf17   :  { %12650 = vmatprep.subr.bf16.mxu1 %v13847_v30  ;;  %12649 = vmatpush3.bf16.msra.mxu0 %v14484_v45 }
 0xf18   :  { %12656 = vmatprep.subr.bf16.mxu0 %v13847_v30 }
 0xf19   :  { %11594 = vmatmul.mubr.msk.f32.vlgmr.msra.gmra.mrb[44].mxu1 %vm404_vm3, %v3991_v18 }
 0xf1a   :  { %12652 = vmatpush3.bf16.msra.mxu1 %v14496_v51  ;;  %11615 = vmatprep.mubr.msk.f32.mxu1 %vm13848_vm4, %v13846_v20 }
 0xf1b   :  { %12653 = vmatprep.subr.bf16.mxu1 %v13847_v30 }
 0xf1e   :  { %12655 = vmatpush3.bf16.msra.mxu1 %v14509_v57 }
 0xf1f   :  { %12662 = vmatprep.subr.bf16.mxu1 %v13847_v30 }
 0xfe4   :  { %v4060_v6 = vpop.f32.mrb[42].mxu1  ;;  %v4130_v19 = vpop.f32.mrb[44].mxu0 }
 0xfe5   :  { %v4061_v21 = vadd.f32 %v14542_v7, %v4060_v6  ;;  %v11573_v22 = vpop.f32.mrb[43].mxu1  ;;  %v11584_v23 = vpop.f32.mrb[45].mxu0  ;;  %v4131_v25 = vadd.f32 %v14550_v61, %v4130_v19 }
 0xfe7   :  { %v4204_v24 = vadd.f32 %v4061_v21, %v14538_v1  ;;  %v4211_v28 = vadd.f32 %v4131_v25, %v14540_v49 }
 0xfe9   :  { %v10352_v27 = vmul.f32 -1.442695, %v4204_v24  ;;  %v10353_v36 = vmul.f32 -1.442695, %v4211_v28 }
 0xfeb   :  { %13248 = vpow2.f32 %v10352_v27 }
 0xfec   :  { %v4200_v32 = vpop.f32.mrb[44].mxu1  ;;  %13250 = vpow2.f32 %v10353_v36 }
 0xfed   :  { %v11595_v33 = vpop.f32.mrb[45].mxu1  ;;  %v4201_v48 = vadd.f32 %v14556_v26, %v4200_v32 }
 0xff5   :  { %v13249_v37 = vpop.eup %13248 }
 0xff6   :  { %v4208_v41 = vadd.f32 1.0, %v13249_v37  ;;  %v13251_v42 = vpop.eup %13250 }
 0xff7   :  { %v4215_v47 = vadd.f32 1.0, %v13251_v42 }
 0xff8   :  { %13252 = vrcp.f32 %v4208_v41 }
 0xff9   :  { %13254 = vrcp.f32 %v4215_v47 }
0x1002   :  { %v13253_v35 = vpop.eup %13252 }
0x1003   :  { %v4218_v50 = vmul.f32 %v13253_v35, %v4201_v48  ;;  %v13255_v53 = vpop.eup %13254 }
0x1004   :  { %v4221_v46 = vsub.f32 1.0, %v13255_v53  ;;  %v4224_v54 = vmul.f32 %v13255_v53, %v3991_v18 }
0x1005   :  { %v4219_v29 = vadd.f32 %v4218_v50, %v14546_v10 }
0x1007   :  { %13256 = vtanh.f32 %v4219_v29 }
0x1011   :  { %v13257_v56 = vpop.eup %13256 }
0x1012   :  { %v4222_v44 = vmul.f32 %v13257_v56, %v4221_v46 }
0x1014   :  { %v4225_v63 = vadd.f32 %v4224_v54, %v4222_v44 }
0x1016   :  { %v4226_v0 = vmul.f32 %v4225_v63, %v14361_v58 }
0x1018   :  { %v4228_v14 = vadd.f32 %v4227_v5, %v4226_v0 }
0x101a   :  { %11605 = vmatmul.mubr.msk.f32.vlgmr.msra.gmra.mrb[46].mxu0 %vm404_vm3, %v4228_v14  ;;  %11616 = vmatmul.mubr.msk.f32.vlgmr.msra.gmra.mrb[46].mxu1 %vm404_vm3, %v4228_v14  ;;  %v4470_v27 = vrot.slane %v4228_v14, 6 }
0x101b   :  { %12658 = vmatpush3.bf16.msra.mxu0 %v14502_v39  ;;  %11626 = vmatprep.mubr.msk.f32.mxu0 %vm13848_vm4, %v13846_v20 }
0x101c   :  { %12659 = vmatprep.subr.bf16.mxu0 %v13847_v30  ;;  %12664 = vmatpush3.bf16.msra.mxu1 %v14475_v52  ;;  %v4475_v35 = vmul.f32 %v4470_v27, %v14363_v59 }
0x101d   :  { %12665 = vmatprep.subr.bf16.mxu1 %v13847_v30  ;;  %11637 = vmatprep.mubr.msk.f32.mxu1 %vm13848_vm4, %v13846_v20 }
0x101f   :  { %12661 = vmatpush3.bf16.msra.mxu0 %v14515_v60 }
0x1020   :  { %12668 = vmatprep.subr.bf16.mxu0 %v13847_v30  ;;  %12667 = vmatpush3.bf16.msra.mxu1 %v14484_v45 }
0x1021   :  { %12674 = vmatprep.subr.bf16.mxu1 %v13847_v30 }
0x1022   :  { %11627 = vmatmul.mubr.msk.f32.vlgmr.msra.gmra.mrb[48].mxu0 %vm404_vm3, %v4228_v14 }
0x1023   :  { %12670 = vmatpush3.bf16.msra.mxu0 %v14496_v51  ;;  %11648 = vmatprep.mubr.msk.f32.mxu0 %vm13848_vm4, %v13846_v20 }
0x1024   :  { %12671 = vmatprep.subr.bf16.mxu0 %v13847_v30 }
0x1027   :  { %12673 = vmatpush3.bf16.msra.mxu0 %v14509_v57 }
0x1028   :  { %12680 = vmatprep.subr.bf16.mxu0 %v13847_v30 }
0x10ed   :  { %v4298_v3 = vpop.f32.mrb[46].mxu0  ;;  %v4368_v4 = vpop.f32.mrb[46].mxu1 }
0x10ee   :  { %v4299_v9 = vadd.f32 %v14542_v7, %v4298_v3  ;;  %v4369_v55 = vadd.f32 %v14550_v61, %v4368_v4  ;;  %v11606_v16 = vpop.f32.mrb[47].mxu0  ;;  %v11617_v8 = vpop.f32.mrb[47].mxu1 }
0x10f0   :  { %v4443_v11 = vrot.slane %v4299_v9, 6  ;;  %v4453_v13 = vrot.slane %v4369_v55, 6 }
0x10f2   :  { %v4445_v2 = vadd.f32 %v4443_v11, %v14538_v1  ;;  %v4455_v12 = vadd.f32 %v4453_v13, %v14540_v49 }
0x10f4   :  { %v10357_v15 = vmul.f32 -1.442695, %v4445_v2  ;;  %v10358_v62 = vmul.f32 -1.442695, %v4455_v12 }
0x10f5   :  { %v4438_v17 = vpop.f32.mrb[48].mxu0 }
0x10f6   :  { %13258 = vpow2.f32 %v10357_v15  ;;  %v11628_v18 = vpop.f32.mrb[49].mxu0  ;;  %v4439_v23 = vadd.f32 %v14556_v26, %v4438_v17 }
0x10f7   :  { %13260 = vpow2.f32 %v10358_v62 }
0x10f8   :  { %v4463_v25 = vrot.slane %v4439_v23, 6 }
0x1100   :  { %v13259_v6 = vpop.eup %13258 }
0x1101   :  { %v13261_v19 = vpop.eup %13260  ;;  %v4449_v21 = vadd.f32 1.0, %v13259_v6 }
0x1102   :  { %v4459_v22 = vadd.f32 1.0, %v13261_v19 }
0x1103   :  { %13262 = vrcp.f32 %v4449_v21 }
0x1104   :  { %13264 = vrcp.f32 %v4459_v22 }
0x110d   :  { %v13263_v24 = vpop.eup %13262 }
0x110e   :  { %v13265_v28 = vpop.eup %13264  ;;  %v4465_v32 = vmul.f32 %v13263_v24, %v4463_v25 }
0x110f   :  { %v4472_v33 = vmul.f32 %v13265_v28, %v4470_v27  ;;  %v4468_v37 = vsub.f32 1.0, %v13265_v28  ;;  %v4983_v27 = vld [vmem:[%s15491_s10 + $0x8] sm:$0xff]  ;;  %v10370_v28 = vld [vmem:[%s15491_s10 + $0x20] sm:$0xff] }
0x1110   :  { %v4466_v36 = vadd.f32 %v4465_v32, %v14546_v10 }
0x1112   :  { %13266 = vtanh.f32 %v4466_v36  ;;  %v4984_v36 = vld [vmem:[%s15491_s10 + $0x10] sm:$0xff] }
0x111c   :  { %v13267_v41 = vpop.eup %13266 }
0x111d   :  { %v4469_v42 = vmul.f32 %v13267_v41, %v4468_v37  ;;  %v4985_v37 = vld [vmem:[%s15491_s10 + $0x18] sm:$0xff] }
0x111f   :  { %v4473_v47 = vadd.f32 %v4472_v33, %v4469_v42  ;;  %v10371_v33 = vld [vmem:[%s15491_s10 + $0x28] sm:$0xff]  ;;  %v10372_v42 = vld [vmem:[%s15491_s10 + $0x30] sm:$0xff] }
0x1120   :  { %v12705_v41 = vpack.c.bf16 %v10371_v33, %v10370_v28  ;;  %v5491_v33 = vld [vmem:[%s15493_s19 + $0x8] sm:$0xff] }
0x1121   :  { %v4474_v48 = vmul.f32 %v4473_v47, %v14361_v58  ;;  %v10373_v47 = vld [vmem:[%s15491_s10 + $0x38] sm:$0xff] }
0x1123   :  { %v4476_v50 = vadd.f32 %v4475_v35, %v4474_v48  ;;  %v12702_v48 = vpack.c.bf16 %v4985_v37, %v4984_v36 }
0x1125   :  { %v4478_v29 = vrot.slane %v4476_v50, 2  ;;  %v4719_v2 = vrot.slane %v4476_v50, 6 }
0x1127   :  { %11638 = vmatmul.mubr.msk.f32.vlgmr.msra.gmra.mrb[48].mxu1 %vm404_vm3, %v4478_v29  ;;  %11649 = vmatmul.mubr.msk.f32.vlgmr.msra.gmra.mrb[50].mxu0 %vm404_vm3, %v4478_v29  ;;  %v4724_v23 = vmul.f32 %v4719_v2, %v14363_v59 }
0x1128   :  { %12676 = vmatpush3.bf16.msra.mxu1 %v14502_v39  ;;  %11659 = vmatprep.mubr.msk.f32.mxu1 %vm13848_vm4, %v13846_v20 }
0x1129   :  { %12677 = vmatprep.subr.bf16.mxu1 %v13847_v30  ;;  %12682 = vmatpush3.bf16.msra.mxu0 %v14475_v52 }
0x112a   :  { %12683 = vmatprep.subr.bf16.mxu0 %v13847_v30  ;;  %11670 = vmatprep.mubr.msk.f32.mxu0 %vm13848_vm4, %v13846_v20 }
0x112c   :  { %12679 = vmatpush3.bf16.msra.mxu1 %v14515_v60 }
0x112d   :  { %12686 = vmatprep.subr.bf16.mxu1 %v13847_v30  ;;  %12685 = vmatpush3.bf16.msra.mxu0 %v14484_v45 }
0x112e   :  { %12692 = vmatprep.subr.bf16.mxu0 %v13847_v30 }
0x112f   :  { %11660 = vmatmul.mubr.msk.f32.vlgmr.msra.gmra.mrb[50].mxu1 %vm404_vm3, %v4478_v29 }
0x1130   :  { %12688 = vmatpush3.bf16.msra.mxu1 %v14496_v51  ;;  %11681 = vmatprep.mubr.msk.f32.mxu1 %vm13848_vm4, %v13846_v20 }
0x1131   :  { %12689 = vmatprep.subr.bf16.mxu1 %v13847_v30 }
0x1134   :  { %12691 = vmatpush3.bf16.msra.mxu1 %v14509_v57 }
0x1135   :  { %12698 = vmatprep.subr.bf16.mxu1 %v13847_v30 }
0x11fa   :  { %v4547_v52 = vpop.f32.mrb[48].mxu1  ;;  %v4617_v53 = vpop.f32.mrb[50].mxu0 }
0x11fb   :  { %v4548_v46 = vadd.f32 %v14542_v7, %v4547_v52  ;;  %v4618_v45 = vadd.f32 %v14550_v61, %v4617_v53  ;;  %v11639_v56 = vpop.f32.mrb[49].mxu1  ;;  %v11650_v54 = vpop.f32.mrb[51].mxu0 }
0x11fd   :  { %v4692_v44 = vrot.slane %v4548_v46, 4  ;;  %v4702_v63 = vrot.slane %v4618_v45, 4 }
0x11ff   :  { %v4694_v51 = vadd.f32 %v4692_v44, %v14538_v1  ;;  %v4704_v0 = vadd.f32 %v4702_v63, %v14540_v49 }
0x1201   :  { %v10362_v5 = vmul.f32 -1.442695, %v4694_v51  ;;  %v10363_v14 = vmul.f32 -1.442695, %v4704_v0 }
0x1202   :  { %v4687_v3 = vpop.f32.mrb[50].mxu1 }
0x1203   :  { %13268 = vpow2.f32 %v10362_v5  ;;  %v11661_v57 = vpop.f32.mrb[51].mxu1  ;;  %v4688_v8 = vadd.f32 %v14556_v26, %v4687_v3 }
0x1204   :  { %13270 = vpow2.f32 %v10363_v14 }
0x1205   :  { %v4712_v11 = vrot.slane %v4688_v8, 4 }
0x120d   :  { %v13269_v4 = vpop.eup %13268 }
0x120e   :  { %v13271_v9 = vpop.eup %13270  ;;  %v4698_v55 = vadd.f32 1.0, %v13269_v4 }
0x120f   :  { %v4708_v16 = vadd.f32 1.0, %v13271_v9 }
0x1210   :  { %13272 = vrcp.f32 %v4698_v55 }
0x1211   :  { %13274 = vrcp.f32 %v4708_v16 }
0x121a   :  { %v13273_v13 = vpop.eup %13272 }
0x121b   :  { %v13275_v12 = vpop.eup %13274  ;;  %v4714_v15 = vmul.f32 %v13273_v13, %v4712_v11 }
0x121c   :  { %v4721_v62 = vmul.f32 %v13275_v12, %v4719_v2  ;;  %v4717_v18 = vsub.f32 1.0, %v13275_v12 }
0x121d   :  { %v4715_v17 = vadd.f32 %v4714_v15, %v14546_v10 }
0x121f   :  { %13276 = vtanh.f32 %v4715_v17  ;;  %v5152_v17 = vld [vmem:[%s15492_s26 + $0x8] sm:$0xff] }
0x1229   :  { %v13277_v6 = vpop.eup %13276 }
0x122a   :  { %v4718_v19 = vmul.f32 %v13277_v6, %v4717_v18  ;;  %v10377_v18 = vld [vmem:[%s15492_s26 + $0x20] sm:$0xff]  ;;  %v10378_v6 = vld [vmem:[%s15492_s26 + $0x28] sm:$0xff] }
0x122c   :  { %v4722_v21 = vadd.f32 %v4721_v62, %v4718_v19  ;;  %v5151_v62 = vld [vmem:[%s15492_s26] sm:$0xff]  ;;  %v4976_v19 = vrot.slane %v14469_v31, 6 }
0x122e   :  { %v4723_v22 = vmul.f32 %v4722_v21, %v14361_v58 }
0x1230   :  { %v14738_v25 = vadd.f32 %v4724_v23, %v4723_v22  ;;  %v12711_v22 = vpack.c.bf16 %v5152_v17, %v5151_v62  ;;  %v12717_v23 = vpack.c.bf16 %v10378_v6, %v10377_v18 }
0x1232   :  { %v4727_v24 = vrot.slane %v14738_v25, 4 }
0x1234   :  { %11671 = vmatmul.mubr.msk.f32.vlgmr.msra.gmra.mrb[52].mxu0 %vm404_vm3, %v4727_v24  ;;  %11682 = vmatmul.mubr.msk.f32.vlgmr.msra.gmra.mrb[52].mxu1 %vm404_vm3, %v4727_v24 }
0x1235   :  { %12694 = vmatpush3.bf16.msra.mxu0 %v14502_v39  ;;  %11692 = vmatprep.mubr.msk.f32.mxu0 %vm13848_vm4, %v13846_v20  ;;  %v4982_v39 = vld [vmem:[%s15491_s10] sm:$0xff] }
0x1236   :  { %12695 = vmatprep.subr.bf16.mxu0 %v13847_v30  ;;  %11703 = vmatprep.mubr.msk.f32.mxu1 %vm13848_vm4, %v13846_v20  ;;  %v12699_v32 = vpack.c.bf16 %v4983_v27, %v4982_v39  ;;  %v10379_v39 = vld [vmem:[%s15492_s26 + $0x30] sm:$0xff]  ;;  %v10380_v27 = vld [vmem:[%s15492_s26 + $0x38] sm:$0xff] }
0x1237   :  { %v12720_v36 = vpack.c.bf16 %v10380_v27, %v10379_v39  ;;  %v10391_v27 = vld [vmem:[%s15493_s19 + $0x20] sm:$0xff] }
0x1238   :  { %12700 = vmatpush3.bf16.msra.mxu1 %v12699_v32  ;;  %v5490_v32 = vld [vmem:[%s15493_s19] sm:$0xff] }
0x1239   :  { %12697 = vmatpush3.bf16.msra.mxu0 %v14515_v60  ;;  %12701 = vmatprep.subr.bf16.mxu1 %v13847_v30  ;;  %v12708_v60 = vpack.c.bf16 %v10373_v47, %v10372_v42  ;;  %v12728_v37 = vpack.c.bf16 %v5491_v33, %v5490_v32  ;;  %v5493_v42 = vld [vmem:[%s15493_s19 + $0x18] sm:$0xff] }
0x123a   :  { %12704 = vmatprep.subr.bf16.mxu0 %v13847_v30 }
0x123c   :  { %11693 = vmatmul.mubr.msk.f32.vlgmr.msra.gmra.mrb[54].mxu0 %vm404_vm3, %v4727_v24  ;;  %12703 = vmatpush3.bf16.msra.mxu1 %v12702_v48  ;;  %v5154_v24 = vld [vmem:[%s15492_s26 + $0x18] sm:$0xff]  ;;  %v10398_v48 = vld [vmem:[%s15493_s19 + $0x40] sm:$0xff] }
0x123d   :  { %11714 = vmatprep.mubr.msk.f32.mxu0 %vm13848_vm4, %v13846_v20  ;;  %12706 = vmatpush3.bf16.msra.mxu0 %v12705_v41  ;;  %v5492_v41 = vld [vmem:[%s15493_s19 + $0x10] sm:$0xff] }
0x123e   :  { %12707 = vmatprep.subr.bf16.mxu0 %v13847_v30  ;;  %12710 = vmatprep.subr.bf16.mxu1 %v13847_v30  ;;  %v12732_v47 = vpack.c.bf16 %v5493_v42, %v5492_v41  ;;  %v10394_v41 = vld [vmem:[%s15493_s19 + $0x38] sm:$0xff] }
0x1241   :  { %12709 = vmatpush3.bf16.msra.mxu0 %v12708_v60  ;;  %v10399_v60 = vld [vmem:[%s15493_s19 + $0x48] sm:$0xff] }
0x1242   :  { %12716 = vmatprep.subr.bf16.mxu0 %v13847_v30 }
0x1307   :  { %v4796_v35 = vpop.f32.mrb[52].mxu0  ;;  %v4866_v50 = vpop.f32.mrb[52].mxu1 }
0x1308   :  { %v4797_v29 = vadd.f32 %v14542_v7, %v4796_v35  ;;  %v4867_v52 = vadd.f32 %v14550_v61, %v4866_v50  ;;  %v11672_v53 = vpop.f32.mrb[53].mxu0  ;;  %v11683_v46 = vpop.f32.mrb[53].mxu1  ;;  %v12744_v35 = vpack.c.bf16 %v10399_v60, %v10398_v48  ;;  %v10400_v50 = vld [vmem:[%s15493_s19 + $0x50] sm:$0xff]  ;;  %v5753_v48 = vld [vmem:[#allocation11 + $0x8] sm:$0xff] }
0x1309   :  { %v5326_v53 = vld [vmem:[#allocation20] sm:$0xff]  ;;  %v5327_v46 = vld [vmem:[#allocation20 + $0x8] sm:$0xff] }
0x130a   :  { %v4941_v45 = vrot.slane %v4797_v29, 2  ;;  %v4951_v56 = vrot.slane %v4867_v52, 2  ;;  %v10401_v29 = vld [vmem:[%s15493_s19 + $0x58] sm:$0xff] }
0x130b   :  { %v12748_v52 = vpack.c.bf16 %v10401_v29, %v10400_v50  ;;  %v5755_v50 = vld [vmem:[#allocation11 + $0x18] sm:$0xff] }
0x130c   :  { %v4943_v54 = vadd.f32 %v4941_v45, %v14538_v1  ;;  %v4953_v44 = vadd.f32 %v4951_v56, %v14540_v49  ;;  %v4968_v49 = vrot.slane %v14738_v25, 6  ;;  %v5153_v25 = vld [vmem:[%s15492_s26 + $0x10] sm:$0xff]  ;;  %v12723_v45 = vpack.c.bf16 %v5327_v46, %v5326_v53  ;;  %v5921_v46 = vld [vmem:[#allocation11 + $0x48] sm:$0xff] }
0x130d   :  { %v12714_v31 = vpack.c.bf16 %v5154_v24, %v5153_v25  ;;  %v5837_v56 = vld [vmem:[#allocation11 + $0x20] sm:$0xff] }
0x130e   :  { %v10367_v63 = vmul.f32 -1.442695, %v4943_v54  ;;  %v10368_v51 = vmul.f32 -1.442695, %v4953_v44  ;;  %v4973_v15 = vmul.f32 %v4968_v49, %v14363_v59  ;;  %v5838_v54 = vld [vmem:[#allocation11 + $0x28] sm:$0xff]  ;;  %v5410_v25 = vld [vmem:[#allocation20 + $0x10] sm:$0xff] }
0x130f   :  { %v4936_v0 = vpop.f32.mrb[54].mxu0  ;;  %v14818_v44 = vpack.c.bf16 %v5838_v54, %v5837_v56  ;;  %v5411_v24 = vld [vmem:[#allocation20 + $0x18] sm:$0xff] }
0x1310   :  { %13278 = vpow2.f32 %v10367_v63  ;;  %v11694_v5 = vpop.f32.mrb[55].mxu0  ;;  %v4937_v61 = vadd.f32 %v14556_v26, %v4936_v0  ;;  %v12726_v33 = vpack.c.bf16 %v5411_v24, %v5410_v25 }
0x1311   :  { %13280 = vpow2.f32 %v10368_v51 }
0x1312   :  { %v4961_v4 = vrot.slane %v4937_v61, 2 }
0x131a   :  { %v13279_v14 = vpop.eup %13278 }
0x131b   :  { %v13281_v3 = vpop.eup %13280  ;;  %v4947_v57 = vadd.f32 1.0, %v13279_v14 }
0x131c   :  { %v4957_v7 = vadd.f32 1.0, %v13281_v3 }
0x131d   :  { %13282 = vrcp.f32 %v4947_v57 }
0x131e   :  { %13284 = vrcp.f32 %v4957_v7  ;;  %v10375_v7 = vld [vmem:[%s15494_s20] ss:$0 sm:$0xff] }
0x1327   :  { %v13283_v1 = vpop.eup %13282 }
0x1328   :  { %v13285_v9 = vpop.eup %13284  ;;  %v4963_v55 = vmul.f32 %v13283_v1, %v4961_v4 }
0x1329   :  { %v4970_v16 = vmul.f32 %v13285_v9, %v4968_v49  ;;  %v4966_v11 = vsub.f32 1.0, %v13285_v9 }
0x132a   :  { %v4964_v8 = vadd.f32 %v4963_v55, %v14546_v10 }
0x132c   :  { %13286 = vtanh.f32 %v4964_v8 }
0x1336   :  { %v13287_v13 = vpop.eup %13286 }
0x1337   :  { %v4967_v2 = vmul.f32 %v13287_v13, %v4966_v11  ;;  %v10382_v13 = vld [vmem:[%s15495_s29] ss:$0 sm:$0xff] }
0x1339   :  { %v4971_v26 = vadd.f32 %v4970_v16, %v4967_v2  ;;  %v14826_v2 = vld [vmem:[#allocation10] ss:$0 sm:$0xff] }
0x133b   :  { %v4972_v12 = vmul.f32 %v4971_v26, %v14361_v58 }
0x133d   :  { %v4974_v10 = vadd.f32 %v4973_v15, %v4972_v12 }
0x133f   :  { %v4979_v21 = vrot.slane %v4974_v10, 4  ;;  %v14834_v10 = vld [vmem:[#allocation10 + $0x2] ss:$0 sm:$0xff] }
0x1341   :  { %v4981_v28 = vsel %vm2697_vm5, %v4976_v19, %v4979_v21 }
0x1342   :  { %11704 = vmatmul.mubr.msk.f32.vlgmr.msra.gmra.mrb[54].mxu1 %vm404_vm3, %v4981_v28  ;;  %11715 = vmatmul.mubr.msk.f32.vlgmr.msra.gmra.mrb[56].mxu0 %vm404_vm3, %v4981_v28 }
0x1343   :  { %12712 = vmatpush3.bf16.msra.mxu1 %v12711_v22  ;;  %12718 = vmatpush3.bf16.msra.mxu0 %v12717_v23  ;;  %v5319_v23 = vld [vmem:[%s15496_s8] sm:$0x3] }
0x1344   :  { %12713 = vmatprep.subr.bf16.mxu1 %v13847_v30  ;;  %12719 = vmatprep.subr.bf16.mxu0 %v13847_v30 }
0x1345   :  { %11725 = vmatprep.mubr.msk.f32.mxu1 %vm13848_vm4, %v13846_v20  ;;  %11736 = vmatprep.mubr.msk.f32.mxu0 %vm13848_vm4, %v13846_v20 }
0x1347   :  { %12715 = vmatpush3.bf16.msra.mxu1 %v12714_v31  ;;  %12721 = vmatpush3.bf16.msra.mxu0 %v12720_v36 }
0x1348   :  { %12729 = vmatprep.subr.bf16.mxu0 %v12728_v37  ;;  %12722 = vmatprep.subr.bf16.mxu1 %v13847_v30 }
0x134a   :  { %11726 = vmatmul.mubr.msk.f32.vlgmr.msra.gmra.mrb[56].mxu1 %vm404_vm3, %v4981_v28  ;;  %11737 = vmatmul.mubr.msk.f32.vlgmr.msra.gmra.mrb[58].mxu0 %vm404_vm3, %v4981_v28  ;;  %v10392_v28 = vld [vmem:[%s15493_s19 + $0x28] sm:$0xff] }
0x134b   :  { %12731 = vmatpush3.bf16.msra.mxu0 %v12728_v37  ;;  %11761 = vmatprep.mubr.msk.f32.mxu0 %vm404_vm3, %v14137_v40  ;;  %v12736_v36 = vpack.c.bf16 %v10392_v28, %v10391_v27  ;;  %v10393_v37 = vld [vmem:[%s15493_s19 + $0x30] sm:$0xff] }
0x134c   :  { %12733 = vmatprep.subr.bf16.mxu0 %v12732_v47  ;;  %11743 = vmatprep.mubr.msk.f32.mxu1 %vm13848_vm4, %v13846_v20  ;;  %v12740_v42 = vpack.c.bf16 %v10394_v41, %v10393_v37  ;;  %v14918_v27 = vld [vmem:[#allocation13 + $0x2] ss:$0 sm:$0xff] }
0x134d   :  { %12724 = vmatpush3.bf16.msra.mxu1 %v12723_v45  ;;  %v10383_v45 = vld [vmem:[%s15497_s18] ss:$0 sm:$0xff] }
0x134e   :  { %12725 = vmatprep.subr.bf16.mxu1 %v13847_v30 }
0x134f   :  { %12735 = vmatpush3.bf16.msra.mxu0 %v12732_v47  ;;  %v5752_v47 = vld [vmem:[#allocation11] sm:$0xff] }
0x1350   :  { %12745 = vmatprep.subr.bf16.mxu0 %v12744_v35  ;;  %v14852_v60 = vpack.c.bf16 %v5753_v48, %v5752_v47 }
0x1352   :  { %11762 = vmatmul.mubr.msk.f32.vlgmr.msra.gmra.mrb[60].mxu0 %vm404_vm3, %v14133_v38 }
0x1353   :  { %12747 = vmatpush3.bf16.msra.mxu0 %v12744_v35  ;;  %11783 = vmatprep.mubr.msk.f32.mxu0 %vm404_vm3, %v14137_v40  ;;  %v5754_v35 = vld [vmem:[#allocation11 + $0x10] sm:$0xff] }
0x1354   :  { %12749 = vmatprep.subr.bf16.mxu0 %v12748_v52  ;;  %v14858_v29 = vpack.c.bf16 %v5755_v50, %v5754_v35 }
0x1357   :  { %12751 = vmatpush3.bf16.msra.mxu0 %v12748_v52  ;;  %v5840_v52 = vld [vmem:[#allocation11 + $0x38] sm:$0xff] }
0x1358   :  { %12758 = vmatprep.subr.bf16.mxu0 %v13847_v30 }
0x135a   :  { %11784 = vmatmul.mubr.msk.f32.vlgmr.msra.gmra.mrb[62].mxu0 %vm404_vm3, %v14133_v38 }
0x135b   :  { %11805 = vmatprep.mubr.msk.f32.mxu0 %vm13848_vm4, %v13846_v20  ;;  %12760 = vmatpush3.bf16.msra.mxu0 %v14818_v44 }
0x135c   :  { %12761 = vmatprep.subr.bf16.mxu0 %v13847_v30 }
0x1415   :  { %v5055_v63 = vpop.f32.mrb[54].mxu1  ;;  %v5130_v51 = vpop.f32.mrb[56].mxu0 }
0x1416   :  { %v5135_v0 = vrot.slane %v5130_v51, 1  ;;  %v11705_v5 = vpop.f32.mrb[55].mxu1  ;;  %v11716_v14 = vpop.f32.mrb[57].mxu0 }
0x1417   :  { %v5923_v5 = vld [vmem:[#allocation11 + $0x58] sm:$0xff] }
0x1418   :  { %v5137_v3 = vadd.f32 %v5135_v0, %v5055_v63  ;;  %v5922_v0 = vld [vmem:[#allocation11 + $0x50] sm:$0xff] }
0x141a   :  { %v5139_v57 = vrot.slane %v5137_v3, 1 }
0x141c   :  { %v5142_v61 = vsel %vm5141_vm8, %v5137_v3, %v5139_v57  ;;  %v14881_v3 = vpack.c.bf16 %v5923_v5, %v5922_v0 }
0x141d   :  { %v5150_v4 = vadd.f32 %v10375_v7, %v5142_v61  ;;  %v5221_v1 = vpop.f32.mrb[56].mxu1  ;;  %v5296_v49 = vpop.f32.mrb[58].mxu0  ;;  %v10395_v7 = vld [vmem:[#allocation10 + $0x1] ss:$0 sm:$0xff] }
0x141e   :  { %v5301_v9 = vrot.slane %v5296_v49, 1  ;;  %v11727_v55 = vpop.f32.mrb[57].mxu1  ;;  %v11738_v16 = vpop.f32.mrb[59].mxu0  ;;  %v14904_v49 = vld [vmem:[#allocation13] ss:$0 sm:$0xff] }
0x141f   :  { %5323 = vst.msk [vmem:[#allocation22] sm:$0x3] %vm5322_vm9, %v5150_v4 }
0x1420   :  { %v5303_v8 = vadd.f32 %v5301_v9, %v5221_v1  ;;  %v14906_v9 = vld [vmem:[#allocation13 + $0x1] ss:$0 sm:$0xff] }
0x1422   :  { %v5305_v11 = vrot.slane %v5303_v8, 1 }
0x1424   :  { %v5307_v26 = vsel %vm5141_vm8, %v5303_v8, %v5305_v11 }
0x1425   :  { %v5315_v12 = vadd.f32 %v10382_v13, %v5307_v26  ;;  %v11763_v15 = vpop.f32.mrb[60].mxu0 }
0x1426   :  { %v14830_v62 = vadd.f32 %v11763_v15, %v14826_v2  ;;  %v14832_v17 = vpop.f32.mrb[61].mxu0 }
0x1427   :  { %v5316_v18 = vmul.f32 0.5, %v5315_v12  ;;  %v14910_v8 = vadd.f32 %v14826_v2, %v14832_v17 }
0x1429   :  { %v5317_v6 = vmul.f32 1.442695, %v5316_v18 }
0x142b   :  { %13288 = vpow2.f32 %v5317_v6 }
0x142d   :  { %v11785_v19 = vpop.f32.mrb[62].mxu0 }
0x142e   :  { %v14837_v21 = vadd.f32 %v11785_v19, %v14834_v10  ;;  %v14839_v22 = vpop.f32.mrb[63].mxu0 }
0x1435   :  { %v13289_v39 = vpop.eup %13288 }
0x1436   :  { %v5320_v32 = vmul.f32 %v13289_v39, %v5319_v23  ;;  %5324 = vst.msk [vmem:[#allocation23] sm:$0x3] %vm5322_vm9, %v13289_v39 }
0x1438   :  { %v5321_v31 = vadd.f32 %v5320_v32, %v5150_v4 }
0x143a   :  { %11744 = vmatmul.mubr.msk.f32.vlgmr.msra.gmra.mrb[58].mxu1 %vm5335_vm10, %v5321_v31  ;;  %5325 = vst.msk [vmem:[#allocation25] sm:$0x3] %vm5322_vm9, %v5321_v31 }
0x143b   :  { %12727 = vmatpush3.bf16.msra.mxu1 %v12726_v33  ;;  %11750 = vmatprep.mubr.msk.f32.mxu1 %vm13848_vm4, %v13846_v20 }
0x143c   :  { %12737 = vmatprep.subr.bf16.mxu1 %v12736_v36 }
0x143e   :  { %11751 = vmatmul.mubr.msk.f32.vlgmr.msra.gmra.mrb[60].mxu1 %vm5335_vm10, %v5321_v31  ;;  %v14923_v31 = vadd.f32 %v14834_v10, %v14839_v22 }
0x143f   :  { %12739 = vmatpush3.bf16.msra.mxu1 %v12736_v36  ;;  %11772 = vmatprep.mubr.msk.f32.mxu1 %vm404_vm3, %v14137_v40  ;;  %v5839_v40 = vld [vmem:[#allocation11 + $0x30] sm:$0xff] }
0x1440   :  { %12741 = vmatprep.subr.bf16.mxu1 %v12740_v42  ;;  %v14865_v53 = vpack.c.bf16 %v5840_v52, %v5839_v40 }
0x1442   :  { %12763 = vmatpush3.bf16.msra.mxu0 %v14865_v53 }
0x1443   :  { %12743 = vmatpush3.bf16.msra.mxu1 %v12740_v42  ;;  %12770 = vmatprep.subr.bf16.mxu0 %v13847_v30 }
0x1444   :  { %12752 = vmatprep.subr.bf16.mxu1 %v13847_v30 }
0x1446   :  { %11773 = vmatmul.mubr.msk.f32.vlgmr.msra.gmra.mrb[62].mxu1 %vm404_vm3, %v14133_v38  ;;  %v5920_v38 = vld [vmem:[#allocation11 + $0x40] sm:$0xff] }
0x1447   :  { %12754 = vmatpush3.bf16.msra.mxu1 %v14852_v60  ;;  %11794 = vmatprep.mubr.msk.f32.mxu1 %vm13848_vm4, %v13846_v20  ;;  %v14870_v54 = vpack.c.bf16 %v5921_v46, %v5920_v38 }
0x1448   :  { %12755 = vmatprep.subr.bf16.mxu1 %v13847_v30 }
0x144b   :  { %12757 = vmatpush3.bf16.msra.mxu1 %v14858_v29 }
0x144c   :  { %12764 = vmatprep.subr.bf16.mxu1 %v13847_v30 }
0x150d   :  { %v5405_v56 = vpop.f32.mrb[58].mxu1 }
0x150e   :  { %v14872_v63 = vadd.f32 %v10383_v45, %v5405_v56  ;;  %v11745_v51 = vpop.f32.mrb[59].mxu1 }
0x1510   :  { %11795 = vmatmul.mubr.msk.f32.vlgmr.msra.gmra.mrb[64].mxu1 %vm404_vm3, %v14872_v63  ;;  %11806 = vmatmul.mubr.msk.f32.vlgmr.msra.gmra.mrb[64].mxu0 %vm404_vm3, %v14872_v63  ;;  %v6024_v40 = vmul.f32 %v14872_v63, %v14231_v43 }
0x1511   :  { %12766 = vmatpush3.bf16.msra.mxu1 %v14870_v54  ;;  %v14879_v14 = vpop.f32.mrb[60].mxu1  ;;  %11816 = vmatprep.mubr.msk.f32.mxu1 %vm13848_vm4, %v13846_v20 }
0x1512   :  { %v11752_v57 = vpop.f32.mrb[61].mxu1  ;;  %12767 = vmatprep.subr.bf16.mxu1 %v13847_v30  ;;  %12772 = vmatpush3.bf16.msra.mxu0 %v14852_v60 }
0x1513   :  { %12773 = vmatprep.subr.bf16.mxu0 %v13847_v30  ;;  %11827 = vmatprep.mubr.msk.f32.mxu0 %vm13848_vm4, %v13846_v20 }
0x1515   :  { %12769 = vmatpush3.bf16.msra.mxu1 %v14881_v3 }
0x1516   :  { %12776 = vmatprep.subr.bf16.mxu1 %v13847_v30  ;;  %12775 = vmatpush3.bf16.msra.mxu0 %v14858_v29 }
0x1517   :  { %12782 = vmatprep.subr.bf16.mxu0 %v13847_v30 }
0x1518   :  { %11817 = vmatmul.mubr.msk.f32.vlgmr.msra.gmra.mrb[66].mxu1 %vm404_vm3, %v14872_v63 }
0x1519   :  { %v11774_v61 = vpop.f32.mrb[62].mxu1  ;;  %12778 = vmatpush3.bf16.msra.mxu1 %v14818_v44  ;;  %11838 = vmatprep.mubr.msk.f32.mxu1 %vm13848_vm4, %v13846_v20 }
0x151a   :  { %v14899_v4 = vadd.f32 %v11774_v61, %v10395_v7  ;;  %v5655_v1 = vpop.f32.mrb[63].mxu1  ;;  %12779 = vmatprep.subr.bf16.mxu1 %v13847_v30 }
0x151b   :  { %v14915_v18 = vadd.f32 %v10395_v7, %v5655_v1 }
0x151d   :  { %12781 = vmatpush3.bf16.msra.mxu1 %v14865_v53 }
0x151e   :  { %12788 = vmatprep.subr.bf16.mxu1 %v13847_v30 }
0x15e3   :  { %v5832_v55 = vpop.f32.mrb[64].mxu1  ;;  %v5915_v16 = vpop.f32.mrb[64].mxu0 }
0x15e4   :  { %v5833_v11 = vadd.f32 %v14904_v49, %v5832_v55  ;;  %v11796_v13 = vpop.f32.mrb[65].mxu1  ;;  %v11807_v26 = vpop.f32.mrb[65].mxu0  ;;  %v5916_v12 = vadd.f32 %v14906_v9, %v5915_v16 }
0x15e6   :  { %v6002_v15 = vadd.f32 %v5833_v11, %v14910_v8  ;;  %v6009_v19 = vadd.f32 %v5916_v12, %v14915_v18 }
0x15e8   :  { %v10411_v6 = vmul.f32 -1.442695, %v6002_v15  ;;  %v10412_v24 = vmul.f32 -1.442695, %v6009_v19 }
0x15ea   :  { %13290 = vpow2.f32 %v10411_v6 }
0x15eb   :  { %v5998_v23 = vpop.f32.mrb[66].mxu1  ;;  %13292 = vpow2.f32 %v10412_v24 }
0x15ec   :  { %v11818_v25 = vpop.f32.mrb[67].mxu1  ;;  %v5999_v32 = vadd.f32 %v14918_v27, %v5998_v23 }
0x15f4   :  { %v13291_v2 = vpop.eup %13290 }
0x15f5   :  { %v6006_v17 = vadd.f32 1.0, %v13291_v2  ;;  %v13293_v39 = vpop.eup %13292 }
0x15f6   :  { %v6013_v28 = vadd.f32 1.0, %v13293_v39 }
0x15f7   :  { %13294 = vrcp.f32 %v6006_v17 }
0x15f8   :  { %13296 = vrcp.f32 %v6013_v28 }
0x1601   :  { %v13295_v33 = vpop.eup %13294 }
0x1602   :  { %v6016_v36 = vmul.f32 %v13295_v33, %v5999_v32  ;;  %v13297_v41 = vpop.eup %13296 }
0x1603   :  { %v6019_v42 = vsub.f32 1.0, %v13297_v41  ;;  %v6021_v48 = vmul.f32 %v13297_v41, %v14872_v63 }
0x1604   :  { %v6017_v37 = vadd.f32 %v6016_v36, %v14923_v31 }
0x1606   :  { %13298 = vtanh.f32 %v6017_v37 }
0x1610   :  { %v13299_v47 = vpop.eup %13298 }
0x1611   :  { %v6020_v35 = vmul.f32 %v13299_v47, %v6019_v42 }
0x1613   :  { %v6022_v50 = vadd.f32 %v6021_v48, %v6020_v35 }
0x1615   :  { %v6023_v52 = vmul.f32 %v6022_v50, %v14229_v34 }
0x1617   :  { %v6025_v38 = vadd.f32 %v6024_v40, %v6023_v52 }
0x1619   :  { %11828 = vmatmul.mubr.msk.f32.vlgmr.msra.gmra.mrb[66].mxu0 %vm404_vm3, %v6025_v38  ;;  %11839 = vmatmul.mubr.msk.f32.vlgmr.msra.gmra.mrb[68].mxu1 %vm404_vm3, %v6025_v38  ;;  %v6268_v19 = vrot.slane %v6025_v38, 6  ;;  %v6026_v42 = vmul.f32 %v6025_v38, %v14229_v34 }
0x161a   :  { %12784 = vmatpush3.bf16.msra.mxu0 %v14870_v54  ;;  %11849 = vmatprep.mubr.msk.f32.mxu0 %vm13848_vm4, %v13846_v20 }
0x161b   :  { %12785 = vmatprep.subr.bf16.mxu0 %v13847_v30  ;;  %12790 = vmatpush3.bf16.msra.mxu1 %v14852_v60  ;;  %v6273_v36 = vmul.f32 %v6268_v19, %v14231_v43 }
0x161c   :  { %12791 = vmatprep.subr.bf16.mxu1 %v13847_v30  ;;  %11860 = vmatprep.mubr.msk.f32.mxu1 %vm13848_vm4, %v13846_v20 }
0x161e   :  { %12787 = vmatpush3.bf16.msra.mxu0 %v14881_v3 }
0x161f   :  { %12794 = vmatprep.subr.bf16.mxu0 %v13847_v30  ;;  %12793 = vmatpush3.bf16.msra.mxu1 %v14858_v29 }
0x1620   :  { %12800 = vmatprep.subr.bf16.mxu1 %v13847_v30 }
0x1621   :  { %11850 = vmatmul.mubr.msk.f32.vlgmr.msra.gmra.mrb[68].mxu0 %vm404_vm3, %v6025_v38 }
0x1622   :  { %12796 = vmatpush3.bf16.msra.mxu0 %v14818_v44  ;;  %11871 = vmatprep.mubr.msk.f32.mxu0 %vm13848_vm4, %v13846_v20 }
0x1623   :  { %12797 = vmatprep.subr.bf16.mxu0 %v13847_v30 }
0x1626   :  { %12799 = vmatpush3.bf16.msra.mxu0 %v14865_v53 }
0x1627   :  { %12806 = vmatprep.subr.bf16.mxu0 %v13847_v30 }
0x16ec   :  { %v6096_v10 = vpop.f32.mrb[66].mxu0  ;;  %v6166_v22 = vpop.f32.mrb[68].mxu1 }
0x16ed   :  { %v6097_v46 = vadd.f32 %v14904_v49, %v6096_v10  ;;  %v6167_v45 = vadd.f32 %v14906_v9, %v6166_v22  ;;  %v11829_v56 = vpop.f32.mrb[67].mxu0  ;;  %v11840_v63 = vpop.f32.mrb[69].mxu1 }
0x16ef   :  { %v6241_v51 = vrot.slane %v6097_v46, 6  ;;  %v6251_v0 = vrot.slane %v6167_v45, 6 }
0x16f1   :  { %v6243_v5 = vadd.f32 %v6241_v51, %v14910_v8  ;;  %v6253_v57 = vadd.f32 %v6251_v0, %v14915_v18 }
0x16f3   :  { %v10416_v7 = vmul.f32 -1.442695, %v6243_v5  ;;  %v10417_v61 = vmul.f32 -1.442695, %v6253_v57 }
0x16f4   :  { %v6236_v1 = vpop.f32.mrb[68].mxu0 }
0x16f5   :  { %13300 = vpow2.f32 %v10416_v7  ;;  %v11851_v55 = vpop.f32.mrb[69].mxu0  ;;  %v6237_v12 = vadd.f32 %v14918_v27, %v6236_v1 }
0x16f6   :  { %13302 = vpow2.f32 %v10417_v61 }
0x16f7   :  { %v6261_v15 = vrot.slane %v6237_v12, 6 }
0x16ff   :  { %v13301_v16 = vpop.eup %13300 }
0x1700   :  { %v13303_v11 = vpop.eup %13302  ;;  %v6247_v13 = vadd.f32 1.0, %v13301_v16 }
0x1701   :  { %v6257_v26 = vadd.f32 1.0, %v13303_v11 }
0x1702   :  { %13304 = vrcp.f32 %v6247_v13 }
0x1703   :  { %13306 = vrcp.f32 %v6257_v26 }
0x170c   :  { %v13305_v6 = vpop.eup %13304 }
0x170d   :  { %v13307_v23 = vpop.eup %13306  ;;  %v6263_v25 = vmul.f32 %v13305_v6, %v6261_v15 }
0x170e   :  { %v6270_v24 = vmul.f32 %v13307_v23, %v6268_v19  ;;  %v6266_v17 = vsub.f32 1.0, %v13307_v23 }
0x170f   :  { %v6264_v2 = vadd.f32 %v6263_v25, %v14923_v31 }
0x1711   :  { %13308 = vtanh.f32 %v6264_v2 }
0x171b   :  { %v13309_v39 = vpop.eup %13308 }
0x171c   :  { %v6267_v28 = vmul.f32 %v13309_v39, %v6266_v17 }
0x171e   :  { %v6271_v32 = vadd.f32 %v6270_v24, %v6267_v28 }
0x1720   :  { %v6272_v33 = vmul.f32 %v6271_v32, %v14229_v34 }
0x1722   :  { %v6274_v37 = vadd.f32 %v6273_v36, %v6272_v33 }
0x1724   :  { %v6277_v41 = vrot.slane %v6274_v37, 2  ;;  %v6275_v47 = vmul.f32 %v6274_v37, %v14229_v34  ;;  %v6518_v13 = vrot.slane %v6274_v37, 6 }
0x1726   :  { %11861 = vmatmul.mubr.msk.f32.vlgmr.msra.gmra.mrb[70].mxu1 %vm404_vm3, %v6277_v41  ;;  %11872 = vmatmul.mubr.msk.f32.vlgmr.msra.gmra.mrb[70].mxu0 %vm404_vm3, %v6277_v41  ;;  %v7765_v48 = vsel %vm2697_vm5, %v6026_v42, %v6275_v47  ;;  %v6523_v17 = vmul.f32 %v6518_v13, %v14231_v43 }
0x1727   :  { %12802 = vmatpush3.bf16.msra.mxu1 %v14870_v54  ;;  %11882 = vmatprep.mubr.msk.f32.mxu1 %vm13848_vm4, %v13846_v20 }
0x1728   :  { %12803 = vmatprep.subr.bf16.mxu1 %v13847_v30  ;;  %12808 = vmatpush3.bf16.msra.mxu0 %v14852_v60 }
0x1729   :  { %12809 = vmatprep.subr.bf16.mxu0 %v13847_v30  ;;  %11893 = vmatprep.mubr.msk.f32.mxu0 %vm13848_vm4, %v13846_v20 }
0x172b   :  { %12805 = vmatpush3.bf16.msra.mxu1 %v14881_v3 }
0x172c   :  { %12812 = vmatprep.subr.bf16.mxu1 %v13847_v30  ;;  %12811 = vmatpush3.bf16.msra.mxu0 %v14858_v29 }
0x172d   :  { %12818 = vmatprep.subr.bf16.mxu0 %v13847_v30 }
0x172e   :  { %11883 = vmatmul.mubr.msk.f32.vlgmr.msra.gmra.mrb[72].mxu1 %vm404_vm3, %v6277_v41 }
0x172f   :  { %12814 = vmatpush3.bf16.msra.mxu1 %v14818_v44  ;;  %11904 = vmatprep.mubr.msk.f32.mxu1 %vm13848_vm4, %v13846_v20 }
0x1730   :  { %12815 = vmatprep.subr.bf16.mxu1 %v13847_v30 }
0x1733   :  { %12817 = vmatpush3.bf16.msra.mxu1 %v14865_v53 }
0x1734   :  { %12824 = vmatprep.subr.bf16.mxu1 %v13847_v30 }
0x17f9   :  { %v6346_v35 = vpop.f32.mrb[70].mxu1  ;;  %v6416_v50 = vpop.f32.mrb[70].mxu0 }
0x17fa   :  { %v6347_v40 = vadd.f32 %v14904_v49, %v6346_v35  ;;  %v6417_v52 = vadd.f32 %v14906_v9, %v6416_v50  ;;  %v11862_v38 = vpop.f32.mrb[71].mxu1  ;;  %v11873_v10 = vpop.f32.mrb[71].mxu0 }
0x17fc   :  { %v6491_v22 = vrot.slane %v6347_v40, 4  ;;  %v6501_v46 = vrot.slane %v6417_v52, 4 }
0x17fe   :  { %v6493_v45 = vadd.f32 %v6491_v22, %v14910_v8  ;;  %v6503_v56 = vadd.f32 %v6501_v46, %v14915_v18 }
0x1800   :  { %v10421_v63 = vmul.f32 -1.442695, %v6493_v45  ;;  %v10422_v51 = vmul.f32 -1.442695, %v6503_v56 }
0x1801   :  { %v6486_v0 = vpop.f32.mrb[72].mxu1 }
0x1802   :  { %13310 = vpow2.f32 %v10421_v63  ;;  %v11884_v5 = vpop.f32.mrb[73].mxu1  ;;  %v6487_v55 = vadd.f32 %v14918_v27, %v6486_v0 }
0x1803   :  { %13312 = vpow2.f32 %v10422_v51 }
0x1804   :  { %v6511_v16 = vrot.slane %v6487_v55, 4 }
0x180c   :  { %v13311_v57 = vpop.eup %13310 }
0x180d   :  { %v13313_v7 = vpop.eup %13312  ;;  %v6497_v61 = vadd.f32 1.0, %v13311_v57 }
0x180e   :  { %v6507_v1 = vadd.f32 1.0, %v13313_v7 }
0x180f   :  { %13314 = vrcp.f32 %v6497_v61 }
0x1810   :  { %13316 = vrcp.f32 %v6507_v1 }
0x1819   :  { %v13315_v11 = vpop.eup %13314 }
0x181a   :  { %v13317_v26 = vpop.eup %13316  ;;  %v6513_v12 = vmul.f32 %v13315_v11, %v6511_v16 }
0x181b   :  { %v6520_v15 = vmul.f32 %v13317_v26, %v6518_v13  ;;  %v6516_v19 = vsub.f32 1.0, %v13317_v26 }
0x181c   :  { %v6514_v6 = vadd.f32 %v6513_v12, %v14923_v31 }
0x181e   :  { %13318 = vtanh.f32 %v6514_v6 }
0x1828   :  { %v13319_v23 = vpop.eup %13318 }
0x1829   :  { %v6517_v25 = vmul.f32 %v13319_v23, %v6516_v19 }
0x182b   :  { %v6521_v24 = vadd.f32 %v6520_v15, %v6517_v25 }
0x182d   :  { %v6522_v2 = vmul.f32 %v6521_v24, %v14229_v34 }
0x182f   :  { %v6524_v39 = vadd.f32 %v6523_v17, %v6522_v2 }
0x1831   :  { %v6527_v28 = vrot.slane %v6524_v39, 4  ;;  %v6525_v32 = vmul.f32 %v6524_v39, %v14229_v34  ;;  %v6768_v7 = vrot.slane %v6524_v39, 6 }
0x1833   :  { %11894 = vmatmul.mubr.msk.f32.vlgmr.msra.gmra.mrb[72].mxu0 %vm404_vm3, %v6527_v28  ;;  %11905 = vmatmul.mubr.msk.f32.vlgmr.msra.gmra.mrb[74].mxu1 %vm404_vm3, %v6527_v28  ;;  %v7766_v33 = vsel %vm2699_vm6, %v7765_v48, %v6525_v32  ;;  %v6773_v12 = vmul.f32 %v6768_v7, %v14231_v43 }
0x1834   :  { %12820 = vmatpush3.bf16.msra.mxu0 %v14870_v54  ;;  %11915 = vmatprep.mubr.msk.f32.mxu0 %vm13848_vm4, %v13846_v20 }
0x1835   :  { %12821 = vmatprep.subr.bf16.mxu0 %v13847_v30  ;;  %12826 = vmatpush3.bf16.msra.mxu1 %v14852_v60 }
0x1836   :  { %12827 = vmatprep.subr.bf16.mxu1 %v13847_v30  ;;  %11926 = vmatprep.mubr.msk.f32.mxu1 %vm13848_vm4, %v13846_v20 }
0x1838   :  { %12823 = vmatpush3.bf16.msra.mxu0 %v14881_v3 }
0x1839   :  { %12830 = vmatprep.subr.bf16.mxu0 %v13847_v30  ;;  %12829 = vmatpush3.bf16.msra.mxu1 %v14858_v29 }
0x183a   :  { %12836 = vmatprep.subr.bf16.mxu1 %v13847_v30 }
0x183b   :  { %11916 = vmatmul.mubr.msk.f32.vlgmr.msra.gmra.mrb[74].mxu0 %vm404_vm3, %v6527_v28 }
0x183c   :  { %12832 = vmatpush3.bf16.msra.mxu0 %v14818_v44  ;;  %11937 = vmatprep.mubr.msk.f32.mxu0 %vm13848_vm4, %v13846_v20 }
0x183d   :  { %12833 = vmatprep.subr.bf16.mxu0 %v13847_v30 }
0x1840   :  { %12835 = vmatpush3.bf16.msra.mxu0 %v14865_v53 }
0x1841   :  { %12842 = vmatprep.subr.bf16.mxu0 %v13847_v30 }
0x1906   :  { %v6596_v36 = vpop.f32.mrb[72].mxu0  ;;  %v6666_v37 = vpop.f32.mrb[74].mxu1 }
0x1907   :  { %v6597_v41 = vadd.f32 %v14904_v49, %v6596_v36  ;;  %v6667_v42 = vadd.f32 %v14906_v9, %v6666_v37  ;;  %v11895_v47 = vpop.f32.mrb[73].mxu0  ;;  %v11906_v48 = vpop.f32.mrb[75].mxu1 }
0x1909   :  { %v6741_v35 = vrot.slane %v6597_v41, 2  ;;  %v6751_v50 = vrot.slane %v6667_v42, 2 }
0x190b   :  { %v6743_v40 = vadd.f32 %v6741_v35, %v14910_v8  ;;  %v6753_v52 = vadd.f32 %v6751_v50, %v14915_v18 }
0x190d   :  { %v10426_v38 = vmul.f32 -1.442695, %v6743_v40  ;;  %v10427_v10 = vmul.f32 -1.442695, %v6753_v52 }
0x190e   :  { %v6736_v22 = vpop.f32.mrb[74].mxu0 }
0x190f   :  { %13320 = vpow2.f32 %v10426_v38  ;;  %v11917_v46 = vpop.f32.mrb[75].mxu0  ;;  %v6737_v0 = vadd.f32 %v14918_v27, %v6736_v22 }
0x1910   :  { %13322 = vpow2.f32 %v10427_v10 }
0x1911   :  { %v6761_v5 = vrot.slane %v6737_v0, 2 }
0x1919   :  { %v13321_v45 = vpop.eup %13320 }
0x191a   :  { %v13323_v56 = vpop.eup %13322  ;;  %v6747_v63 = vadd.f32 1.0, %v13321_v45 }
0x191b   :  { %v6757_v51 = vadd.f32 1.0, %v13323_v56 }
0x191c   :  { %13324 = vrcp.f32 %v6747_v63 }
0x191d   :  { %13326 = vrcp.f32 %v6757_v51 }
0x1926   :  { %v13325_v57 = vpop.eup %13324 }
0x1927   :  { %v13327_v8 = vpop.eup %13326  ;;  %v6763_v61 = vmul.f32 %v13325_v57, %v6761_v5 }
0x1928   :  { %v6770_v18 = vmul.f32 %v13327_v8, %v6768_v7  ;;  %v6766_v55 = vsub.f32 1.0, %v13327_v8 }
0x1929   :  { %v6764_v1 = vadd.f32 %v6763_v61, %v14923_v31 }
0x192b   :  { %13328 = vtanh.f32 %v6764_v1 }
0x1935   :  { %v13329_v16 = vpop.eup %13328 }
0x1936   :  { %v6767_v11 = vmul.f32 %v13329_v16, %v6766_v55 }
0x1938   :  { %v6771_v13 = vadd.f32 %v6770_v18, %v6767_v11 }
0x193a   :  { %v6772_v26 = vmul.f32 %v6771_v13, %v14229_v34 }
0x193c   :  { %v6774_v15 = vadd.f32 %v6773_v12, %v6772_v26 }
0x193e   :  { %v6777_v6 = vrot.slane %v6774_v15, 6  ;;  %v6775_v19 = vmul.f32 %v6774_v15, %v14229_v34 }
0x1940   :  { %11927 = vmatmul.mubr.msk.f32.vlgmr.msra.gmra.mrb[76].mxu1 %vm404_vm3, %v6777_v6  ;;  %11938 = vmatmul.mubr.msk.f32.vlgmr.msra.gmra.mrb[76].mxu0 %vm404_vm3, %v6777_v6  ;;  %v15026_v23 = vsel %vm2701_vm7, %v7766_v33, %v6775_v19  ;;  %v7013_v0 = vmul.f32 %v6777_v6, %v14363_v59 }
0x1941   :  { %12838 = vmatpush3.bf16.msra.mxu1 %v14870_v54  ;;  %11948 = vmatprep.mubr.msk.f32.mxu1 %vm13848_vm4, %v13846_v20 }
0x1942   :  { %12839 = vmatprep.subr.bf16.mxu1 %v13847_v30  ;;  %12844 = vmatpush3.bf16.msra.mxu0 %v14852_v60 }
0x1943   :  { %12845 = vmatprep.subr.bf16.mxu0 %v13847_v30  ;;  %11959 = vmatprep.mubr.msk.f32.mxu0 %vm13848_vm4, %v13846_v20 }
0x1945   :  { %12841 = vmatpush3.bf16.msra.mxu1 %v14881_v3 }
0x1946   :  { %12848 = vmatprep.subr.bf16.mxu1 %v13847_v30  ;;  %12847 = vmatpush3.bf16.msra.mxu0 %v14858_v29 }
0x1947   :  { %12854 = vmatprep.subr.bf16.mxu0 %v13847_v30 }
0x1948   :  { %11949 = vmatmul.mubr.msk.f32.vlgmr.msra.gmra.mrb[78].mxu1 %vm404_vm3, %v6777_v6 }
0x1949   :  { %12850 = vmatpush3.bf16.msra.mxu1 %v14818_v44  ;;  %11970 = vmatprep.mubr.msk.f32.mxu1 %vm13848_vm4, %v13846_v20 }
0x194a   :  { %12851 = vmatprep.subr.bf16.mxu1 %v13847_v30 }
0x194d   :  { %12853 = vmatpush3.bf16.msra.mxu1 %v14865_v53 }
0x194e   :  { %12860 = vmatprep.subr.bf16.mxu1 %v13847_v30 }
0x1a13   :  { %v6846_v31 = vpop.f32.mrb[76].mxu1  ;;  %v6916_v25 = vpop.f32.mrb[76].mxu0 }
0x1a14   :  { %v6847_v24 = vadd.f32 %v14904_v49, %v6846_v31  ;;  %v11928_v2 = vpop.f32.mrb[77].mxu1  ;;  %v11939_v17 = vpop.f32.mrb[77].mxu0  ;;  %v6917_v39 = vadd.f32 %v14906_v9, %v6916_v25 }
0x1a16   :  { %v6990_v28 = vadd.f32 %v6847_v24, %v14830_v62  ;;  %v6997_v33 = vadd.f32 %v6917_v39, %v14899_v4 }
0x1a18   :  { %v10431_v32 = vmul.f32 -1.442695, %v6990_v28  ;;  %v10432_v41 = vmul.f32 -1.442695, %v6997_v33 }
0x1a1a   :  { %13330 = vpow2.f32 %v10431_v32 }
0x1a1b   :  { %v6986_v36 = vpop.f32.mrb[78].mxu1  ;;  %13332 = vpow2.f32 %v10432_v41 }
0x1a1c   :  { %v11950_v37 = vpop.f32.mrb[79].mxu1  ;;  %v6987_v50 = vadd.f32 %v14918_v27, %v6986_v36 }
0x1a24   :  { %v13331_v42 = vpop.eup %13330 }
0x1a25   :  { %v6994_v47 = vadd.f32 1.0, %v13331_v42  ;;  %v13333_v48 = vpop.eup %13332 }
0x1a26   :  { %v7001_v35 = vadd.f32 1.0, %v13333_v48 }
0x1a27   :  { %13334 = vrcp.f32 %v6994_v47 }
0x1a28   :  { %13336 = vrcp.f32 %v7001_v35 }
0x1a31   :  { %v13335_v40 = vpop.eup %13334 }
0x1a32   :  { %v7004_v52 = vmul.f32 %v13335_v40, %v6987_v50  ;;  %v13337_v10 = vpop.eup %13336 }
0x1a33   :  { %v7007_v22 = vsub.f32 1.0, %v13337_v10  ;;  %v7010_v45 = vmul.f32 %v13337_v10, %v6777_v6 }
0x1a34   :  { %v7005_v38 = vadd.f32 %v7004_v52, %v14837_v21 }
0x1a36   :  { %13338 = vtanh.f32 %v7005_v38 }
0x1a40   :  { %v13339_v46 = vpop.eup %13338 }
0x1a41   :  { %v7008_v56 = vmul.f32 %v13339_v46, %v7007_v22 }
0x1a43   :  { %v7011_v63 = vadd.f32 %v7010_v45, %v7008_v56 }
0x1a45   :  { %v7012_v51 = vmul.f32 %v7011_v63, %v14361_v58 }
0x1a47   :  { %v7014_v5 = vadd.f32 %v7013_v0, %v7012_v51 }
0x1a49   :  { %11960 = vmatmul.mubr.msk.f32.vlgmr.msra.gmra.mrb[78].mxu0 %vm404_vm3, %v7014_v5  ;;  %11971 = vmatmul.mubr.msk.f32.vlgmr.msra.gmra.mrb[80].mxu1 %vm404_vm3, %v7014_v5  ;;  %v7257_v28 = vrot.slane %v7014_v5, 6  ;;  %v7015_v38 = vmul.f32 %v7014_v5, %v14361_v58 }
0x1a4a   :  { %12856 = vmatpush3.bf16.msra.mxu0 %v14870_v54  ;;  %11981 = vmatprep.mubr.msk.f32.mxu0 %vm13848_vm4, %v13846_v20 }
0x1a4b   :  { %12857 = vmatprep.subr.bf16.mxu0 %v13847_v30  ;;  %12862 = vmatpush3.bf16.msra.mxu1 %v14852_v60  ;;  %v7262_v50 = vmul.f32 %v7257_v28, %v14363_v59 }
0x1a4c   :  { %12863 = vmatprep.subr.bf16.mxu1 %v13847_v30  ;;  %11992 = vmatprep.mubr.msk.f32.mxu1 %vm13848_vm4, %v13846_v20 }
0x1a4e   :  { %12859 = vmatpush3.bf16.msra.mxu0 %v14881_v3 }
0x1a4f   :  { %12866 = vmatprep.subr.bf16.mxu0 %v13847_v30  ;;  %12865 = vmatpush3.bf16.msra.mxu1 %v14858_v29 }
0x1a50   :  { %12872 = vmatprep.subr.bf16.mxu1 %v13847_v30 }
0x1a51   :  { %11982 = vmatmul.mubr.msk.f32.vlgmr.msra.gmra.mrb[80].mxu0 %vm404_vm3, %v7014_v5 }
0x1a52   :  { %12868 = vmatpush3.bf16.msra.mxu0 %v14818_v44  ;;  %12003 = vmatprep.mubr.msk.f32.mxu0 %vm13848_vm4, %v13846_v20 }
0x1a53   :  { %12869 = vmatprep.subr.bf16.mxu0 %v13847_v30 }
0x1a56   :  { %12871 = vmatpush3.bf16.msra.mxu0 %v14865_v53 }
0x1a57   :  { %12878 = vmatprep.subr.bf16.mxu0 %v13847_v30 }
0x1b1c   :  { %v7085_v57 = vpop.f32.mrb[78].mxu0  ;;  %v7155_v7 = vpop.f32.mrb[80].mxu1 }
0x1b1d   :  { %v7086_v8 = vadd.f32 %v14904_v49, %v7085_v57  ;;  %v7156_v61 = vadd.f32 %v14906_v9, %v7155_v7  ;;  %v11961_v18 = vpop.f32.mrb[79].mxu0  ;;  %v11972_v1 = vpop.f32.mrb[81].mxu1 }
0x1b1f   :  { %v7230_v55 = vrot.slane %v7086_v8, 6  ;;  %v7240_v16 = vrot.slane %v7156_v61, 6 }
0x1b21   :  { %v7232_v11 = vadd.f32 %v7230_v55, %v14830_v62  ;;  %v7242_v13 = vadd.f32 %v7240_v16, %v14899_v4 }
0x1b23   :  { %v10436_v26 = vmul.f32 -1.442695, %v7232_v11  ;;  %v10437_v12 = vmul.f32 -1.442695, %v7242_v13 }
0x1b24   :  { %v7225_v15 = vpop.f32.mrb[80].mxu0 }
0x1b25   :  { %13340 = vpow2.f32 %v10436_v26  ;;  %v11983_v6 = vpop.f32.mrb[81].mxu0  ;;  %v7226_v2 = vadd.f32 %v14918_v27, %v7225_v15 }
0x1b26   :  { %13342 = vpow2.f32 %v10437_v12 }
0x1b27   :  { %v7250_v17 = vrot.slane %v7226_v2, 6 }
0x1b2f   :  { %v13341_v19 = vpop.eup %13340 }
0x1b30   :  { %v13343_v31 = vpop.eup %13342  ;;  %v7236_v25 = vadd.f32 1.0, %v13341_v19 }
0x1b31   :  { %v7246_v24 = vadd.f32 1.0, %v13343_v31 }
0x1b32   :  { %13344 = vrcp.f32 %v7236_v25 }
0x1b33   :  { %13346 = vrcp.f32 %v7246_v24 }
0x1b3c   :  { %v13345_v39 = vpop.eup %13344 }
0x1b3d   :  { %v13347_v32 = vpop.eup %13346  ;;  %v7252_v33 = vmul.f32 %v13345_v39, %v7250_v17 }
0x1b3e   :  { %v7259_v36 = vmul.f32 %v13347_v32, %v7257_v28  ;;  %v7255_v41 = vsub.f32 1.0, %v13347_v32 }
0x1b3f   :  { %v7253_v37 = vadd.f32 %v7252_v33, %v14837_v21 }
0x1b41   :  { %13348 = vtanh.f32 %v7253_v37  ;;  %v7771_v37 = vld [vmem:[#allocation14] sm:$0xff] }
0x1b4b   :  { %v13349_v42 = vpop.eup %13348 }
0x1b4c   :  { %v7256_v47 = vmul.f32 %v13349_v42, %v7255_v41  ;;  %v7772_v41 = vld [vmem:[#allocation14 + $0x8] sm:$0xff]  ;;  %v7864_v42 = vld [vmem:[#allocation14 + $0x20] sm:$0xff] }
0x1b4e   :  { %v7260_v48 = vadd.f32 %v7259_v36, %v7256_v47  ;;  %v12896_v47 = vpack.c.bf16 %v7772_v41, %v7771_v37  ;;  %v8041_v37 = vld [vmem:[#allocation17 + $0x10] sm:$0xff]  ;;  %v8042_v41 = vld [vmem:[#allocation17 + $0x18] sm:$0xff] }
0x1b50   :  { %v7261_v35 = vmul.f32 %v7260_v48, %v14361_v58  ;;  %v7773_v48 = vld [vmem:[#allocation14 + $0x10] sm:$0xff] }
0x1b52   :  { %v7263_v40 = vadd.f32 %v7262_v50, %v7261_v35  ;;  %v7774_v35 = vld [vmem:[#allocation14 + $0x18] sm:$0xff] }
0x1b54   :  { %v7266_v52 = vrot.slane %v7263_v40, 2  ;;  %v7264_v10 = vmul.f32 %v7263_v40, %v14361_v58  ;;  %v7507_v26 = vrot.slane %v7263_v40, 6  ;;  %v12900_v40 = vpack.c.bf16 %v7774_v35, %v7773_v48  ;;  %v8125_v48 = vld [vmem:[#allocation17 + $0x28] sm:$0xff]  ;;  %v8207_v35 = vld [vmem:[#allocation17 + $0x40] sm:$0xff] }
0x1b56   :  { %11993 = vmatmul.mubr.msk.f32.vlgmr.msra.gmra.mrb[82].mxu1 %vm404_vm3, %v7266_v52  ;;  %12004 = vmatmul.mubr.msk.f32.vlgmr.msra.gmra.mrb[82].mxu0 %vm404_vm3, %v7266_v52  ;;  %v7768_v22 = vsel %vm2697_vm5, %v7015_v38, %v7264_v10  ;;  %v7512_v39 = vmul.f32 %v7507_v26, %v14363_v59  ;;  %v7867_v38 = vld [vmem:[#allocation14 + $0x38] sm:$0xff]  ;;  %v7952_v10 = vld [vmem:[#allocation14 + $0x40] sm:$0xff] }
0x1b57   :  { %12874 = vmatpush3.bf16.msra.mxu1 %v14870_v54  ;;  %12014 = vmatprep.mubr.msk.f32.mxu1 %vm13848_vm4, %v13846_v20 }
0x1b58   :  { %12875 = vmatprep.subr.bf16.mxu1 %v13847_v30  ;;  %12880 = vmatpush3.bf16.msra.mxu0 %v14852_v60 }
0x1b59   :  { %12881 = vmatprep.subr.bf16.mxu0 %v13847_v30  ;;  %12025 = vmatprep.mubr.msk.f32.mxu0 %vm13848_vm4, %v13846_v20 }
0x1b5b   :  { %12877 = vmatpush3.bf16.msra.mxu1 %v14881_v3 }
0x1b5c   :  { %12884 = vmatprep.subr.bf16.mxu1 %v13847_v30  ;;  %12883 = vmatpush3.bf16.msra.mxu0 %v14858_v29 }
0x1b5d   :  { %12890 = vmatprep.subr.bf16.mxu0 %v13847_v30 }
0x1b5e   :  { %12015 = vmatmul.mubr.msk.f32.vlgmr.msra.gmra.mrb[84].mxu1 %vm404_vm3, %v7266_v52  ;;  %v7866_v52 = vld [vmem:[#allocation14 + $0x30] sm:$0xff] }
0x1b5f   :  { %12886 = vmatpush3.bf16.msra.mxu1 %v14818_v44  ;;  %12036 = vmatprep.mubr.msk.f32.mxu1 %vm13848_vm4, %v13846_v20 }
0x1b60   :  { %12887 = vmatprep.subr.bf16.mxu1 %v13847_v30 }
0x1b63   :  { %12889 = vmatpush3.bf16.msra.mxu1 %v14865_v53 }
0x1b64   :  { %12897 = vmatprep.subr.bf16.mxu1 %v12896_v47 }
0x1c29   :  { %v7335_v60 = vpop.f32.mrb[82].mxu1  ;;  %v7405_v46 = vpop.f32.mrb[82].mxu0 }
0x1c2a   :  { %v7336_v45 = vadd.f32 %v14904_v49, %v7335_v60  ;;  %v7406_v56 = vadd.f32 %v14906_v9, %v7405_v46  ;;  %v11994_v29 = vpop.f32.mrb[83].mxu1  ;;  %v12005_v63 = vpop.f32.mrb[83].mxu0 }
0x1c2c   :  { %v7480_v51 = vrot.slane %v7336_v45, 4  ;;  %v7490_v0 = vrot.slane %v7406_v56, 4 }
0x1c2e   :  { %v7482_v5 = vadd.f32 %v7480_v51, %v14830_v62  ;;  %v7492_v44 = vadd.f32 %v7490_v0, %v14899_v4 }
0x1c30   :  { %v10441_v57 = vmul.f32 -1.442695, %v7482_v5  ;;  %v10442_v7 = vmul.f32 -1.442695, %v7492_v44 }
0x1c31   :  { %v7475_v8 = vpop.f32.mrb[84].mxu1 }
0x1c32   :  { %13350 = vpow2.f32 %v10441_v57  ;;  %v12016_v61 = vpop.f32.mrb[85].mxu1  ;;  %v7476_v16 = vadd.f32 %v14918_v27, %v7475_v8 }
0x1c33   :  { %13352 = vpow2.f32 %v10442_v7 }
0x1c34   :  { %v7500_v11 = vrot.slane %v7476_v16, 4 }
0x1c3c   :  { %v13351_v53 = vpop.eup %13350 }
0x1c3d   :  { %v13353_v18 = vpop.eup %13352  ;;  %v7486_v1 = vadd.f32 1.0, %v13351_v53 }
0x1c3e   :  { %v7496_v55 = vadd.f32 1.0, %v13353_v18 }
0x1c3f   :  { %13354 = vrcp.f32 %v7486_v1 }
0x1c40   :  { %13356 = vrcp.f32 %v7496_v55 }
0x1c49   :  { %v13355_v13 = vpop.eup %13354 }
0x1c4a   :  { %v13357_v12 = vpop.eup %13356  ;;  %v7502_v15 = vmul.f32 %v13355_v13, %v7500_v11 }
0x1c4b   :  { %v7509_v6 = vmul.f32 %v13357_v12, %v7507_v26  ;;  %v7505_v31 = vsub.f32 1.0, %v13357_v12 }
0x1c4c   :  { %v7503_v19 = vadd.f32 %v7502_v15, %v14837_v21 }
0x1c4e   :  { %13358 = vtanh.f32 %v7503_v19 }
0x1c58   :  { %v13359_v25 = vpop.eup %13358 }
0x1c59   :  { %v7506_v24 = vmul.f32 %v13359_v25, %v7505_v31 }
0x1c5b   :  { %v7510_v2 = vadd.f32 %v7509_v6, %v7506_v24 }
0x1c5d   :  { %v7511_v17 = vmul.f32 %v7510_v2, %v14361_v58  ;;  %v8039_v2 = vld [vmem:[#allocation17] sm:$0xff] }
0x1c5f   :  { %v15115_v28 = vadd.f32 %v7512_v39, %v7511_v17  ;;  %v7954_v39 = vld [vmem:[#allocation14 + $0x50] sm:$0xff] }
0x1c61   :  { %v7516_v32 = vrot.slane %v15115_v28, 4  ;;  %v7514_v33 = vmul.f32 %v15115_v28, %v14361_v58 }
0x1c63   :  { %12026 = vmatmul.mubr.msk.f32.vlgmr.msra.gmra.mrb[84].mxu0 %vm404_vm3, %v7516_v32  ;;  %12037 = vmatmul.mubr.msk.f32.vlgmr.msra.gmra.mrb[86].mxu1 %vm404_vm3, %v7516_v32  ;;  %v15123_v36 = vsel %vm2699_vm6, %v7768_v22, %v7514_v33  ;;  %v12908_v22 = vpack.c.bf16 %v7867_v38, %v7866_v52  ;;  %v8126_v38 = vld [vmem:[#allocation17 + $0x30] sm:$0xff] }
0x1c64   :  { %12892 = vmatpush3.bf16.msra.mxu0 %v14870_v54  ;;  %12058 = vmatprep.mubr.msk.f32.mxu1 %vm404_vm3, %v15026_v23  ;;  %v7865_v54 = vld [vmem:[#allocation14 + $0x28] sm:$0xff] }
0x1c65   :  { %12893 = vmatprep.subr.bf16.mxu0 %v13847_v30  ;;  %12047 = vmatprep.mubr.msk.f32.mxu0 %vm13848_vm4, %v13846_v20  ;;  %v12904_v50 = vpack.c.bf16 %v7865_v54, %v7864_v42  ;;  %v8124_v54 = vld [vmem:[#allocation17 + $0x20] sm:$0xff] }
0x1c66   :  { %12899 = vmatpush3.bf16.msra.mxu1 %v12896_v47  ;;  %v15153_v47 = vpack.c.bf16 %v8042_v41, %v8041_v37 }
0x1c67   :  { %12901 = vmatprep.subr.bf16.mxu1 %v12900_v40 }
0x1c68   :  { %12895 = vmatpush3.bf16.msra.mxu0 %v14881_v3  ;;  %v7953_v3 = vld [vmem:[#allocation14 + $0x48] sm:$0xff] }
0x1c69   :  { %12905 = vmatprep.subr.bf16.mxu0 %v12904_v50  ;;  %v12912_v60 = vpack.c.bf16 %v7953_v3, %v7952_v10  ;;  %v8127_v10 = vld [vmem:[#allocation17 + $0x38] sm:$0xff] }
0x1c6a   :  { %12903 = vmatpush3.bf16.msra.mxu1 %v12900_v40  ;;  %v10386_v40 = vld [vmem:[%s15497_s18 + $0x1] ss:$0 sm:$0xff]  ;;  %v8210_v3 = vld [vmem:[#allocation17 + $0x58] sm:$0xff] }
0x1c6b   :  { %12048 = vmatmul.mubr.msk.f32.vlgmr.msra.gmra.mrb[86].mxu0 %vm404_vm3, %v7516_v32  ;;  %12913 = vmatprep.subr.bf16.mxu1 %v12912_v60  ;;  %v7955_v32 = vld [vmem:[#allocation14 + $0x58] sm:$0xff] }
0x1c6c   :  { %12069 = vmatprep.mubr.msk.f32.mxu0 %vm404_vm3, %v15026_v23  ;;  %12907 = vmatpush3.bf16.msra.mxu0 %v12904_v50  ;;  %v8208_v50 = vld [vmem:[#allocation17 + $0x48] sm:$0xff] }
0x1c6d   :  { %12909 = vmatprep.subr.bf16.mxu0 %v12908_v22  ;;  %v15164_v52 = vpack.c.bf16 %v8208_v50, %v8207_v35 }
0x1c70   :  { %12911 = vmatpush3.bf16.msra.mxu0 %v12908_v22  ;;  %v8209_v22 = vld [vmem:[#allocation17 + $0x50] sm:$0xff] }
0x1c71   :  { %12920 = vmatprep.subr.bf16.mxu0 %v13847_v30 }
0x1d36   :  { %v7585_v46 = vpop.f32.mrb[84].mxu0  ;;  %v7655_v45 = vpop.f32.mrb[86].mxu1 }
0x1d37   :  { %v7586_v56 = vadd.f32 %v14904_v49, %v7585_v46  ;;  %v7656_v29 = vadd.f32 %v14906_v9, %v7655_v45  ;;  %v12027_v63 = vpop.f32.mrb[85].mxu0  ;;  %v12038_v51 = vpop.f32.mrb[87].mxu1  ;;  %v10448_v46 = vld [vmem:[#allocation16] ss:$0 sm:$0xff]  ;;  %v10451_v45 = vld [vmem:[#allocation16 + $0x1] ss:$0 sm:$0xff] }
0x1d39   :  { %v7730_v0 = vrot.slane %v7586_v56, 2  ;;  %v7740_v5 = vrot.slane %v7656_v29, 2 }
0x1d3b   :  { %v7732_v44 = vadd.f32 %v7730_v0, %v14830_v62  ;;  %v7742_v57 = vadd.f32 %v7740_v5, %v14899_v4  ;;  %v7757_v62 = vrot.slane %v15115_v28, 6 }
0x1d3d   :  { %v10446_v7 = vmul.f32 -1.442695, %v7732_v44  ;;  %v10447_v8 = vmul.f32 -1.442695, %v7742_v57  ;;  %v7762_v24 = vmul.f32 %v7757_v62, %v14363_v59  ;;  %v10454_v44 = vld [vmem:[#allocation16 + $0x2] ss:$0 sm:$0xff] }
0x1d3e   :  { %v7725_v61 = vpop.f32.mrb[86].mxu0  ;;  %v15210_v57 = vld [vmem:[#allocation19] ss:$0 sm:$0xff] }
0x1d3f   :  { %13360 = vpow2.f32 %v10446_v7  ;;  %v12049_v53 = vpop.f32.mrb[87].mxu0  ;;  %v7726_v9 = vadd.f32 %v14918_v27, %v7725_v61  ;;  %v8040_v27 = vld [vmem:[#allocation17 + $0x8] sm:$0xff] }
0x1d40   :  { %13362 = vpow2.f32 %v10447_v8  ;;  %v15146_v33 = vpack.c.bf16 %v8040_v27, %v8039_v2 }
0x1d41   :  { %v7750_v16 = vrot.slane %v7726_v9, 2 }
0x1d49   :  { %v13361_v18 = vpop.eup %13360 }
0x1d4a   :  { %v13363_v1 = vpop.eup %13362  ;;  %v7736_v55 = vadd.f32 1.0, %v13361_v18 }
0x1d4b   :  { %v7746_v49 = vadd.f32 1.0, %v13363_v1 }
0x1d4c   :  { %13364 = vrcp.f32 %v7736_v55 }
0x1d4d   :  { %13366 = vrcp.f32 %v7746_v49 }
0x1d56   :  { %v13365_v11 = vpop.eup %13364 }
0x1d57   :  { %v13367_v13 = vpop.eup %13366  ;;  %v7752_v4 = vmul.f32 %v13365_v11, %v7750_v16  ;;  %v15218_v16 = vld [vmem:[#allocation19 + $0x1] ss:$0 sm:$0xff] }
0x1d58   :  { %v7759_v26 = vmul.f32 %v13367_v13, %v7757_v62  ;;  %v7755_v15 = vsub.f32 1.0, %v13367_v13 }
0x1d59   :  { %v7753_v12 = vadd.f32 %v7752_v4, %v14837_v21  ;;  %v12916_v21 = vpack.c.bf16 %v7955_v32, %v7954_v39 }
0x1d5b   :  { %13368 = vtanh.f32 %v7753_v12 }
0x1d65   :  { %v13369_v6 = vpop.eup %13368 }
0x1d66   :  { %v7756_v19 = vmul.f32 %v13369_v6, %v7755_v15 }
0x1d68   :  { %v7760_v31 = vadd.f32 %v7759_v26, %v7756_v19 }
0x1d6a   :  { %v7761_v25 = vmul.f32 %v7760_v31, %v14361_v58 }
0x1d6c   :  { %v7763_v17 = vadd.f32 %v7762_v24, %v7761_v25  ;;  %v15224_v24 = vld [vmem:[#allocation19 + $0x2] ss:$0 sm:$0xff] }
0x1d6e   :  { %v7764_v28 = vmul.f32 %v7763_v17, %v14361_v58 }
0x1d70   :  { %v7770_v42 = vsel %vm2701_vm7, %v15123_v36, %v7764_v28  ;;  %v15162_v36 = vpack.c.bf16 %v8125_v48, %v8124_v54 }
0x1d71   :  { %12059 = vmatmul.mubr.msk.f32.vlgmr.msra.gmra.mrb[88].mxu1 %vm404_vm3, %v7770_v42  ;;  %12070 = vmatmul.mubr.msk.f32.vlgmr.msra.gmra.mrb[88].mxu0 %vm404_vm3, %v7770_v42 }
0x1d72   :  { %12915 = vmatpush3.bf16.msra.mxu1 %v12912_v60  ;;  %12922 = vmatpush3.bf16.msra.mxu0 %v15146_v33  ;;  %v15176_v60 = vpack.c.bf16 %v8127_v10, %v8126_v38 }
0x1d73   :  { %12080 = vmatprep.mubr.msk.f32.mxu1 %vm404_vm3, %v15026_v23  ;;  %12917 = vmatprep.subr.bf16.mxu1 %v12916_v21  ;;  %v15167_v23 = vadd.f32 %v10386_v40, %v14879_v14  ;;  %v15178_v14 = vpack.c.bf16 %v8210_v3, %v8209_v22 }
0x1d74   :  { %12923 = vmatprep.subr.bf16.mxu0 %v13847_v30  ;;  %12091 = vmatprep.mubr.msk.f32.mxu0 %vm13848_vm4, %v13846_v20 }
0x1d75   :  { %v8311_v35 = vmul.f32 %v15167_v23, %v14231_v43 }
0x1d76   :  { %12919 = vmatpush3.bf16.msra.mxu1 %v12916_v21  ;;  %12925 = vmatpush3.bf16.msra.mxu0 %v15153_v47 }
0x1d77   :  { %12926 = vmatprep.subr.bf16.mxu1 %v13847_v30  ;;  %12932 = vmatprep.subr.bf16.mxu0 %v13847_v30 }
0x1d79   :  { %12081 = vmatmul.mubr.msk.f32.vlgmr.msra.gmra.mrb[90].mxu1 %vm404_vm3, %v7770_v42  ;;  %12092 = vmatmul.mubr.msk.f32.vlgmr.msra.gmra.mrb[90].mxu0 %vm404_vm3, %v15167_v23 }
0x1d7a   :  { %12928 = vmatpush3.bf16.msra.mxu1 %v15162_v36  ;;  %12934 = vmatpush3.bf16.msra.mxu0 %v15164_v52 }
0x1d7b   :  { %12929 = vmatprep.subr.bf16.mxu1 %v13847_v30  ;;  %12935 = vmatprep.subr.bf16.mxu0 %v13847_v30 }
0x1d7c   :  { %12102 = vmatprep.mubr.msk.f32.mxu1 %vm13848_vm4, %v13846_v20  ;;  %12113 = vmatprep.mubr.msk.f32.mxu0 %vm13848_vm4, %v13846_v20 }
0x1d7e   :  { %12931 = vmatpush3.bf16.msra.mxu1 %v15176_v60  ;;  %12937 = vmatpush3.bf16.msra.mxu0 %v15178_v14 }
0x1d7f   :  { %12938 = vmatprep.subr.bf16.mxu1 %v13847_v30  ;;  %12944 = vmatprep.subr.bf16.mxu0 %v13847_v30 }
0x1d81   :  { %12103 = vmatmul.mubr.msk.f32.vlgmr.msra.gmra.mrb[92].mxu1 %vm404_vm3, %v15167_v23  ;;  %12114 = vmatmul.mubr.msk.f32.vlgmr.msra.gmra.mrb[92].mxu0 %vm404_vm3, %v15167_v23 }
0x1d82   :  { %12940 = vmatpush3.bf16.msra.mxu1 %v15146_v33  ;;  %12946 = vmatpush3.bf16.msra.mxu0 %v15162_v36 }
0x1d83   :  { %12941 = vmatprep.subr.bf16.mxu1 %v13847_v30  ;;  %12947 = vmatprep.subr.bf16.mxu0 %v13847_v30 }
0x1d84   :  { %12124 = vmatprep.mubr.msk.f32.mxu1 %vm13848_vm4, %v13846_v20  ;;  %12135 = vmatprep.mubr.msk.f32.mxu0 %vm13848_vm4, %v13846_v20 }
0x1d86   :  { %12943 = vmatpush3.bf16.msra.mxu1 %v15153_v47  ;;  %12949 = vmatpush3.bf16.msra.mxu0 %v15176_v60 }
0x1d87   :  { %12950 = vmatprep.subr.bf16.mxu1 %v13847_v30  ;;  %12956 = vmatprep.subr.bf16.mxu0 %v13847_v30 }
0x1e44   :  { %v12060_v56 = vpop.f32.mrb[88].mxu1  ;;  %v12071_v29 = vpop.f32.mrb[88].mxu0 }
0x1e45   :  { %v15206_v63 = vadd.f32 %v12060_v56, %v10448_v46  ;;  %v15208_v51 = vadd.f32 %v12071_v29, %v10451_v45  ;;  %v7854_v0 = vpop.f32.mrb[89].mxu1  ;;  %v7942_v5 = vpop.f32.mrb[89].mxu0 }
0x1e46   :  { %v15212_v61 = vadd.f32 %v10448_v46, %v7854_v0  ;;  %v15220_v13 = vadd.f32 %v10451_v45, %v7942_v5 }
0x1e4c   :  { %v12082_v7 = vpop.f32.mrb[90].mxu1  ;;  %v8119_v8 = vpop.f32.mrb[90].mxu0 }
0x1e4d   :  { %v15214_v53 = vadd.f32 %v12082_v7, %v10454_v44  ;;  %v8120_v18 = vadd.f32 %v15210_v57, %v8119_v8  ;;  %v8030_v1 = vpop.f32.mrb[91].mxu1  ;;  %v12093_v55 = vpop.f32.mrb[91].mxu0 }
0x1e4e   :  { %v15227_v39 = vadd.f32 %v10454_v44, %v8030_v1 }
0x1e4f   :  { %v8289_v49 = vadd.f32 %v8120_v18, %v15212_v61 }
0x1e51   :  { %v10463_v9 = vmul.f32 -1.442695, %v8289_v49 }
0x1e53   :  { %13370 = vpow2.f32 %v10463_v9 }
0x1e54   :  { %v8202_v11 = vpop.f32.mrb[92].mxu1  ;;  %v8285_v62 = vpop.f32.mrb[92].mxu0 }
0x1e55   :  { %v8203_v4 = vadd.f32 %v15218_v16, %v8202_v11  ;;  %v12104_v26 = vpop.f32.mrb[93].mxu1  ;;  %v12115_v12 = vpop.f32.mrb[93].mxu0  ;;  %v8286_v27 = vadd.f32 %v15224_v24, %v8285_v62 }
0x1e57   :  { %v8296_v15 = vadd.f32 %v8203_v4, %v15220_v13 }
0x1e59   :  { %v10464_v6 = vmul.f32 -1.442695, %v8296_v15 }
0x1e5b   :  { %13372 = vpow2.f32 %v10464_v6 }
0x1e5d   :  { %v13371_v19 = vpop.eup %13370 }
0x1e5e   :  { %v8293_v31 = vadd.f32 1.0, %v13371_v19 }
0x1e60   :  { %13374 = vrcp.f32 %v8293_v31 }
0x1e65   :  { %v13373_v25 = vpop.eup %13372 }
0x1e66   :  { %v8300_v2 = vadd.f32 1.0, %v13373_v25 }
0x1e68   :  { %13376 = vrcp.f32 %v8300_v2 }
0x1e6a   :  { %v13375_v17 = vpop.eup %13374 }
0x1e6b   :  { %v8303_v32 = vmul.f32 %v13375_v17, %v8286_v27 }
0x1e6d   :  { %v8304_v28 = vadd.f32 %v8303_v32, %v15227_v39 }
0x1e6f   :  { %13378 = vtanh.f32 %v8304_v28 }
0x1e72   :  { %v13377_v21 = vpop.eup %13376 }
0x1e73   :  { %v8306_v37 = vsub.f32 1.0, %v13377_v21  ;;  %v8308_v42 = vmul.f32 %v13377_v21, %v15167_v23 }
0x1e79   :  { %v13379_v41 = vpop.eup %13378 }
0x1e7a   :  { %v8307_v54 = vmul.f32 %v13379_v41, %v8306_v37 }
0x1e7c   :  { %v8309_v48 = vadd.f32 %v8308_v42, %v8307_v54 }
0x1e7e   :  { %v8310_v50 = vmul.f32 %v8309_v48, %v14229_v34 }
0x1e80   :  { %v8312_v40 = vadd.f32 %v8311_v35, %v8310_v50 }
0x1e82   :  { %12125 = vmatmul.mubr.msk.f32.vlgmr.msra.gmra.mrb[94].mxu1 %vm404_vm3, %v8312_v40  ;;  %12136 = vmatmul.mubr.msk.f32.vlgmr.msra.gmra.mrb[94].mxu0 %vm404_vm3, %v8312_v40  ;;  %v8555_v4 = vrot.slane %v8312_v40, 6  ;;  %v8313_v21 = vmul.f32 %v8312_v40, %v14229_v34 }
0x1e83   :  { %12952 = vmatpush3.bf16.msra.mxu1 %v15164_v52  ;;  %12146 = vmatprep.mubr.msk.f32.mxu1 %vm13848_vm4, %v13846_v20 }
0x1e84   :  { %12953 = vmatprep.subr.bf16.mxu1 %v13847_v30  ;;  %12958 = vmatpush3.bf16.msra.mxu0 %v15146_v33  ;;  %v8560_v17 = vmul.f32 %v8555_v4, %v14231_v43 }
0x1e85   :  { %12959 = vmatprep.subr.bf16.mxu0 %v13847_v30  ;;  %12157 = vmatprep.mubr.msk.f32.mxu0 %vm13848_vm4, %v13846_v20 }
0x1e87   :  { %12955 = vmatpush3.bf16.msra.mxu1 %v15178_v14 }
0x1e88   :  { %12962 = vmatprep.subr.bf16.mxu1 %v13847_v30  ;;  %12961 = vmatpush3.bf16.msra.mxu0 %v15153_v47 }
0x1e89   :  { %12968 = vmatprep.subr.bf16.mxu0 %v13847_v30 }
0x1e8a   :  { %12147 = vmatmul.mubr.msk.f32.vlgmr.msra.gmra.mrb[96].mxu1 %vm404_vm3, %v8312_v40 }
0x1e8b   :  { %12964 = vmatpush3.bf16.msra.mxu1 %v15162_v36  ;;  %12168 = vmatprep.mubr.msk.f32.mxu1 %vm13848_vm4, %v13846_v20 }
0x1e8c   :  { %12965 = vmatprep.subr.bf16.mxu1 %v13847_v30 }
0x1e8f   :  { %12967 = vmatpush3.bf16.msra.mxu1 %v15176_v60 }
0x1e90   :  { %12974 = vmatprep.subr.bf16.mxu1 %v13847_v30 }
0x1f55   :  { %v8383_v38 = vpop.f32.mrb[94].mxu1  ;;  %v8453_v23 = vpop.f32.mrb[94].mxu0 }
0x1f56   :  { %v8384_v10 = vadd.f32 %v15210_v57, %v8383_v38  ;;  %v8454_v22 = vadd.f32 %v15218_v16, %v8453_v23  ;;  %v12126_v3 = vpop.f32.mrb[95].mxu1  ;;  %v12137_v46 = vpop.f32.mrb[95].mxu0 }
0x1f58   :  { %v8528_v45 = vrot.slane %v8384_v10, 6  ;;  %v8538_v56 = vrot.slane %v8454_v22, 6 }
0x1f5a   :  { %v8530_v29 = vadd.f32 %v8528_v45, %v15212_v61  ;;  %v8540_v0 = vadd.f32 %v8538_v56, %v15220_v13 }
0x1f5c   :  { %v10468_v5 = vmul.f32 -1.442695, %v8530_v29  ;;  %v10469_v44 = vmul.f32 -1.442695, %v8540_v0 }
0x1f5d   :  { %v8523_v7 = vpop.f32.mrb[96].mxu1 }
0x1f5e   :  { %13380 = vpow2.f32 %v10468_v5  ;;  %v12148_v8 = vpop.f32.mrb[97].mxu1  ;;  %v8524_v9 = vadd.f32 %v15224_v24, %v8523_v7 }
0x1f5f   :  { %13382 = vpow2.f32 %v10469_v44 }
0x1f60   :  { %v8548_v11 = vrot.slane %v8524_v9, 6 }
0x1f68   :  { %v13381_v18 = vpop.eup %13380 }
0x1f69   :  { %v13383_v1 = vpop.eup %13382  ;;  %v8534_v55 = vadd.f32 1.0, %v13381_v18 }
0x1f6a   :  { %v8544_v49 = vadd.f32 1.0, %v13383_v1 }
0x1f6b   :  { %13384 = vrcp.f32 %v8534_v55 }
0x1f6c   :  { %13386 = vrcp.f32 %v8544_v49 }
0x1f75   :  { %v13385_v62 = vpop.eup %13384 }
0x1f76   :  { %v13387_v26 = vpop.eup %13386  ;;  %v8550_v12 = vmul.f32 %v13385_v62, %v8548_v11 }
0x1f77   :  { %v8557_v15 = vmul.f32 %v13387_v26, %v8555_v4  ;;  %v8553_v19 = vsub.f32 1.0, %v13387_v26 }
0x1f78   :  { %v8551_v6 = vadd.f32 %v8550_v12, %v15227_v39 }
0x1f7a   :  { %13388 = vtanh.f32 %v8551_v6 }
0x1f84   :  { %v13389_v31 = vpop.eup %13388 }
0x1f85   :  { %v8554_v25 = vmul.f32 %v13389_v31, %v8553_v19 }
0x1f87   :  { %v8558_v2 = vadd.f32 %v8557_v15, %v8554_v25 }
0x1f89   :  { %v8559_v27 = vmul.f32 %v8558_v2, %v14229_v34 }
0x1f8b   :  { %v8561_v32 = vadd.f32 %v8560_v17, %v8559_v27 }
0x1f8d   :  { %v8564_v28 = vrot.slane %v8561_v32, 2  ;;  %v8562_v37 = vmul.f32 %v8561_v32, %v14229_v34  ;;  %v8805_v1 = vrot.slane %v8561_v32, 6 }
0x1f8f   :  { %12158 = vmatmul.mubr.msk.f32.vlgmr.msra.gmra.mrb[96].mxu0 %vm404_vm3, %v8564_v28  ;;  %12169 = vmatmul.mubr.msk.f32.vlgmr.msra.gmra.mrb[98].mxu1 %vm404_vm3, %v8564_v28  ;;  %v10052_v41 = vsel %vm2697_vm5, %v8313_v21, %v8562_v37  ;;  %v8810_v6 = vmul.f32 %v8805_v1, %v14231_v43 }
0x1f90   :  { %12970 = vmatpush3.bf16.msra.mxu0 %v15164_v52  ;;  %12179 = vmatprep.mubr.msk.f32.mxu0 %vm13848_vm4, %v13846_v20 }
0x1f91   :  { %12971 = vmatprep.subr.bf16.mxu0 %v13847_v30  ;;  %12976 = vmatpush3.bf16.msra.mxu1 %v15146_v33 }
0x1f92   :  { %12977 = vmatprep.subr.bf16.mxu1 %v13847_v30  ;;  %12190 = vmatprep.mubr.msk.f32.mxu1 %vm13848_vm4, %v13846_v20 }
0x1f94   :  { %12973 = vmatpush3.bf16.msra.mxu0 %v15178_v14 }
0x1f95   :  { %12980 = vmatprep.subr.bf16.mxu0 %v13847_v30  ;;  %12979 = vmatpush3.bf16.msra.mxu1 %v15153_v47 }
0x1f96   :  { %12986 = vmatprep.subr.bf16.mxu1 %v13847_v30 }
0x1f97   :  { %12180 = vmatmul.mubr.msk.f32.vlgmr.msra.gmra.mrb[98].mxu0 %vm404_vm3, %v8564_v28 }
0x1f98   :  { %12982 = vmatpush3.bf16.msra.mxu0 %v15162_v36  ;;  %12201 = vmatprep.mubr.msk.f32.mxu0 %vm13848_vm4, %v13846_v20 }
0x1f99   :  { %12983 = vmatprep.subr.bf16.mxu0 %v13847_v30 }
0x1f9c   :  { %12985 = vmatpush3.bf16.msra.mxu0 %v15176_v60 }
0x1f9d   :  { %12992 = vmatprep.subr.bf16.mxu0 %v13847_v30 }
0x2062   :  { %v8633_v42 = vpop.f32.mrb[96].mxu0  ;;  %v8703_v54 = vpop.f32.mrb[98].mxu1 }
0x2063   :  { %v8634_v48 = vadd.f32 %v15210_v57, %v8633_v42  ;;  %v8704_v35 = vadd.f32 %v15218_v16, %v8703_v54  ;;  %v12159_v50 = vpop.f32.mrb[97].mxu0  ;;  %v12170_v40 = vpop.f32.mrb[99].mxu1 }
0x2065   :  { %v8778_v38 = vrot.slane %v8634_v48, 4  ;;  %v8788_v23 = vrot.slane %v8704_v35, 4 }
0x2067   :  { %v8780_v10 = vadd.f32 %v8778_v38, %v15212_v61  ;;  %v8790_v22 = vadd.f32 %v8788_v23, %v15220_v13 }
0x2069   :  { %v10473_v3 = vmul.f32 -1.442695, %v8780_v10  ;;  %v10474_v46 = vmul.f32 -1.442695, %v8790_v22 }
0x206a   :  { %v8773_v45 = vpop.f32.mrb[98].mxu0 }
0x206b   :  { %13390 = vpow2.f32 %v10473_v3  ;;  %v12181_v56 = vpop.f32.mrb[99].mxu0  ;;  %v8774_v7 = vadd.f32 %v15224_v24, %v8773_v45 }
0x206c   :  { %13392 = vpow2.f32 %v10474_v46 }
0x206d   :  { %v8798_v8 = vrot.slane %v8774_v7, 4 }
0x2075   :  { %v13391_v29 = vpop.eup %13390 }
0x2076   :  { %v13393_v0 = vpop.eup %13392  ;;  %v8784_v5 = vadd.f32 1.0, %v13391_v29 }
0x2077   :  { %v8794_v44 = vadd.f32 1.0, %v13393_v0 }
0x2078   :  { %13394 = vrcp.f32 %v8784_v5 }
0x2079   :  { %13396 = vrcp.f32 %v8794_v44 }
0x2082   :  { %v13395_v18 = vpop.eup %13394 }
0x2083   :  { %v13397_v55 = vpop.eup %13396  ;;  %v8800_v49 = vmul.f32 %v13395_v18, %v8798_v8 }
0x2084   :  { %v8807_v9 = vmul.f32 %v13397_v55, %v8805_v1  ;;  %v8803_v62 = vsub.f32 1.0, %v13397_v55 }
0x2085   :  { %v8801_v11 = vadd.f32 %v8800_v49, %v15227_v39 }
0x2087   :  { %13398 = vtanh.f32 %v8801_v11 }
0x2091   :  { %v13399_v4 = vpop.eup %13398 }
0x2092   :  { %v8804_v26 = vmul.f32 %v13399_v4, %v8803_v62 }
0x2094   :  { %v8808_v12 = vadd.f32 %v8807_v9, %v8804_v26 }
0x2096   :  { %v8809_v15 = vmul.f32 %v8808_v12, %v14229_v34 }
0x2098   :  { %v8811_v19 = vadd.f32 %v8810_v6, %v8809_v15 }
0x209a   :  { %v8814_v31 = vrot.slane %v8811_v19, 4  ;;  %v8812_v25 = vmul.f32 %v8811_v19, %v14229_v34  ;;  %v9055_v29 = vrot.slane %v8811_v19, 6 }
0x209c   :  { %12191 = vmatmul.mubr.msk.f32.vlgmr.msra.gmra.mrb[100].mxu1 %vm404_vm3, %v8814_v31  ;;  %12202 = vmatmul.mubr.msk.f32.vlgmr.msra.gmra.mrb[100].mxu0 %vm404_vm3, %v8814_v31  ;;  %v10053_v2 = vsel %vm2699_vm6, %v10052_v41, %v8812_v25  ;;  %v9060_v55 = vmul.f32 %v9055_v29, %v14231_v43 }
0x209d   :  { %12988 = vmatpush3.bf16.msra.mxu1 %v15164_v52  ;;  %12212 = vmatprep.mubr.msk.f32.mxu1 %vm13848_vm4, %v13846_v20 }
0x209e   :  { %12989 = vmatprep.subr.bf16.mxu1 %v13847_v30  ;;  %12994 = vmatpush3.bf16.msra.mxu0 %v15146_v33 }
0x209f   :  { %12995 = vmatprep.subr.bf16.mxu0 %v13847_v30  ;;  %12223 = vmatprep.mubr.msk.f32.mxu0 %vm13848_vm4, %v13846_v20 }
0x20a1   :  { %12991 = vmatpush3.bf16.msra.mxu1 %v15178_v14 }
0x20a2   :  { %12998 = vmatprep.subr.bf16.mxu1 %v13847_v30  ;;  %12997 = vmatpush3.bf16.msra.mxu0 %v15153_v47 }
0x20a3   :  { %13004 = vmatprep.subr.bf16.mxu0 %v13847_v30 }
0x20a4   :  { %12213 = vmatmul.mubr.msk.f32.vlgmr.msra.gmra.mrb[102].mxu1 %vm404_vm3, %v8814_v31 }
0x20a5   :  { %13000 = vmatpush3.bf16.msra.mxu1 %v15162_v36  ;;  %12234 = vmatprep.mubr.msk.f32.mxu1 %vm13848_vm4, %v13846_v20 }
0x20a6   :  { %13001 = vmatprep.subr.bf16.mxu1 %v13847_v30 }
0x20a9   :  { %13003 = vmatpush3.bf16.msra.mxu1 %v15176_v60 }
0x20aa   :  { %13010 = vmatprep.subr.bf16.mxu1 %v13847_v30 }
0x216f   :  { %v8883_v27 = vpop.f32.mrb[100].mxu1  ;;  %v8953_v17 = vpop.f32.mrb[100].mxu0 }
0x2170   :  { %v8884_v32 = vadd.f32 %v15210_v57, %v8883_v27  ;;  %v8954_v28 = vadd.f32 %v15218_v16, %v8953_v17  ;;  %v12192_v21 = vpop.f32.mrb[101].mxu1  ;;  %v12203_v37 = vpop.f32.mrb[101].mxu0 }
0x2172   :  { %v9028_v41 = vrot.slane %v8884_v32, 2  ;;  %v9038_v42 = vrot.slane %v8954_v28, 2 }
0x2174   :  { %v9030_v54 = vadd.f32 %v9028_v41, %v15212_v61  ;;  %v9040_v48 = vadd.f32 %v9038_v42, %v15220_v13 }
0x2176   :  { %v10478_v35 = vmul.f32 -1.442695, %v9030_v54  ;;  %v10479_v50 = vmul.f32 -1.442695, %v9040_v48 }
0x2177   :  { %v9023_v40 = vpop.f32.mrb[102].mxu1 }
0x2178   :  { %13400 = vpow2.f32 %v10478_v35  ;;  %v12214_v38 = vpop.f32.mrb[103].mxu1  ;;  %v9024_v46 = vadd.f32 %v15224_v24, %v9023_v40 }
0x2179   :  { %13402 = vpow2.f32 %v10479_v50 }
0x217a   :  { %v9048_v45 = vrot.slane %v9024_v46, 2 }
0x2182   :  { %v13401_v23 = vpop.eup %13400 }
0x2183   :  { %v13403_v10 = vpop.eup %13402  ;;  %v9034_v22 = vadd.f32 1.0, %v13401_v23 }
0x2184   :  { %v9044_v3 = vadd.f32 1.0, %v13403_v10 }
0x2185   :  { %13404 = vrcp.f32 %v9034_v22 }
0x2186   :  { %13406 = vrcp.f32 %v9044_v3 }
0x218f   :  { %v13405_v56 = vpop.eup %13404 }
0x2190   :  { %v13407_v61 = vpop.eup %13406  ;;  %v9050_v0 = vmul.f32 %v13405_v56, %v9048_v45 }
0x2191   :  { %v9057_v13 = vmul.f32 %v13407_v61, %v9055_v29  ;;  %v9053_v44 = vsub.f32 1.0, %v13407_v61 }
0x2192   :  { %v9051_v5 = vadd.f32 %v9050_v0, %v15227_v39 }
0x2194   :  { %13408 = vtanh.f32 %v9051_v5 }
0x219e   :  { %v13409_v7 = vpop.eup %13408 }
0x219f   :  { %v9054_v8 = vmul.f32 %v13409_v7, %v9053_v44 }
0x21a1   :  { %v9058_v18 = vadd.f32 %v9057_v13, %v9054_v8 }
0x21a3   :  { %v9059_v1 = vmul.f32 %v9058_v18, %v14229_v34 }
0x21a5   :  { %v9061_v49 = vadd.f32 %v9060_v55, %v9059_v1 }
0x21a7   :  { %v9064_v9 = vrot.slane %v9061_v49, 6  ;;  %v9062_v11 = vmul.f32 %v9061_v49, %v14229_v34 }
0x21a9   :  { %12224 = vmatmul.mubr.msk.f32.vlgmr.msra.gmra.mrb[102].mxu0 %vm404_vm3, %v9064_v9  ;;  %12235 = vmatmul.mubr.msk.f32.vlgmr.msra.gmra.mrb[104].mxu1 %vm404_vm3, %v9064_v9  ;;  %v15330_v62 = vsel %vm2701_vm7, %v10053_v2, %v9062_v11  ;;  %v9300_v10 = vmul.f32 %v9064_v9, %v14363_v59 }
0x21aa   :  { %13006 = vmatpush3.bf16.msra.mxu0 %v15164_v52  ;;  %12245 = vmatprep.mubr.msk.f32.mxu0 %vm13848_vm4, %v13846_v20 }
0x21ab   :  { %13007 = vmatprep.subr.bf16.mxu0 %v13847_v30  ;;  %13012 = vmatpush3.bf16.msra.mxu1 %v15146_v33 }
0x21ac   :  { %13013 = vmatprep.subr.bf16.mxu1 %v13847_v30  ;;  %12256 = vmatprep.mubr.msk.f32.mxu1 %vm13848_vm4, %v13846_v20 }
0x21ae   :  { %13009 = vmatpush3.bf16.msra.mxu0 %v15178_v14 }
0x21af   :  { %13016 = vmatprep.subr.bf16.mxu0 %v13847_v30  ;;  %13015 = vmatpush3.bf16.msra.mxu1 %v15153_v47 }
0x21b0   :  { %13022 = vmatprep.subr.bf16.mxu1 %v13847_v30 }
0x21b1   :  { %12246 = vmatmul.mubr.msk.f32.vlgmr.msra.gmra.mrb[104].mxu0 %vm404_vm3, %v9064_v9 }
0x21b2   :  { %13018 = vmatpush3.bf16.msra.mxu0 %v15162_v36  ;;  %12267 = vmatprep.mubr.msk.f32.mxu0 %vm13848_vm4, %v13846_v20 }
0x21b3   :  { %13019 = vmatprep.subr.bf16.mxu0 %v13847_v30 }
0x21b6   :  { %13021 = vmatpush3.bf16.msra.mxu0 %v15176_v60 }
0x21b7   :  { %13028 = vmatprep.subr.bf16.mxu0 %v13847_v30 }
0x227c   :  { %v9133_v34 = vpop.f32.mrb[102].mxu0  ;;  %v9203_v43 = vpop.f32.mrb[104].mxu1 }
0x227d   :  { %v9134_v39 = vadd.f32 %v15210_v57, %v9133_v34  ;;  %v12225_v4 = vpop.f32.mrb[103].mxu0  ;;  %v12236_v26 = vpop.f32.mrb[105].mxu1  ;;  %v9204_v12 = vadd.f32 %v15218_v16, %v9203_v43 }
0x227f   :  { %v9277_v15 = vadd.f32 %v9134_v39, %v15206_v63  ;;  %v9284_v19 = vadd.f32 %v9204_v12, %v15208_v51 }
0x2281   :  { %v10483_v6 = vmul.f32 -1.442695, %v9277_v15  ;;  %v10484_v2 = vmul.f32 -1.442695, %v9284_v19 }
0x2283   :  { %13410 = vpow2.f32 %v10483_v6 }
0x2284   :  { %v9273_v31 = vpop.f32.mrb[104].mxu0  ;;  %13412 = vpow2.f32 %v10484_v2 }
0x2285   :  { %v12247_v25 = vpop.f32.mrb[105].mxu0  ;;  %v9274_v21 = vadd.f32 %v15224_v24, %v9273_v31 }
0x228d   :  { %v13411_v27 = vpop.eup %13410 }
0x228e   :  { %v9281_v17 = vadd.f32 1.0, %v13411_v27  ;;  %v13413_v32 = vpop.eup %13412 }
0x228f   :  { %v9288_v28 = vadd.f32 1.0, %v13413_v32 }
0x2290   :  { %13414 = vrcp.f32 %v9281_v17 }
0x2291   :  { %13416 = vrcp.f32 %v9288_v28 }
0x229a   :  { %v13415_v37 = vpop.eup %13414 }
0x229b   :  { %v9291_v41 = vmul.f32 %v13415_v37, %v9274_v21  ;;  %v13417_v54 = vpop.eup %13416 }
0x229c   :  { %v9294_v48 = vsub.f32 1.0, %v13417_v54  ;;  %v9297_v50 = vmul.f32 %v13417_v54, %v9064_v9 }
0x229d   :  { %v9292_v42 = vadd.f32 %v9291_v41, %v15214_v53 }
0x229f   :  { %13418 = vtanh.f32 %v9292_v42 }
0x22a9   :  { %v13419_v35 = vpop.eup %13418 }
0x22aa   :  { %v9295_v40 = vmul.f32 %v13419_v35, %v9294_v48 }
0x22ac   :  { %v9298_v38 = vadd.f32 %v9297_v50, %v9295_v40 }
0x22ae   :  { %v9299_v23 = vmul.f32 %v9298_v38, %v14361_v58 }
0x22b0   :  { %v9301_v22 = vadd.f32 %v9300_v10, %v9299_v23 }
0x22b2   :  { %12257 = vmatmul.mubr.msk.f32.vlgmr.msra.gmra.mrb[106].mxu1 %vm404_vm3, %v9301_v22  ;;  %12268 = vmatmul.mubr.msk.f32.vlgmr.msra.gmra.mrb[106].mxu0 %vm404_vm3, %v9301_v22  ;;  %v9544_v4 = vrot.slane %v9301_v22, 6  ;;  %v9302_v21 = vmul.f32 %v9301_v22, %v14361_v58 }
0x22b3   :  { %13024 = vmatpush3.bf16.msra.mxu1 %v15164_v52  ;;  %12278 = vmatprep.mubr.msk.f32.mxu1 %vm13848_vm4, %v13846_v20 }
0x22b4   :  { %13025 = vmatprep.subr.bf16.mxu1 %v13847_v30  ;;  %13030 = vmatpush3.bf16.msra.mxu0 %v15146_v33  ;;  %v9549_v17 = vmul.f32 %v9544_v4, %v14363_v59 }
0x22b5   :  { %13031 = vmatprep.subr.bf16.mxu0 %v13847_v30  ;;  %12289 = vmatprep.mubr.msk.f32.mxu0 %vm13848_vm4, %v13846_v20 }
0x22b7   :  { %13027 = vmatpush3.bf16.msra.mxu1 %v15178_v14 }
0x22b8   :  { %13034 = vmatprep.subr.bf16.mxu1 %v13847_v30  ;;  %13033 = vmatpush3.bf16.msra.mxu0 %v15153_v47 }
0x22b9   :  { %13040 = vmatprep.subr.bf16.mxu0 %v13847_v30 }
0x22ba   :  { %12279 = vmatmul.mubr.msk.f32.vlgmr.msra.gmra.mrb[108].mxu1 %vm404_vm3, %v9301_v22 }
0x22bb   :  { %13036 = vmatpush3.bf16.msra.mxu1 %v15162_v36  ;;  %12300 = vmatprep.mubr.msk.f32.mxu1 %vm13848_vm4, %v13846_v20 }
0x22bc   :  { %13037 = vmatprep.subr.bf16.mxu1 %v13847_v30 }
0x22bf   :  { %13039 = vmatpush3.bf16.msra.mxu1 %v15176_v60 }
0x22c0   :  { %13046 = vmatprep.subr.bf16.mxu1 %v13847_v30 }
0x2385   :  { %v9372_v3 = vpop.f32.mrb[106].mxu1  ;;  %v9442_v46 = vpop.f32.mrb[106].mxu0 }
0x2386   :  { %v9373_v45 = vadd.f32 %v15210_v57, %v9372_v3  ;;  %v9443_v56 = vadd.f32 %v15218_v16, %v9442_v46  ;;  %v12258_v29 = vpop.f32.mrb[107].mxu1  ;;  %v12269_v61 = vpop.f32.mrb[107].mxu0 }
0x2388   :  { %v9517_v0 = vrot.slane %v9373_v45, 6  ;;  %v9527_v13 = vrot.slane %v9443_v56, 6 }
0x238a   :  { %v9519_v5 = vadd.f32 %v9517_v0, %v15206_v63  ;;  %v9529_v44 = vadd.f32 %v9527_v13, %v15208_v51 }
0x238c   :  { %v10488_v7 = vmul.f32 -1.442695, %v9519_v5  ;;  %v10489_v8 = vmul.f32 -1.442695, %v9529_v44 }
0x238d   :  { %v9512_v18 = vpop.f32.mrb[108].mxu1 }
0x238e   :  { %13420 = vpow2.f32 %v10488_v7  ;;  %v12280_v1 = vpop.f32.mrb[109].mxu1  ;;  %v9513_v34 = vadd.f32 %v15224_v24, %v9512_v18 }
0x238f   :  { %13422 = vpow2.f32 %v10489_v8 }
0x2390   :  { %v9537_v43 = vrot.slane %v9513_v34, 6 }
0x2398   :  { %v13421_v55 = vpop.eup %13420 }
0x2399   :  { %v13423_v49 = vpop.eup %13422  ;;  %v9523_v9 = vadd.f32 1.0, %v13421_v55 }
0x239a   :  { %v9533_v11 = vadd.f32 1.0, %v13423_v49 }
0x239b   :  { %13424 = vrcp.f32 %v9523_v9 }
0x239c   :  { %13426 = vrcp.f32 %v9533_v11 }
0x23a5   :  { %v13425_v39 = vpop.eup %13424 }
0x23a6   :  { %v13427_v26 = vpop.eup %13426  ;;  %v9539_v12 = vmul.f32 %v13425_v39, %v9537_v43 }
0x23a7   :  { %v9546_v15 = vmul.f32 %v13427_v26, %v9544_v4  ;;  %v9542_v19 = vsub.f32 1.0, %v13427_v26  ;;  %v10058_v26 = vld [vmem:[%s15498_s22] sm:$0xff] }
0x23a8   :  { %v9540_v6 = vadd.f32 %v9539_v12, %v15214_v53  ;;  %v10059_v12 = vld [vmem:[%s15498_s22 + $0x8] sm:$0xff] }
0x23aa   :  { %13428 = vtanh.f32 %v9540_v6  ;;  %v13064_v6 = vpack.c.bf16 %v10059_v12, %v10058_v26 }
0x23b4   :  { %v13429_v31 = vpop.eup %13428 }
0x23b5   :  { %v9543_v25 = vmul.f32 %v13429_v31, %v9542_v19  ;;  %v10061_v19 = vld [vmem:[%s15498_s22 + $0x18] sm:$0xff] }
0x23b7   :  { %v9547_v2 = vadd.f32 %v9546_v15, %v9543_v25  ;;  %v10060_v15 = vld [vmem:[%s15498_s22 + $0x10] sm:$0xff] }
0x23b8   :  { %v13068_v31 = vpack.c.bf16 %v10061_v19, %v10060_v15 }
0x23b9   :  { %v9548_v27 = vmul.f32 %v9547_v2, %v14361_v58 }
0x23bb   :  { %v9550_v32 = vadd.f32 %v9549_v17, %v9548_v27 }
0x23bd   :  { %v9553_v28 = vrot.slane %v9550_v32, 2  ;;  %v9551_v37 = vmul.f32 %v9550_v32, %v14361_v58  ;;  %v9794_v13 = vrot.slane %v9550_v32, 6 }
0x23bf   :  { %12290 = vmatmul.mubr.msk.f32.vlgmr.msra.gmra.mrb[108].mxu0 %vm404_vm3, %v9553_v28  ;;  %12301 = vmatmul.mubr.msk.f32.vlgmr.msra.gmra.mrb[110].mxu1 %vm404_vm3, %v9553_v28  ;;  %v10055_v41 = vsel %vm2697_vm5, %v9302_v21, %v9551_v37  ;;  %v9799_v11 = vmul.f32 %v9794_v13, %v14363_v59 }
0x23c0   :  { %13042 = vmatpush3.bf16.msra.mxu0 %v15164_v52  ;;  %12311 = vmatprep.mubr.msk.f32.mxu0 %vm13848_vm4, %v13846_v20 }
0x23c1   :  { %13043 = vmatprep.subr.bf16.mxu0 %v13847_v30  ;;  %13048 = vmatpush3.bf16.msra.mxu1 %v15146_v33 }
0x23c2   :  { %13049 = vmatprep.subr.bf16.mxu1 %v13847_v30  ;;  %12322 = vmatprep.mubr.msk.f32.mxu1 %vm13848_vm4, %v13846_v20 }
0x23c4   :  { %13045 = vmatpush3.bf16.msra.mxu0 %v15178_v14 }
0x23c5   :  { %13052 = vmatprep.subr.bf16.mxu0 %v13847_v30  ;;  %13051 = vmatpush3.bf16.msra.mxu1 %v15153_v47 }
0x23c6   :  { %13058 = vmatprep.subr.bf16.mxu1 %v13847_v30 }
0x23c7   :  { %12312 = vmatmul.mubr.msk.f32.vlgmr.msra.gmra.mrb[110].mxu0 %vm404_vm3, %v9553_v28 }
0x23c8   :  { %13054 = vmatpush3.bf16.msra.mxu0 %v15162_v36  ;;  %12333 = vmatprep.mubr.msk.f32.mxu0 %vm13848_vm4, %v13846_v20 }
0x23c9   :  { %13055 = vmatprep.subr.bf16.mxu0 %v13847_v30 }
0x23cc   :  { %13057 = vmatpush3.bf16.msra.mxu0 %v15176_v60 }
0x23cd   :  { %13065 = vmatprep.subr.bf16.mxu0 %v13064_v6 }
0x2492   :  { %v9622_v33 = vpop.f32.mrb[108].mxu0  ;;  %v9692_v42 = vpop.f32.mrb[110].mxu1 }
0x2493   :  { %v9623_v54 = vadd.f32 %v15210_v57, %v9622_v33  ;;  %v9693_v48 = vadd.f32 %v15218_v16, %v9692_v42  ;;  %v12291_v47 = vpop.f32.mrb[109].mxu0  ;;  %v12302_v35 = vpop.f32.mrb[111].mxu1 }
0x2495   :  { %v9767_v50 = vrot.slane %v9623_v54, 4  ;;  %v9777_v40 = vrot.slane %v9693_v48, 4 }
0x2497   :  { %v9769_v38 = vadd.f32 %v9767_v50, %v15206_v63  ;;  %v9779_v36 = vadd.f32 %v9777_v40, %v15208_v51 }
0x2499   :  { %v10493_v23 = vmul.f32 -1.442695, %v9769_v38  ;;  %v10494_v10 = vmul.f32 -1.442695, %v9779_v36 }
0x249a   :  { %v9762_v22 = vpop.f32.mrb[110].mxu0 }
0x249b   :  { %13430 = vpow2.f32 %v10493_v23  ;;  %v12313_v3 = vpop.f32.mrb[111].mxu0  ;;  %v9763_v29 = vadd.f32 %v15224_v24, %v9762_v22 }
0x249c   :  { %13432 = vpow2.f32 %v10494_v10 }
0x249d   :  { %v9787_v61 = vrot.slane %v9763_v29, 4 }
0x24a5   :  { %v13431_v60 = vpop.eup %13430 }
0x24a6   :  { %v13433_v46 = vpop.eup %13432  ;;  %v9773_v45 = vadd.f32 1.0, %v13431_v60 }
0x24a7   :  { %v9783_v56 = vadd.f32 1.0, %v13433_v46 }
0x24a8   :  { %13434 = vrcp.f32 %v9773_v45 }
0x24a9   :  { %13436 = vrcp.f32 %v9783_v56 }
0x24b2   :  { %v13435_v0 = vpop.eup %13434 }
0x24b3   :  { %v13437_v5 = vpop.eup %13436  ;;  %v9789_v44 = vmul.f32 %v13435_v0, %v9787_v61 }
0x24b4   :  { %v9796_v7 = vmul.f32 %v13437_v5, %v9794_v13  ;;  %v9792_v18 = vsub.f32 1.0, %v13437_v5 }
0x24b5   :  { %v9790_v8 = vadd.f32 %v9789_v44, %v15214_v53 }
0x24b7   :  { %13438 = vtanh.f32 %v9790_v8 }
0x24c1   :  { %v13439_v1 = vpop.eup %13438 }
0x24c2   :  { %v9793_v55 = vmul.f32 %v13439_v1, %v9792_v18 }
0x24c4   :  { %v9797_v49 = vadd.f32 %v9796_v7, %v9793_v55 }
0x24c6   :  { %v9798_v9 = vmul.f32 %v9797_v49, %v14361_v58 }
0x24c8   :  { %v9800_v34 = vadd.f32 %v9799_v11, %v9798_v9 }
0x24ca   :  { %v9803_v43 = vrot.slane %v9800_v34, 4  ;;  %v9801_v39 = vmul.f32 %v9800_v34, %v14361_v58  ;;  %v10044_v35 = vrot.slane %v9800_v34, 6 }
0x24cc   :  { %12323 = vmatmul.mubr.msk.f32.vlgmr.msra.gmra.mrb[112].mxu1 %vm404_vm3, %v9803_v43  ;;  %12334 = vmatmul.mubr.msk.f32.vlgmr.msra.gmra.mrb[112].mxu0 %vm404_vm3, %v9803_v43  ;;  %v10056_v4 = vsel %vm2699_vm6, %v10055_v41, %v9801_v39  ;;  %v10049_v3 = vmul.f32 %v10044_v35, %v14363_v59 }
0x24cd   :  { %13060 = vmatpush3.bf16.msra.mxu1 %v15164_v52  ;;  %12355 = vmatprep.mubr.msk.f32.mxu0 %vm404_vm3, %v15330_v62 }
0x24ce   :  { %13061 = vmatprep.subr.bf16.mxu1 %v13847_v30  ;;  %12344 = vmatprep.mubr.msk.f32.mxu1 %vm13848_vm4, %v13846_v20 }
0x24cf   :  { %13067 = vmatpush3.bf16.msra.mxu0 %v13064_v6 }
0x24d0   :  { %13069 = vmatprep.subr.bf16.mxu0 %v13068_v31 }
0x24d1   :  { %13063 = vmatpush3.bf16.msra.mxu1 %v15178_v14 }
0x24d3   :  { %13071 = vmatpush3.bf16.msra.mxu0 %v13068_v31 }
0x24d4   :  { %12345 = vmatmul.mubr.msk.f32.vlgmr.msra.gmra.mrb[114].mxu1 %vm404_vm3, %v9803_v43 }
0x259f   :  { %v9872_v52 = vpop.f32.mrb[112].mxu1  ;;  %v9942_v62 = vpop.f32.mrb[112].mxu0 }
0x25a0   :  { %v9873_v30 = vadd.f32 %v15210_v57, %v9872_v52  ;;  %v9943_v20 = vadd.f32 %v15218_v16, %v9942_v62  ;;  %v12324_v25 = vpop.f32.mrb[113].mxu1  ;;  %v12335_v14 = vpop.f32.mrb[113].mxu0 }
0x25a2   :  { %v10017_v2 = vrot.slane %v9873_v30, 2  ;;  %v10027_v27 = vrot.slane %v9943_v20, 2 }
0x25a4   :  { %v10019_v17 = vadd.f32 %v10017_v2, %v15206_v63  ;;  %v10029_v32 = vadd.f32 %v10027_v27, %v15208_v51 }
0x25a6   :  { %v10498_v28 = vmul.f32 -1.442695, %v10019_v17  ;;  %v10499_v21 = vmul.f32 -1.442695, %v10029_v32 }
0x25a7   :  { %v10012_v37 = vpop.f32.mrb[114].mxu1 }
0x25a8   :  { %13440 = vpow2.f32 %v10498_v28  ;;  %v12346_v41 = vpop.f32.mrb[115].mxu1  ;;  %v10013_v16 = vadd.f32 %v15224_v24, %v10012_v37 }
0x25a9   :  { %13442 = vpow2.f32 %v10499_v21 }
0x25aa   :  { %v10037_v48 = vrot.slane %v10013_v16, 2 }
0x25b2   :  { %v13441_v33 = vpop.eup %13440 }
0x25b3   :  { %v13443_v42 = vpop.eup %13442  ;;  %v10023_v54 = vadd.f32 1.0, %v13441_v33 }
0x25b4   :  { %v10033_v57 = vadd.f32 1.0, %v13443_v42 }
0x25b5   :  { %13444 = vrcp.f32 %v10023_v54 }
0x25b6   :  { %13446 = vrcp.f32 %v10033_v57 }
0x25bf   :  { %v13445_v47 = vpop.eup %13444 }
0x25c0   :  { %v13447_v63 = vpop.eup %13446  ;;  %v10039_v50 = vmul.f32 %v13445_v47, %v10037_v48 }
0x25c1   :  { %v10046_v51 = vmul.f32 %v13447_v63, %v10044_v35  ;;  %v10042_v38 = vsub.f32 1.0, %v13447_v63 }
0x25c2   :  { %v10040_v40 = vadd.f32 %v10039_v50, %v15214_v53 }
0x25c4   :  { %13448 = vtanh.f32 %v10040_v40 }
0x25ce   :  { %v13449_v36 = vpop.eup %13448 }
0x25cf   :  { %v10043_v23 = vmul.f32 %v13449_v36, %v10042_v38 }
0x25d1   :  { %v10047_v10 = vadd.f32 %v10046_v51, %v10043_v23 }
0x25d3   :  { %v10048_v22 = vmul.f32 %v10047_v10, %v14361_v58 }
0x25d5   :  { %v10050_v60 = vadd.f32 %v10049_v3, %v10048_v22 }
0x25d7   :  { %v10051_v24 = vmul.f32 %v10050_v60, %v14361_v58 }
0x25d9   :  { %v10057_v46 = vsel %vm2701_vm7, %v10056_v4, %v10051_v24 }
0x25da   :  { %12356 = vmatmul.mubr.msk.f32.vlgmr.msra.gmra.mrb[114].mxu0 %vm404_vm3, %v10057_v46 }
0x25db   :  { %13725 = shalt.err (!%p13722_p2)
}
0x25dc   :  { %s13726_s1 = scalar_lea.hbm %s14010_s17, 32 }
0x25dd   :  { %p13727_p3 = scmp.ne.s32.totalorder %s14010_s17, %s13726_s1  ;;  %p13730_p4 = scmp.lt.u32.totalorder %s13726_s1, %s14010_s17 }
0x25df   :  { %p13732_p5 = pnand %p13730_p4, %p13727_p3 }
0x25e1   :  { %13735 = shalt.err (!%p13732_p5)
}
0x25e2   :  { %10173 = dma.vmem_to_hbm [thread:$0]  %s10171_s23, 32, %s14010_s17, [#allocation24]  }
0x25e3   :  { %s13736_s2 = scalar_lea.vmem %s10161_s0, 32  ;;  %p13741_p7 = scmp.lt.s32.totalorder %s10161_s0, %s10161_s0 }
0x25e4   :  { %p13737_p6 = scmp.ne.s32.totalorder %s10161_s0, %s13736_s2  ;;  %p13742_p8 = scmp.lt.s32.totalorder %s13736_s2, %s13736_s2 }
0x25e6   :  { %p13743_p9 = por %p13742_p8, %p13741_p7 }
0x25e8   :  { %p13744_p10 = pnand %p13743_p9, %p13737_p6 }
0x25ea   :  { %13747 = shalt.err (!%p13744_p10)
}
0x25eb   :  { %s13748_s12 = scalar_lea.hbm %s14005_s25, 32 }
0x25ec   :  { %p13749_p11 = scmp.ne.s32.totalorder %s14005_s25, %s13748_s12  ;;  %p13752_p12 = scmp.lt.u32.totalorder %s13748_s12, %s14005_s25 }
0x25ee   :  { %p13754_p13 = pnand %p13752_p12, %p13749_p11 }
0x25f0   :  { %13757 = shalt.err (!%p13754_p13)
}
0x25f1   :  { %10163 = dma.vmem_to_hbm [thread:$0]  %s10161_s0, 32, %s14005_s25, [#allocation4]  }
0x25f2   :  { %s13851_s21 = smov [#allocation25]  }
0x25f3   :  { %s10180_s17 = sshll.u32 %s13851_s21, 4  ;;  %s10181_s17 = int_to_ptr.vmem [resolvable:$true] %s10180_s17 }
0x25f4   :  { %s13758_s11 = scalar_lea.vmem %s10181_s17, 32  ;;  %p13763_p1 = scmp.lt.s32.totalorder %s10181_s17, %s10181_s17 }
0x25f5   :  { %p13759_p0 = scmp.ne.s32.totalorder %s10181_s17, %s13758_s11  ;;  %p13764_p2 = scmp.lt.s32.totalorder %s13758_s11, %s13758_s11 }
0x25f7   :  { %p13765_p3 = por %p13764_p2, %p13763_p1 }
0x25f9   :  { %p13766_p4 = pnand %p13765_p3, %p13759_p0 }
0x25fb   :  { %13769 = shalt.err (!%p13766_p4)
}
0x25fc   :  { %s13770_s27 = scalar_lea.hbm %s14015_s9, 32 }
0x25fd   :  { %p13771_p5 = scmp.ne.s32.totalorder %s14015_s9, %s13770_s27  ;;  %p13774_p6 = scmp.lt.u32.totalorder %s13770_s27, %s14015_s9 }
0x25ff   :  { %p13776_p7 = pnand %p13774_p6, %p13771_p5 }
0x2601   :  { %13779 = shalt.err (!%p13776_p7)
}
0x2602   :  { %s15499_s25 = sld [smem:[#allocation47_spill]] }
0x2603   :  { %10183 = dma.vmem_to_hbm [thread:$0]  %s10181_s17, 32, %s14015_s9, [#allocation24]  }
0x2608   :  { %v10500_v58 = vld [vmem:[%s15499_s25] ss:$0 sm:$0xff] }
0x26ad   :  { %v12357_v59 = vpop.f32.mrb[114].mxu0 }
0x26ae   :  { %v10147_v53 = vadd.f32 %v12357_v59, %v10500_v58  ;;  %v10141_v45 = vpop.f32.mrb[115].mxu0 }
0x26af   :  { %v10142_v56 = vadd.f32 %v10500_v58, %v10141_v45 }
0x26b0   :  { %10151 = vst [vmem:[%s14000_s3 + $0x8] sm:$0xff] %v10147_v53 }
0x26b1   :  { %10150 = vst [vmem:[%s14000_s3] sm:$0xff] %v10142_v56 }
0x26b2   :  { %13794 = dma.done.wait [#allocation4], 32  }
0x26b3   :  { %13795 = vsyncadd [#allocation4], 4294967264 }
0x26b4   :  { %13796 = dma.done.wait [#allocation24], 64  }
0x26b5   :  { %13797 = vsyncadd [#allocation24], 4294967232 }
0x26b6   :  { %10195 = vsyncpa [#allocation3], 1 }
0x26b7   :  { %10196 = vsyncpa [#allocation6], 1 }
0x26b8   :  { %10197 = vsyncpa [#allocation9], 1 }
0x26b9   :  { %10198 = vsyncpa [#allocation12], 1 }
0x26ba   :  { %10199 = vsyncpa [#allocation15], 1 }
0x26bb   :  { %10200 = vsyncpa [#allocation18], 1 }
0x26bc   :  { %10201 = vsyncpa [#allocation21], 1 }
0x26bd   :  { %10202 = vsyncpa [#allocation4], 1 }
0x26be   :  { %10203 = vsyncpa [#allocation24], 1 }

</bundles_post_ra>
